<compile_context>
chip_gen: v6e
topology: v6e:2x2x1
jax: 0.10.0
libtpu: 0.0.40
codegen_flags: <defaults>
</compile_context>

<pallas_src>
import functools

import jax
import jax.numpy as jnp
from jax.experimental import pallas as pl
from jax.experimental.pallas import tpu as pltpu


def mlp_kernel(x_ref, w1_ref, b1_ref, w2_ref, b2_ref, o_ref):
    """One hidden-dim chunk per grid step; output accumulated in-place.

    x_ref:  (M, K)   bf16  tokens x in_features (full, resident every step)
    w1_ref: (K, TH)  bf16  chunk of first-layer weights
    b1_ref: (1, TH)  f32   chunk of first-layer bias
    w2_ref: (TH, N)  bf16  chunk of second-layer weights
    b2_ref: (1, N)   f32   second-layer bias (full, resident)
    o_ref:  (M, N)   f32   final output (same block every step -> accumulator)
    """
    p = pl.program_id(0)

    # Linear #1 (this hidden chunk) + bias, f32 accumulation on the MXU.
    hidden = jnp.dot(x_ref[...], w1_ref[...], preferred_element_type=jnp.float32)
    hidden = hidden + b1_ref[...]

    # GELU, exact (approximate='none'): 0.5 * x * (1 + erf(x / sqrt(2)))
    inv_sqrt2 = jnp.float32(0.7071067811865476)
    gelu = 0.5 * hidden * (1.0 + jax.lax.erf(hidden * inv_sqrt2))

    # Dropout(p=0.0) is the identity in the forward pass -> no-op.

    # Linear #2 partial contraction over this hidden chunk (bf16 operands, f32 acc).
    partial = jnp.dot(gelu.astype(jnp.bfloat16), w2_ref[...],
                      preferred_element_type=jnp.float32)

    @pl.when(p == 0)
    def _():
        # Initialize the resident output block with the first partial + fused b2.
        o_ref[...] = partial + b2_ref[...]

    @pl.when(p != 0)
    def _():
        o_ref[...] += partial


def prepare_params(w1, b1, w2, b2):
    """One-time parameter preparation (do NOT redo this per call).

    Weights are stored as (in, out) bf16 so the kernel computes x @ W directly
    with native bf16 MXU feeds; biases stay f32.
    """
    return (w1.astype(jnp.bfloat16),
            b1.reshape(1, -1).astype(jnp.float32),
            w2.astype(jnp.bfloat16),
            b2.reshape(1, -1).astype(jnp.float32))


@functools.partial(jax.jit, static_argnames=("n_split",))
def swin_mlp(x, w1_b, b1_2d, w2_b, b2_2d, *, n_split=2):
    """x: (B, H, W, C) f32. w1_b: (C, HID) bf16, b1_2d: (1, HID) f32,
    w2_b: (HID, C) bf16, b2_2d: (1, C) f32."""
    B, H, W, C = x.shape
    HID = w1_b.shape[1]
    M = B * H * W
    TH = HID // n_split

    # Activation feed for the MXU (tiny: ~0.2 MB, cast fuses into call setup).
    x2d = x.reshape(M, C).astype(jnp.bfloat16)

    flops = 4 * M * HID * C  # two matmuls, 2*M*HID*C each
    bytes_accessed = (M * C * 2          # x (bf16)
                      + C * HID * 2      # W1 (bf16)
                      + HID * C * 2      # W2 (bf16)
                      + HID * 4 + C * 4  # biases (f32)
                      + M * C * 4)       # output (f32), written once

    out2d = pl.pallas_call(
        mlp_kernel,
        out_shape=jax.ShapeDtypeStruct((M, C), jnp.float32),
        grid=(n_split,),
        in_specs=[
            pl.BlockSpec((M, C), lambda p: (0, 0)),     # x (full, resident)
            pl.BlockSpec((C, TH), lambda p: (0, p)),    # W1 chunk
            pl.BlockSpec((1, TH), lambda p: (0, p)),    # b1 chunk
            pl.BlockSpec((TH, C), lambda p: (p, 0)),    # W2 chunk
            pl.BlockSpec((1, C), lambda p: (0, 0)),     # b2 (full, resident)
        ],
        # Same output block every step -> stays resident in VMEM, written once.
        out_specs=pl.BlockSpec((M, C), lambda p: (0, 0)),
        compiler_params=pltpu.CompilerParams(
            dimension_semantics=("arbitrary",),         # reduction axis (pipelining only)
            vmem_limit_bytes=32 * 1024 * 1024,
        ),
        cost_estimate=pl.CostEstimate(
            flops=flops,
            transcendentals=M * HID,                    # one erf per hidden element
            bytes_accessed=bytes_accessed,
        ),
    )(x2d, w1_b, b1_2d, w2_b, b2_2d)

    return out2d.reshape(B, H, W, C)


def _reference(x, w1, b1, w2, b2):
    h = jnp.einsum("bhwc,cd->bhwd", x, w1) + b1
    g = 0.5 * h * (1.0 + jax.lax.erf(h * jnp.float32(0.7071067811865476)))
    return jnp.einsum("bhwd,dc->bhwc", g, w2) + b2


if __name__ == "__main__":
    IN_F, HID_F = 512, 2048
    B, Hs, Ws = 1, 14, 14

    key = jax.random.PRNGKey(0)
    kx, k1, k2, k3, k4 = jax.random.split(key, 5)

    # Deterministic synthetic parameters (PyTorch stores weight as (out,in);
    # here they are kept transposed as (in,out) for direct x @ W use).
    x = jax.random.normal(kx, (B, Hs, Ws, IN_F), dtype=jnp.float32)
    w1 = jax.random.normal(k1, (IN_F, HID_F), dtype=jnp.float32) * 0.02
    b1 = jax.random.normal(k2, (HID_F,), dtype=jnp.float32) * 0.02
    w2 = jax.random.normal(k3, (HID_F, IN_F), dtype=jnp.float32) * 0.02
    b2 = jax.random.normal(k4, (IN_F,), dtype=jnp.float32) * 0.02

    # One-time bf16 parameter preparation (hoisted out of the call path).
    w1_b, b1_2d, w2_b, b2_2d = prepare_params(w1, b1, w2, b2)
    jax.block_until_ready((w1_b, b1_2d, w2_b, b2_2d))

    out = swin_mlp(x, w1_b, b1_2d, w2_b, b2_2d)
    jax.block_until_ready(out)

    ref = _reference(x, w1, b1, w2, b2)
    assert out.shape == (B, Hs, Ws, IN_F)
    # bf16 MXU feeds -> looser tolerance than a pure-f32 path.
    assert jnp.allclose(out, ref, atol=3e-2, rtol=3e-2), "mismatch vs f32 reference"

    print("KERNEL_OK")
</pallas_src>

<mosaic_0001>
module attributes {stable_mosaic.version = 11 : i64} {
  func.func @mlp_kernel(%arg0: i32, %arg1: memref<196x512xbf16, #tpu.memory_space<vmem>>, %arg2: memref<512x1024xbf16, #tpu.memory_space<vmem>>, %arg3: memref<1x1024xf32, #tpu.memory_space<vmem>>, %arg4: memref<1024x512xbf16, #tpu.memory_space<vmem>>, %arg5: memref<1x512xf32, #tpu.memory_space<vmem>>, %arg6: memref<196x512xf32, #tpu.memory_space<vmem>>) attributes {dimension_semantics = [#tpu.dimension_semantics<arbitrary>], iteration_bounds = array<i64: 2>, scalar_prefetch = 0 : i64, scratch_operands = 0 : i64, tpu.core_type = #tpu.core_type<tc>, window_params = [{pipeline_mode = #tpu.pipeline_mode<synchronous>, transform_indices = @transform_0, window_bounds = array<i64: 196, 512>}, {transform_indices = @transform_1, window_bounds = array<i64: 512, 1024>}, {transform_indices = @transform_2, window_bounds = array<i64: 1, 1024>}, {transform_indices = @transform_3, window_bounds = array<i64: 1024, 512>}, {pipeline_mode = #tpu.pipeline_mode<synchronous>, transform_indices = @transform_4, window_bounds = array<i64: 1, 512>}, {pipeline_mode = #tpu.pipeline_mode<synchronous>, transform_indices = @transform_5, window_bounds = array<i64: 196, 512>}]} {
    %c0 = arith.constant 0 : index
    %c0_0 = arith.constant 0 : index
    %0 = vector.load %arg1[%c0, %c0_0] : memref<196x512xbf16, #tpu.memory_space<vmem>>, vector<196x512xbf16>
    %c0_1 = arith.constant 0 : index
    %c0_2 = arith.constant 0 : index
    %1 = vector.load %arg2[%c0_1, %c0_2] : memref<512x1024xbf16, #tpu.memory_space<vmem>>, vector<512x1024xbf16>
    %cst = arith.constant dense<0.000000e+00> : vector<196x1024xf32>
    %2 = tpu.matmul %0, %1, %cst {dimension_numbers = #tpu.dot_dimension_numbers<[1], [0], [0], [1], [0, 0, 1, 1], [], []>} : vector<196x512xbf16>, vector<512x1024xbf16>, vector<196x1024xf32> -> vector<196x1024xf32>
    %c0_3 = arith.constant 0 : index
    %c0_4 = arith.constant 0 : index
    %3 = vector.load %arg3[%c0_3, %c0_4] : memref<1x1024xf32, #tpu.memory_space<vmem>>, vector<1x1024xf32>
    %4 = vector.broadcast %3 : vector<1x1024xf32> to vector<196x1024xf32>
    %5 = arith.addf %2, %4 : vector<196x1024xf32>
    %cst_5 = arith.constant 5.000000e-01 : f32
    %6 = vector.broadcast %cst_5 : f32 to vector<196x1024xf32>
    %7 = arith.mulf %6, %5 : vector<196x1024xf32>
    %cst_6 = arith.constant 0.707106769 : f32
    %8 = vector.broadcast %cst_6 : f32 to vector<196x1024xf32>
    %9 = arith.mulf %5, %8 : vector<196x1024xf32>
    %10 = math.erf %9 : vector<196x1024xf32>
    %cst_7 = arith.constant 1.000000e+00 : f32
    %11 = vector.broadcast %cst_7 : f32 to vector<196x1024xf32>
    %12 = arith.addf %11, %10 : vector<196x1024xf32>
    %13 = arith.mulf %7, %12 : vector<196x1024xf32>
    %14 = arith.truncf %13 : vector<196x1024xf32> to vector<196x1024xbf16>
    %c0_8 = arith.constant 0 : index
    %c0_9 = arith.constant 0 : index
    %15 = vector.load %arg4[%c0_8, %c0_9] : memref<1024x512xbf16, #tpu.memory_space<vmem>>, vector<1024x512xbf16>
    %cst_10 = arith.constant dense<0.000000e+00> : vector<196x512xf32>
    %16 = tpu.matmul %14, %15, %cst_10 {dimension_numbers = #tpu.dot_dimension_numbers<[1], [0], [0], [1], [0, 0, 1, 1], [], []>} : vector<196x1024xbf16>, vector<1024x512xbf16>, vector<196x512xf32> -> vector<196x512xf32>
    %c0_i32 = arith.constant 0 : i32
    %17 = arith.cmpi eq, %arg0, %c0_i32 : i32
    %18 = arith.extui %17 : i1 to i32
    %c0_i32_11 = arith.constant 0 : i32
    %19 = arith.cmpi ne, %18, %c0_i32_11 : i32
    scf.if %19 {
      %c0_14 = arith.constant 0 : index
      %c0_15 = arith.constant 0 : index
      %23 = vector.load %arg5[%c0_14, %c0_15] : memref<1x512xf32, #tpu.memory_space<vmem>>, vector<1x512xf32>
      %24 = vector.broadcast %23 : vector<1x512xf32> to vector<196x512xf32>
      %25 = arith.addf %16, %24 : vector<196x512xf32>
      %c0_16 = arith.constant 0 : index
      %c0_17 = arith.constant 0 : index
      %26 = vector.load %arg6[%c0_16, %c0_17] : memref<196x512xf32, #tpu.memory_space<vmem>>, vector<196x512xf32>
      tpu.vector_store %arg6[%c0_16, %c0_17], %25 {strides = array<i32>} : memref<196x512xf32, #tpu.memory_space<vmem>>, vector<196x512xf32>,
    } else {
    }
    %c0_i32_12 = arith.constant 0 : i32
    %20 = arith.cmpi ne, %arg0, %c0_i32_12 : i32
    %21 = arith.extui %20 : i1 to i32
    %c0_i32_13 = arith.constant 0 : i32
    %22 = arith.cmpi ne, %21, %c0_i32_13 : i32
    scf.if %22 {
      %c0_14 = arith.constant 0 : index
      %c0_15 = arith.constant 0 : index
      %23 = vector.load %arg6[%c0_14, %c0_15] : memref<196x512xf32, #tpu.memory_space<vmem>>, vector<196x512xf32>
      %24 = arith.addf %23, %16 : vector<196x512xf32>
      %c0_16 = arith.constant 0 : index
      %c0_17 = arith.constant 0 : index
      %25 = vector.load %arg6[%c0_16, %c0_17] : memref<196x512xf32, #tpu.memory_space<vmem>>, vector<196x512xf32>
      tpu.vector_store %arg6[%c0_16, %c0_17], %24 {strides = array<i32>} : memref<196x512xf32, #tpu.memory_space<vmem>>, vector<196x512xf32>,
    } else {
    }
    return
  }
  func.func @transform_0(%arg0: i32) -> (i32, i32) {
    %c0_i32 = arith.constant 0 : i32
    %c0_i32_0 = arith.constant 0 : i32
    %c0_i32_1 = arith.constant 0 : i32
    return %c0_i32, %c0_i32_0 : i32, i32
  }
  func.func @transform_1(%arg0: i32) -> (i32, i32) {
    %c0_i32 = arith.constant 0 : i32
    %c0_i32_0 = arith.constant 0 : i32
    return %c0_i32, %arg0 : i32, i32
  }
  func.func @transform_2(%arg0: i32) -> (i32, i32) {
    %c0_i32 = arith.constant 0 : i32
    %c0_i32_0 = arith.constant 0 : i32
    return %c0_i32, %arg0 : i32, i32
  }
  func.func @transform_3(%arg0: i32) -> (i32, i32) {
    %c0_i32 = arith.constant 0 : i32
    %c0_i32_0 = arith.constant 0 : i32
    return %arg0, %c0_i32 : i32, i32
  }
  func.func @transform_4(%arg0: i32) -> (i32, i32) {
    %c0_i32 = arith.constant 0 : i32
    %c0_i32_0 = arith.constant 0 : i32
    %c0_i32_1 = arith.constant 0 : i32
    return %c0_i32, %c0_i32_0 : i32, i32
  }
  func.func @transform_5(%arg0: i32) -> (i32, i32) {
    %c0_i32 = arith.constant 0 : i32
    %c0_i32_0 = arith.constant 0 : i32
    %c0_i32_1 = arith.constant 0 : i32
    return %c0_i32, %c0_i32_0 : i32, i32
  }
}

</mosaic_0001>

<bundles_post_ra>
// kernel: swin_mlp.1
= control target key start
LH: loop header
LB: loop body
LE: loop exit
PB: predicated region body
PF: predicated region fallthrough
CT: control target
= control target key end

     0   :  { %10 = vsyncpa [#allocation3], 0  ;;  %s14903_s0 = inlined_call_operand.vmem [shape: bf16[196,512], index: 0, kind: input, shape index: {}]   ;;  %s14904_s1 = inlined_call_operand.hbm [shape: bf16[512,2048], index: 1, kind: input, shape index: {}]   ;;  %s14905_s2 = inlined_call_operand.hbm [shape: f32[1,2048], index: 2, kind: input, shape index: {}]   ;;  %s14906_s3 = inlined_call_operand.hbm [shape: bf16[2048,512], index: 3, kind: input, shape index: {}]   ;;  %s14907_s4 = inlined_call_operand.hbm [shape: f32[1,512], index: 4, kind: input, shape index: {}]   ;;  %s14908_s5 = inlined_call_operand.vmem [shape: f32[196,512], index: 5, kind: output, shape index: {}]  }
   0x1   :  { %12 = vsyncpa [#allocation3 + $0x1], 0 }
   0x2   :  { %13 = vsyncpa [#allocation5], 0 }
   0x3   :  { %15 = vsyncpa [#allocation5 + $0x1], 0 }
   0x4   :  { %16 = vsyncpa [#allocation8], 0  ;;  %s9851_s18 = smov 0   ;;  %s9853_s19 = smov 0  }
   0x5   :  { %s9855_s20 = smov 0   ;;  %s9857_s21 = smov 0  }
   0x6 LB: > { %s9872_s22 = sadd.s32 1, %s9810_s21   ;;  %s50_s23 = sadd.s32 1, %s9806_s20  ;;  %s9810_s21 = sphi %s9857_s21, %s15618_s21   ;;  %s9806_s20 = sphi %s9855_s20, %s15617_s20   ;;  %s9802_s19 = sphi %s9853_s19, %s15616_s19   ;;  %s9798_s18 = sphi %s9851_s18, %s15615_s18  }
   0x7   : > { %s47_s24 = ssub.s32 %s9810_s21, %s9872_s22  ;;  %p57_p0 = scmp.ne.s32.totalorder %s9806_s20, %s9802_s19 }
   0x8   : > { %p48_p1 = scmp.eq.s32.totalorder %s47_s24, 0  ;;  %p58_p2 = scmp.eq.s32.totalorder %s9810_s21, 0 }
   0x9   : > { %p8658_p3 = scmp.lt.s32.totalorder %s9810_s21, 2  ;;  %s9885_s26 = sand.u32 1, %s9806_s20  }
   0xa   : > { %s9882_s25 = scalar_select %p48_p1, %s9806_s20, %s50_s23  }
   0xb   : > { %p59_p4 = por %p58_p2, %p57_p0  ;;  %s8046_s27 = sshll.u32 %s9885_s26, 11 }
   0xc   : > { %s199_s29 = scalar_lea.vmem [#allocation2], %s8046_s27  ;;  %s216_s6 = sand.u32 1, %s9810_s21  }
   0xd   : > { %p9888_p5 = pnand %p8658_p3, %p59_p4  ;;  %s206_s30 = sshll.u32 %s199_s29, 4  ;;  %s9895_s30 = int_to_ptr.vmem [resolvable:$true] %s206_s30 }
   0xe   : > { %s8049_s7 = sshll.u32 %s9885_s26, 3  ;;  %s8630_s8 = sshll.u32 %s9810_s21, 7 }
   0xf   : > { %s9902_s11 = scalar_lea.hbm %s14905_s2, %s8630_s8  ;;  %s220_s12 = scalar_lea.vmem [#allocation4], %s8049_s7 }
  0x10   : > { %s228_s13 = sshll.u32 %s220_s12, 4  ;;  %s9904_s14 = scalar_lea.sflag [#allocation5], %s216_s6  ;;  %s229_s13 = int_to_ptr.vmem [resolvable:$true] %s228_s13 }
  0x11   : > { %s9658_s15 = scalar_lea.hbm %s9902_s11, 128  ;;  %p9910_p7 = pneg %p9888_p5 }
  0x12   : > { %p9659_p6 = scmp.ne.s32.totalorder %s9902_s11, %s9658_s15  ;;  %s9663_s24 = scalar_lea.hbm %s14905_s2, 256 }
  0x13   : > { %p9664_p10 = scmp.lt.s32.totalorder %s9902_s11, %s14905_s2  ;;  %p9665_p11 = scmp.lt.s32.totalorder %s9663_s24, %s9658_s15 }
  0x14   : > { %p9661_p8 = pnand %p9910_p7, %p9659_p6 }
  0x15   : > { %p9666_p12 = por %p9665_p11, %p9664_p10 }
  0x16   : > { %p9662_p9 = pneg %p9661_p8 }
  0x18   : > { %p9667_p13 = pnand %p9666_p12, %p9662_p9 }
  0x1a   : > { %9670 = shalt.err (!%p9667_p13)
}
  0x1b   : > { %s9671_s6 = scalar_lea.vmem %s229_s13, 128  ;;  %s9812_s8 = smov [#allocation4]  }
  0x1c   : > { %p9672_p0 = scmp.ne.s32.totalorder %s229_s13, %s9671_s6  ;;  %s9676_s9 = sshll.u32 %s9812_s8, 4  ;;  %s9677_s9 = int_to_ptr.vmem [resolvable:$false] %s9676_s9 }
  0x1d   : > { %s9678_s10 = scalar_lea.vmem %s9677_s9, 256  ;;  %p9679_p3 = scmp.lt.s32.totalorder %s229_s13, %s9677_s9 }
  0x1e   : > { %p9674_p1 = pnand %p9672_p0, %p9910_p7  ;;  %p9680_p4 = scmp.lt.s32.totalorder %s9678_s10, %s9671_s6 }
  0x20   : > { %p9675_p2 = pneg %p9674_p1  ;;  %p9681_p6 = por %p9680_p4, %p9679_p3 }
  0x22   : > { %p9682_p8 = pnand %p9681_p6, %p9675_p2 }
  0x24   : > { %9685 = shalt.err (!%p9682_p8)
}
  0x25   : > { %8653 = dma.hbm_to_vmem [thread:$0]  (!%p9888_p5), %s9902_s11, 128, %s229_s13, %s9904_s14  }
  0x26   : > { %s239_s12 = scalar_lea.vmem [#allocation6], %s8046_s27  ;;  %s9934_s17 = sadd.s32 4294967295, %s9810_s21  }
  0x27   : > { %s247_s15 = sshll.u32 %s239_s12, 4  ;;  %p63_p9 = scmp.ne.s32.totalorder %s9802_s19, %s9798_s18  ;;  %s9931_s15 = int_to_ptr.vmem [resolvable:$true] %s247_s15 }
  0x28   : > { %p14909_p10 = scmp.eq.s32.totalorder %s9934_s17, 0  ;;  %p8043_p11 = scmp.ge.s32.totalorder %s9810_s21, 1 }
  0x29   : > { %p168_p12 = scmp.lt.s32.totalorder %s9810_s21, 3  ;;  %s9813_s13 = smov [#allocation7]  }
  0x2a   : > { %p9944_p0 = por %p14909_p10, %p63_p9  ;;  %s184_s23 = sshll.u32 %s9813_s13, 4  ;;  %s9952_s23 = int_to_ptr.vmem [resolvable:$true] %s184_s23 }
  0x2b   : > { %p9948_p1 = pnand %p8043_p11, %p168_p12  ;;  %s8629_s18 = sshll.u32 %s9810_s21, 9 }
  0x2c   : > { %s15064_s11 = scalar_select %p9944_p0, 1, 0 }
  0x2d   : > { %s15065_s27 = scalar_select %p9948_p1, 1, 0 }
  0x2e   : > { %p8643_p2 = pneg %p9948_p1  ;;  %s9960_s7 = scalar_lea.hbm %s14904_s1, %s8629_s18 }
  0x2f   : > { %s9686_s9 = scalar_lea.hbm %s9960_s7, 32768  ;;  %s9691_s13 = scalar_lea.hbm %s14904_s1, 65536 }
  0x30   : > { %p9964_p3 = pnand %p8643_p2, %p14909_p10  ;;  %p9687_p4 = scmp.ne.s32.totalorder %s9960_s7, %s9686_s9 }
  0x31   : > { %p9692_p9 = scmp.lt.s32.totalorder %s9960_s7, %s14904_s1  ;;  %p9693_p11 = scmp.lt.s32.totalorder %s9691_s13, %s9686_s9 }
  0x32   : > { %s15066_s6 = scalar_select %p9964_p3, 1, 0 }
  0x33   : > { %p9689_p6 = pnand %p9687_p4, %p9910_p7  ;;  %p9694_p12 = por %p9693_p11, %p9692_p9 }
  0x35   : > { %p9690_p8 = pneg %p9689_p6 }
  0x37   : > { %p9695_p2 = pnand %p9694_p12, %p9690_p8 }
  0x39   : > { %9698 = shalt.err (!%p9695_p2)
}
  0x3a   : > { %s9699_s29 = scalar_lea.vmem %s9895_s30, 32768  ;;  %s9814_s8 = smov [#allocation2]  }
  0x3b   : > { %p9700_p13 = scmp.ne.s32.totalorder %s9895_s30, %s9699_s29  ;;  %s9704_s10 = sshll.u32 %s9814_s8, 4  ;;  %s9705_s10 = int_to_ptr.vmem [resolvable:$false] %s9704_s10 }
  0x3c   : > { %s9706_s12 = scalar_lea.vmem %s9705_s10, 65536  ;;  %p9707_p10 = scmp.lt.s32.totalorder %s9895_s30, %s9705_s10 }
  0x3d   : > { %p9702_p4 = pnand %p9700_p13, %p9910_p7  ;;  %p9708_p0 = scmp.lt.s32.totalorder %s9706_s12, %s9699_s29 }
  0x3f   : > { %p9703_p6 = pneg %p9702_p4  ;;  %p9709_p1 = por %p9708_p0, %p9707_p10 }
  0x41   : > { %p9710_p3 = pnand %p9709_p1, %p9703_p6 }
  0x43   : > { %9713 = shalt.err (!%p9710_p3)
}
  0x44   : > { %s9815_s9 = smov 1024   ;;  %s9816_s13 = smov 512  }
  0x45   : > { %s9817_s18 = smov 32   ;;  %s15067_s8 = scalar_lea.sflag [#allocation3], %s9885_s26 }
  0x46   : > { %8650 = dma.hbm_to_vmem [thread:$0]  (!%p9888_p5), %s9960_s7, 32768, %s9895_s30, %s15067_s8, %s9815_s9, %s9816_s13, %s9817_s18  }
  0x47   : > { %s8632_s24 = sshll.u32 %s9810_s21, 15  ;;  %p15068_p13 = scmp.ne.s32.totalorder %s15066_s6, 0 }
  0x48   : > { %s9725_s29 = scalar_lea.vmem %s9952_s23, 64  ;;  %p9733_p8 = scmp.lt.s32.totalorder %s9952_s23, %s9952_s23 }
  0x49   : > { %p9716_p10 = pneg %p15068_p13  ;;  %p9726_p0 = scmp.ne.s32.totalorder %s9952_s23, %s9725_s29 }
  0x4a   : > { %p9734_p9 = scmp.lt.s32.totalorder %s9725_s29, %s9725_s29 }
  0x4b   : > { %p9728_p1 = pnand %p9726_p0, %p9716_p10 }
  0x4c   : > { %p9735_p11 = por %p9734_p9, %p9733_p8 }
  0x4d   : > { %p9729_p3 = pneg %p9728_p1 }
  0x4f   : > { %p9736_p12 = pnand %p9735_p11, %p9729_p3 }
  0x51   : > { %9739 = shalt.err (!%p9736_p12)
}
  0x52   : > { %8646 = dma.hbm_to_vmem [thread:$0]  (!%p15068_p13), %s14907_s4, 64, %s9952_s23, [#allocation8]  }
  0x53   : > { %s10007_s30 = scalar_lea.hbm %s14906_s3, %s8632_s24  ;;  %s9745_s13 = scalar_lea.hbm %s14906_s3, 65536 }
  0x54   : > { %s9740_s7 = scalar_lea.hbm %s10007_s30, 32768  ;;  %p9746_p13 = scmp.lt.s32.totalorder %s10007_s30, %s14906_s3 }
  0x55   : > { %p9741_p2 = scmp.ne.s32.totalorder %s10007_s30, %s9740_s7  ;;  %p9747_p10 = scmp.lt.s32.totalorder %s9745_s13, %s9740_s7 }
  0x57   : > { %p9743_p4 = pnand %p9741_p2, %p9910_p7  ;;  %p9748_p0 = por %p9747_p10, %p9746_p13 }
  0x59   : > { %p9744_p6 = pneg %p9743_p4 }
  0x5b   : > { %p9749_p1 = pnand %p9748_p0, %p9744_p6 }
  0x5d   : > { %9752 = shalt.err (!%p9749_p1)
}
  0x5e   : > { %s9753_s23 = scalar_lea.vmem %s9931_s15, 32768  ;;  %s9818_s24 = smov [#allocation6]  }
  0x5f   : > { %p9754_p3 = scmp.ne.s32.totalorder %s9931_s15, %s9753_s23  ;;  %s9758_s29 = sshll.u32 %s9818_s24, 4  ;;  %s9759_s29 = int_to_ptr.vmem [resolvable:$false] %s9758_s29 }
  0x60   : > { %s9760_s10 = scalar_lea.vmem %s9759_s29, 65536  ;;  %p9761_p11 = scmp.lt.s32.totalorder %s9931_s15, %s9759_s29 }
  0x61   : > { %p9756_p8 = pnand %p9754_p3, %p9910_p7  ;;  %p9762_p12 = scmp.lt.s32.totalorder %s9760_s10, %s9753_s23 }
  0x63   : > { %p9757_p9 = pneg %p9756_p8  ;;  %p9763_p2 = por %p9762_p12, %p9761_p11 }
  0x65   : > { %p9764_p4 = pnand %p9763_p2, %p9757_p9 }
  0x67   : > { %9767 = shalt.err (!%p9764_p4)
}
  0x68   : > { %s9819_s12 = smov 256   ;;  %s9820_s21 = smov 16  }
  0x69   : > { %8656 = dma.hbm_to_vmem [thread:$0]  (!%p9888_p5), %s10007_s30, 32768, %s9931_s15, %s9904_s14, %s9819_s12, %s9819_s12, %s9820_s21  }
  0x6a   : > { %p15069_p7 = scmp.ne.s32.totalorder %s15065_s27, 0 }
  0x6c   : > { %259 = sbr.rel (%p15069_p7) target bundleno = 1379 (0x563), region = 40 }
  0x71   : > { %s261_s16 = sand.u32 1, %s9802_s19   ;;  %p15070_p6 = scmp.ne.s32.totalorder %s15064_s11, 0 }
  0x72   : > { %s8057_s26 = sshll.u32 %s261_s16, 11  ;;  %s262_s7 = scalar_lea.sflag [#allocation3], %s261_s16 }
  0x73   : > { %s10033_s6 = scalar_lea.vmem [#allocation2], %s8057_s26 }
  0x74   : > { %9785 = dma.done.wait (%p15070_p6), %s262_s7, 32768  }
  0x75   : > { %9787 = vsyncadd (%p15070_p6), %s262_s7, 4294934528  ;;  %s270_s9 = sand.u32 1, %s9934_s17   ;;  %s8058_s28 = sshll.u32 %s261_s16, 3 }
  0x76   : > { %s271_s14 = scalar_lea.sflag [#allocation5], %s270_s9  ;;  %s10040_s15 = scalar_lea.vmem [#allocation4], %s8058_s28 }
  0x77   : > { %9789 = dma.done.wait (%p15070_p6), %s271_s14, 32896  }
  0x78   : > { %9791 = vsyncadd (%p15070_p6), %s271_s14, 4294934400  ;;  %s10046_s27 = scalar_lea.vmem [#allocation6], %s8057_s26  ;;  %p15071_p5 = scmp.eq.s32.totalorder %s9934_s17, 0 }
  0x7a   : > { %9793 = dma.done.wait (%p15071_p5), [#allocation8], 64   ;;  %p15072_p13 = pmov %p15071_p5 }
  0x7b   : > { %v428_v0 = vld [vmem:[%s10033_s6 + $0x1c0] sm:$0xff]  ;;  %v8700_v59 = vld [vmem:[%s14903_s0 + $0xc] ss:$16 sps:$4 sm:$0xff]   ;;  %p15486_p10 = scmp.ne.s32.totalorder %s9934_s17, 0 }
  0x7c   : > { %9795 = vsyncadd (%p15072_p13), [#allocation8], 4294967232  ;;  %v432_v1 = vld [vmem:[%s10033_s6 + $0x1e0] sm:$0xff]  ;;  %2397 = vmatprep.mubr.bf16.mxu1 %v8700_v59 }
  0x7d   : > { %v556_v2 = vld [vmem:[%s10033_s6 + $0x5c0] sm:$0xff]  ;;  %v8170_v3 = vcombine.high %v428_v0, %v432_v1  ;;  %v8169_v5 = vcombine.low %v428_v0, %v432_v1 }
  0x7e   : > { %v560_v4 = vld [vmem:[%s10033_s6 + $0x5e0] sm:$0xff] }
  0x7f   : > { %v420_v6 = vld [vmem:[%s10033_s6 + $0x180] sm:$0xff]  ;;  %v8298_v8 = vcombine.high %v556_v2, %v560_v4  ;;  %v8297_v9 = vcombine.low %v556_v2, %v560_v4  ;;  %2204 = vmatprep.subr.bf16.mxu0 %v8170_v3 }
  0x80   : > { %v424_v7 = vld [vmem:[%s10033_s6 + $0x1a0] sm:$0xff]  ;;  %2205 = vmatpush1.bf16.msra.mxu0 %v8169_v5 }
  0x81   : > { %v8162_v10 = vcombine.high %v420_v6, %v424_v7  ;;  %v548_v11 = vld [vmem:[%s10033_s6 + $0x580] sm:$0xff]  ;;  %2365 = vmatprep.subr.bf16.mxu1 %v8298_v8  ;;  %v8161_v18 = vcombine.low %v420_v6, %v424_v7 }
  0x82   : > { %v552_v12 = vld [vmem:[%s10033_s6 + $0x5a0] sm:$0xff]  ;;  %2366 = vmatpush1.bf16.msra.mxu1 %v8297_v9 }
  0x83   : > { %v412_v13 = vld [vmem:[%s10033_s6 + $0x140] sm:$0xff]  ;;  %v8290_v14 = vcombine.high %v548_v11, %v552_v12  ;;  %2206 = vmatprep.subr.bf16.mxu0 %v8162_v10  ;;  %v8289_v19 = vcombine.low %v548_v11, %v552_v12 }
  0x84   : > { %v416_v15 = vld [vmem:[%s10033_s6 + $0x160] sm:$0xff]  ;;  %2207 = vmatpush1.bf16.msra.mxu0 %v8161_v18 }
  0x85   : > { %v540_v16 = vld [vmem:[%s10033_s6 + $0x540] sm:$0xff]  ;;  %v8154_v20 = vcombine.high %v412_v13, %v416_v15  ;;  %2367 = vmatprep.subr.bf16.mxu1 %v8290_v14  ;;  %v8153_v26 = vcombine.low %v412_v13, %v416_v15 }
  0x86   : > { %v544_v17 = vld [vmem:[%s10033_s6 + $0x560] sm:$0xff]  ;;  %2368 = vmatpush1.bf16.msra.mxu1 %v8289_v19 }
  0x87   : > { %v8282_v21 = vcombine.high %v540_v16, %v544_v17  ;;  %v404_v22 = vld [vmem:[%s10033_s6 + $0x100] sm:$0xff]  ;;  %2208 = vmatprep.subr.bf16.mxu0 %v8154_v20  ;;  %v8281_v27 = vcombine.low %v540_v16, %v544_v17 }
  0x88   : > { %v408_v23 = vld [vmem:[%s10033_s6 + $0x120] sm:$0xff]  ;;  %2209 = vmatpush1.bf16.msra.mxu0 %v8153_v26 }
  0x89   : > { %v532_v24 = vld [vmem:[%s10033_s6 + $0x500] sm:$0xff]  ;;  %v8146_v28 = vcombine.high %v404_v22, %v408_v23  ;;  %2369 = vmatprep.subr.bf16.mxu1 %v8282_v21  ;;  %v8145_v34 = vcombine.low %v404_v22, %v408_v23 }
  0x8a   : > { %v536_v25 = vld [vmem:[%s10033_s6 + $0x520] sm:$0xff]  ;;  %2370 = vmatpush1.bf16.msra.mxu1 %v8281_v27 }
  0x8b   : > { %v8274_v29 = vcombine.high %v532_v24, %v536_v25  ;;  %v396_v30 = vld [vmem:[%s10033_s6 + $0xc0] sm:$0xff]  ;;  %2210 = vmatprep.subr.bf16.mxu0 %v8146_v28  ;;  %v8273_v35 = vcombine.low %v532_v24, %v536_v25 }
  0x8c   : > { %v400_v31 = vld [vmem:[%s10033_s6 + $0xe0] sm:$0xff]  ;;  %2211 = vmatpush1.bf16.msra.mxu0 %v8145_v34 }
  0x8d   : > { %v524_v32 = vld [vmem:[%s10033_s6 + $0x4c0] sm:$0xff]  ;;  %v8138_v36 = vcombine.high %v396_v30, %v400_v31  ;;  %2371 = vmatprep.subr.bf16.mxu1 %v8274_v29  ;;  %v8137_v42 = vcombine.low %v396_v30, %v400_v31 }
  0x8e   : > { %v528_v33 = vld [vmem:[%s10033_s6 + $0x4e0] sm:$0xff]  ;;  %2372 = vmatpush1.bf16.msra.mxu1 %v8273_v35 }
  0x8f   : > { %v8266_v37 = vcombine.high %v524_v32, %v528_v33  ;;  %v388_v38 = vld [vmem:[%s10033_s6 + $0x80] sm:$0xff]  ;;  %2212 = vmatprep.subr.bf16.mxu0 %v8138_v36  ;;  %v8265_v43 = vcombine.low %v524_v32, %v528_v33 }
  0x90   : > { %v392_v39 = vld [vmem:[%s10033_s6 + $0xa0] sm:$0xff]  ;;  %2213 = vmatpush1.bf16.msra.mxu0 %v8137_v42 }
  0x91   : > { %v516_v40 = vld [vmem:[%s10033_s6 + $0x480] sm:$0xff]  ;;  %v8130_v44 = vcombine.high %v388_v38, %v392_v39  ;;  %2373 = vmatprep.subr.bf16.mxu1 %v8266_v37  ;;  %v8129_v50 = vcombine.low %v388_v38, %v392_v39 }
  0x92   : > { %v520_v41 = vld [vmem:[%s10033_s6 + $0x4a0] sm:$0xff]  ;;  %2374 = vmatpush1.bf16.msra.mxu1 %v8265_v43 }
  0x93   : > { %v8258_v45 = vcombine.high %v516_v40, %v520_v41  ;;  %v380_v46 = vld [vmem:[%s10033_s6 + $0x40] sm:$0xff]  ;;  %2214 = vmatprep.subr.bf16.mxu0 %v8130_v44  ;;  %v8257_v52 = vcombine.low %v516_v40, %v520_v41 }
  0x94   : > { %v384_v47 = vld [vmem:[%s10033_s6 + $0x60] sm:$0xff]  ;;  %2215 = vmatpush1.bf16.msra.mxu0 %v8129_v50 }
  0x95   : > { %v508_v48 = vld [vmem:[%s10033_s6 + $0x440] sm:$0xff]  ;;  %v8122_v53 = vcombine.high %v380_v46, %v384_v47  ;;  %2375 = vmatprep.subr.bf16.mxu1 %v8258_v45  ;;  %v8121_v60 = vcombine.low %v380_v46, %v384_v47 }
  0x96   : > { %v512_v49 = vld [vmem:[%s10033_s6 + $0x460] sm:$0xff]  ;;  %2376 = vmatpush1.bf16.msra.mxu1 %v8257_v52 }
  0x97   : > { %v372_v51 = vld [vmem:[%s10033_s6] sm:$0xff]  ;;  %v8250_v55 = vcombine.high %v508_v48, %v512_v49  ;;  %2216 = vmatprep.subr.bf16.mxu0 %v8122_v53  ;;  %v8249_v61 = vcombine.low %v508_v48, %v512_v49 }
  0x98   : > { %v376_v54 = vld [vmem:[%s10033_s6 + $0x20] sm:$0xff]  ;;  %2217 = vmatpush1.bf16.msra.mxu0 %v8121_v60 }
  0x99   : > { %v8698_v56 = vld [vmem:[%s14903_s0 + $0x4] ss:$16 sps:$4 sm:$0xff]   ;;  %v8114_v62 = vcombine.high %v372_v51, %v376_v54  ;;  %2377 = vmatprep.subr.bf16.mxu1 %v8250_v55  ;;  %v8113_v4 = vcombine.low %v372_v51, %v376_v54 }
  0x9a   : > { %v500_v57 = vld [vmem:[%s10033_s6 + $0x400] sm:$0xff]  ;;  %2236 = vmatprep.mubr.bf16.mxu0 %v8698_v56  ;;  %2378 = vmatpush1.bf16.msra.mxu1 %v8249_v61 }
  0x9b   : > { %v504_v58 = vld [vmem:[%s10033_s6 + $0x420] sm:$0xff]  ;;  %2218 = vmatprep.subr.bf16.mxu0 %v8114_v62 }
  0x9c   : > { %v492_v63 = vld [vmem:[%s10033_s6 + $0x3c0] sm:$0xff]  ;;  %v8242_v0 = vcombine.high %v500_v57, %v504_v58  ;;  %v8241_v5 = vcombine.low %v500_v57, %v504_v58  ;;  %2219 = vmatpush1.bf16.msra.mxu0 %v8113_v4 }
  0x9d   : > { %v496_v1 = vld [vmem:[%s10033_s6 + $0x3e0] sm:$0xff] }
  0x9e   : > { %v620_v2 = vld [vmem:[%s10033_s6 + $0x7c0] sm:$0xff]  ;;  %v8234_v6 = vcombine.high %v492_v63, %v496_v1  ;;  %2379 = vmatprep.subr.bf16.mxu1 %v8242_v0  ;;  %v8233_v12 = vcombine.low %v492_v63, %v496_v1  ;;  %v429_v0 = vld [vmem:[%s10033_s6 + $0x1c8] sm:$0xff] }
  0x9f   : > { %v624_v3 = vld [vmem:[%s10033_s6 + $0x7e0] sm:$0xff]  ;;  %2380 = vmatpush1.bf16.msra.mxu1 %v8241_v5  ;;  %v433_v1 = vld [vmem:[%s10033_s6 + $0x1e8] sm:$0xff] }
  0xa0   : > { %v484_v7 = vld [vmem:[%s10033_s6 + $0x380] sm:$0xff]  ;;  %v8362_v9 = vcombine.high %v620_v2, %v624_v3  ;;  %2220 = vmatprep.subr.bf16.mxu0 %v8234_v6  ;;  %v8361_v13 = vcombine.low %v620_v2, %v624_v3  ;;  %v557_v2 = vld [vmem:[%s10033_s6 + $0x5c8] sm:$0xff]  ;;  %v8172_v6 = vcombine.high %v429_v0, %v433_v1 }
  0xa1   : > { %v488_v8 = vld [vmem:[%s10033_s6 + $0x3a0] sm:$0xff]  ;;  %2221 = vmatpush2.bf16.msra.mxu0 %v8233_v12  ;;  %v561_v3 = vld [vmem:[%s10033_s6 + $0x5e8] sm:$0xff] }
  0xa2   : > { %v612_v10 = vld [vmem:[%s10033_s6 + $0x780] sm:$0xff]  ;;  %v8226_v14 = vcombine.high %v484_v7, %v488_v8  ;;  %2381 = vmatprep.subr.bf16.mxu1 %v8362_v9  ;;  %v8225_v20 = vcombine.low %v484_v7, %v488_v8  ;;  %v8703_v8 = vld [vmem:[%s14903_s0 + $0x8] ss:$16 sps:$4 sm:$0xff]   ;;  %v8300_v9 = vcombine.high %v557_v2, %v561_v3 }
  0xa3   : > { %v616_v11 = vld [vmem:[%s10033_s6 + $0x7a0] sm:$0xff]  ;;  %2382 = vmatpush2.bf16.msra.mxu1 %v8361_v13  ;;  %v425_v12 = vld [vmem:[%s10033_s6 + $0x1a8] sm:$0xff]  ;;  %v8171_v13 = vcombine.low %v429_v0, %v433_v1 }
  0xa4   : > { %v476_v15 = vld [vmem:[%s10033_s6 + $0x340] sm:$0xff]  ;;  %v8354_v16 = vcombine.high %v612_v10, %v616_v11  ;;  %2222 = vmatprep.subr.bf16.mxu0 %v8226_v14  ;;  %v8353_v21 = vcombine.low %v612_v10, %v616_v11  ;;  %v421_v11 = vld [vmem:[%s10033_s6 + $0x188] sm:$0xff] }
  0xa5   : > { %v480_v17 = vld [vmem:[%s10033_s6 + $0x360] sm:$0xff]  ;;  %2223 = vmatpush2.bf16.msra.mxu0 %v8225_v20  ;;  %v549_v14 = vld [vmem:[%s10033_s6 + $0x588] sm:$0xff] }
  0xa6   : > { %v604_v18 = vld [vmem:[%s10033_s6 + $0x740] sm:$0xff]  ;;  %v8218_v22 = vcombine.high %v476_v15, %v480_v17  ;;  %2383 = vmatprep.subr.bf16.mxu1 %v8354_v16  ;;  %v8217_v28 = vcombine.low %v476_v15, %v480_v17  ;;  %v553_v15 = vld [vmem:[%s10033_s6 + $0x5a8] sm:$0xff]  ;;  %v8299_v16 = vcombine.low %v557_v2, %v561_v3 }
  0xa7   : > { %v608_v19 = vld [vmem:[%s10033_s6 + $0x760] sm:$0xff]  ;;  %2384 = vmatpush2.bf16.msra.mxu1 %v8353_v21  ;;  %v8706_v17 = vld [vmem:[%s14903_s0 + $0x2c] ss:$16 sps:$4 sm:$0xff]   ;;  %v8292_v21 = vcombine.high %v549_v14, %v553_v15 }
  0xa8   : > { %v468_v23 = vld [vmem:[%s10033_s6 + $0x300] sm:$0xff]  ;;  %v8346_v24 = vcombine.high %v604_v18, %v608_v19  ;;  %2224 = vmatprep.subr.bf16.mxu0 %v8218_v22  ;;  %v8345_v29 = vcombine.low %v604_v18, %v608_v19  ;;  %v8164_v18 = vcombine.high %v421_v11, %v425_v12  ;;  %v413_v19 = vld [vmem:[%s10033_s6 + $0x148] sm:$0xff] }
  0xa9   : > { %v472_v25 = vld [vmem:[%s10033_s6 + $0x320] sm:$0xff]  ;;  %2225 = vmatpush2.bf16.msra.mxu0 %v8217_v28  ;;  %v417_v20 = vld [vmem:[%s10033_s6 + $0x168] sm:$0xff] }
  0xaa   : > { %v596_v26 = vld [vmem:[%s10033_s6 + $0x700] sm:$0xff]  ;;  %v8210_v30 = vcombine.high %v468_v23, %v472_v25  ;;  %2385 = vmatprep.subr.bf16.mxu1 %v8346_v24  ;;  %v8209_v36 = vcombine.low %v468_v23, %v472_v25  ;;  %v541_v22 = vld [vmem:[%s10033_s6 + $0x548] sm:$0xff]  ;;  %v8163_v24 = vcombine.low %v421_v11, %v425_v12  ;;  %v8291_v25 = vcombine.low %v549_v14, %v553_v15 }
  0xab   : > { %v600_v27 = vld [vmem:[%s10033_s6 + $0x720] sm:$0xff]  ;;  %2386 = vmatpush2.bf16.msra.mxu1 %v8345_v29  ;;  %v545_v23 = vld [vmem:[%s10033_s6 + $0x568] sm:$0xff] }
  0xac   : > { %v460_v31 = vld [vmem:[%s10033_s6 + $0x2c0] sm:$0xff]  ;;  %v8338_v32 = vcombine.high %v596_v26, %v600_v27  ;;  %2226 = vmatprep.subr.bf16.mxu0 %v8210_v30  ;;  %v8337_v37 = vcombine.low %v596_v26, %v600_v27  ;;  %v8156_v26 = vcombine.high %v413_v19, %v417_v20  ;;  %v8284_v27 = vcombine.high %v541_v22, %v545_v23  ;;  %v405_v29 = vld [vmem:[%s10033_s6 + $0x108] sm:$0xff] }
  0xad   : > { %v464_v33 = vld [vmem:[%s10033_s6 + $0x2e0] sm:$0xff]  ;;  %2227 = vmatpush2.bf16.msra.mxu0 %v8209_v36  ;;  %v409_v30 = vld [vmem:[%s10033_s6 + $0x128] sm:$0xff] }
  0xae   : > { %v588_v34 = vld [vmem:[%s10033_s6 + $0x6c0] sm:$0xff]  ;;  %v8202_v38 = vcombine.high %v460_v31, %v464_v33  ;;  %2387 = vmatprep.subr.bf16.mxu1 %v8338_v32  ;;  %v8201_v44 = vcombine.low %v460_v31, %v464_v33  ;;  %v8709_v31 = vld [vmem:[%s14903_s0 + $0x28] ss:$16 sps:$4 sm:$0xff]   ;;  %v8155_v32 = vcombine.low %v413_v19, %v417_v20  ;;  %v8712_v36 = vld [vmem:[%s14903_s0 + $0x4c] ss:$16 sps:$4 sm:$0xff]  }
  0xaf   : > { %v592_v35 = vld [vmem:[%s10033_s6 + $0x6e0] sm:$0xff]  ;;  %2388 = vmatpush2.bf16.msra.mxu1 %v8337_v37  ;;  %v533_v33 = vld [vmem:[%s10033_s6 + $0x508] sm:$0xff]  ;;  %v8283_v37 = vcombine.low %v541_v22, %v545_v23 }
  0xb0   : > { %v8330_v39 = vcombine.high %v588_v34, %v592_v35  ;;  %v452_v40 = vld [vmem:[%s10033_s6 + $0x280] sm:$0xff]  ;;  %2228 = vmatprep.subr.bf16.mxu0 %v8202_v38  ;;  %v8329_v45 = vcombine.low %v588_v34, %v592_v35  ;;  %v537_v34 = vld [vmem:[%s10033_s6 + $0x528] sm:$0xff]  ;;  %v8148_v38 = vcombine.high %v405_v29, %v409_v30 }
  0xb1   : > { %v456_v41 = vld [vmem:[%s10033_s6 + $0x2a0] sm:$0xff]  ;;  %2229 = vmatpush2.bf16.msra.mxu0 %v8201_v44  ;;  %v529_v44 = vld [vmem:[%s10033_s6 + $0x4e8] sm:$0xff] }
  0xb2   : > { %v580_v42 = vld [vmem:[%s10033_s6 + $0x680] sm:$0xff]  ;;  %v8194_v46 = vcombine.high %v452_v40, %v456_v41  ;;  %2389 = vmatprep.subr.bf16.mxu1 %v8330_v39  ;;  %v8193_v52 = vcombine.low %v452_v40, %v456_v41  ;;  %v397_v39 = vld [vmem:[%s10033_s6 + $0xc8] sm:$0xff]  ;;  %v8276_v41 = vcombine.high %v533_v33, %v537_v34 }
  0xb3   : > { %v584_v43 = vld [vmem:[%s10033_s6 + $0x6a0] sm:$0xff]  ;;  %2390 = vmatpush2.bf16.msra.mxu1 %v8329_v45  ;;  %v401_v40 = vld [vmem:[%s10033_s6 + $0xe8] sm:$0xff] }
  0xb4   : > { %v8322_v47 = vcombine.high %v580_v42, %v584_v43  ;;  %v444_v48 = vld [vmem:[%s10033_s6 + $0x240] sm:$0xff]  ;;  %2230 = vmatprep.subr.bf16.mxu0 %v8194_v46  ;;  %v8321_v53 = vcombine.low %v580_v42, %v584_v43  ;;  %v8147_v42 = vcombine.low %v405_v29, %v409_v30  ;;  %v525_v43 = vld [vmem:[%s10033_s6 + $0x4c8] sm:$0xff]  ;;  %v8140_v45 = vcombine.high %v397_v39, %v401_v40 }
  0xb5   : > { %v448_v49 = vld [vmem:[%s10033_s6 + $0x260] sm:$0xff]  ;;  %2231 = vmatpush2.bf16.msra.mxu0 %v8193_v52  ;;  %v373_v2 = vld [vmem:[%s10033_s6 + $0x8] sm:$0xff] }
  0xb6   : > { %v572_v50 = vld [vmem:[%s10033_s6 + $0x640] sm:$0xff]  ;;  %v8186_v54 = vcombine.high %v444_v48, %v448_v49  ;;  %2391 = vmatprep.subr.bf16.mxu1 %v8322_v47  ;;  %v8185_v60 = vcombine.low %v444_v48, %v448_v49  ;;  %v8275_v47 = vcombine.low %v533_v33, %v537_v34  ;;  %v8715_v48 = vld [vmem:[%s14903_s0 + $0x48] ss:$16 sps:$4 sm:$0xff]   ;;  %v8268_v49 = vcombine.high %v525_v43, %v529_v44  ;;  %v8730_v30 = vld [vmem:[%s14903_s0 + $0xac] ss:$16 sps:$4 sm:$0xff]  }
  0xb7   : > { %v576_v51 = vld [vmem:[%s10033_s6 + $0x660] sm:$0xff]  ;;  %2392 = vmatpush2.bf16.msra.mxu1 %v8321_v53  ;;  %v517_v53 = vld [vmem:[%s10033_s6 + $0x488] sm:$0xff] }
  0xb8   : > { %v8314_v55 = vcombine.high %v572_v50, %v576_v51  ;;  %v436_v56 = vld [vmem:[%s10033_s6 + $0x200] sm:$0xff]  ;;  %2232 = vmatprep.subr.bf16.mxu0 %v8186_v54  ;;  %v8313_v61 = vcombine.low %v572_v50, %v576_v51  ;;  %v389_v50 = vld [vmem:[%s10033_s6 + $0x88] sm:$0xff] }
  0xb9   : > { %v440_v57 = vld [vmem:[%s10033_s6 + $0x220] sm:$0xff]  ;;  %2233 = vmatpush2.bf16.msra.mxu0 %v8185_v60  ;;  %v393_v51 = vld [vmem:[%s10033_s6 + $0xa8] sm:$0xff] }
  0xba   : > { %v564_v58 = vld [vmem:[%s10033_s6 + $0x600] sm:$0xff]  ;;  %v8178_v62 = vcombine.high %v436_v56, %v440_v57  ;;  %2393 = vmatprep.subr.bf16.mxu1 %v8314_v55  ;;  %v8177_v4 = vcombine.low %v436_v56, %v440_v57  ;;  %v521_v54 = vld [vmem:[%s10033_s6 + $0x4a8] sm:$0xff]  ;;  %v8139_v56 = vcombine.low %v397_v39, %v401_v40  ;;  %v8267_v57 = vcombine.low %v525_v43, %v529_v44 }
  0xbb   : > { %v568_v59 = vld [vmem:[%s10033_s6 + $0x620] sm:$0xff]  ;;  %2394 = vmatpush2.bf16.msra.mxu1 %v8313_v61  ;;  %v8718_v55 = vld [vmem:[%s14903_s0 + $0x6c] ss:$16 sps:$4 sm:$0xff]   ;;  %v8131_v1 = vcombine.low %v389_v50, %v393_v51  ;;  %v10234_v44 = vld [vmem:[%s14903_s0 + $0xa8] ss:$16 sps:$4 sm:$0xff]  }
  0xbc   : > { %v8306_v63 = vcombine.high %v564_v58, %v568_v59  ;;  %2234 = vmatprep.subr.bf16.mxu0 %v8178_v62  ;;  %v8305_v5 = vcombine.low %v564_v58, %v568_v59  ;;  %v8702_v7 = vld [vmem:[%s14903_s0] ss:$16 sps:$4 sm:$0xff]   ;;  %v8704_v10 = vld [vmem:[%s14903_s0 + $0x24] ss:$16 sps:$4 sm:$0xff]   ;;  %v8132_v58 = vcombine.high %v389_v50, %v393_v51  ;;  %v8260_v59 = vcombine.high %v517_v53, %v521_v54  ;;  %v381_v60 = vld [vmem:[%s10033_s6 + $0x48] sm:$0xff] }
  0xbd   : > { %2235 = vmatpush2.bf16.msra.mxu0 %v8177_v4  ;;  %v8708_v28 = vld [vmem:[%s14903_s0 + $0x20] ss:$16 sps:$4 sm:$0xff]   ;;  %v8710_v35 = vld [vmem:[%s14903_s0 + $0x44] ss:$16 sps:$4 sm:$0xff]   ;;  %v385_v61 = vld [vmem:[%s10033_s6 + $0x68] sm:$0xff] }
  0xbe   : > { %2395 = vmatprep.subr.bf16.mxu1 %v8306_v63  ;;  %2526 = vmatprep.subr.bf16.mxu0 %v8172_v6  ;;  %v8714_v46 = vld [vmem:[%s14903_s0 + $0x40] ss:$16 sps:$4 sm:$0xff]   ;;  %v8716_v52 = vld [vmem:[%s14903_s0 + $0x64] ss:$16 sps:$4 sm:$0xff]   ;;  %v509_v62 = vld [vmem:[%s10033_s6 + $0x448] sm:$0xff]  ;;  %v8259_v6 = vcombine.low %v517_v53, %v521_v54  ;;  %v8123_v12 = vcombine.low %v381_v60, %v385_v61 }
  0xbf   : > { %2396 = vmatpush2.bf16.msra.mxu1 %v8305_v5  ;;  %v513_v63 = vld [vmem:[%s10033_s6 + $0x468] sm:$0xff]  ;;  %v8720_v0 = vld [vmem:[%s14903_s0 + $0x60] ss:$16 sps:$4 sm:$0xff]   ;;  %v8722_v5 = vld [vmem:[%s14903_s0 + $0x84] ss:$16 sps:$4 sm:$0xff]  }
  0xc0   : > { %2687 = vmatprep.subr.bf16.mxu1 %v8300_v9  ;;  %2237 = vmatmul.mubr.bf16.vlgmr.msra.gmra.mxu0 %v8702_v7  ;;  %v377_v3 = vld [vmem:[%s10033_s6 + $0x28] sm:$0xff]  ;;  %v8124_v7 = vcombine.high %v381_v60, %v385_v61  ;;  %v8252_v11 = vcombine.high %v509_v62, %v513_v63  ;;  %v8251_v15 = vcombine.low %v509_v62, %v513_v63  ;;  %v8726_v20 = vld [vmem:[%s14903_s0 + $0x80] ss:$16 sps:$4 sm:$0xff]  }
  0xc1   : > { %2527 = vmatpush1.bf16.msra.mxu0 %v8171_v13  ;;  %2246 = vmatprep.mubr.bf16.mxu0 %v8704_v10  ;;  %v8721_v4 = vld [vmem:[%s14903_s0 + $0x68] ss:$16 sps:$4 sm:$0xff]   ;;  %v8724_v10 = vld [vmem:[%s14903_s0 + $0x8c] ss:$16 sps:$4 sm:$0xff]   ;;  %v8732_v40 = vld [vmem:[%s14903_s0 + $0xa0] ss:$16 sps:$4 sm:$0xff]  }
  0xc2   : > { %2398 = vmatmul.mubr.bf16.vlgmr.msra.gmra.mxu1 %v8703_v8  ;;  %2528 = vmatprep.subr.bf16.mxu0 %v8164_v18  ;;  %v501_v8 = vld [vmem:[%s10033_s6 + $0x408] sm:$0xff]  ;;  %v10258_v60 = vld [vmem:[%s14903_s0 + $0xc0] ss:$16 sps:$4 sm:$0xff]  }
  0xc3   : > { %2688 = vmatpush1.bf16.msra.mxu1 %v8299_v16  ;;  %2407 = vmatprep.mubr.bf16.mxu1 %v8706_v17  ;;  %v505_v9 = vld [vmem:[%s10033_s6 + $0x428] sm:$0xff]  ;;  %v8116_v16 = vcombine.high %v373_v2, %v377_v3 }
  0xc4   : > { %2689 = vmatprep.subr.bf16.mxu1 %v8292_v21  ;;  %v493_v13 = vld [vmem:[%s10033_s6 + $0x3c8] sm:$0xff]  ;;  %v8244_v17 = vcombine.high %v501_v8, %v505_v9  ;;  %v8115_v21 = vcombine.low %v373_v2, %v377_v3 }
  0xc5   : > { %2529 = vmatpush1.bf16.msra.mxu0 %v8163_v24  ;;  %v497_v14 = vld [vmem:[%s10033_s6 + $0x3e8] sm:$0xff] }
  0xc6   : > { %2530 = vmatprep.subr.bf16.mxu0 %v8156_v26  ;;  %v621_v18 = vld [vmem:[%s10033_s6 + $0x7c8] sm:$0xff]  ;;  %v8243_v26 = vcombine.low %v501_v8, %v505_v9 }
  0xc7   : > { %2690 = vmatpush1.bf16.msra.mxu1 %v8291_v25  ;;  %v625_v19 = vld [vmem:[%s10033_s6 + $0x7e8] sm:$0xff]  ;;  %v8728_v25 = vld [vmem:[%s14903_s0 + $0xa4] ss:$16 sps:$4 sm:$0xff]  }
  0xc8   : > { %2691 = vmatprep.subr.bf16.mxu1 %v8284_v27  ;;  %2247 = vmatmul.mubr.bf16.gmra.mxu0 %v8708_v28  ;;  %v485_v22 = vld [vmem:[%s10033_s6 + $0x388] sm:$0xff]  ;;  %v8236_v27 = vcombine.high %v493_v13, %v497_v14 }
  0xc9   : > { %2531 = vmatpush1.bf16.msra.mxu0 %v8155_v32  ;;  %2256 = vmatprep.mubr.bf16.mxu0 %v8710_v35  ;;  %v489_v23 = vld [vmem:[%s10033_s6 + $0x3a8] sm:$0xff]  ;;  %v8235_v32 = vcombine.low %v493_v13, %v497_v14  ;;  %v8363_v35 = vcombine.low %v621_v18, %v625_v19 }
  0xca   : > { %2408 = vmatmul.mubr.bf16.gmra.mxu1 %v8709_v31  ;;  %2532 = vmatprep.subr.bf16.mxu0 %v8148_v38  ;;  %v8727_v24 = vld [vmem:[%s14903_s0 + $0x88] ss:$16 sps:$4 sm:$0xff]   ;;  %v8364_v31 = vcombine.high %v621_v18, %v625_v19  ;;  %v10246_v50 = vld [vmem:[%s14903_s0 + $0xcc] ss:$16 sps:$4 sm:$0xff]  }
  0xcb   : > { %2417 = vmatprep.mubr.bf16.mxu1 %v8712_v36  ;;  %2692 = vmatpush1.bf16.msra.mxu1 %v8283_v37  ;;  %v613_v28 = vld [vmem:[%s10033_s6 + $0x788] sm:$0xff]  ;;  %v8228_v36 = vcombine.high %v485_v22, %v489_v23 }
  0xcc   : > { %2693 = vmatprep.subr.bf16.mxu1 %v8276_v41  ;;  %v617_v29 = vld [vmem:[%s10033_s6 + $0x7a8] sm:$0xff]  ;;  %v8227_v41 = vcombine.low %v485_v22, %v489_v23 }
  0xcd   : > { %2533 = vmatpush1.bf16.msra.mxu0 %v8147_v42  ;;  %v477_v33 = vld [vmem:[%s10033_s6 + $0x348] sm:$0xff]  ;;  %v8356_v37 = vcombine.high %v613_v28, %v617_v29 }
  0xce   : > { %2534 = vmatprep.subr.bf16.mxu0 %v8140_v45  ;;  %v481_v34 = vld [vmem:[%s10033_s6 + $0x368] sm:$0xff]  ;;  %v10239_v45 = vld [vmem:[%s14903_s0 + $0xc4] ss:$16 sps:$4 sm:$0xff]  }
  0xcf   : > { %2694 = vmatpush1.bf16.msra.mxu1 %v8275_v47  ;;  %v605_v38 = vld [vmem:[%s10033_s6 + $0x748] sm:$0xff]  ;;  %v8220_v47 = vcombine.high %v477_v33, %v481_v34 }
  0xd0   : > { %2257 = vmatmul.mubr.bf16.gmra.mxu0 %v8714_v46  ;;  %2695 = vmatprep.subr.bf16.mxu1 %v8268_v49  ;;  %v609_v39 = vld [vmem:[%s10033_s6 + $0x768] sm:$0xff]  ;;  %v8355_v46 = vcombine.low %v613_v28, %v617_v29  ;;  %v10312_v29 = vld [vmem:[%s10033_s6 + $0x1d0] sm:$0xff] }
  0xd1   : > { %2266 = vmatprep.mubr.bf16.mxu0 %v8716_v52  ;;  %2535 = vmatpush1.bf16.msra.mxu0 %v8139_v56  ;;  %v469_v42 = vld [vmem:[%s10033_s6 + $0x308] sm:$0xff]  ;;  %v8348_v51 = vcombine.high %v605_v38, %v609_v39  ;;  %v8219_v52 = vcombine.low %v477_v33, %v481_v34  ;;  %v10321_v34 = vld [vmem:[%s10033_s6 + $0x5d0] sm:$0xff] }
  0xd2   : > { %2418 = vmatmul.mubr.bf16.gmra.mxu1 %v8715_v48  ;;  %2536 = vmatprep.subr.bf16.mxu0 %v8132_v58  ;;  %v473_v43 = vld [vmem:[%s10033_s6 + $0x328] sm:$0xff] }
  0xd3   : > { %2427 = vmatprep.mubr.bf16.mxu1 %v8718_v55  ;;  %2696 = vmatpush1.bf16.msra.mxu1 %v8267_v57  ;;  %v597_v48 = vld [vmem:[%s10033_s6 + $0x708] sm:$0xff]  ;;  %v8347_v55 = vcombine.low %v605_v38, %v609_v39  ;;  %v8212_v56 = vcombine.high %v469_v42, %v473_v43  ;;  %v8211_v61 = vcombine.low %v469_v42, %v473_v43  ;;  %v10340_v39 = vld [vmem:[%s14903_s0 + $0x124] ss:$16 sps:$4 sm:$0xff]  }
  0xd4   : > { %2697 = vmatprep.subr.bf16.mxu1 %v8260_v59  ;;  %v601_v49 = vld [vmem:[%s10033_s6 + $0x728] sm:$0xff] }
  0xd5   : > { %2537 = vmatpush1.bf16.msra.mxu0 %v8131_v1  ;;  %v461_v53 = vld [vmem:[%s10033_s6 + $0x2c8] sm:$0xff]  ;;  %v8340_v57 = vcombine.high %v597_v48, %v601_v49  ;;  %v10270_v1 = vld [vmem:[%s14903_s0 + $0xe4] ss:$16 sps:$4 sm:$0xff]   ;;  %v8339_v2 = vcombine.low %v597_v48, %v601_v49 }
  0xd6   : > { %2538 = vmatprep.subr.bf16.mxu0 %v8124_v7  ;;  %v465_v54 = vld [vmem:[%s10033_s6 + $0x2e8] sm:$0xff]  ;;  %v10368_v48 = vld [vmem:[%s14903_s0 + $0x144] ss:$16 sps:$4 sm:$0xff]  }
  0xd7   : > { %2698 = vmatpush1.bf16.msra.mxu1 %v8259_v6  ;;  %v589_v58 = vld [vmem:[%s10033_s6 + $0x6c8] sm:$0xff]  ;;  %v8204_v3 = vcombine.high %v461_v53, %v465_v54  ;;  %v8203_v8 = vcombine.low %v461_v53, %v465_v54  ;;  %v10392_v53 = vld [vmem:[%s14903_s0 + $0x164] ss:$16 sps:$4 sm:$0xff]  }
  0xd8   : > { %2267 = vmatmul.mubr.bf16.gmra.mxu0 %v8720_v0  ;;  %2699 = vmatprep.subr.bf16.mxu1 %v8252_v11  ;;  %v593_v59 = vld [vmem:[%s10033_s6 + $0x6e8] sm:$0xff] }
  0xd9   : > { %2276 = vmatprep.mubr.bf16.mxu0 %v8722_v5  ;;  %2539 = vmatpush1.bf16.msra.mxu0 %v8123_v12  ;;  %v453_v62 = vld [vmem:[%s10033_s6 + $0x288] sm:$0xff]  ;;  %v8332_v7 = vcombine.high %v589_v58, %v593_v59  ;;  %v8331_v11 = vcombine.low %v589_v58, %v593_v59 }
  0xda   : > { %2428 = vmatmul.mubr.bf16.gmra.mxu1 %v8721_v4  ;;  %2540 = vmatprep.subr.bf16.mxu0 %v8116_v16  ;;  %v457_v63 = vld [vmem:[%s10033_s6 + $0x2a8] sm:$0xff]  ;;  %v10290_v16 = vld [vmem:[%s14903_s0 + $0xe0] ss:$16 sps:$4 sm:$0xff]  }
  0xdb   : > { %2437 = vmatprep.mubr.bf16.mxu1 %v8724_v10  ;;  %2700 = vmatpush1.bf16.msra.mxu1 %v8251_v15  ;;  %v10265_v0 = vld [vmem:[%s14903_s0 + $0xc8] ss:$16 sps:$4 sm:$0xff]   ;;  %v10277_v6 = vld [vmem:[%s14903_s0 + $0xec] ss:$16 sps:$4 sm:$0xff]   ;;  %v8196_v12 = vcombine.high %v453_v62, %v457_v63 }
  0xdc   : > { %2701 = vmatprep.subr.bf16.mxu1 %v8244_v17  ;;  %v581_v4 = vld [vmem:[%s10033_s6 + $0x688] sm:$0xff]  ;;  %v8195_v17 = vcombine.low %v453_v62, %v457_v63 }
  0xdd   : > { %2541 = vmatpush1.bf16.msra.mxu0 %v8115_v21  ;;  %v585_v5 = vld [vmem:[%s10033_s6 + $0x6a8] sm:$0xff]  ;;  %v10302_v21 = vld [vmem:[%s14903_s0 + $0x104] ss:$16 sps:$4 sm:$0xff]  }
  0xde   : > { %2542 = vmatprep.subr.bf16.mxu0 %v8236_v27  ;;  %v445_v9 = vld [vmem:[%s10033_s6 + $0x248] sm:$0xff]  ;;  %v8324_v13 = vcombine.high %v581_v4, %v585_v5  ;;  %v8323_v22 = vcombine.low %v581_v4, %v585_v5  ;;  %v422_v4 = vld [vmem:[%s10033_s6 + $0x190] sm:$0xff] }
  0xdf   : > { %2702 = vmatpush1.bf16.msra.mxu1 %v8243_v26  ;;  %v449_v10 = vld [vmem:[%s10033_s6 + $0x268] sm:$0xff]  ;;  %v426_v5 = vld [vmem:[%s10033_s6 + $0x1b0] sm:$0xff] }
  0xe0   : > { %2277 = vmatmul.mubr.bf16.gmra.mxu0 %v8726_v20  ;;  %2703 = vmatprep.subr.bf16.mxu1 %v8364_v31  ;;  %v573_v14 = vld [vmem:[%s10033_s6 + $0x648] sm:$0xff]  ;;  %v8188_v23 = vcombine.high %v445_v9, %v449_v10  ;;  %v8187_v28 = vcombine.low %v445_v9, %v449_v10  ;;  %v414_v10 = vld [vmem:[%s10033_s6 + $0x150] sm:$0xff] }
  0xe1   : > { %2286 = vmatprep.mubr.bf16.mxu0 %v8728_v25  ;;  %2543 = vmatpush2.bf16.msra.mxu0 %v8235_v32  ;;  %v577_v15 = vld [vmem:[%s10033_s6 + $0x668] sm:$0xff] }
  0xe2   : > { %2438 = vmatmul.mubr.bf16.gmra.mxu1 %v8727_v24  ;;  %2544 = vmatprep.subr.bf16.mxu0 %v8228_v36  ;;  %v437_v18 = vld [vmem:[%s10033_s6 + $0x208] sm:$0xff]  ;;  %v8316_v27 = vcombine.high %v573_v14, %v577_v15  ;;  %v8315_v31 = vcombine.low %v573_v14, %v577_v15  ;;  %v10330_v36 = vld [vmem:[%s14903_s0 + $0x100] ss:$16 sps:$4 sm:$0xff]  }
  0xe3   : > { %2447 = vmatprep.mubr.bf16.mxu1 %v8730_v30  ;;  %2704 = vmatpush2.bf16.msra.mxu1 %v8363_v35  ;;  %v441_v19 = vld [vmem:[%s10033_s6 + $0x228] sm:$0xff]  ;;  %v10315_v30 = vld [vmem:[%s10033_s6 + $0x1f0] sm:$0xff] }
  0xe4   : > { %2705 = vmatprep.subr.bf16.mxu1 %v8356_v37  ;;  %v10297_v20 = vld [vmem:[%s14903_s0 + $0xe8] ss:$16 sps:$4 sm:$0xff]   ;;  %v10309_v26 = vld [vmem:[%s14903_s0 + $0x10c] ss:$16 sps:$4 sm:$0xff]   ;;  %v8180_v32 = vcombine.high %v437_v18, %v441_v19  ;;  %v10324_v35 = vld [vmem:[%s10033_s6 + $0x5f0] sm:$0xff]  ;;  %v8179_v37 = vcombine.low %v437_v18, %v441_v19  ;;  %v8173_v9 = vcombine.low %v10312_v29, %v10315_v30 }
  0xe5   : > { %2545 = vmatpush2.bf16.msra.mxu0 %v8227_v41  ;;  %v565_v24 = vld [vmem:[%s10033_s6 + $0x608] sm:$0xff]  ;;  %v8174_v41 = vcombine.high %v10312_v29, %v10315_v30  ;;  %v8302_v43 = vcombine.high %v10321_v34, %v10324_v35  ;;  %v542_v14 = vld [vmem:[%s10033_s6 + $0x550] sm:$0xff] }
  0xe6   : > { %2546 = vmatprep.subr.bf16.mxu0 %v8220_v47  ;;  %v569_v25 = vld [vmem:[%s10033_s6 + $0x628] sm:$0xff]  ;;  %v546_v15 = vld [vmem:[%s10033_s6 + $0x570] sm:$0xff] }
  0xe7   : > { %2706 = vmatpush2.bf16.msra.mxu1 %v8355_v46  ;;  %v8308_v33 = vcombine.high %v565_v24, %v569_v25  ;;  %v10335_v38 = vld [vmem:[%s14903_s0 + $0x108] ss:$16 sps:$4 sm:$0xff]   ;;  %v10347_v42 = vld [vmem:[%s14903_s0 + $0x12c] ss:$16 sps:$4 sm:$0xff]   ;;  %v10358_v46 = vld [vmem:[%s14903_s0 + $0x120] ss:$16 sps:$4 sm:$0xff]   ;;  %v8286_v30 = vcombine.high %v542_v14, %v546_v15 }
  0xe8   : > { %2287 = vmatmul.mubr.bf16.gmra.mxu0 %v8732_v40  ;;  %2707 = vmatprep.subr.bf16.mxu1 %v8348_v51  ;;  %v8307_v40 = vcombine.low %v565_v24, %v569_v25  ;;  %v10363_v47 = vld [vmem:[%s14903_s0 + $0x128] ss:$16 sps:$4 sm:$0xff]   ;;  %v10373_v49 = vld [vmem:[%s14903_s0 + $0x14c] ss:$16 sps:$4 sm:$0xff]   ;;  %v10382_v51 = vld [vmem:[%s14903_s0 + $0x140] ss:$16 sps:$4 sm:$0xff]  }
  0xe9   : > { %2296 = vmatprep.mubr.bf16.mxu0 %v10239_v45  ;;  %2547 = vmatpush2.bf16.msra.mxu0 %v8219_v52  ;;  %v10387_v52 = vld [vmem:[%s14903_s0 + $0x148] ss:$16 sps:$4 sm:$0xff]   ;;  %v10397_v54 = vld [vmem:[%s14903_s0 + $0x16c] ss:$16 sps:$4 sm:$0xff]  }
  0xea   : > { %2448 = vmatmul.mubr.bf16.gmra.mxu1 %v10234_v44  ;;  %2548 = vmatprep.subr.bf16.mxu0 %v8212_v56  ;;  %v371_v56 = vld [vmem:[%s14903_s0 + $0x188] sm:$0x33] }
  0xeb   : > { %2457 = vmatprep.mubr.bf16.mxu1 %v10246_v50  ;;  %2708 = vmatpush2.bf16.msra.mxu1 %v8347_v55  ;;  %v370_v55 = vld [vmem:[%s14903_s0 + $0x180] sm:$0x33]  ;;  %v10417_v58 = vld [vmem:[%s14903_s0 + $0x168] ss:$16 sps:$4 sm:$0xff]   ;;  %v10429_v63 = vcombine.low %v371_v56, %v371_v56  ;;  %v10480_v29 = vld [vmem:[%s14903_s0 + $0x2c] ss:$16 sps:$4 sm:$0xff]  }
  0xec   : > { %2709 = vmatprep.subr.bf16.mxu1 %v8340_v57  ;;  %v10412_v57 = vld [vmem:[%s14903_s0 + $0x160] ss:$16 sps:$4 sm:$0xff]   ;;  %v10419_v59 = vcombine.high %v370_v55, %v370_v55  ;;  %v10427_v62 = vcombine.low %v370_v55, %v370_v55  ;;  %v10466_v19 = vld [vmem:[%s14903_s0 + $0x8] ss:$16 sps:$4 sm:$0xff]  }
  0xed   : > { %2549 = vmatpush2.bf16.msra.mxu0 %v8211_v61  ;;  %v10421_v61 = vcombine.high %v371_v56, %v371_v56  ;;  %15076 = vst [vmem:[#allocation15_spill] sm:$0xff] %v10429_v63  ;;  %v10492_v55 = vld [vmem:[%s14903_s0 + $0x20] ss:$16 sps:$4 sm:$0xff]  }
  0xee   : > { %2550 = vmatprep.subr.bf16.mxu0 %v8204_v3  ;;  %15073 = vst [vmem:[#allocation12_spill] sm:$0xff] %v10419_v59  ;;  %15075 = vst [vmem:[#allocation14_spill] sm:$0xff] %v10427_v62  ;;  %v10442_v3 = vld [vmem:[%s14903_s0 + $0xc] ss:$16 sps:$4 sm:$0xff]  }
  0xef   : > { %2710 = vmatpush2.bf16.msra.mxu1 %v8339_v2  ;;  %15074 = vst [vmem:[#allocation13_spill] sm:$0xff] %v10421_v61  ;;  %v10436_v2 = vld [vmem:[%s14903_s0 + $0x4] ss:$16 sps:$4 sm:$0xff]  }
  0xf0   : > { %2297 = vmatmul.mubr.bf16.gmra.mxu0 %v10258_v60  ;;  %2711 = vmatprep.subr.bf16.mxu1 %v8332_v7  ;;  %v550_v7 = vld [vmem:[%s10033_s6 + $0x590] sm:$0xff] }
  0xf1   : > { %2306 = vmatprep.mubr.bf16.mxu0 %v10270_v1  ;;  %2551 = vmatpush2.bf16.msra.mxu0 %v8203_v8  ;;  %v554_v8 = vld [vmem:[%s10033_s6 + $0x5b0] sm:$0xff] }
  0xf2   : > { %2458 = vmatmul.mubr.bf16.gmra.mxu1 %v10265_v0  ;;  %2552 = vmatprep.subr.bf16.mxu0 %v8196_v12  ;;  %v8301_v12 = vcombine.low %v10321_v34, %v10324_v35  ;;  %v8294_v18 = vcombine.high %v550_v7, %v554_v8  ;;  %v8293_v24 = vcombine.low %v550_v7, %v554_v8  ;;  %v398_v34 = vld [vmem:[%s10033_s6 + $0xd0] sm:$0xff]  ;;  %v10510_v8 = vld [vmem:[%s14903_s0 + $0x4c] ss:$16 sps:$4 sm:$0xff]  }
  0xf3   : > { %2467 = vmatprep.mubr.bf16.mxu1 %v10277_v6  ;;  %2712 = vmatpush2.bf16.msra.mxu1 %v8331_v11  ;;  %v418_v11 = vld [vmem:[%s10033_s6 + $0x170] sm:$0xff] }
  0xf4   : > { %2713 = vmatprep.subr.bf16.mxu1 %v8324_v13  ;;  %v8166_v13 = vcombine.high %v422_v4, %v426_v5  ;;  %v8158_v25 = vcombine.high %v414_v10, %v418_v11  ;;  %v402_v35 = vld [vmem:[%s10033_s6 + $0xf0] sm:$0xff] }
  0xf5   : > { %2553 = vmatpush2.bf16.msra.mxu0 %v8195_v17  ;;  %v10460_v17 = vld [vmem:[%s14903_s0] ss:$16 sps:$4 sm:$0xff]   ;;  %v10504_v7 = vld [vmem:[%s14903_s0 + $0x44] ss:$16 sps:$4 sm:$0xff]  }
  0xf6   : > { %2554 = vmatprep.subr.bf16.mxu0 %v8188_v23  ;;  %v10472_v23 = vld [vmem:[%s14903_s0 + $0x24] ss:$16 sps:$4 sm:$0xff]  }
  0xf7   : > { %2714 = vmatpush2.bf16.msra.mxu1 %v8323_v22  ;;  %v8165_v22 = vcombine.low %v422_v4, %v426_v5  ;;  %v10498_v4 = vld [vmem:[%s14903_s0 + $0x28] ss:$16 sps:$4 sm:$0xff]  }
  0xf8   : > { %2307 = vmatmul.mubr.bf16.gmra.mxu0 %v10290_v16  ;;  %2715 = vmatprep.subr.bf16.mxu1 %v8316_v27  ;;  %v406_v27 = vld [vmem:[%s10033_s6 + $0x110] sm:$0xff] }
  0xf9   : > { %2316 = vmatprep.mubr.bf16.mxu0 %v10302_v21  ;;  %2555 = vmatpush2.bf16.msra.mxu0 %v8187_v28  ;;  %v410_v28 = vld [vmem:[%s10033_s6 + $0x130] sm:$0xff] }
  0xfa   : > { %2468 = vmatmul.mubr.bf16.gmra.mxu1 %v10297_v20  ;;  %2556 = vmatprep.subr.bf16.mxu0 %v8180_v32  ;;  %v538_v32 = vld [vmem:[%s10033_s6 + $0x530] sm:$0xff]  ;;  %v8149_v5 = vcombine.low %v406_v27, %v410_v28 }
  0xfb   : > { %2477 = vmatprep.mubr.bf16.mxu1 %v10309_v26  ;;  %2716 = vmatpush2.bf16.msra.mxu1 %v8315_v31  ;;  %v534_v31 = vld [vmem:[%s10033_s6 + $0x510] sm:$0xff] }
  0xfc   : > { %2717 = vmatprep.subr.bf16.mxu1 %v8308_v33  ;;  %v8157_v33 = vcombine.low %v414_v10, %v418_v11  ;;  %v8278_v56 = vcombine.high %v534_v31, %v538_v32  ;;  %v390_v10 = vld [vmem:[%s10033_s6 + $0x90] sm:$0xff] }
  0xfd   : > { %2557 = vmatpush2.bf16.msra.mxu0 %v8179_v37  ;;  %v8285_v37 = vcombine.low %v542_v14, %v546_v15  ;;  %v394_v11 = vld [vmem:[%s10033_s6 + $0xb0] sm:$0xff] }
  0xfe   : > { %2848 = vmatprep.subr.bf16.mxu0 %v8174_v41  ;;  %v526_v41 = vld [vmem:[%s10033_s6 + $0x4d0] sm:$0xff] }
  0xff   : > { %2718 = vmatpush2.bf16.msra.mxu1 %v8307_v40  ;;  %v8150_v40 = vcombine.high %v406_v27, %v410_v28  ;;  %v522_v14 = vld [vmem:[%s10033_s6 + $0x4b0] sm:$0xff] }
 0x100   : > { %2317 = vmatmul.mubr.bf16.gmra.mxu0 %v10330_v36  ;;  %3009 = vmatprep.subr.bf16.mxu1 %v8302_v43  ;;  %v530_v43 = vld [vmem:[%s10033_s6 + $0x4f0] sm:$0xff] }
 0x101   : > { %2326 = vmatprep.mubr.bf16.mxu0 %v10340_v39  ;;  %v8270_v15 = vcombine.high %v526_v41, %v530_v43  ;;  %v382_v28 = vld [vmem:[%s10033_s6 + $0x50] sm:$0xff] }
 0x102   : > { %2478 = vmatmul.mubr.bf16.gmra.mxu1 %v10335_v38 }
 0x103   : > { %2487 = vmatprep.mubr.bf16.mxu1 %v10347_v42 }
 0x108   : > { %2327 = vmatmul.mubr.bf16.gmra.mxu0 %v10358_v46 }
 0x109   : > { %2336 = vmatprep.mubr.bf16.mxu0 %v10368_v48 }
 0x10a   : > { %2488 = vmatmul.mubr.bf16.gmra.mxu1 %v10363_v47 }
 0x10b   : > { %2497 = vmatprep.mubr.bf16.mxu1 %v10373_v49 }
 0x110   : > { %2337 = vmatmul.mubr.bf16.gmra.mxu0 %v10382_v51 }
 0x111   : > { %2346 = vmatprep.mubr.bf16.mxu0 %v10392_v53 }
 0x112   : > { %2498 = vmatmul.mubr.bf16.gmra.mxu1 %v10387_v52 }
 0x113   : > { %2507 = vmatprep.mubr.bf16.mxu1 %v10397_v54 }
 0x118   : > { %2347 = vmatmul.mubr.bf16.gmra.mxu0 %v10412_v57 }
 0x119   : > { %2356 = vmatprep.mubr.bf16.mxu0 %v10419_v59 }
 0x11a   : > { %2508 = vmatmul.mubr.bf16.gmra.mxu1 %v10417_v58 }
 0x11b   : > { %2517 = vmatprep.mubr.bf16.mxu1 %v10421_v61 }
 0x120   : > { %2357 = vmatmul.mubr.bf16.gmra.mxu0 %v10427_v62 }
 0x121   : > { %2558 = vmatprep.mubr.bf16.mxu0 %v10436_v2 }
 0x122   : > { %2518 = vmatmul.mubr.bf16.gmra.mxu1 %v10429_v63 }
 0x123   : > { %2719 = vmatprep.mubr.bf16.mxu1 %v10442_v3 }
 0x128   : > { %2559 = vmatmul.mubr.bf16.vlgmr.msra.gmra.mxu0 %v10460_v17 }
 0x129   : > { %2849 = vmatpush1.bf16.msra.mxu0 %v8173_v9  ;;  %2568 = vmatprep.mubr.bf16.mxu0 %v10472_v23  ;;  %v8142_v9 = vcombine.high %v398_v34, %v402_v35 }
 0x12a   : > { %2720 = vmatmul.mubr.bf16.vlgmr.msra.gmra.mxu1 %v10466_v19  ;;  %2850 = vmatprep.subr.bf16.mxu0 %v8166_v13  ;;  %v518_v13 = vld [vmem:[%s10033_s6 + $0x490] sm:$0xff] }
 0x12b   : > { %3010 = vmatpush1.bf16.msra.mxu1 %v8301_v12  ;;  %2729 = vmatprep.mubr.bf16.mxu1 %v10480_v29  ;;  %v8277_v12 = vcombine.low %v534_v31, %v538_v32  ;;  %v8262_v27 = vcombine.high %v518_v13, %v522_v14  ;;  %v10528_v31 = vld [vmem:[%s14903_s0 + $0x48] ss:$16 sps:$4 sm:$0xff]   ;;  %v10534_v32 = vld [vmem:[%s14903_s0 + $0x64] ss:$16 sps:$4 sm:$0xff]  }
 0x12c   : > { %3011 = vmatprep.subr.bf16.mxu1 %v8294_v18  ;;  %v8141_v18 = vcombine.low %v398_v34, %v402_v35  ;;  %v514_v34 = vld [vmem:[%s10033_s6 + $0x470] sm:$0xff]  ;;  %v10542_v35 = vld [vmem:[%s14903_s0 + $0x6c] ss:$16 sps:$4 sm:$0xff]  }
 0x12d   : > { %2851 = vmatpush1.bf16.msra.mxu0 %v8165_v22  ;;  %v8269_v22 = vcombine.low %v526_v41, %v530_v43  ;;  %15077 = vst [vmem:[#allocation16_spill] sm:$0xff] %v10542_v35 }
 0x12e   : > { %2852 = vmatprep.subr.bf16.mxu0 %v8158_v25  ;;  %v10520_v25 = vld [vmem:[%s14903_s0 + $0x40] ss:$16 sps:$4 sm:$0xff]  }
 0x12f   : > { %3012 = vmatpush1.bf16.msra.mxu1 %v8293_v24  ;;  %v8134_v24 = vcombine.high %v390_v10, %v394_v11 }
 0x130   : > { %3013 = vmatprep.subr.bf16.mxu1 %v8286_v30  ;;  %2569 = vmatmul.mubr.bf16.gmra.mxu0 %v10492_v55  ;;  %v386_v30 = vld [vmem:[%s10033_s6 + $0x70] sm:$0xff] }
 0x131   : > { %2853 = vmatpush1.bf16.msra.mxu0 %v8157_v33  ;;  %2578 = vmatprep.mubr.bf16.mxu0 %v10504_v7  ;;  %v510_v33 = vld [vmem:[%s10033_s6 + $0x450] sm:$0xff]  ;;  %v8126_v41 = vcombine.high %v382_v28, %v386_v30 }
 0x132   : > { %2730 = vmatmul.mubr.bf16.gmra.mxu1 %v10498_v4  ;;  %2854 = vmatprep.subr.bf16.mxu0 %v8150_v40  ;;  %v8261_v40 = vcombine.low %v518_v13, %v522_v14  ;;  %v8254_v43 = vcombine.high %v510_v33, %v514_v34  ;;  %v494_v14 = vld [vmem:[%s10033_s6 + $0x3d0] sm:$0xff] }
 0x133   : > { %2739 = vmatprep.mubr.bf16.mxu1 %v10510_v8  ;;  %3014 = vmatpush1.bf16.msra.mxu1 %v8285_v37  ;;  %v8133_v37 = vcombine.low %v390_v10, %v394_v11  ;;  %v10552_v11 = vld [vmem:[%s14903_s0 + $0x60] ss:$16 sps:$4 sm:$0xff]  }
 0x134   : > { %3015 = vmatprep.subr.bf16.mxu1 %v8278_v56  ;;  %v374_v56 = vld [vmem:[%s10033_s6 + $0x10] sm:$0xff]  ;;  %15078 = vst [vmem:[#allocation17_spill] sm:$0xff] %v10552_v11 }
 0x135   : > { %2855 = vmatpush1.bf16.msra.mxu0 %v8149_v5  ;;  %v378_v5 = vld [vmem:[%s10033_s6 + $0x30] sm:$0xff] }
 0x136   : > { %2856 = vmatprep.subr.bf16.mxu0 %v8142_v9  ;;  %v502_v9 = vld [vmem:[%s10033_s6 + $0x410] sm:$0xff]  ;;  %v8118_v10 = vcombine.high %v374_v56, %v378_v5 }
 0x137   : > { %3016 = vmatpush1.bf16.msra.mxu1 %v8277_v12  ;;  %v506_v12 = vld [vmem:[%s10033_s6 + $0x430] sm:$0xff] }
 0x138   : > { %2579 = vmatmul.mubr.bf16.gmra.mxu0 %v10520_v25  ;;  %3017 = vmatprep.subr.bf16.mxu1 %v8270_v15  ;;  %v8125_v15 = vcombine.low %v382_v28, %v386_v30  ;;  %v8246_v13 = vcombine.high %v502_v9, %v506_v12  ;;  %v622_v28 = vld [vmem:[%s10033_s6 + $0x7d0] sm:$0xff] }
 0x139   : > { %2588 = vmatprep.mubr.bf16.mxu0 %v10534_v32  ;;  %2857 = vmatpush1.bf16.msra.mxu0 %v8141_v18  ;;  %v8253_v18 = vcombine.low %v510_v33, %v514_v34  ;;  %v626_v30 = vld [vmem:[%s10033_s6 + $0x7f0] sm:$0xff]  ;;  %v10574_v33 = vld [vmem:[%s14903_s0 + $0x8c] ss:$16 sps:$4 sm:$0xff]   ;;  %v8117_v34 = vcombine.low %v374_v56, %v378_v5 }
 0x13a   : > { %2740 = vmatmul.mubr.bf16.gmra.mxu1 %v10528_v31  ;;  %2858 = vmatprep.subr.bf16.mxu0 %v8134_v24  ;;  %v10560_v24 = vld [vmem:[%s14903_s0 + $0x68] ss:$16 sps:$4 sm:$0xff]   ;;  %15081 = vst [vmem:[#allocation20_spill] sm:$0xff] %v10574_v33  ;;  %v10584_v5 = vld [vmem:[%s14903_s0 + $0x80] ss:$16 sps:$4 sm:$0xff]  }
 0x13b   : > { %2749 = vmatprep.mubr.bf16.mxu1 %v10542_v35  ;;  %3018 = vmatpush1.bf16.msra.mxu1 %v8269_v22  ;;  %v498_v22 = vld [vmem:[%s10033_s6 + $0x3f0] sm:$0xff]  ;;  %15079 = vst [vmem:[#allocation18_spill] sm:$0xff] %v10560_v24  ;;  %15082 = vst [vmem:[#allocation21_spill] sm:$0xff] %v10584_v5 }
 0x13c   : > { %3019 = vmatprep.subr.bf16.mxu1 %v8262_v27  ;;  %v10566_v27 = vld [vmem:[%s14903_s0 + $0x84] ss:$16 sps:$4 sm:$0xff]   ;;  %v8237_v35 = vcombine.low %v494_v14, %v498_v22 }
 0x13d   : > { %2859 = vmatpush1.bf16.msra.mxu0 %v8133_v37  ;;  %15080 = vst [vmem:[#allocation19_spill] sm:$0xff] %v10566_v27  ;;  %v8245_v37 = vcombine.low %v502_v9, %v506_v12  ;;  %v478_v12 = vld [vmem:[%s10033_s6 + $0x350] sm:$0xff] }
 0x13e   : > { %2860 = vmatprep.subr.bf16.mxu0 %v8126_v41  ;;  %v8366_v41 = vcombine.high %v622_v28, %v626_v30 }
 0x13f   : > { %3020 = vmatpush1.bf16.msra.mxu1 %v8261_v40  ;;  %v8238_v40 = vcombine.high %v494_v14, %v498_v22  ;;  %v606_v14 = vld [vmem:[%s10033_s6 + $0x750] sm:$0xff] }
 0x140   : > { %2589 = vmatmul.mubr.bf16.gmra.mxu0 %v10552_v11  ;;  %3021 = vmatprep.subr.bf16.mxu1 %v8254_v43  ;;  %v486_v43 = vld [vmem:[%s10033_s6 + $0x390] sm:$0xff] }
 0x141   : > { %2598 = vmatprep.mubr.bf16.mxu0 %v10566_v27  ;;  %2861 = vmatpush1.bf16.msra.mxu0 %v8125_v15  ;;  %v490_v27 = vld [vmem:[%s10033_s6 + $0x3b0] sm:$0xff]  ;;  %v8365_v15 = vcombine.low %v622_v28, %v626_v30  ;;  %v10606_v28 = vld [vmem:[%s14903_s0 + $0xac] ss:$16 sps:$4 sm:$0xff]  }
 0x142   : > { %2750 = vmatmul.mubr.bf16.gmra.mxu1 %v10560_v24  ;;  %2862 = vmatprep.subr.bf16.mxu0 %v8118_v10  ;;  %v614_v24 = vld [vmem:[%s10033_s6 + $0x790] sm:$0xff]  ;;  %v8230_v56 = vcombine.high %v486_v43, %v490_v27  ;;  %v10592_v10 = vld [vmem:[%s14903_s0 + $0x88] ss:$16 sps:$4 sm:$0xff]   ;;  %15085 = vst [vmem:[#allocation24_spill] sm:$0xff] %v10606_v28  ;;  %v8229_v30 = vcombine.low %v486_v43, %v490_v27 }
 0x143   : > { %2759 = vmatprep.mubr.bf16.mxu1 %v10574_v33  ;;  %3022 = vmatpush1.bf16.msra.mxu1 %v8253_v18  ;;  %v618_v11 = vld [vmem:[%s10033_s6 + $0x7b0] sm:$0xff]  ;;  %15083 = vst [vmem:[#allocation22_spill] sm:$0xff] %v10592_v10 }
 0x144   : > { %3023 = vmatprep.subr.bf16.mxu1 %v8246_v13  ;;  %v8358_v9 = vcombine.high %v614_v24, %v618_v11  ;;  %v482_v18 = vld [vmem:[%s10033_s6 + $0x370] sm:$0xff] }
 0x145   : > { %2863 = vmatpush1.bf16.msra.mxu0 %v8117_v34  ;;  %v10598_v13 = vld [vmem:[%s14903_s0 + $0xa4] ss:$16 sps:$4 sm:$0xff]   ;;  %v8357_v34 = vcombine.low %v614_v24, %v618_v11  ;;  %v8221_v33 = vcombine.low %v478_v12, %v482_v18  ;;  %v9580_v11 = vld [vmem:[%s14903_s0 + $0xa0] ss:$16 sps:$4 sm:$0xff]  }
 0x146   : > { %2864 = vmatprep.subr.bf16.mxu0 %v8238_v40  ;;  %15084 = vst [vmem:[#allocation23_spill] sm:$0xff] %v10598_v13  ;;  %v610_v22 = vld [vmem:[%s10033_s6 + $0x770] sm:$0xff] }
 0x147   : > { %3024 = vmatpush1.bf16.msra.mxu1 %v8245_v37  ;;  %v8222_v37 = vcombine.high %v478_v12, %v482_v18  ;;  %v8350_v40 = vcombine.high %v606_v14, %v610_v22  ;;  %v462_v43 = vld [vmem:[%s10033_s6 + $0x2d0] sm:$0xff] }
 0x148   : > { %2599 = vmatmul.mubr.bf16.gmra.mxu0 %v10584_v5  ;;  %3025 = vmatprep.subr.bf16.mxu1 %v8366_v41  ;;  %v470_v41 = vld [vmem:[%s10033_s6 + $0x310] sm:$0xff] }
 0x149   : > { %2608 = vmatprep.mubr.bf16.mxu0 %v10598_v13  ;;  %2865 = vmatpush2.bf16.msra.mxu0 %v8237_v35  ;;  %v474_v13 = vld [vmem:[%s10033_s6 + $0x330] sm:$0xff]  ;;  %v8349_v35 = vcombine.low %v606_v14, %v610_v22 }
 0x14a   : > { %2760 = vmatmul.mubr.bf16.gmra.mxu1 %v10592_v10  ;;  %2866 = vmatprep.subr.bf16.mxu0 %v8230_v56  ;;  %v598_v10 = vld [vmem:[%s10033_s6 + $0x710] sm:$0xff]  ;;  %v8214_v27 = vcombine.high %v470_v41, %v474_v13  ;;  %v8213_v12 = vcombine.low %v470_v41, %v474_v13 }
 0x14b   : > { %2769 = vmatprep.mubr.bf16.mxu1 %v10606_v28  ;;  %3026 = vmatpush2.bf16.msra.mxu1 %v8365_v15  ;;  %v602_v5 = vld [vmem:[%s10033_s6 + $0x730] sm:$0xff] }
 0x14c   : > { %3027 = vmatprep.subr.bf16.mxu1 %v8358_v9  ;;  %v8342_v24 = vcombine.high %v598_v10, %v602_v5  ;;  %v466_v15 = vld [vmem:[%s10033_s6 + $0x2f0] sm:$0xff]  ;;  %v8341_v18 = vcombine.low %v598_v10, %v602_v5 }
 0x14d   : > { %2867 = vmatpush2.bf16.msra.mxu0 %v8229_v30  ;;  %v590_v56 = vld [vmem:[%s10033_s6 + $0x6d0] sm:$0xff]  ;;  %v8206_v14 = vcombine.high %v462_v43, %v466_v15 }
 0x14e   : > { %2868 = vmatprep.subr.bf16.mxu0 %v8222_v37  ;;  %v594_v9 = vld [vmem:[%s10033_s6 + $0x6f0] sm:$0xff]  ;;  %v8205_v37 = vcombine.low %v462_v43, %v466_v15 }
 0x14f   : > { %3028 = vmatpush2.bf16.msra.mxu1 %v8357_v34  ;;  %v8334_v22 = vcombine.high %v590_v56, %v594_v9  ;;  %v454_v30 = vld [vmem:[%s10033_s6 + $0x290] sm:$0xff] }
 0x150   : > { %2609 = vmatmul.mubr.bf16.gmra.mxu0 %v9580_v11  ;;  %3029 = vmatprep.subr.bf16.mxu1 %v8350_v40  ;;  %v458_v34 = vld [vmem:[%s10033_s6 + $0x2b0] sm:$0xff] }
 0x151   : > { %2618 = vmatprep.mubr.bf16.mxu0 %v10239_v45  ;;  %2869 = vmatpush2.bf16.msra.mxu0 %v8221_v33  ;;  %v586_v45 = vld [vmem:[%s10033_s6 + $0x6b0] sm:$0xff]  ;;  %v8198_v33 = vcombine.high %v454_v30, %v458_v34 }
 0x152   : > { %2770 = vmatmul.mubr.bf16.gmra.mxu1 %v10234_v44  ;;  %2870 = vmatprep.subr.bf16.mxu0 %v8214_v27  ;;  %v582_v44 = vld [vmem:[%s10033_s6 + $0x690] sm:$0xff] }
 0x153   : > { %2779 = vmatprep.mubr.bf16.mxu1 %v10246_v50  ;;  %3030 = vmatpush2.bf16.msra.mxu1 %v8349_v35  ;;  %v8333_v50 = vcombine.low %v590_v56, %v594_v9  ;;  %v8326_v5 = vcombine.high %v582_v44, %v586_v45  ;;  %v446_v10 = vld [vmem:[%s10033_s6 + $0x250] sm:$0xff]  ;;  %v8197_v35 = vcombine.low %v454_v30, %v458_v34 }
 0x154   : > { %3031 = vmatprep.subr.bf16.mxu1 %v8342_v24  ;;  %v450_v13 = vld [vmem:[%s10033_s6 + $0x270] sm:$0xff] }
 0x155   : > { %2871 = vmatpush2.bf16.msra.mxu0 %v8213_v12  ;;  %v574_v40 = vld [vmem:[%s10033_s6 + $0x650] sm:$0xff]  ;;  %v8190_v27 = vcombine.high %v446_v10, %v450_v13  ;;  %v8189_v15 = vcombine.low %v446_v10, %v450_v13  ;;  %v10641_v12 = vld [vmem:[%s10033_s6 + $0x1d8] sm:$0xff] }
 0x156   : > { %2872 = vmatprep.subr.bf16.mxu0 %v8206_v14  ;;  %v578_v41 = vld [vmem:[%s10033_s6 + $0x670] sm:$0xff]  ;;  %v10649_v14 = vld [vmem:[%s10033_s6 + $0x5d8] sm:$0xff] }
 0x157   : > { %3032 = vmatpush2.bf16.msra.mxu1 %v8341_v18  ;;  %v8318_v11 = vcombine.high %v574_v40, %v578_v41  ;;  %v438_v24 = vld [vmem:[%s10033_s6 + $0x210] sm:$0xff]  ;;  %v10644_v18 = vld [vmem:[%s10033_s6 + $0x1f8] sm:$0xff] }
 0x158   : > { %2619 = vmatmul.mubr.bf16.gmra.mxu0 %v10258_v60  ;;  %3033 = vmatprep.subr.bf16.mxu1 %v8334_v22  ;;  %v8325_v60 = vcombine.low %v582_v44, %v586_v45  ;;  %v442_v43 = vld [vmem:[%s10033_s6 + $0x230] sm:$0xff]  ;;  %v10652_v22 = vld [vmem:[%s10033_s6 + $0x5f8] sm:$0xff]  ;;  %v8176_v34 = vcombine.high %v10641_v12, %v10644_v18 }
 0x159   : > { %2628 = vmatprep.mubr.bf16.mxu0 %v10270_v1  ;;  %2873 = vmatpush2.bf16.msra.mxu0 %v8205_v37  ;;  %v570_v1 = vld [vmem:[%s10033_s6 + $0x630] sm:$0xff]  ;;  %v8182_v56 = vcombine.high %v438_v24, %v442_v43  ;;  %v8181_v30 = vcombine.low %v438_v24, %v442_v43  ;;  %v10704_v45 = vld [vmem:[%s10033_s6 + $0x178] sm:$0xff] }
 0x15a   : > { %2780 = vmatmul.mubr.bf16.gmra.mxu1 %v10265_v0  ;;  %2874 = vmatprep.subr.bf16.mxu0 %v8198_v33  ;;  %v566_v0 = vld [vmem:[%s10033_s6 + $0x610] sm:$0xff]  ;;  %v10710_v37 = vld [vmem:[%s10033_s6 + $0x578] sm:$0xff] }
 0x15b   : > { %2789 = vmatprep.mubr.bf16.mxu1 %v10277_v6  ;;  %3034 = vmatpush2.bf16.msra.mxu1 %v8333_v50  ;;  %v8317_v6 = vcombine.low %v574_v40, %v578_v41  ;;  %v8310_v9 = vcombine.high %v566_v0, %v570_v1  ;;  %v10720_v10 = vld [vmem:[%s10033_s6 + $0x118] sm:$0xff] }
 0x15c   : > { %3035 = vmatprep.subr.bf16.mxu1 %v8326_v5  ;;  %v10736_v24 = vld [vmem:[%s10033_s6 + $0x538] sm:$0xff] }
 0x15d   : > { %2875 = vmatpush2.bf16.msra.mxu0 %v8197_v35  ;;  %v10825_v35 = vld [vmem:[%s10033_s6 + $0x18] sm:$0xff] }
 0x15e   : > { %2876 = vmatprep.subr.bf16.mxu0 %v8190_v27  ;;  %v10730_v27 = vld [vmem:[%s10033_s6 + $0x138] sm:$0xff] }
 0x15f   : > { %3036 = vmatpush2.bf16.msra.mxu1 %v8325_v60  ;;  %v10839_v33 = vld [vmem:[%s10033_s6 + $0x438] sm:$0xff] }
 0x160   : > { %2629 = vmatmul.mubr.bf16.gmra.mxu0 %v10290_v16  ;;  %3037 = vmatprep.subr.bf16.mxu1 %v8318_v11  ;;  %v8309_v16 = vcombine.low %v566_v0, %v570_v1  ;;  %v10733_v11 = vld [vmem:[%s10033_s6 + $0x518] sm:$0xff]  ;;  %15092 = vst [vmem:[#allocation31_spill] sm:$0xff] %v10839_v33 }
 0x161   : > { %2638 = vmatprep.mubr.bf16.mxu0 %v10302_v21  ;;  %2877 = vmatpush2.bf16.msra.mxu0 %v8189_v15  ;;  %v630_v21 = vlaneseq  ;;  %v10784_v1 = vld [vmem:[%s10033_s6 + $0x498] sm:$0xff] }
 0x162   : > { %2790 = vmatmul.mubr.bf16.gmra.mxu1 %v10297_v20  ;;  %2878 = vmatprep.subr.bf16.mxu0 %v8182_v56  ;;  %v8304_v20 = vcombine.high %v10649_v14, %v10652_v22  ;;  %v10747_v56 = vld [vmem:[%s10033_s6 + $0xd8] sm:$0xff] }
 0x163   : > { %2799 = vmatprep.mubr.bf16.mxu1 %v10309_v26  ;;  %3038 = vmatpush2.bf16.msra.mxu1 %v8317_v6  ;;  %v10667_v26 = vshrl.u32 %v630_v21, 7  ;;  %v10801_v15 = vld [vmem:[%s10033_s6 + $0x78] sm:$0xff] }
 0x164   : > { %3039 = vmatprep.subr.bf16.mxu1 %v8310_v9  ;;  %v10750_v9 = vld [vmem:[%s10033_s6 + $0xf8] sm:$0xff]  ;;  %15087 = vst [vmem:[#allocation26_spill] sm:$0xff] %v10801_v15 }
 0x165   : > { %2879 = vmatpush2.bf16.msra.mxu0 %v8181_v30  ;;  %15086 = vst [vmem:[#allocation25_spill] sm:$0xff] %v10667_v26  ;;  %v10898_v15 = vld [vmem:[%s10033_s6 + $0x358] sm:$0xff] }
 0x166   : > { %3170 = vmatprep.subr.bf16.mxu0 %v8176_v34  ;;  %15100 = vst [vmem:[#allocation39_spill] sm:$0xff] %v10898_v15 }
 0x167   : > { %3040 = vmatpush2.bf16.msra.mxu1 %v8309_v16 }
 0x168   : > { %2639 = vmatmul.mubr.bf16.gmra.mxu0 %v10330_v36  ;;  %3331 = vmatprep.subr.bf16.mxu1 %v8304_v20  ;;  %v14922_v36 = vsub.s32 0, %v10667_v26 }
 0x169   : > { %2648 = vmatprep.mubr.bf16.mxu0 %v10340_v39  ;;  %v14921_v39 = vsub.s32 1, %v10667_v26 }
 0x16a   : > { %2800 = vmatmul.mubr.bf16.gmra.mxu1 %v10335_v38  ;;  %v628_v38 = vld [vmem:[%s10040_s15] sm:$0xff] }
 0x16b   : > { %2809 = vmatprep.mubr.bf16.mxu1 %v10347_v42  ;;  %v10678_v42 = vrot.slane %v628_v38, %v14922_v36 }
 0x170   : > { %2649 = vmatmul.mubr.bf16.gmra.mxu0 %v10358_v46  ;;  %v10682_v46 = vrot.slane %v628_v38, %v14921_v39  ;;  %v10759_v38 = vld [vmem:[%s10033_s6 + $0x4d8] sm:$0xff] }
 0x171   : > { %2658 = vmatprep.mubr.bf16.mxu0 %v10368_v48  ;;  %v10688_v48 = vld [vmem:[%s10033_s6 + $0x1b8] sm:$0xff] }
 0x172   : > { %2810 = vmatmul.mubr.bf16.gmra.mxu1 %v10363_v47  ;;  %v10685_v47 = vld [vmem:[%s10033_s6 + $0x198] sm:$0xff] }
 0x173   : > { %2819 = vmatprep.mubr.bf16.mxu1 %v10373_v49  ;;  %v10776_v39 = vld [vmem:[%s10033_s6 + $0xb8] sm:$0xff] }
 0x178   : > { %2659 = vmatmul.mubr.bf16.gmra.mxu0 %v10382_v51  ;;  %v10692_v51 = vld [vmem:[%s10033_s6 + $0x598] sm:$0xff] }
 0x179   : > { %2668 = vmatprep.mubr.bf16.mxu0 %v10392_v53  ;;  %v10698_v53 = vld [vmem:[%s10033_s6 + $0x158] sm:$0xff] }
 0x17a   : > { %2820 = vmatmul.mubr.bf16.gmra.mxu1 %v10387_v52  ;;  %v10695_v52 = vld [vmem:[%s10033_s6 + $0x5b8] sm:$0xff] }
 0x17b   : > { %2829 = vmatprep.mubr.bf16.mxu1 %v10397_v54 }
 0x180   : > { %v2238_v49 = vpop.f32.mrf.mxu0  ;;  %2669 = vmatmul.mubr.bf16.gmra.mxu0 %v10412_v57  ;;  %v10707_v57 = vld [vmem:[%s10033_s6 + $0x558] sm:$0xff] }
 0x181   : > { %v2239_v54 = vadd.f32 %v2238_v49, %v10678_v42  ;;  %2678 = vmatprep.mubr.bf16.mxu0 %v10419_v59  ;;  %v10762_v49 = vld [vmem:[%s10033_s6 + $0x4f8] sm:$0xff] }
 0x182   : > { %v2399_v44 = vpop.f32.mrf.mxu1  ;;  %2830 = vmatmul.mubr.bf16.gmra.mxu1 %v10417_v58  ;;  %v2240_v50 = vpop.f32.mrf.mxu0  ;;  %v10828_v58 = vld [vmem:[%s10033_s6 + $0x38] sm:$0xff] }
 0x183   : > { %2839 = vmatprep.mubr.bf16.mxu1 %v10421_v61  ;;  %v10722_v13 = vadd.f32 %v2399_v44, %v2239_v54  ;;  %v2241_v40 = vadd.f32 %v2240_v50, %v10682_v46  ;;  %v10798_v50 = vld [vmem:[%s10033_s6 + $0x58] sm:$0xff]  ;;  %15090 = vst [vmem:[#allocation29_spill] sm:$0xff] %v10828_v58 }
 0x184   : > { %v2401_v41 = vpop.f32.mrf.mxu1  ;;  %v2242_v43 = vpop.f32.mrf.mxu0  ;;  %v10888_v58 = vld [vmem:[%s10033_s6 + $0x7b8] sm:$0xff] }
 0x185   : > { %v3692_v30 = vmul.f32 0.70710677, %v10722_v13  ;;  %v10753_v16 = vadd.f32 %v2401_v41, %v2241_v40  ;;  %v2243_v34 = vadd.f32 %v2242_v43, %v10678_v42  ;;  %v10773_v43 = vld [vmem:[%s10033_s6 + $0x98] sm:$0xff]  ;;  %15099 = vst [vmem:[#allocation38_spill] sm:$0xff] %v10888_v58 }
 0x186   : > { %v2403_v20 = vpop.f32.mrf.mxu1  ;;  %v2244_v54 = vpop.f32.mrf.mxu0  ;;  %v10787_v40 = vld [vmem:[%s10033_s6 + $0x4b8] sm:$0xff] }
 0x187   : > { %9158 = verf.f32 %v3692_v30  ;;  %v3693_v36 = vmul.f32 0.70710677, %v10753_v16  ;;  %v10779_v6 = vadd.f32 %v2403_v20, %v2243_v34  ;;  %v2245_v41 = vadd.f32 %v2244_v54, %v10682_v46  ;;  %v10810_v20 = vld [vmem:[%s10033_s6 + $0x458] sm:$0xff] }
 0x188   : > { %v2405_v44 = vpop.f32.mrf.mxu1  ;;  %v2248_v21 = vpop.f32.mrf.mxu0  ;;  %2679 = vmatmul.mubr.bf16.gmra.mxu0 %v10427_v62  ;;  %15088 = vst [vmem:[#allocation27_spill] sm:$0xff] %v10810_v20  ;;  %v10813_v30 = vld [vmem:[%s10033_s6 + $0x478] sm:$0xff] }
 0x189   : > { %9160 = verf.f32 %v3693_v36  ;;  %v3700_v54 = vmul.f32 0.70710677, %v10779_v6  ;;  %v2249_v60 = vadd.f32 %v2248_v21, %v10678_v42  ;;  %2880 = vmatprep.mubr.bf16.mxu0 %v10436_v2  ;;  %15089 = vst [vmem:[#allocation28_spill] sm:$0xff] %v10813_v30  ;;  %v10815_v36 = vadd.f32 %v2405_v44, %v2245_v41  ;;  %v10836_v2 = vld [vmem:[%s10033_s6 + $0x418] sm:$0xff] }
 0x18a   : > { %v2409_v5 = vpop.f32.mrf.mxu1  ;;  %2840 = vmatmul.mubr.bf16.gmra.mxu1 %v10429_v63  ;;  %v2250_v0 = vpop.f32.mrf.mxu0  ;;  %15091 = vst [vmem:[#allocation30_spill] sm:$0xff] %v10836_v2  ;;  %v10852_v21 = vld [vmem:[%s10033_s6 + $0x3f8] sm:$0xff] }
 0x18b   : > { %3041 = vmatprep.mubr.bf16.mxu1 %v10442_v3  ;;  %9162 = verf.f32 %v3700_v54  ;;  %v10830_v44 = vadd.f32 %v2409_v5, %v2249_v60  ;;  %v2251_v3 = vadd.f32 %v2250_v0, %v10682_v46  ;;  %v3701_v34 = vmul.f32 0.70710677, %v10815_v36  ;;  %v10849_v0 = vld [vmem:[%s10033_s6 + $0x3d8] sm:$0xff]  ;;  %15094 = vst [vmem:[#allocation33_spill] sm:$0xff] %v10852_v21 }
 0x18c   : > { %v2411_v41 = vpop.f32.mrf.mxu1  ;;  %v2252_v63 = vpop.f32.mrf.mxu0  ;;  %15093 = vst [vmem:[#allocation32_spill] sm:$0xff] %v10849_v0  ;;  %v10861_v54 = vld [vmem:[%s10033_s6 + $0x7d8] sm:$0xff] }
 0x18d   : > { %v3708_v62 = vmul.f32 0.70710677, %v10830_v44  ;;  %v10855_v61 = vadd.f32 %v2411_v41, %v2251_v3  ;;  %v2253_v59 = vadd.f32 %v2252_v63, %v10678_v42  ;;  %15095 = vst [vmem:[#allocation34_spill] sm:$0xff] %v10861_v54  ;;  %v10864_v60 = vld [vmem:[%s10033_s6 + $0x7f8] sm:$0xff]  ;;  %9164 = verf.f32 %v3701_v34 }
 0x18e   : > { %v2413_v26 = vpop.f32.mrf.mxu1  ;;  %15096 = vst [vmem:[#allocation35_spill] sm:$0xff] %v10864_v60  ;;  %v2254_v28 = vpop.f32.mrf.mxu0  ;;  %v10873_v41 = vld [vmem:[%s10033_s6 + $0x398] sm:$0xff] }
 0x18f   : > { %v10876_v5 = vld [vmem:[%s10033_s6 + $0x3b8] sm:$0xff]  ;;  %9166 = verf.f32 %v3708_v62  ;;  %v10878_v20 = vadd.f32 %v2413_v26, %v2253_v59  ;;  %v3709_v63 = vmul.f32 0.70710677, %v10855_v61  ;;  %v2255_v33 = vadd.f32 %v2254_v28, %v10682_v46 }
 0x190   : > { %15097 = vst [vmem:[#allocation36_spill] sm:$0xff] %v10876_v5  ;;  %v2415_v34 = vpop.f32.mrf.mxu1  ;;  %v10885_v3 = vld [vmem:[%s10033_s6 + $0x798] sm:$0xff]  ;;  %v2258_v62 = vpop.f32.mrf.mxu0  ;;  %2881 = vmatmul.mubr.bf16.vlgmr.msra.gmra.mxu0 %v10460_v17  ;;  %v15102_v17 = vcombine.low %v10641_v12, %v10644_v18 }
 0x191   : > { %15098 = vst [vmem:[#allocation37_spill] sm:$0xff] %v10885_v3  ;;  %v10901_v30 = vld [vmem:[%s10033_s6 + $0x378] sm:$0xff]  ;;  %v3716_v21 = vmul.f32 0.70710677, %v10878_v20  ;;  %v2259_v0 = vadd.f32 %v2258_v62, %v10678_v42  ;;  %v10919_v2 = vadd.f32 %v2415_v34, %v2255_v33  ;;  %2890 = vmatprep.mubr.bf16.mxu0 %v10472_v23  ;;  %v15104_v23 = vcombine.high %v10685_v47, %v10688_v48 }
 0x192   : > { %15101 = vst [vmem:[#allocation40_spill] sm:$0xff] %v10901_v30  ;;  %v2419_v28 = vpop.f32.mrf.mxu1  ;;  %3042 = vmatmul.mubr.bf16.vlgmr.msra.gmra.mxu1 %v10466_v19  ;;  %3171 = vmatpush1.bf16.msra.mxu0 %v15102_v17  ;;  %v10914_v60 = vld [vmem:[%s10033_s6 + $0x758] sm:$0xff]  ;;  %v2260_v62 = vpop.f32.mrf.mxu0  ;;  %v15103_v19 = vcombine.low %v10649_v14, %v10652_v22 }
 0x193   : > { %v10917_v54 = vld [vmem:[%s10033_s6 + $0x778] sm:$0xff]  ;;  %9168 = verf.f32 %v3716_v21  ;;  %v10935_v33 = vadd.f32 %v2419_v28, %v2259_v0  ;;  %v2261_v14 = vadd.f32 %v2260_v62, %v10682_v46  ;;  %3051 = vmatprep.mubr.bf16.mxu1 %v10480_v29  ;;  %3172 = vmatprep.subr.bf16.mxu0 %v15104_v23  ;;  %v3717_v21 = vmul.f32 0.70710677, %v10919_v2 }
 0x194   : > { %3332 = vmatpush1.bf16.msra.mxu1 %v15103_v19  ;;  %v10930_v17 = vld [vmem:[%s10033_s6 + $0x318] sm:$0xff]  ;;  %v2421_v22 = vpop.f32.mrf.mxu1  ;;  %v9159_v12 = vpop.eup %9158  ;;  %9170 = verf.f32 %v3709_v63  ;;  %v15105_v28 = vcombine.high %v10692_v51, %v10695_v52 }
 0x195   : > { %v10933_v59 = vld [vmem:[%s10033_s6 + $0x338] sm:$0xff]  ;;  %v2262_v0 = vpop.f32.mrf.mxu0  ;;  %v3724_v63 = vmul.f32 0.70710677, %v10935_v33  ;;  %v10965_v26 = vadd.f32 %v2421_v22, %v2261_v14  ;;  %v4092_v15 = vadd.f32 1.0, %v9159_v12  ;;  %9172 = verf.f32 %v3717_v21 }
 0x196   : > { %v10945_v19 = vld [vmem:[%s10033_s6 + $0x718] sm:$0xff]  ;;  %3333 = vmatprep.subr.bf16.mxu1 %v15105_v28  ;;  %v2423_v58 = vpop.f32.mrf.mxu1  ;;  %v15106_v28 = vcombine.low %v10685_v47, %v10688_v48  ;;  %v9161_v30 = vpop.eup %9160  ;;  %v2263_v3 = vadd.f32 %v2262_v0, %v10678_v42  ;;  %v15107_v14 = vcombine.low %v10692_v51, %v10695_v52  ;;  %v15108_v47 = vcombine.high %v10698_v53, %v10704_v45 }
 0x197   : > { %v10956_v23 = vld [vmem:[%s10033_s6 + $0x738] sm:$0xff]  ;;  %v2264_v5 = vpop.f32.mrf.mxu0  ;;  %9174 = verf.f32 %v3724_v63  ;;  %v15109_v12 = vcombine.high %v10707_v57, %v10710_v37  ;;  %v3500_v21 = vmul.f32 0.5, %v10779_v6 }
 0x198   : > { %v10959_v34 = vld [vmem:[%s10033_s6 + $0x2d8] sm:$0xff]  ;;  %3173 = vmatpush1.bf16.msra.mxu0 %v15106_v28  ;;  %3334 = vmatpush1.bf16.msra.mxu1 %v15107_v14  ;;  %v2425_v22 = vpop.f32.mrf.mxu1  ;;  %v9163_v0 = vpop.eup %9162  ;;  %v3492_v28 = vmul.f32 0.5, %v10722_v13  ;;  %v3725_v14 = vmul.f32 0.70710677, %v10965_v26  ;;  %v10994_v63 = vadd.f32 %v2423_v58, %v2263_v3  ;;  %v15110_v13 = vcombine.low %v10698_v53, %v10704_v45 }
 0x199   : > { %v10962_v18 = vld [vmem:[%s10033_s6 + $0x2f8] sm:$0xff]  ;;  %3174 = vmatprep.subr.bf16.mxu0 %v15108_v47  ;;  %3335 = vmatprep.subr.bf16.mxu1 %v15109_v12  ;;  %v2265_v47 = vadd.f32 %v2264_v5, %v10682_v46  ;;  %v2268_v48 = vpop.f32.mrf.mxu0  ;;  %v4093_v12 = vadd.f32 1.0, %v9161_v30  ;;  %v4100_v62 = vadd.f32 1.0, %v9163_v0 }
 0x19a   : > { %v8208_v52 = vcombine.high %v10959_v34, %v10962_v18  ;;  %2891 = vmatmul.mubr.bf16.gmra.mxu0 %v10492_v55  ;;  %v2269_v51 = vadd.f32 %v2268_v48, %v10678_v42  ;;  %v2429_v29 = vpop.f32.mrf.mxu1  ;;  %3052 = vmatmul.mubr.bf16.gmra.mxu1 %v10498_v4  ;;  %v4292_v58 = vmul.f32 %v4092_v15, %v3492_v28  ;;  %9176 = verf.f32 %v3725_v14  ;;  %v9165_v6 = vpop.eup %9164 }
 0x19b   : > { %v3732_v5 = vmul.f32 0.70710677, %v10994_v63  ;;  %v11005_v3 = vadd.f32 %v2425_v22, %v2265_v47  ;;  %v2270_v55 = vpop.f32.mrf.mxu0  ;;  %2900 = vmatprep.mubr.bf16.mxu0 %v10504_v7  ;;  %3061 = vmatprep.mubr.bf16.mxu1 %v10510_v8  ;;  %v3493_v4 = vmul.f32 0.5, %v10753_v16  ;;  %v4300_v30 = vmul.f32 %v4100_v62, %v3500_v21  ;;  %v11025_v21 = vld [vmem:[%s10033_s6 + $0x6d8] sm:$0xff] }
 0x19c   : > { %3175 = vmatpush1.bf16.msra.mxu0 %v15110_v13  ;;  %v11010_v48 = vadd.f32 %v2429_v29, %v2269_v51  ;;  %v2271_v53 = vadd.f32 %v2270_v55, %v10682_v46  ;;  %v2431_v45 = vpop.f32.mrf.mxu1  ;;  %v15111_v15 = vcombine.low %v10707_v57, %v10710_v37  ;;  %v15112_v7 = vcombine.high %v10720_v10, %v10730_v27  ;;  %v9167_v8 = vpop.eup %9166  ;;  %v11028_v57 = vld [vmem:[%s10033_s6 + $0x6f8] sm:$0xff] }
 0x19d   : > { %v3501_v22 = vmul.f32 0.5, %v10815_v36  ;;  %v4101_v0 = vadd.f32 1.0, %v9165_v6  ;;  %9178 = verf.f32 %v3732_v5  ;;  %v3733_v16 = vmul.f32 0.70710677, %v11005_v3  ;;  %v2272_v29 = vpop.f32.mrf.mxu0 }
 0x19e   : > { %3336 = vmatpush1.bf16.msra.mxu1 %v15111_v15  ;;  %3176 = vmatprep.subr.bf16.mxu0 %v15112_v7  ;;  %v15113_v62 = vcombine.high %v10733_v11, %v10736_v24  ;;  %v4293_v37 = vmul.f32 %v4093_v12, %v3493_v4  ;;  %v11030_v51 = vpack.c.bf16 %v4300_v30, %v4292_v58  ;;  %v3740_v28 = vmul.f32 0.70710677, %v11010_v48  ;;  %v2433_v14 = vpop.f32.mrf.mxu1 }
 0x19f   : > { %v15115_v36 = vcombine.low %v10720_v10, %v10730_v27  ;;  %v4301_v13 = vmul.f32 %v4101_v0, %v3501_v22  ;;  %9180 = verf.f32 %v3733_v16  ;;  %v11038_v5 = vadd.f32 %v2431_v45, %v2271_v53  ;;  %v2274_v6 = vpop.f32.mrf.mxu0 }
 0x1a0   : > { %3337 = vmatprep.subr.bf16.mxu1 %v15113_v62  ;;  %15114 = vst [vmem:[#allocation41_spill] sm:$0xff] %v11030_v51  ;;  %v2273_v55 = vadd.f32 %v2272_v29, %v10678_v42  ;;  %v15116_v12 = vcombine.high %v10747_v56, %v10750_v9  ;;  %v3508_v58 = vmul.f32 0.5, %v10830_v44  ;;  %v4108_v4 = vadd.f32 1.0, %v9167_v8  ;;  %v2435_v27 = vpop.f32.mrf.mxu1  ;;  %v9169_v45 = vpop.eup %9168 }
 0x1a1   : > { %3177 = vmatpush1.bf16.msra.mxu0 %v15115_v36  ;;  %v2275_v10 = vadd.f32 %v2274_v6, %v10682_v46  ;;  %v15117_v30 = vcombine.low %v10733_v11, %v10736_v24  ;;  %9182 = verf.f32 %v3740_v28  ;;  %v3741_v15 = vmul.f32 0.70710677, %v11038_v5  ;;  %v2278_v22 = vpop.f32.mrf.mxu0  ;;  %v9171_v11 = vpop.eup %9170 }
 0x1a2   : > { %3178 = vmatprep.subr.bf16.mxu0 %v15116_v12  ;;  %v11052_v7 = vadd.f32 %v2433_v14, %v2273_v55  ;;  %2901 = vmatmul.mubr.bf16.gmra.mxu0 %v10520_v25  ;;  %v15118_v44 = vcombine.high %v10759_v38, %v10762_v49  ;;  %v11058_v8 = vpack.c.bf16 %v4301_v13, %v4293_v37  ;;  %v3516_v24 = vmul.f32 0.5, %v10878_v20  ;;  %v2439_v62 = vpop.f32.mrf.mxu1  ;;  %v15119_v14 = vld [vmem:[#allocation16_spill] sm:$0xff] }
 0x1a3   : > { %3338 = vmatpush1.bf16.msra.mxu1 %v15117_v30  ;;  %v4116_v0 = vadd.f32 1.0, %v9169_v45  ;;  %v11061_v16 = vadd.f32 %v2435_v27, %v2275_v10  ;;  %v2279_v29 = vadd.f32 %v2278_v22, %v10678_v42  ;;  %2910 = vmatprep.mubr.bf16.mxu0 %v10534_v32  ;;  %v3517_v25 = vmul.f32 0.5, %v10919_v2  ;;  %v2280_v28 = vpop.f32.mrf.mxu0  ;;  %v11075_v13 = vld [vmem:[%s10033_s6 + $0x298] sm:$0xff]  ;;  %v9173_v32 = vpop.eup %9172 }
 0x1a4   : > { %3339 = vmatprep.subr.bf16.mxu1 %v15118_v44  ;;  %3062 = vmatmul.mubr.bf16.gmra.mxu1 %v10528_v31  ;;  %9184 = verf.f32 %v3741_v15  ;;  %v3748_v37 = vmul.f32 0.70710677, %v11052_v7  ;;  %v15120_v20 = vcombine.low %v10747_v56, %v10750_v9  ;;  %v8336_v36 = vcombine.high %v11025_v21, %v11028_v57  ;;  %v11078_v31 = vld [vmem:[%s10033_s6 + $0x2b8] sm:$0xff]  ;;  %v2441_v10 = vpop.f32.mrf.mxu1  ;;  %v9175_v9 = vpop.eup %9174 }
 0x1a5   : > { %3071 = vmatprep.mubr.bf16.mxu1 %v15119_v14  ;;  %v4308_v55 = vmul.f32 %v4108_v4, %v3508_v58  ;;  %v4316_v2 = vmul.f32 %v4116_v0, %v3516_v24  ;;  %v3749_v6 = vmul.f32 0.70710677, %v11061_v16  ;;  %v11081_v12 = vadd.f32 %v2439_v62, %v2279_v29  ;;  %v2282_v4 = vpop.f32.mrf.mxu0 }
 0x1a6   : > { %3179 = vmatpush1.bf16.msra.mxu0 %v15120_v20  ;;  %v15121_v27 = vcombine.low %v10759_v38, %v10762_v49  ;;  %v15122_v56 = vcombine.high %v10773_v43, %v10776_v39  ;;  %v4109_v30 = vadd.f32 1.0, %v9171_v11  ;;  %v4117_v45 = vadd.f32 1.0, %v9173_v32  ;;  %v2443_v38 = vpop.f32.mrf.mxu1 }
 0x1a7   : > { %9186 = verf.f32 %v3748_v37  ;;  %v2281_v58 = vadd.f32 %v2280_v28, %v10682_v46  ;;  %v15123_v15 = vcombine.high %v10784_v1, %v10787_v40  ;;  %v3509_v22 = vmul.f32 0.5, %v10855_v61  ;;  %v2284_v62 = vpop.f32.mrf.mxu0  ;;  %v9177_v61 = vpop.eup %9176 }
 0x1a8   : > { %3340 = vmatpush1.bf16.msra.mxu1 %v15121_v27  ;;  %3180 = vmatprep.subr.bf16.mxu0 %v15122_v56  ;;  %v11094_v44 = vpack.c.bf16 %v4316_v2, %v4308_v55  ;;  %9188 = verf.f32 %v3749_v6  ;;  %v4317_v24 = vmul.f32 %v4117_v45, %v3517_v25  ;;  %v3756_v11 = vmul.f32 0.70710677, %v11081_v12  ;;  %v2445_v32 = vpop.f32.mrf.mxu1  ;;  %v15127_v55 = vld [vmem:[#allocation26_spill] sm:$0xff]  ;;  %v15129_v56 = vld [vmem:[#allocation17_spill] sm:$0xff] }
 0x1a9   : > { %3341 = vmatprep.subr.bf16.mxu1 %v15123_v15  ;;  %v11099_v0 = vadd.f32 %v2441_v10, %v2281_v58  ;;  %v2283_v29 = vadd.f32 %v2282_v4, %v10678_v42  ;;  %v15125_v37 = vcombine.low %v10773_v43, %v10776_v39  ;;  %v3524_v28 = vmul.f32 0.5, %v10935_v33  ;;  %v2288_v27 = vpop.f32.mrf.mxu0  ;;  %v15133_v4 = vld [vmem:[#allocation18_spill] sm:$0xff]  ;;  %v15134_v15 = vld [vmem:[#allocation19_spill] sm:$0xff] }
 0x1aa   : > { %15124 = vst [vmem:[#allocation16_spill] sm:$0xff] %v11094_v44  ;;  %v4124_v14 = vadd.f32 1.0, %v9175_v9  ;;  %v2285_v20 = vadd.f32 %v2284_v62, %v10682_v46  ;;  %v15126_v25 = vcombine.low %v10784_v1, %v10787_v40  ;;  %v15128_v2 = vcombine.high %v10798_v50, %v15127_v55  ;;  %2911 = vmatmul.mubr.bf16.gmra.mxu0 %v15129_v56  ;;  %v15130_v9 = vld [vmem:[#allocation27_spill] sm:$0xff]  ;;  %v15131_v1 = vld [vmem:[#allocation28_spill] sm:$0xff]  ;;  %v9179_v45 = vpop.eup %9178 }
 0x1ab   : > { %3181 = vmatpush1.bf16.msra.mxu0 %v15125_v37  ;;  %v4309_v39 = vmul.f32 %v4109_v30, %v3509_v22  ;;  %v3525_v43 = vmul.f32 0.5, %v10965_v26  ;;  %v3532_v33 = vmul.f32 0.5, %v10994_v63  ;;  %v3757_v10 = vmul.f32 0.70710677, %v11099_v0  ;;  %v2449_v63 = vpop.f32.mrf.mxu1  ;;  %2920 = vmatprep.mubr.bf16.mxu0 %v15134_v15 }
 0x1ac   : > { %3342 = vmatpush1.bf16.msra.mxu1 %v15126_v25  ;;  %3182 = vmatprep.subr.bf16.mxu0 %v15128_v2  ;;  %v15132_v40 = vcombine.high %v15130_v9, %v15131_v1  ;;  %9190 = verf.f32 %v3756_v11  ;;  %v11122_v58 = vadd.f32 %v2443_v38, %v2283_v29  ;;  %v11124_v30 = vadd.f32 %v2445_v32, %v2285_v20  ;;  %v2290_v25 = vpop.f32.mrf.mxu0  ;;  %v15135_v2 = vld [vmem:[#allocation20_spill] sm:$0xff]  ;;  %v9181_v32 = vpop.eup %9180 }
 0x1ad   : > { %v2289_v26 = vadd.f32 %v2288_v27, %v10678_v42  ;;  %3072 = vmatmul.mubr.bf16.gmra.mxu1 %v15133_v4  ;;  %v4125_v22 = vadd.f32 1.0, %v9177_v61  ;;  %v4132_v62 = vadd.f32 1.0, %v9179_v45  ;;  %v3533_v37 = vmul.f32 0.5, %v11005_v3  ;;  %v11135_v11 = vld [vmem:[%s10033_s6 + $0x698] sm:$0xff]  ;;  %v2451_v56 = vpop.f32.mrf.mxu1 }
 0x1ae   : > { %3343 = vmatprep.subr.bf16.mxu1 %v15132_v40  ;;  %3081 = vmatprep.mubr.bf16.mxu1 %v15135_v2  ;;  %v15136_v38 = vcombine.low %v10798_v50, %v15127_v55  ;;  %v11138_v29 = vld [vmem:[%s10033_s6 + $0x6b8] sm:$0xff]  ;;  %v11140_v20 = vpack.c.bf16 %v4317_v24, %v4309_v39  ;;  %v4324_v27 = vmul.f32 %v4124_v14, %v3524_v28  ;;  %9192 = verf.f32 %v3757_v10  ;;  %v2292_v14 = vpop.f32.mrf.mxu0  ;;  %v15141_v39 = vld [vmem:[#allocation30_spill] sm:$0xff]  ;;  %v15142_v10 = vld [vmem:[#allocation31_spill] sm:$0xff]  ;;  %v9183_v2 = vpop.eup %9182 }
 0x1af   : > { %v3764_v61 = vmul.f32 0.70710677, %v11122_v58  ;;  %v3765_v3 = vmul.f32 0.70710677, %v11124_v30  ;;  %v15138_v40 = vcombine.low %v15130_v9, %v15131_v1  ;;  %v15139_v50 = vld [vmem:[#allocation29_spill] sm:$0xff]  ;;  %v4332_v45 = vmul.f32 %v4132_v62, %v3532_v33  ;;  %v2453_v1 = vpop.f32.mrf.mxu1 }
 0x1b0   : > { %3183 = vmatpush1.bf16.msra.mxu0 %v15136_v38  ;;  %15137 = vst [vmem:[#allocation26_spill] sm:$0xff] %v11140_v20  ;;  %v15140_v55 = vcombine.high %v10825_v35, %v15139_v50  ;;  %v4133_v4 = vadd.f32 1.0, %v9181_v32  ;;  %v11150_v24 = vadd.f32 %v2449_v63, %v2289_v26  ;;  %v2291_v28 = vadd.f32 %v2290_v25, %v10682_v46  ;;  %v2294_v25 = vpop.f32.mrf.mxu0 }
 0x1b1   : > { %3344 = vmatpush1.bf16.msra.mxu1 %v15138_v40  ;;  %v15143_v15 = vcombine.high %v15141_v39, %v15142_v10  ;;  %9194 = verf.f32 %v3764_v61  ;;  %v2293_v9 = vadd.f32 %v2292_v14, %v10678_v42  ;;  %v4325_v26 = vmul.f32 %v4125_v22, %v3525_v43  ;;  %v9185_v61 = vpop.eup %9184  ;;  %v2455_v38 = vpop.f32.mrf.mxu1  ;;  %v15147_v22 = vld [vmem:[#allocation32_spill] sm:$0xff] }
 0x1b2   : > { %3184 = vmatprep.subr.bf16.mxu0 %v15140_v55  ;;  %v11161_v63 = vpack.c.bf16 %v4332_v45, %v4324_v27  ;;  %v4333_v62 = vmul.f32 %v4133_v4, %v3533_v37  ;;  %9196 = verf.f32 %v3765_v3  ;;  %v15145_v32 = vcombine.low %v10825_v35, %v15139_v50  ;;  %v15148_v37 = vld [vmem:[#allocation33_spill] sm:$0xff]  ;;  %v2298_v50 = vpop.f32.mrf.mxu0  ;;  %v15152_v4 = vld [vmem:[#allocation35_spill] sm:$0xff] }
 0x1b3   : > { %3345 = vmatprep.subr.bf16.mxu1 %v15143_v15  ;;  %v3540_v40 = vmul.f32 0.5, %v11010_v48  ;;  %v3772_v55 = vmul.f32 0.70710677, %v11150_v24  ;;  %v11168_v14 = vadd.f32 %v2451_v56, %v2291_v28  ;;  %v11170_v15 = vadd.f32 %v2453_v1, %v2293_v9  ;;  %v15150_v45 = vld [vmem:[#allocation21_spill] sm:$0xff]  ;;  %v15151_v56 = vld [vmem:[#allocation34_spill] sm:$0xff] }
 0x1b4   : > { %15144 = vst [vmem:[#allocation17_spill] sm:$0xff] %v11161_v63  ;;  %3185 = vmatpush1.bf16.msra.mxu0 %v15145_v32  ;;  %v15146_v43 = vcombine.low %v15141_v39, %v15142_v10  ;;  %v15149_v27 = vcombine.high %v15147_v22, %v15148_v37  ;;  %v4140_v35 = vadd.f32 1.0, %v9183_v2  ;;  %v3541_v3 = vmul.f32 0.5, %v11038_v5  ;;  %v9187_v39 = vpop.eup %9186  ;;  %v2459_v5 = vpop.f32.mrf.mxu1  ;;  %v15155_v32 = vld [vmem:[#allocation22_spill] sm:$0xff] }
 0x1b5   : > { %v2295_v48 = vadd.f32 %v2294_v25, %v10682_v46  ;;  %2921 = vmatmul.mubr.bf16.gmra.mxu0 %v15150_v45  ;;  %v15153_v28 = vcombine.high %v15151_v56, %v15152_v4  ;;  %v11184_v9 = vpack.c.bf16 %v4333_v62, %v4325_v26  ;;  %v3548_v10 = vmul.f32 0.5, %v11052_v7  ;;  %3082 = vmatmul.mubr.bf16.gmra.mxu1 %v15155_v32  ;;  %v15156_v25 = vld [vmem:[#allocation23_spill] sm:$0xff]  ;;  %v2300_v7 = vpop.f32.mrf.mxu0 }
 0x1b6   : > { %3346 = vmatpush1.bf16.msra.mxu1 %v15146_v43  ;;  %3186 = vmatprep.subr.bf16.mxu0 %v15149_v27  ;;  %v3549_v1 = vmul.f32 0.5, %v11061_v16  ;;  %9198 = verf.f32 %v3772_v55  ;;  %v3773_v2 = vmul.f32 0.70710677, %v11168_v14  ;;  %v9189_v43 = vpop.eup %9188  ;;  %v4141_v27 = vadd.f32 1.0, %v9185_v61 }
 0x1b7   : > { %3347 = vmatprep.subr.bf16.mxu1 %v15153_v28  ;;  %15154 = vst [vmem:[#allocation27_spill] sm:$0xff] %v11184_v9  ;;  %2930 = vmatprep.mubr.bf16.mxu0 %v15156_v25  ;;  %v4148_v45 = vadd.f32 1.0, %v9187_v39  ;;  %v3780_v26 = vmul.f32 0.70710677, %v11170_v15  ;;  %v11192_v62 = vadd.f32 %v2455_v38, %v2295_v48  ;;  %v15157_v28 = vld [vmem:[#allocation24_spill] sm:$0xff]  ;;  %v15158_v16 = vcombine.low %v15147_v22, %v15148_v37  ;;  %v2461_v39 = vpop.f32.mrf.mxu1 }
 0x1b8   : > { %3091 = vmatprep.mubr.bf16.mxu1 %v15157_v28  ;;  %v4149_v55 = vadd.f32 1.0, %v9189_v43  ;;  %9200 = verf.f32 %v3773_v2  ;;  %v2299_v32 = vadd.f32 %v2298_v50, %v10678_v42  ;;  %v2301_v61 = vadd.f32 %v2300_v7, %v10682_v46  ;;  %v15160_v48 = vld [vmem:[#allocation36_spill] sm:$0xff]  ;;  %v2302_v7 = vpop.f32.mrf.mxu0  ;;  %v15162_v28 = vld [vmem:[#allocation37_spill] sm:$0xff] }
 0x1b9   : > { %3187 = vmatpush2.bf16.msra.mxu0 %v15158_v16  ;;  %v15159_v38 = vcombine.low %v15151_v56, %v15152_v4  ;;  %v15161_v25 = vcombine.high %v10873_v41, %v15160_v48  ;;  %v11207_v22 = vld [vmem:[%s10033_s6 + $0x258] sm:$0xff]  ;;  %v4340_v2 = vmul.f32 %v4140_v35, %v3540_v40  ;;  %v4348_v43 = vmul.f32 %v4148_v45, %v3548_v10  ;;  %v15163_v16 = vld [vmem:[#allocation38_spill] sm:$0xff]  ;;  %v2463_v35 = vpop.f32.mrf.mxu1 }
 0x1ba   : > { %v11210_v37 = vld [vmem:[%s10033_s6 + $0x278] sm:$0xff]  ;;  %9202 = verf.f32 %v3780_v26  ;;  %v3781_v50 = vmul.f32 0.70710677, %v11192_v62  ;;  %v15164_v56 = vcombine.high %v15162_v28, %v15163_v16  ;;  %v11222_v6 = vadd.f32 %v2459_v5, %v2299_v32  ;;  %v9191_v26 = vpop.eup %9190 }
 0x1bb   : > { %3348 = vmatpush2.bf16.msra.mxu1 %v15159_v38  ;;  %3188 = vmatprep.subr.bf16.mxu0 %v15161_v25  ;;  %v11217_v4 = vld [vmem:[%s10033_s6 + $0x658] sm:$0xff]  ;;  %v4349_v25 = vmul.f32 %v4149_v55, %v3549_v1  ;;  %v11224_v33 = vadd.f32 %v2461_v39, %v2301_v61  ;;  %v2303_v40 = vadd.f32 %v2302_v7, %v10678_v42  ;;  %v2465_v61 = vpop.f32.mrf.mxu1 }
 0x1bc   : > { %3349 = vmatprep.subr.bf16.mxu1 %v15164_v56  ;;  %v11220_v38 = vld [vmem:[%s10033_s6 + $0x678] sm:$0xff]  ;;  %v11233_v49 = vpack.c.bf16 %v4348_v43, %v4340_v2  ;;  %9204 = verf.f32 %v3781_v50  ;;  %v2304_v56 = vpop.f32.mrf.mxu0  ;;  %v15166_v53 = vcombine.low %v10873_v41, %v15160_v48  ;;  %v4341_v55 = vmul.f32 %v4141_v27, %v3541_v3  ;;  %v15168_v2 = vld [vmem:[#allocation39_spill] sm:$0xff]  ;;  %v9193_v48 = vpop.eup %9192 }
 0x1bd   : > { %v11228_v10 = vld [vmem:[%s10033_s6 + $0x218] sm:$0xff]  ;;  %v3788_v32 = vmul.f32 0.70710677, %v11222_v6  ;;  %v15167_v39 = vcombine.low %v15162_v28, %v15163_v16  ;;  %v3556_v3 = vmul.f32 0.5, %v11081_v12  ;;  %v11254_v27 = vadd.f32 %v2463_v35, %v2303_v40  ;;  %v9581_v28 = vld [vmem:[%s14903_s0 + $0xa0] ss:$16 sps:$4 sm:$0xff]   ;;  %v2469_v40 = vpop.f32.mrf.mxu1 }
 0x1be   : > { %v11231_v45 = vld [vmem:[%s10033_s6 + $0x238] sm:$0xff]  ;;  %15165 = vst [vmem:[#allocation28_spill] sm:$0xff] %v11233_v49  ;;  %3189 = vmatpush2.bf16.msra.mxu0 %v15166_v53  ;;  %v2305_v7 = vadd.f32 %v2304_v56, %v10682_v46  ;;  %v2308_v1 = vpop.f32.mrf.mxu0  ;;  %v15171_v16 = vcombine.high %v10914_v60, %v10917_v54  ;;  %v9583_v56 = vld [vmem:[%s14903_s0 + $0xc4] ss:$16 sps:$4 sm:$0xff]   ;;  %v15174_v5 = vcombine.low %v10914_v60, %v10917_v54  ;;  %v4157_v47 = vadd.f32 1.0, %v9193_v48 }
 0x1bf   : > { %3350 = vmatpush2.bf16.msra.mxu1 %v15167_v39  ;;  %v15169_v43 = vld [vmem:[#allocation40_spill] sm:$0xff]  ;;  %2931 = vmatmul.mubr.bf16.gmra.mxu0 %v9581_v28  ;;  %9206 = verf.f32 %v3788_v32  ;;  %v2309_v12 = vadd.f32 %v2308_v1, %v10678_v42  ;;  %v11272_v28 = vpack.c.bf16 %v4349_v25, %v4341_v55  ;;  %v3557_v39 = vmul.f32 0.5, %v11099_v0 }
 0x1c0   : > { %v15170_v50 = vcombine.high %v15168_v2, %v15169_v43  ;;  %3351 = vmatprep.subr.bf16.mxu1 %v15171_v16  ;;  %v9582_v35 = vld [vmem:[%s14903_s0 + $0xa8] ss:$16 sps:$4 sm:$0xff]   ;;  %2940 = vmatprep.mubr.bf16.mxu0 %v9583_v56  ;;  %v9195_v16 = vpop.eup %9194  ;;  %v3565_v1 = vmul.f32 0.5, %v11124_v30  ;;  %v3796_v32 = vmul.f32 0.70710677, %v11254_v27  ;;  %v2310_v41 = vpop.f32.mrf.mxu0  ;;  %v15173_v56 = vcombine.low %v15168_v2, %v15169_v43 }
 0x1c1   : > { %3092 = vmatmul.mubr.bf16.gmra.mxu1 %v9582_v35  ;;  %15172 = vst [vmem:[#allocation18_spill] sm:$0xff] %v11272_v28  ;;  %v9584_v35 = vld [vmem:[%s14903_s0 + $0xcc] ss:$16 sps:$4 sm:$0xff]   ;;  %v9197_v25 = vpop.eup %9196  ;;  %v4164_v55 = vadd.f32 1.0, %v9195_v16  ;;  %v11284_v53 = vadd.f32 %v2465_v61, %v2305_v7  ;;  %v11286_v0 = vadd.f32 %v2469_v40, %v2309_v12  ;;  %v2471_v30 = vpop.f32.mrf.mxu1  ;;  %v3572_v2 = vmul.f32 0.5, %v11150_v24 }
 0x1c2   : > { %3190 = vmatprep.subr.bf16.mxu0 %v15170_v50  ;;  %v4156_v50 = vadd.f32 1.0, %v9191_v26  ;;  %v3564_v26 = vmul.f32 0.5, %v11122_v58  ;;  %3101 = vmatprep.mubr.bf16.mxu1 %v9584_v35  ;;  %v2311_v58 = vadd.f32 %v2310_v41, %v10682_v46  ;;  %v15175_v35 = vcombine.high %v10930_v17, %v10933_v59  ;;  %v2312_v61 = vpop.f32.mrf.mxu0 }
 0x1c3   : > { %3191 = vmatpush2.bf16.msra.mxu0 %v15173_v56  ;;  %3352 = vmatpush2.bf16.msra.mxu1 %v15174_v5  ;;  %v11297_v43 = vmul.f32 0.5, %v11168_v14  ;;  %9208 = verf.f32 %v3796_v32  ;;  %v15176_v41 = vcombine.high %v10945_v19, %v10956_v23  ;;  %v4165_v54 = vadd.f32 1.0, %v9197_v25  ;;  %v2473_v5 = vpop.f32.mrf.mxu1  ;;  %v9199_v40 = vpop.eup %9198 }
 0x1c4   : > { %3192 = vmatprep.subr.bf16.mxu0 %v15175_v35  ;;  %v4356_v7 = vmul.f32 %v4156_v50, %v3556_v3  ;;  %v4364_v12 = vmul.f32 %v4164_v55, %v3564_v26  ;;  %v3789_v60 = vmul.f32 0.70710677, %v11224_v33  ;;  %v3797_v48 = vmul.f32 0.70710677, %v11284_v53  ;;  %v2314_v32 = vpop.f32.mrf.mxu0 }
 0x1c5   : > { %3353 = vmatprep.subr.bf16.mxu1 %v15176_v41  ;;  %v3804_v24 = vmul.f32 0.70710677, %v11286_v0  ;;  %v11305_v16 = vadd.f32 %v2471_v30, %v2311_v58  ;;  %v2313_v14 = vadd.f32 %v2312_v61, %v10678_v42  ;;  %v15177_v56 = vcombine.low %v10930_v17, %v10933_v59  ;;  %v2475_v55 = vpop.f32.mrf.mxu1  ;;  %v9201_v58 = vpop.eup %9200  ;;  %v9587_v41 = vld [vmem:[%s14903_s0 + $0xe4] ss:$16 sps:$4 sm:$0xff]  }
 0x1c6   : > { %v11311_v3 = vpack.c.bf16 %v4364_v12, %v4356_v7  ;;  %v4172_v50 = vadd.f32 1.0, %v9199_v40  ;;  %v3580_v26 = vmul.f32 0.5, %v11170_v15  ;;  %v2315_v25 = vadd.f32 %v2314_v32, %v10682_v46  ;;  %v2318_v61 = vpop.f32.mrf.mxu0  ;;  %v9585_v15 = vld [vmem:[%s14903_s0 + $0xc0] ss:$16 sps:$4 sm:$0xff]  }
 0x1c7   : > { %3193 = vmatpush2.bf16.msra.mxu0 %v15177_v56  ;;  %v15179_v35 = vcombine.low %v10945_v19, %v10956_v23  ;;  %v4357_v30 = vmul.f32 %v4157_v47, %v3557_v39  ;;  %v3581_v59 = vmul.f32 0.5, %v11192_v62  ;;  %9210 = verf.f32 %v3804_v24  ;;  %v9203_v19 = vpop.eup %9202  ;;  %v2479_v62 = vpop.f32.mrf.mxu1  ;;  %v9586_v39 = vld [vmem:[%s14903_s0 + $0xc8] ss:$16 sps:$4 sm:$0xff]  }
 0x1c8   : > { %15178 = vst [vmem:[#allocation19_spill] sm:$0xff] %v11311_v3  ;;  %3194 = vmatprep.subr.bf16.mxu0 %v8208_v52  ;;  %v11322_v17 = vadd.f32 %v2473_v5, %v2313_v14  ;;  %2941 = vmatmul.mubr.bf16.gmra.mxu0 %v9585_v15  ;;  %v4173_v23 = vadd.f32 1.0, %v9201_v58  ;;  %9212 = verf.f32 %v3789_v60  ;;  %v11330_v52 = vadd.f32 %v2475_v55, %v2315_v25  ;;  %v2320_v60 = vpop.f32.mrf.mxu0  ;;  %v9588_v5 = vld [vmem:[%s14903_s0 + $0xec] ss:$16 sps:$4 sm:$0xff]  }
 0x1c9   : > { %3354 = vmatpush2.bf16.msra.mxu1 %v15179_v35  ;;  %v2319_v47 = vadd.f32 %v2318_v61, %v10678_v42  ;;  %2950 = vmatprep.mubr.bf16.mxu0 %v9587_v41  ;;  %v4365_v7 = vmul.f32 %v4165_v54, %v3565_v1  ;;  %9214 = verf.f32 %v3797_v48  ;;  %v15180_v40 = vcombine.low %v10959_v34, %v10962_v18  ;;  %v9205_v24 = vpop.eup %9204  ;;  %v2481_v48 = vpop.f32.mrf.mxu1  ;;  %v11364_v61 = vld [vmem:[%s10033_s6 + $0x618] sm:$0xff] }
 0x1ca   : > { %3355 = vmatprep.subr.bf16.mxu1 %v8336_v36  ;;  %3102 = vmatmul.mubr.bf16.gmra.mxu1 %v9586_v39  ;;  %v4180_v36 = vadd.f32 1.0, %v9203_v19  ;;  %v3812_v12 = vmul.f32 0.70710677, %v11322_v17  ;;  %v4372_v14 = vmul.f32 %v4172_v50, %v3572_v2  ;;  %v3805_v32 = vmul.f32 0.70710677, %v11305_v16  ;;  %v2322_v50 = vpop.f32.mrf.mxu0 }
 0x1cb   : > { %3111 = vmatprep.mubr.bf16.mxu1 %v9588_v5  ;;  %3195 = vmatpush2.bf16.msra.mxu0 %v15180_v40  ;;  %v3813_v1 = vmul.f32 0.70710677, %v11330_v52  ;;  %v11348_v54 = vadd.f32 %v2479_v62, %v2319_v47  ;;  %v15181_v56 = vcombine.low %v11025_v21, %v11028_v57  ;;  %v15182_v25 = vcombine.high %v11075_v13, %v11078_v31  ;;  %v2483_v58 = vpop.f32.mrf.mxu1  ;;  %v9589_v5 = vld [vmem:[%s14903_s0 + $0xe0] ss:$16 sps:$4 sm:$0xff]  }
 0x1cc   : > { %v4380_v18 = vmul.f32 %v4180_v36, %v3580_v26  ;;  %v4181_v34 = vadd.f32 1.0, %v9205_v24  ;;  %9216 = verf.f32 %v3812_v12  ;;  %v2321_v2 = vadd.f32 %v2320_v60, %v10682_v46  ;;  %v11367_v26 = vld [vmem:[%s10033_s6 + $0x638] sm:$0xff]  ;;  %v9207_v15 = vpop.eup %9206  ;;  %v2324_v39 = vpop.f32.mrf.mxu0 }
 0x1cd   : > { %3356 = vmatpush2.bf16.msra.mxu1 %v15181_v56  ;;  %3196 = vmatprep.subr.bf16.mxu0 %v15182_v25  ;;  %v15183_v55 = vcombine.high %v11135_v11, %v11138_v29  ;;  %v4373_v35 = vmul.f32 %v4173_v23, %v11297_v43  ;;  %9218 = verf.f32 %v3813_v1  ;;  %v3820_v21 = vmul.f32 0.70710677, %v11348_v54  ;;  %v2485_v12 = vpop.f32.mrf.mxu1  ;;  %v9590_v25 = vld [vmem:[%s14903_s0 + $0xe8] ss:$16 sps:$4 sm:$0xff]  }
 0x1ce   : > { %v2323_v57 = vadd.f32 %v2322_v50, %v10678_v42  ;;  %v11369_v19 = vpack.c.bf16 %v4380_v18, %v4372_v14  ;;  %v4381_v47 = vmul.f32 %v4181_v34, %v3581_v59  ;;  %v11371_v62 = vadd.f32 %v2481_v48, %v2321_v2  ;;  %v9591_v18 = vld [vmem:[%s14903_s0 + $0x104] ss:$16 sps:$4 sm:$0xff]   ;;  %v9592_v50 = vld [vmem:[%s14903_s0 + $0x10c] ss:$16 sps:$4 sm:$0xff]  }
 0x1cf   : > { %3357 = vmatprep.subr.bf16.mxu1 %v15183_v55  ;;  %v15185_v43 = vcombine.low %v11075_v13, %v11078_v31  ;;  %v11376_v23 = vpack.c.bf16 %v4365_v7, %v4357_v30  ;;  %9220 = verf.f32 %v3820_v21  ;;  %v2325_v36 = vadd.f32 %v2324_v39, %v10682_v46  ;;  %v2328_v7 = vpop.f32.mrf.mxu0  ;;  %v2489_v56 = vpop.f32.mrf.mxu1 }
 0x1d0   : > { %15184 = vst [vmem:[#allocation20_spill] sm:$0xff] %v11369_v19  ;;  %v11378_v41 = vadd.f32 %v2483_v58, %v2323_v57  ;;  %v15187_v60 = vcombine.low %v11135_v11, %v11138_v29  ;;  %v15188_v59 = vcombine.high %v11207_v22, %v11210_v37  ;;  %v8183_v13 = vcombine.low %v11228_v10, %v11231_v45  ;;  %v9209_v24 = vpop.eup %9208 }
 0x1d1   : > { %3197 = vmatpush2.bf16.msra.mxu0 %v15185_v43  ;;  %15186 = vst [vmem:[#allocation29_spill] sm:$0xff] %v11376_v23  ;;  %v4188_v31 = vadd.f32 1.0, %v9207_v15  ;;  %v3821_v30 = vmul.f32 0.70710677, %v11371_v62  ;;  %v15189_v11 = vcombine.high %v11217_v4, %v11220_v38  ;;  %v8312_v29 = vcombine.high %v11364_v61, %v11367_v26  ;;  %v2330_v2 = vpop.f32.mrf.mxu0  ;;  %v2491_v21 = vpop.f32.mrf.mxu1 }
 0x1d2   : > { %3358 = vmatpush2.bf16.msra.mxu1 %v15187_v60  ;;  %3198 = vmatprep.subr.bf16.mxu0 %v15188_v59  ;;  %v11398_v40 = vpack.c.bf16 %v4381_v47, %v4373_v35  ;;  %v3588_v14 = vmul.f32 0.5, %v11222_v6  ;;  %9222 = verf.f32 %v3805_v32  ;;  %v3828_v1 = vmul.f32 0.70710677, %v11378_v41  ;;  %v8776_v47 = vld [vmem:[%s10046_s27 + $0xe4] ss:$16 sps:$4 sm:$0xff]  }
 0x1d3   : > { %2951 = vmatmul.mubr.bf16.gmra.mxu0 %v9589_v5  ;;  %3359 = vmatprep.subr.bf16.mxu1 %v15189_v11  ;;  %v11402_v48 = vadd.f32 %v2485_v12, %v2325_v36  ;;  %v3596_v34 = vmul.f32 0.5, %v11254_v27  ;;  %v4196_v6 = vadd.f32 1.0, %v9209_v24  ;;  %9224 = verf.f32 %v3821_v30  ;;  %v2332_v43 = vpop.f32.mrf.mxu0  ;;  %v8779_v36 = vld [vmem:[%s10046_s27 + $0x2e4] ss:$16 sps:$4 sm:$0xff]  }
 0x1d4   : > { %15190 = vst [vmem:[#allocation30_spill] sm:$0xff] %v11398_v40  ;;  %3112 = vmatmul.mubr.bf16.gmra.mxu1 %v9590_v25  ;;  %2960 = vmatprep.mubr.bf16.mxu0 %v9591_v18  ;;  %v2329_v32 = vadd.f32 %v2328_v7, %v10678_v42  ;;  %v15191_v55 = vcombine.low %v11207_v22, %v11210_v37  ;;  %9226 = verf.f32 %v3828_v1  ;;  %v9211_v12 = vpop.eup %9210  ;;  %v3597_v11 = vmul.f32 0.5, %v11284_v53  ;;  %v9593_v53 = vld [vmem:[%s14903_s0 + $0x100] ss:$16 sps:$4 sm:$0xff]  }
 0x1d5   : > { %3121 = vmatprep.mubr.bf16.mxu1 %v9592_v50  ;;  %v3829_v35 = vmul.f32 0.70710677, %v11402_v48  ;;  %v2331_v27 = vadd.f32 %v2330_v2, %v10682_v46  ;;  %v15192_v57 = vcombine.low %v11217_v4, %v11220_v38  ;;  %v15193_v58 = vcombine.high %v11228_v10, %v11231_v45  ;;  %v2493_v38 = vpop.f32.mrf.mxu1  ;;  %v15194_v10 = vld [vmem:[#allocation25_spill] sm:$0xff]  ;;  %v9213_v59 = vpop.eup %9212  ;;  %v9595_v2 = vld [vmem:[%s14903_s0 + $0x124] ss:$16 sps:$4 sm:$0xff]  }
 0x1d6   : > { %3199 = vmatpush2.bf16.msra.mxu0 %v15191_v55  ;;  %v8311_v15 = vcombine.low %v11364_v61, %v11367_v26  ;;  %v4388_v22 = vmul.f32 %v4188_v31, %v3588_v14  ;;  %v4396_v37 = vmul.f32 %v4196_v6, %v3596_v34  ;;  %v11429_v39 = vadd.f32 %v2489_v56, %v2329_v32  ;;  %v2334_v30 = vpop.f32.mrf.mxu0  ;;  %v9215_v5 = vpop.eup %9214  ;;  %v9594_v32 = vld [vmem:[%s14903_s0 + $0x108] ss:$16 sps:$4 sm:$0xff]  }
 0x1d7   : > { %3360 = vmatpush2.bf16.msra.mxu1 %v15192_v57  ;;  %3200 = vmatprep.subr.bf16.mxu0 %v15193_v58  ;;  %9228 = verf.f32 %v3829_v35  ;;  %v11432_v60 = vadd.f32 %v2491_v21, %v2331_v27  ;;  %v2333_v4 = vadd.f32 %v2332_v43, %v10678_v42  ;;  %v14966_v45 = vsub.s32 2, %v15194_v10  ;;  %v2495_v1 = vpop.f32.mrf.mxu1  ;;  %v9596_v57 = vld [vmem:[%s14903_s0 + $0x12c] ss:$16 sps:$4 sm:$0xff]  }
 0x1d8   : > { %3361 = vmatprep.subr.bf16.mxu1 %v8312_v29  ;;  %v11437_v61 = vmul.f32 0.5, %v11224_v33  ;;  %v11439_v26 = vpack.c.bf16 %v4396_v37, %v4388_v22  ;;  %v3836_v31 = vmul.f32 0.70710677, %v11429_v39  ;;  %v14965_v7 = vsub.s32 3, %v15194_v10 }
 0x1d9   : > { %v3604_v29 = vmul.f32 0.5, %v11286_v0  ;;  %v3837_v24 = vmul.f32 0.70710677, %v11432_v60  ;;  %v11446_v14 = vadd.f32 %v2493_v38, %v2333_v4  ;;  %v4204_v33 = vadd.f32 1.0, %v9211_v12  ;;  %v9217_v0 = vpop.eup %9216 }
 0x1da   : > { %15195 = vst [vmem:[#allocation31_spill] sm:$0xff] %v11439_v26  ;;  %3201 = vmatpush2.bf16.msra.mxu0 %v8183_v13  ;;  %v11449_v56 = vmul.f32 0.5, %v11305_v16  ;;  %9230 = verf.f32 %v3836_v31  ;;  %v2335_v25 = vadd.f32 %v2334_v30, %v10682_v46  ;;  %v2338_v13 = vpop.f32.mrf.mxu0  ;;  %v3612_v18 = vmul.f32 0.5, %v11322_v17  ;;  %v2499_v16 = vpop.f32.mrf.mxu1 }
 0x1db   : > { %3362 = vmatpush2.bf16.msra.mxu1 %v8311_v15  ;;  %6132 = vmatprep.subr.bf16.mxu0 %v8776_v47  ;;  %9232 = verf.f32 %v3837_v24  ;;  %v3844_v34 = vmul.f32 0.70710677, %v11446_v14  ;;  %v2339_v6 = vadd.f32 %v2338_v13, %v10678_v42  ;;  %v9219_v50 = vpop.eup %9218  ;;  %v4212_v55 = vadd.f32 1.0, %v9217_v0 }
 0x1dc   : > { %2961 = vmatmul.mubr.bf16.gmra.mxu0 %v9593_v53  ;;  %6293 = vmatprep.subr.bf16.mxu1 %v8779_v36  ;;  %v3613_v17 = vmul.f32 0.5, %v11330_v52  ;;  %v3620_v35 = vmul.f32 0.5, %v11348_v54  ;;  %v11466_v27 = vadd.f32 %v2495_v1, %v2335_v25  ;;  %v2340_v21 = vpop.f32.mrf.mxu0  ;;  %v4189_v58 = vadd.f32 1.0, %v9213_v59  ;;  %v2501_v22 = vpop.f32.mrf.mxu1 }
 0x1dd   : > { %3122 = vmatmul.mubr.bf16.gmra.mxu1 %v9594_v32  ;;  %2970 = vmatprep.mubr.bf16.mxu0 %v9595_v2  ;;  %9234 = verf.f32 %v3844_v34  ;;  %v11471_v15 = vadd.f32 %v2499_v16, %v2339_v6  ;;  %v2341_v47 = vadd.f32 %v2340_v21, %v10682_v46  ;;  %v9221_v37 = vpop.eup %9220  ;;  %v4197_v43 = vadd.f32 1.0, %v9215_v5 }
 0x1de   : > { %3131 = vmatprep.mubr.bf16.mxu1 %v9596_v57  ;;  %v4404_v52 = vmul.f32 %v4204_v33, %v3604_v29  ;;  %v4412_v36 = vmul.f32 %v4212_v55, %v3612_v18  ;;  %v3845_v54 = vmul.f32 0.70710677, %v11466_v27  ;;  %v2342_v12 = vpop.f32.mrf.mxu0  ;;  %v4213_v4 = vadd.f32 1.0, %v9219_v50  ;;  %v2503_v30 = vpop.f32.mrf.mxu1  ;;  %v9597_v50 = vld [vmem:[%s14903_s0 + $0x120] ss:$16 sps:$4 sm:$0xff]  }
 0x1df   : > { %v4220_v38 = vadd.f32 1.0, %v9221_v37  ;;  %v11476_v31 = vmul.f32 0.5, %v11371_v62  ;;  %v3852_v59 = vmul.f32 0.70710677, %v11471_v15  ;;  %v9223_v24 = vpop.eup %9222  ;;  %v11481_v25 = vadd.f32 %v2501_v22, %v2341_v47  ;;  %v9599_v57 = vld [vmem:[%s14903_s0 + $0x144] ss:$16 sps:$4 sm:$0xff]  }
 0x1e0   : > { %v11479_v1 = vpack.c.bf16 %v4412_v36, %v4404_v52  ;;  %9236 = verf.f32 %v3845_v54  ;;  %v2343_v5 = vadd.f32 %v2342_v12, %v10678_v42  ;;  %v2344_v29 = vpop.f32.mrf.mxu0  ;;  %v9225_v33 = vpop.eup %9224  ;;  %v4389_v13 = vmul.f32 %v4189_v58, %v11437_v61  ;;  %v9600_v52 = vld [vmem:[%s14903_s0 + $0x14c] ss:$16 sps:$4 sm:$0xff]  }
 0x1e1   : > { %v3628_v53 = vmul.f32 0.5, %v11378_v41  ;;  %v3629_v62 = vmul.f32 0.5, %v11402_v48  ;;  %v2345_v0 = vadd.f32 %v2344_v29, %v10682_v46  ;;  %v2505_v18 = vpop.f32.mrf.mxu1  ;;  %v9227_v34 = vpop.eup %9226  ;;  %v4397_v6 = vmul.f32 %v4197_v43, %v3597_v11  ;;  %v9598_v11 = vld [vmem:[%s14903_s0 + $0x128] ss:$16 sps:$4 sm:$0xff]  }
 0x1e2   : > { %15196 = vst [vmem:[#allocation32_spill] sm:$0xff] %v11479_v1  ;;  %9238 = verf.f32 %v3852_v59  ;;  %v3853_v16 = vmul.f32 0.70710677, %v11481_v25  ;;  %v11489_v32 = vadd.f32 %v2503_v30, %v2343_v5  ;;  %v2348_v2 = vpop.f32.mrf.mxu0  ;;  %v4205_v61 = vadd.f32 1.0, %v9223_v24 }
 0x1e3   : > { %v4228_v41 = vadd.f32 1.0, %v9227_v34  ;;  %v11494_v55 = vadd.f32 %v2505_v18, %v2345_v0  ;;  %v2349_v48 = vadd.f32 %v2348_v2, %v10678_v42  ;;  %v2509_v21 = vpop.f32.mrf.mxu1  ;;  %v4413_v47 = vmul.f32 %v4213_v4, %v3613_v17 }
 0x1e4   : > { %2971 = vmatmul.mubr.bf16.gmra.mxu0 %v9597_v50  ;;  %v9229_v58 = vpop.eup %9228  ;;  %v4420_v22 = vmul.f32 %v4220_v38, %v3620_v35  ;;  %9240 = verf.f32 %v3853_v16  ;;  %v3860_v37 = vmul.f32 0.70710677, %v11489_v32  ;;  %v2350_v43 = vpop.f32.mrf.mxu0  ;;  %v4221_v36 = vadd.f32 1.0, %v9225_v33 }
 0x1e5   : > { %3132 = vmatmul.mubr.bf16.gmra.mxu1 %v9598_v11  ;;  %2980 = vmatprep.mubr.bf16.mxu0 %v9599_v57  ;;  %v4428_v54 = vmul.f32 %v4228_v41, %v3628_v53  ;;  %v4229_v12 = vadd.f32 1.0, %v9229_v58  ;;  %v3861_v59 = vmul.f32 0.70710677, %v11494_v55  ;;  %v2511_v30 = vpop.f32.mrf.mxu1  ;;  %v11508_v24 = vadd.f32 %v2509_v21, %v2349_v48  ;;  %v9601_v57 = vld [vmem:[%s14903_s0 + $0x140] ss:$16 sps:$4 sm:$0xff]  }
 0x1e6   : > { %3141 = vmatprep.mubr.bf16.mxu1 %v9600_v52  ;;  %9242 = verf.f32 %v3860_v37  ;;  %v2351_v17 = vadd.f32 %v2350_v43, %v10682_v46  ;;  %v2352_v35 = vpop.f32.mrf.mxu0  ;;  %v11511_v4 = vpack.c.bf16 %v4397_v6, %v4389_v13  ;;  %v4405_v5 = vmul.f32 %v4205_v61, %v11449_v56 }
 0x1e7   : > { %v9231_v38 = vpop.eup %9230  ;;  %v11514_v29 = vpack.c.bf16 %v4428_v54, %v4420_v22  ;;  %9244 = verf.f32 %v3861_v59  ;;  %v2353_v33 = vadd.f32 %v2352_v35, %v10678_v42  ;;  %v2513_v53 = vpop.f32.mrf.mxu1  ;;  %v4429_v18 = vmul.f32 %v4229_v12, %v3629_v62  ;;  %v9604_v54 = vld [vmem:[%s14903_s0 + $0x16c] ss:$16 sps:$4 sm:$0xff]  }
 0x1e8   : > { %15197 = vst [vmem:[#allocation33_spill] sm:$0xff] %v11511_v4  ;;  %v9233_v0 = vpop.eup %9232  ;;  %v3636_v34 = vmul.f32 0.5, %v11429_v39  ;;  %v3868_v16 = vmul.f32 0.70710677, %v11508_v24  ;;  %v11519_v2 = vadd.f32 %v2511_v30, %v2351_v17  ;;  %v2354_v50 = vpop.f32.mrf.mxu0  ;;  %v4236_v13 = vadd.f32 1.0, %v9231_v38 }
 0x1e9   : > { %15198 = vst [vmem:[#allocation21_spill] sm:$0xff] %v11514_v29  ;;  %v11521_v6 = vadd.f32 %v2513_v53, %v2353_v33  ;;  %v2355_v56 = vadd.f32 %v2354_v50, %v10682_v46  ;;  %v2515_v61 = vpop.f32.mrf.mxu1  ;;  %v11524_v41 = vpack.c.bf16 %v4413_v47, %v4405_v5  ;;  %v4421_v21 = vmul.f32 %v4221_v36, %v11476_v31  ;;  %v9603_v31 = vld [vmem:[%s14903_s0 + $0x164] ss:$16 sps:$4 sm:$0xff]  }
 0x1ea   : > { %v9235_v48 = vpop.eup %9234  ;;  %v3637_v62 = vmul.f32 0.5, %v11432_v60  ;;  %9246 = verf.f32 %v3868_v16  ;;  %v3869_v39 = vmul.f32 0.70710677, %v11519_v2  ;;  %v2358_v11 = vpop.f32.mrf.mxu0  ;;  %v4237_v58 = vadd.f32 1.0, %v9233_v0  ;;  %v9602_v60 = vld [vmem:[%s14903_s0 + $0x148] ss:$16 sps:$4 sm:$0xff]  }
 0x1eb   : > { %15199 = vst [vmem:[#allocation34_spill] sm:$0xff] %v11524_v41  ;;  %v3644_v22 = vmul.f32 0.5, %v11446_v14  ;;  %v4244_v37 = vadd.f32 1.0, %v9235_v48  ;;  %v3876_v47 = vmul.f32 0.70710677, %v11521_v6  ;;  %v2519_v43 = vpop.f32.mrf.mxu1  ;;  %v11540_v52 = vadd.f32 %v2515_v61, %v2355_v56 }
 0x1ec   : > { %2981 = vmatmul.mubr.bf16.gmra.mxu0 %v9601_v57  ;;  %9248 = verf.f32 %v3869_v39  ;;  %v2359_v36 = vadd.f32 %v2358_v11, %v10678_v42  ;;  %v2360_v14 = vpop.f32.mrf.mxu0  ;;  %v11546_v12 = vpack.c.bf16 %v4429_v18, %v4421_v21  ;;  %v4436_v30 = vmul.f32 %v4236_v13, %v3636_v34  ;;  %v9605_v34 = vld [vmem:[%s10040_s15] sm:$0xff] }
 0x1ed   : > { %3142 = vmatmul.mubr.bf16.gmra.mxu1 %v9602_v60  ;;  %2990 = vmatprep.mubr.bf16.mxu0 %v9603_v31  ;;  %v9237_v59 = vpop.eup %9236  ;;  %v4444_v17 = vmul.f32 %v4244_v37, %v3644_v22  ;;  %9250 = verf.f32 %v3876_v47  ;;  %v2361_v35 = vadd.f32 %v2360_v14, %v10682_v46  ;;  %v2521_v38 = vpop.f32.mrf.mxu1  ;;  %v3645_v5 = vmul.f32 0.5, %v11466_v27  ;;  %v9606_v22 = vld [vmem:[%s14903_s0 + $0x160] ss:$16 sps:$4 sm:$0xff]   ;;  %v15203_v60 = vld [vmem:[#allocation12_spill] sm:$0xff] }
 0x1ee   : > { %3151 = vmatprep.mubr.bf16.mxu1 %v9604_v54  ;;  %15200 = vst [vmem:[#allocation35_spill] sm:$0xff] %v11546_v12  ;;  %v4245_v33 = vadd.f32 1.0, %v9237_v59  ;;  %v3877_v42 = vmul.f32 0.70710677, %v11540_v52  ;;  %v11551_v53 = vadd.f32 %v2519_v43, %v2359_v36  ;;  %v2362_v0 = vpop.f32.mrf.mxu0  ;;  %v11560_v13 = vrot.slane %v9605_v34, %v14966_v45  ;;  %v9607_v43 = vld [vmem:[%s14903_s0 + $0x168] ss:$16 sps:$4 sm:$0xff]  }
 0x1ef   : > { %v9239_v16 = vpop.eup %9238  ;;  %v11553_v50 = vpack.c.bf16 %v4444_v17, %v4436_v30  ;;  %v11555_v18 = vadd.f32 %v2521_v38, %v2361_v35  ;;  %v2523_v56 = vpop.f32.mrf.mxu1  ;;  %v4437_v46 = vmul.f32 %v4237_v58, %v3637_v62  ;;  %v11564_v39 = vrot.slane %v9605_v34, %v14965_v7  ;;  %v15204_v17 = vld [vmem:[#allocation13_spill] sm:$0xff] }
 0x1f0   : > { %v4445_v61 = vmul.f32 %v4245_v33, %v3645_v5  ;;  %9252 = verf.f32 %v3877_v42  ;;  %v2363_v27 = vpop.f32.mrf.mxu0  ;;  %v4252_v11 = vadd.f32 1.0, %v9239_v16  ;;  %v3652_v36 = vmul.f32 0.5, %v11471_v15  ;;  %v8795_v45 = vld [vmem:[%s10046_s27 + $0x280] ss:$16 sps:$4 sm:$0xff]  }
 0x1f1   : > { %15201 = vst [vmem:[#allocation22_spill] sm:$0xff] %v11553_v50  ;;  %v9241_v48 = vpop.eup %9240  ;;  %v2524_v21 = vpop.f32.mrf.mxu1  ;;  %v3660_v54 = vmul.f32 0.5, %v11489_v32  ;;  %v3661_v35 = vmul.f32 0.5, %v11494_v55  ;;  %v3653_v16 = vmul.f32 0.5, %v11481_v25 }
 0x1f2   : > { %v2560_v57 = vpop.f32.mrf.mxu0  ;;  %v11569_v37 = vpack.c.bf16 %v4445_v61, %v4437_v46  ;;  %v4253_v14 = vadd.f32 1.0, %v9241_v48  ;;  %v4452_v0 = vmul.f32 %v4252_v11, %v3652_v36  ;;  %v3668_v11 = vmul.f32 0.5, %v11508_v24 }
 0x1f3   : > { %v9243_v47 = vpop.eup %9242  ;;  %v2561_v62 = vadd.f32 %v2560_v57, %v11560_v13  ;;  %v2721_v58 = vpop.f32.mrf.mxu1 }
 0x1f4   : > { %2991 = vmatmul.mubr.bf16.gmra.mxu0 %v9606_v22  ;;  %15202 = vst [vmem:[#allocation23_spill] sm:$0xff] %v11569_v37  ;;  %v9245_v31 = vpop.eup %9244  ;;  %v4260_v59 = vadd.f32 1.0, %v9243_v47  ;;  %v2562_v30 = vpop.f32.mrf.mxu0  ;;  %v4453_v48 = vmul.f32 %v4253_v14, %v3653_v16 }
 0x1f5   : > { %3152 = vmatmul.mubr.bf16.gmra.mxu1 %v9607_v43  ;;  %3000 = vmatprep.mubr.bf16.mxu0 %v15203_v60  ;;  %v4261_v38 = vadd.f32 1.0, %v9245_v31  ;;  %v11580_v5 = vadd.f32 %v2721_v58, %v2561_v62  ;;  %v2563_v33 = vadd.f32 %v2562_v30, %v11564_v39  ;;  %v2723_v42 = vpop.f32.mrf.mxu1  ;;  %v3676_v31 = vmul.f32 0.5, %v11521_v6  ;;  %v9608_v6 = vld [vmem:[%s14903_s0 + $0x4] ss:$16 sps:$4 sm:$0xff]  }
 0x1f6   : > { %3161 = vmatprep.mubr.bf16.mxu1 %v15204_v17  ;;  %v4460_v56 = vmul.f32 %v4260_v59, %v3660_v54  ;;  %v2564_v15 = vpop.f32.mrf.mxu0  ;;  %v15206_v54 = vld [vmem:[#allocation14_spill] sm:$0xff] }
 0x1f7   : > { %v9247_v34 = vpop.eup %9246  ;;  %v4461_v46 = vmul.f32 %v4261_v38, %v3661_v35  ;;  %v3694_v32 = vmul.f32 0.70710677, %v11580_v5  ;;  %v11585_v61 = vadd.f32 %v2723_v42, %v2563_v33  ;;  %v2725_v27 = vpop.f32.mrf.mxu1  ;;  %v2565_v57 = vadd.f32 %v2564_v15, %v11560_v13  ;;  %v15208_v33 = vld [vmem:[#allocation15_spill] sm:$0xff] }
 0x1f8   : > { %v11587_v55 = vpack.c.bf16 %v4460_v56, %v4452_v0  ;;  %v4268_v21 = vadd.f32 1.0, %v9247_v34  ;;  %v2566_v22 = vpop.f32.mrf.mxu0  ;;  %v9609_v56 = vld [vmem:[%s14903_s0 + $0xc] ss:$16 sps:$4 sm:$0xff]  }
 0x1f9   : > { %v9249_v47 = vpop.eup %9248  ;;  %v3695_v25 = vmul.f32 0.70710677, %v11585_v61  ;;  %v2567_v62 = vadd.f32 %v2566_v22, %v11564_v39  ;;  %v2727_v58 = vpop.f32.mrf.mxu1  ;;  %9254 = verf.f32 %v3694_v32  ;;  %v11594_v36 = vadd.f32 %v2725_v27, %v2565_v57 }
 0x1fa   : > { %15205 = vst [vmem:[#allocation24_spill] sm:$0xff] %v11587_v55  ;;  %v9251_v43 = vpop.eup %9250  ;;  %v2570_v14 = vpop.f32.mrf.mxu0  ;;  %v11597_v59 = vpack.c.bf16 %v4461_v46, %v4453_v48  ;;  %v4468_v42 = vmul.f32 %v4268_v21, %v3668_v11  ;;  %v4269_v34 = vadd.f32 1.0, %v9249_v47  ;;  %v3677_v57 = vmul.f32 0.5, %v11540_v52 }
 0x1fb   : > { %v4276_v30 = vadd.f32 1.0, %v9251_v43  ;;  %9256 = verf.f32 %v3695_v25  ;;  %v11599_v35 = vadd.f32 %v2727_v58, %v2567_v62  ;;  %v2571_v24 = vadd.f32 %v2570_v14, %v11560_v13  ;;  %v2731_v38 = vpop.f32.mrf.mxu1 }
 0x1fc   : > { %3001 = vmatmul.mubr.bf16.gmra.mxu0 %v15206_v54  ;;  %15207 = vst [vmem:[#allocation36_spill] sm:$0xff] %v11597_v59  ;;  %v3702_v0 = vmul.f32 0.70710677, %v11594_v36  ;;  %v2572_v16 = vpop.f32.mrf.mxu0  ;;  %v3669_v25 = vmul.f32 0.5, %v11519_v2  ;;  %v8777_v2 = vld [vmem:[%s10046_s27 + $0x2e0] ss:$16 sps:$4 sm:$0xff]  }
 0x1fd   : > { %3162 = vmatmul.mubr.bf16.gmra.mxu1 %v15208_v33  ;;  %3202 = vmatprep.mubr.bf16.mxu0 %v9608_v6  ;;  %v9253_v15 = vpop.eup %9252  ;;  %v4476_v46 = vmul.f32 %v4276_v30, %v3676_v31  ;;  %v3703_v32 = vmul.f32 0.70710677, %v11599_v35  ;;  %v11611_v27 = vadd.f32 %v2731_v38, %v2571_v24  ;;  %v2733_v48 = vpop.f32.mrf.mxu1  ;;  %v2573_v22 = vadd.f32 %v2572_v16, %v11564_v39  ;;  %v8774_v30 = vld [vmem:[%s10046_s27 + $0xe0] ss:$16 sps:$4 sm:$0xff]  }
 0x1fe   : > { %3363 = vmatprep.mubr.bf16.mxu1 %v9609_v56  ;;  %v4277_v21 = vadd.f32 1.0, %v9253_v15  ;;  %9258 = verf.f32 %v3702_v0  ;;  %v2574_v11 = vpop.f32.mrf.mxu0  ;;  %v4469_v24 = vmul.f32 %v4269_v34, %v3669_v25  ;;  %v9610_v15 = vld [vmem:[%s14903_s0] ss:$16 sps:$4 sm:$0xff]  }
 0x1ff   : > { %v11616_v62 = vpack.c.bf16 %v4476_v46, %v4468_v42  ;;  %9260 = verf.f32 %v3703_v32  ;;  %v3710_v47 = vmul.f32 0.70710677, %v11611_v27  ;;  %v2735_v58 = vpop.f32.mrf.mxu1  ;;  %v11619_v31 = vadd.f32 %v2733_v48, %v2573_v22  ;;  %v8782_v42 = vld [vmem:[%s10046_s27 + $0xc4] ss:$16 sps:$4 sm:$0xff]  }
 0x200   : > { %v4477_v43 = vmul.f32 %v4277_v21, %v3677_v57  ;;  %v2575_v52 = vadd.f32 %v2574_v11, %v11560_v13  ;;  %v2576_v14 = vpop.f32.mrf.mxu0  ;;  %v8785_v46 = vld [vmem:[%s10046_s27 + $0x2c4] ss:$16 sps:$4 sm:$0xff]   ;;  %v9611_v57 = vld [vmem:[%s14903_s0 + $0x8] ss:$16 sps:$4 sm:$0xff]  }
 0x201   : > { %15209 = vst [vmem:[#allocation37_spill] sm:$0xff] %v11616_v62  ;;  %9262 = verf.f32 %v3710_v47  ;;  %v2577_v38 = vadd.f32 %v2576_v14, %v11564_v39  ;;  %v2737_v6 = vpop.f32.mrf.mxu1  ;;  %v3711_v0 = vmul.f32 0.70710677, %v11619_v31  ;;  %v9612_v21 = vld [vmem:[%s14903_s0 + $0x24] ss:$16 sps:$4 sm:$0xff]  }
 0x202   : > { %v11627_v16 = vadd.f32 %v2735_v58, %v2575_v52  ;;  %v2580_v56 = vpop.f32.mrf.mxu0  ;;  %v11642_v22 = vpack.c.bf16 %v4477_v43, %v4469_v24  ;;  %v9613_v47 = vld [vmem:[%s14903_s0 + $0x2c] ss:$16 sps:$4 sm:$0xff]   ;;  %v8780_v58 = vld [vmem:[%s10046_s27 + $0xc0] ss:$16 sps:$4 sm:$0xff]  }
 0x203   : > { %v11633_v32 = vadd.f32 %v2737_v6, %v2577_v38  ;;  %v2581_v34 = vadd.f32 %v2580_v56, %v11560_v13  ;;  %v2741_v48 = vpop.f32.mrf.mxu1  ;;  %9264 = verf.f32 %v3711_v0  ;;  %v8783_v24 = vld [vmem:[%s10046_s27 + $0x2c0] ss:$16 sps:$4 sm:$0xff]   ;;  %v8788_v6 = vld [vmem:[%s10046_s27 + $0xa4] ss:$16 sps:$4 sm:$0xff]  }
 0x204   : > { %3203 = vmatmul.mubr.bf16.vlgmr.msra.gmra.mxu0 %v9610_v15  ;;  %15210 = vst [vmem:[#allocation38_spill] sm:$0xff] %v11642_v22  ;;  %v3718_v11 = vmul.f32 0.70710677, %v11627_v16  ;;  %v2582_v25 = vpop.f32.mrf.mxu0  ;;  %v8791_v56 = vld [vmem:[%s10046_s27 + $0x2a4] ss:$16 sps:$4 sm:$0xff]  }
 0x205   : > { %3364 = vmatmul.mubr.bf16.vlgmr.msra.gmra.mxu1 %v9611_v57  ;;  %3212 = vmatprep.mubr.bf16.mxu0 %v9612_v21  ;;  %v3719_v52 = vmul.f32 0.70710677, %v11633_v32  ;;  %v11650_v14 = vadd.f32 %v2741_v48, %v2581_v34  ;;  %v2583_v38 = vadd.f32 %v2582_v25, %v11564_v39  ;;  %v2743_v43 = vpop.f32.mrf.mxu1  ;;  %v8786_v21 = vld [vmem:[%s10046_s27 + $0xa0] ss:$16 sps:$4 sm:$0xff]  }
 0x206   : > { %3373 = vmatprep.mubr.bf16.mxu1 %v9613_v47  ;;  %6133 = vmatpush1.bf16.msra.mxu0 %v8774_v30  ;;  %9266 = verf.f32 %v3718_v11  ;;  %v2584_v0 = vpop.f32.mrf.mxu0  ;;  %v9255_v15 = vpop.eup %9254  ;;  %v3494_v11 = vmul.f32 0.5, %v11580_v5  ;;  %v8789_v47 = vld [vmem:[%s10046_s27 + $0x2a0] ss:$16 sps:$4 sm:$0xff]  }
 0x207   : > { %6294 = vmatpush1.bf16.msra.mxu1 %v8777_v2  ;;  %6134 = vmatprep.subr.bf16.mxu0 %v8782_v42  ;;  %9268 = verf.f32 %v3719_v52  ;;  %v3726_v30 = vmul.f32 0.70710677, %v11650_v14  ;;  %v2745_v34 = vpop.f32.mrf.mxu1  ;;  %v11657_v57 = vadd.f32 %v2743_v43, %v2583_v38  ;;  %v2585_v2 = vadd.f32 %v2584_v0, %v11560_v13  ;;  %v8794_v52 = vld [vmem:[%s10046_s27 + $0x84] ss:$16 sps:$4 sm:$0xff]   ;;  %v9614_v5 = vld [vmem:[%s14903_s0 + $0x20] ss:$16 sps:$4 sm:$0xff]  }
 0x208   : > { %6295 = vmatprep.subr.bf16.mxu1 %v8785_v46  ;;  %v9257_v48 = vpop.eup %9256  ;;  %v2586_v42 = vpop.f32.mrf.mxu0  ;;  %v4094_v7 = vadd.f32 1.0, %v9255_v15 }
 0x209   : > { %v2587_v46 = vadd.f32 %v2586_v42, %v11564_v39  ;;  %v2747_v25 = vpop.f32.mrf.mxu1  ;;  %9270 = verf.f32 %v3726_v30  ;;  %v3727_v38 = vmul.f32 0.70710677, %v11657_v57  ;;  %v11666_v43 = vadd.f32 %v2745_v34, %v2585_v2  ;;  %v9615_v2 = vld [vmem:[%s14903_s0 + $0x28] ss:$16 sps:$4 sm:$0xff]  }
 0x20a   : > { %6135 = vmatpush1.bf16.msra.mxu0 %v8780_v58  ;;  %v2590_v0 = vpop.f32.mrf.mxu0  ;;  %v8797_v58 = vld [vmem:[%s10046_s27 + $0x284] ss:$16 sps:$4 sm:$0xff]   ;;  %v4095_v42 = vadd.f32 1.0, %v9257_v48  ;;  %v4294_v59 = vmul.f32 %v4094_v7, %v3494_v11 }
 0x20b   : > { %6296 = vmatpush1.bf16.msra.mxu1 %v8783_v24  ;;  %6136 = vmatprep.subr.bf16.mxu0 %v8788_v6  ;;  %v9259_v24 = vpop.eup %9258  ;;  %v3495_v6 = vmul.f32 0.5, %v11585_v61  ;;  %v11673_v15 = vadd.f32 %v2747_v25, %v2587_v46  ;;  %v2591_v30 = vadd.f32 %v2590_v0, %v11560_v13  ;;  %v2751_v34 = vpop.f32.mrf.mxu1  ;;  %v3502_v61 = vmul.f32 0.5, %v11594_v36 }
 0x20c   : > { %3213 = vmatmul.mubr.bf16.gmra.mxu0 %v9614_v5  ;;  %6297 = vmatprep.subr.bf16.mxu1 %v8791_v56  ;;  %v9616_v5 = vld [vmem:[%s14903_s0 + $0x44] ss:$16 sps:$4 sm:$0xff]   ;;  %v8792_v56 = vld [vmem:[%s10046_s27 + $0x80] ss:$16 sps:$4 sm:$0xff]   ;;  %v9261_v62 = vpop.eup %9260  ;;  %v4102_v48 = vadd.f32 1.0, %v9259_v24  ;;  %v3503_v46 = vmul.f32 0.5, %v11599_v35  ;;  %v2592_v0 = vpop.f32.mrf.mxu0  ;;  %9272 = verf.f32 %v3727_v38 }
 0x20d   : > { %3374 = vmatmul.mubr.bf16.gmra.mxu1 %v9615_v2  ;;  %3222 = vmatprep.mubr.bf16.mxu0 %v9616_v5  ;;  %v3734_v25 = vmul.f32 0.70710677, %v11666_v43  ;;  %v9617_v2 = vld [vmem:[%s14903_s0 + $0x4c] ss:$16 sps:$4 sm:$0xff]   ;;  %v4103_v5 = vadd.f32 1.0, %v9261_v62  ;;  %v11691_v55 = vadd.f32 %v2751_v34, %v2591_v30  ;;  %v2753_v36 = vpop.f32.mrf.mxu1  ;;  %v2593_v37 = vadd.f32 %v2592_v0, %v11564_v39 }
 0x20e   : > { %3383 = vmatprep.mubr.bf16.mxu1 %v9617_v2  ;;  %6137 = vmatpush1.bf16.msra.mxu0 %v8786_v21  ;;  %v3735_v22 = vmul.f32 0.70710677, %v11673_v15  ;;  %v8800_v35 = vld [vmem:[%s10046_s27 + $0x64] ss:$16 sps:$4 sm:$0xff]   ;;  %v9263_v24 = vpop.eup %9262  ;;  %v4302_v50 = vmul.f32 %v4102_v48, %v3502_v61  ;;  %v2594_v2 = vpop.f32.mrf.mxu0  ;;  %v4295_v62 = vmul.f32 %v4095_v42, %v3495_v6  ;;  %v8798_v61 = vld [vmem:[%s10046_s27 + $0x60] ss:$16 sps:$4 sm:$0xff]  }
 0x20f   : > { %6298 = vmatpush1.bf16.msra.mxu1 %v8789_v47  ;;  %6138 = vmatprep.subr.bf16.mxu0 %v8794_v52  ;;  %9274 = verf.f32 %v3734_v25  ;;  %v8803_v21 = vld [vmem:[%s10046_s27 + $0x264] ss:$16 sps:$4 sm:$0xff]   ;;  %v4303_v38 = vmul.f32 %v4103_v5, %v3503_v46  ;;  %v2755_v30 = vpop.f32.mrf.mxu1  ;;  %v3742_v47 = vmul.f32 0.70710677, %v11691_v55  ;;  %v11699_v52 = vadd.f32 %v2753_v36, %v2593_v37  ;;  %v9618_v0 = vld [vmem:[%s14903_s0 + $0x40] ss:$16 sps:$4 sm:$0xff]  }
 0x210   : > { %6299 = vmatprep.subr.bf16.mxu1 %v8797_v58  ;;  %9276 = verf.f32 %v3735_v22  ;;  %v11696_v34 = vpack.c.bf16 %v4302_v50, %v4294_v59  ;;  %v2595_v7 = vadd.f32 %v2594_v2, %v11560_v13  ;;  %v2596_v11 = vpop.f32.mrf.mxu0  ;;  %v9265_v48 = vpop.eup %9264  ;;  %v4110_v58 = vadd.f32 1.0, %v9263_v24  ;;  %v8801_v22 = vld [vmem:[%s10046_s27 + $0x260] ss:$16 sps:$4 sm:$0xff]   ;;  %v8806_v50 = vld [vmem:[%s10046_s27 + $0x44] ss:$16 sps:$4 sm:$0xff]  }
 0x211   : > { %v2597_v6 = vadd.f32 %v2596_v11, %v11564_v39  ;;  %v2757_v42 = vpop.f32.mrf.mxu1  ;;  %v11706_v59 = vpack.c.bf16 %v4303_v38, %v4295_v62  ;;  %v3510_v37 = vmul.f32 0.5, %v11611_v27  ;;  %v3511_v46 = vmul.f32 0.5, %v11619_v31  ;;  %v8809_v5 = vld [vmem:[%s10046_s27 + $0x244] ss:$16 sps:$4 sm:$0xff]   ;;  %v9619_v24 = vld [vmem:[%s14903_s0 + $0x48] ss:$16 sps:$4 sm:$0xff]  }
 0x212   : > { %15211 = vst [vmem:[#allocation39_spill] sm:$0xff] %v11696_v34  ;;  %6139 = vmatpush1.bf16.msra.mxu0 %v8792_v56  ;;  %v3743_v25 = vmul.f32 0.70710677, %v11699_v52  ;;  %v2600_v56 = vpop.f32.mrf.mxu0  ;;  %9278 = verf.f32 %v3742_v47  ;;  %v11715_v36 = vadd.f32 %v2755_v30, %v2595_v7  ;;  %v9620_v2 = vld [vmem:[%s14903_s0 + $0x64] ss:$16 sps:$4 sm:$0xff]   ;;  %v4111_v62 = vadd.f32 1.0, %v9265_v48 }
 0x213   : > { %6300 = vmatpush1.bf16.msra.mxu1 %v8795_v45  ;;  %6140 = vmatprep.subr.bf16.mxu0 %v8800_v35  ;;  %15212 = vst [vmem:[#allocation40_spill] sm:$0xff] %v11706_v59  ;;  %v9267_v45 = vpop.eup %9266  ;;  %v11717_v35 = vadd.f32 %v2757_v42, %v2597_v6  ;;  %v2601_v27 = vadd.f32 %v2600_v56, %v11560_v13  ;;  %v2761_v31 = vpop.f32.mrf.mxu1  ;;  %v3518_v38 = vmul.f32 0.5, %v11627_v16  ;;  %v3519_v47 = vmul.f32 0.5, %v11633_v32  ;;  %v9621_v11 = vld [vmem:[%s14903_s0 + $0x6c] ss:$16 sps:$4 sm:$0xff]  }
 0x214   : > { %3223 = vmatmul.mubr.bf16.gmra.mxu0 %v9618_v0  ;;  %6301 = vmatprep.subr.bf16.mxu1 %v8803_v21  ;;  %v9269_v21 = vpop.eup %9268  ;;  %v4118_v30 = vadd.f32 1.0, %v9267_v45  ;;  %v2602_v7 = vpop.f32.mrf.mxu0  ;;  %v8804_v6 = vld [vmem:[%s10046_s27 + $0x40] ss:$16 sps:$4 sm:$0xff]   ;;  %v4310_v42 = vmul.f32 %v4110_v58, %v3510_v37  ;;  %9280 = verf.f32 %v3743_v25  ;;  %v3750_v48 = vmul.f32 0.70710677, %v11715_v36 }
 0x215   : > { %3384 = vmatmul.mubr.bf16.gmra.mxu1 %v9619_v24  ;;  %3232 = vmatprep.mubr.bf16.mxu0 %v9620_v2  ;;  %v4119_v56 = vadd.f32 1.0, %v9269_v21  ;;  %v2763_v0 = vpop.f32.mrf.mxu1  ;;  %v8807_v16 = vld [vmem:[%s10046_s27 + $0x240] ss:$16 sps:$4 sm:$0xff]   ;;  %v3751_v32 = vmul.f32 0.70710677, %v11717_v35  ;;  %v11735_v24 = vadd.f32 %v2761_v31, %v2601_v27  ;;  %v2603_v2 = vadd.f32 %v2602_v7, %v11564_v39 }
 0x216   : > { %3393 = vmatprep.mubr.bf16.mxu1 %v9621_v11  ;;  %6141 = vmatpush1.bf16.msra.mxu0 %v8798_v61  ;;  %v4318_v45 = vmul.f32 %v4118_v30, %v3518_v38  ;;  %v2604_v61 = vpop.f32.mrf.mxu0  ;;  %v8812_v11 = vld [vmem:[%s10046_s27 + $0x24] ss:$16 sps:$4 sm:$0xff]   ;;  %v9271_v58 = vpop.eup %9270  ;;  %9282 = verf.f32 %v3750_v48  ;;  %v4311_v25 = vmul.f32 %v4111_v62, %v3511_v46  ;;  %v8813_v46 = vld [vmem:[%s10046_s27 + $0x220] ss:$16 sps:$4 sm:$0xff]   ;;  %v3551_v26 = vmul.f32 0.5, %v11717_v35 }
 0x217   : > { %6302 = vmatpush1.bf16.msra.mxu1 %v8801_v22  ;;  %6142 = vmatprep.subr.bf16.mxu0 %v8806_v50  ;;  %v4319_v37 = vmul.f32 %v4119_v56, %v3519_v47  ;;  %v2605_v22 = vadd.f32 %v2604_v61, %v11560_v13  ;;  %v2765_v50 = vpop.f32.mrf.mxu1  ;;  %9284 = verf.f32 %v3751_v32  ;;  %v3758_v27 = vmul.f32 0.70710677, %v11735_v24  ;;  %v8815_v38 = vld [vmem:[%s10046_s27 + $0x224] ss:$16 sps:$4 sm:$0xff]   ;;  %v8810_v56 = vld [vmem:[%s10046_s27 + $0x20] ss:$16 sps:$4 sm:$0xff]  }
 0x218   : > { %6303 = vmatprep.subr.bf16.mxu1 %v8809_v5  ;;  %v11740_v21 = vpack.c.bf16 %v4318_v45, %v4310_v42  ;;  %v2606_v31 = vpop.f32.mrf.mxu0  ;;  %v11744_v5 = vadd.f32 %v2763_v0, %v2603_v2  ;;  %v3526_v42 = vmul.f32 0.5, %v11650_v14  ;;  %v4126_v48 = vadd.f32 1.0, %v9271_v58  ;;  %v8818_v0 = vld [vmem:[%s10046_s27 + $0x4] ss:$16 sps:$4 sm:$0xff]  }
 0x219   : > { %v11746_v30 = vadd.f32 %v2765_v50, %v2605_v22  ;;  %v2607_v47 = vadd.f32 %v2606_v31, %v11564_v39  ;;  %v2767_v7 = vpop.f32.mrf.mxu1  ;;  %v9273_v62 = vpop.eup %9272  ;;  %9286 = verf.f32 %v3758_v27  ;;  %v8821_v32 = vld [vmem:[%s10046_s27 + $0x204] ss:$16 sps:$4 sm:$0xff]   ;;  %v11757_v2 = vpack.c.bf16 %v4319_v37, %v4311_v25  ;;  %v9623_v27 = vld [vmem:[%s14903_s0 + $0x68] ss:$16 sps:$4 sm:$0xff]  }
 0x21a   : > { %15213 = vst [vmem:[#allocation12_spill] sm:$0xff] %v11740_v21  ;;  %6143 = vmatpush1.bf16.msra.mxu0 %v8804_v6  ;;  %v2610_v45 = vpop.f32.mrf.mxu0  ;;  %v9622_v6 = vld [vmem:[%s14903_s0 + $0x60] ss:$16 sps:$4 sm:$0xff]   ;;  %v3534_v22 = vmul.f32 0.5, %v11666_v43  ;;  %v3759_v14 = vmul.f32 0.70710677, %v11744_v5 }
 0x21b   : > { %6304 = vmatpush1.bf16.msra.mxu1 %v8807_v16  ;;  %6144 = vmatprep.subr.bf16.mxu0 %v8812_v11  ;;  %15214 = vst [vmem:[#allocation13_spill] sm:$0xff] %v11757_v2  ;;  %v3527_v16 = vmul.f32 0.5, %v11657_v57  ;;  %v3766_v58 = vmul.f32 0.70710677, %v11746_v30  ;;  %v2771_v50 = vpop.f32.mrf.mxu1  ;;  %v9624_v11 = vld [vmem:[%s14903_s0 + $0x84] ss:$16 sps:$4 sm:$0xff]   ;;  %v11770_v25 = vadd.f32 %v2767_v7, %v2607_v47  ;;  %v2611_v31 = vadd.f32 %v2610_v45, %v11560_v13 }
 0x21c   : > { %3233 = vmatmul.mubr.bf16.gmra.mxu0 %v9622_v6  ;;  %v9275_v61 = vpop.eup %9274  ;;  %v3535_v43 = vmul.f32 0.5, %v11673_v15  ;;  %v2612_v6 = vpop.f32.mrf.mxu0  ;;  %6305 = vmatprep.subr.bf16.mxu1 %v8815_v38  ;;  %v4127_v29 = vadd.f32 1.0, %v9273_v62  ;;  %9288 = verf.f32 %v3759_v14  ;;  %v8816_v15 = vld [vmem:[%s10046_s27] ss:$16 sps:$4 sm:$0xff]   ;;  %v4326_v7 = vmul.f32 %v4126_v48, %v3526_v42  ;;  %v8824_v38 = vld [vmem:[%s10046_s27 + $0x1e4] ss:$16 sps:$4 sm:$0xff]  }
 0x21d   : > { %3394 = vmatmul.mubr.bf16.gmra.mxu1 %v9623_v27  ;;  %3242 = vmatprep.mubr.bf16.mxu0 %v9624_v11  ;;  %v9277_v37 = vpop.eup %9276  ;;  %v4134_v57 = vadd.f32 1.0, %v9275_v61  ;;  %v9625_v27 = vld [vmem:[%s14903_s0 + $0x8c] ss:$16 sps:$4 sm:$0xff]   ;;  %v2613_v61 = vadd.f32 %v2612_v6, %v11564_v39  ;;  %v2773_v12 = vpop.f32.mrf.mxu1  ;;  %v8819_v47 = vld [vmem:[%s10046_s27 + $0x200] ss:$16 sps:$4 sm:$0xff]   ;;  %9290 = verf.f32 %v3766_v58  ;;  %v11781_v14 = vadd.f32 %v2771_v50, %v2611_v31 }
 0x21e   : > { %3403 = vmatprep.mubr.bf16.mxu1 %v9625_v27  ;;  %v4135_v11 = vadd.f32 1.0, %v9277_v37  ;;  %6145 = vmatpush1.bf16.msra.mxu0 %v8810_v56  ;;  %v3767_v1 = vmul.f32 0.70710677, %v11770_v25  ;;  %v2614_v27 = vpop.f32.mrf.mxu0  ;;  %v8822_v58 = vld [vmem:[%s10046_s27 + $0x1e0] ss:$16 sps:$4 sm:$0xff]  }
 0x21f   : > { %6306 = vmatpush1.bf16.msra.mxu1 %v8813_v46  ;;  %v4334_v45 = vmul.f32 %v4134_v57, %v3534_v22  ;;  %6146 = vmatprep.subr.bf16.mxu0 %v8818_v0  ;;  %v11783_v37 = vadd.f32 %v2773_v12, %v2613_v61  ;;  %v2615_v56 = vadd.f32 %v2614_v27, %v11560_v13  ;;  %v2775_v46 = vpop.f32.mrf.mxu1  ;;  %v9279_v42 = vpop.eup %9278  ;;  %v8827_v57 = vld [vmem:[%s10046_s27 + $0x3e4] ss:$16 sps:$4 sm:$0xff]   ;;  %v8825_v12 = vld [vmem:[%s10046_s27 + $0x3e0] ss:$16 sps:$4 sm:$0xff]  }
 0x220   : > { %6307 = vmatprep.subr.bf16.mxu1 %v8821_v32  ;;  %v4335_v62 = vmul.f32 %v4135_v11, %v3535_v43  ;;  %9292 = verf.f32 %v3767_v1  ;;  %v2616_v22 = vpop.f32.mrf.mxu0  ;;  %v4327_v0 = vmul.f32 %v4127_v29, %v3527_v16  ;;  %v3774_v32 = vmul.f32 0.70710677, %v11781_v14  ;;  %v9626_v61 = vld [vmem:[%s14903_s0 + $0x80] ss:$16 sps:$4 sm:$0xff]   ;;  %v8830_v29 = vld [vmem:[%s10046_s27 + $0x1c4] ss:$16 sps:$4 sm:$0xff]  }
 0x221   : > { %v11786_v48 = vpack.c.bf16 %v4334_v45, %v4326_v7  ;;  %v3775_v50 = vmul.f32 0.70710677, %v11783_v37  ;;  %v2777_v43 = vpop.f32.mrf.mxu1  ;;  %v9281_v31 = vpop.eup %9280  ;;  %v11793_v6 = vadd.f32 %v2775_v46, %v2615_v56  ;;  %v2617_v11 = vadd.f32 %v2616_v22, %v11564_v39  ;;  %v8833_v16 = vld [vmem:[%s10046_s27 + $0x3c4] ss:$16 sps:$4 sm:$0xff]   ;;  %v9627_v45 = vld [vmem:[%s14903_s0 + $0x88] ss:$16 sps:$4 sm:$0xff]  }
 0x222   : > { %6147 = vmatpush1.bf16.msra.mxu0 %v8816_v15  ;;  %v2620_v1 = vpop.f32.mrf.mxu0  ;;  %v4142_v7 = vadd.f32 1.0, %v9279_v42  ;;  %9294 = verf.f32 %v3774_v32  ;;  %v9628_v27 = vld [vmem:[%s14903_s0 + $0xa4] ss:$16 sps:$4 sm:$0xff]   ;;  %v11808_v56 = vpack.c.bf16 %v4335_v62, %v4327_v0  ;;  %v3542_v46 = vmul.f32 0.5, %v11691_v55 }
 0x223   : > { %15215 = vst [vmem:[#allocation14_spill] sm:$0xff] %v11786_v48  ;;  %6308 = vmatpush1.bf16.msra.mxu1 %v8819_v47  ;;  %6148 = vmatprep.subr.bf16.mxu0 %v8824_v38  ;;  %v2621_v15 = vadd.f32 %v2620_v1, %v11560_v13  ;;  %v2781_v47 = vpop.f32.mrf.mxu1  ;;  %v9283_v38 = vpop.eup %9282  ;;  %v3550_v42 = vmul.f32 0.5, %v11715_v36  ;;  %9296 = verf.f32 %v3775_v50  ;;  %v3782_v22 = vmul.f32 0.70710677, %v11793_v6  ;;  %v9629_v1 = vld [vmem:[%s14903_s0 + $0xac] ss:$16 sps:$4 sm:$0xff]  }
 0x224   : > { %3243 = vmatmul.mubr.bf16.gmra.mxu0 %v9626_v61  ;;  %15216 = vst [vmem:[#allocation15_spill] sm:$0xff] %v11808_v56  ;;  %v2622_v32 = vpop.f32.mrf.mxu0  ;;  %6309 = vmatprep.subr.bf16.mxu1 %v8827_v57  ;;  %v9285_v61 = vpop.eup %9284  ;;  %v4150_v62 = vadd.f32 1.0, %v9283_v38  ;;  %v11816_v0 = vadd.f32 %v2777_v43, %v2617_v11  ;;  %v8828_v50 = vld [vmem:[%s10046_s27 + $0x1c0] ss:$16 sps:$4 sm:$0xff]   ;;  %v4143_v41 = vadd.f32 1.0, %v9281_v31 }
 0x225   : > { %3404 = vmatmul.mubr.bf16.gmra.mxu1 %v9627_v45  ;;  %3252 = vmatprep.mubr.bf16.mxu0 %v9628_v27  ;;  %v11818_v55 = vadd.f32 %v2781_v47, %v2621_v15  ;;  %v2623_v36 = vadd.f32 %v2622_v32, %v11564_v39  ;;  %v2783_v45 = vpop.f32.mrf.mxu1  ;;  %v8831_v27 = vld [vmem:[%s10046_s27 + $0x3c0] ss:$16 sps:$4 sm:$0xff]   ;;  %v4151_v4 = vadd.f32 1.0, %v9285_v61  ;;  %9298 = verf.f32 %v3782_v22  ;;  %v8836_v43 = vld [vmem:[%s10046_s27 + $0x1a4] ss:$16 sps:$4 sm:$0xff]  }
 0x226   : > { %3413 = vmatprep.mubr.bf16.mxu1 %v9629_v1  ;;  %6149 = vmatpush2.bf16.msra.mxu0 %v8822_v58  ;;  %v2624_v57 = vpop.f32.mrf.mxu0  ;;  %v9287_v11 = vpop.eup %9286  ;;  %v4342_v15 = vmul.f32 %v4142_v7, %v3542_v46  ;;  %v3543_v47 = vmul.f32 0.5, %v11699_v52  ;;  %v4350_v38 = vmul.f32 %v4150_v62, %v3550_v42  ;;  %v3783_v58 = vmul.f32 0.70710677, %v11816_v0  ;;  %v8834_v42 = vld [vmem:[%s10046_s27 + $0x1a0] ss:$16 sps:$4 sm:$0xff]  }
 0x227   : > { %6310 = vmatpush2.bf16.msra.mxu1 %v8825_v12  ;;  %6150 = vmatprep.subr.bf16.mxu0 %v8830_v29  ;;  %v2785_v12 = vpop.f32.mrf.mxu1  ;;  %v4351_v31 = vmul.f32 %v4151_v4, %v3551_v26  ;;  %v4158_v35 = vadd.f32 1.0, %v9287_v11  ;;  %v3790_v22 = vmul.f32 0.70710677, %v11818_v55  ;;  %v11828_v32 = vadd.f32 %v2783_v45, %v2623_v36  ;;  %v8837_v26 = vld [vmem:[%s10046_s27 + $0x3a0] ss:$16 sps:$4 sm:$0xff]  }
 0x228   : > { %6311 = vmatprep.subr.bf16.mxu1 %v8833_v16  ;;  %v2626_v29 = vpop.f32.mrf.mxu0  ;;  %v8839_v16 = vld [vmem:[%s10046_s27 + $0x3a4] ss:$16 sps:$4 sm:$0xff]   ;;  %v11831_v1 = vpack.c.bf16 %v4350_v38, %v4342_v15  ;;  %9300 = verf.f32 %v3783_v58  ;;  %v2625_v52 = vadd.f32 %v2624_v57, %v11560_v13  ;;  %v4343_v62 = vmul.f32 %v4143_v41, %v3543_v47  ;;  %v9630_v57 = vld [vmem:[%s14903_s0 + $0xa0] ss:$16 sps:$4 sm:$0xff]   ;;  %v9631_v58 = vld [vmem:[%s14903_s0 + $0xa8] ss:$16 sps:$4 sm:$0xff]  }
 0x229   : > { %v2627_v7 = vadd.f32 %v2626_v29, %v11564_v39  ;;  %v2787_v46 = vpop.f32.mrf.mxu1  ;;  %v8842_v4 = vld [vmem:[%s10046_s27 + $0x184] ss:$16 sps:$4 sm:$0xff]   ;;  %v9289_v61 = vpop.eup %9288  ;;  %v3558_v36 = vmul.f32 0.5, %v11735_v24  ;;  %9302 = verf.f32 %v3790_v22  ;;  %v3791_v45 = vmul.f32 0.70710677, %v11828_v32 }
 0x22a   : > { %15217 = vst [vmem:[#allocation42_spill] sm:$0xff] %v11831_v1  ;;  %6151 = vmatpush2.bf16.msra.mxu0 %v8828_v50  ;;  %v2630_v11 = vpop.f32.mrf.mxu0  ;;  %v8845_v15 = vld [vmem:[%s10046_s27 + $0x384] ss:$16 sps:$4 sm:$0xff]   ;;  %v9291_v50 = vpop.eup %9290  ;;  %v11845_v38 = vadd.f32 %v2785_v12, %v2625_v52  ;;  %v4159_v22 = vadd.f32 1.0, %v9289_v61  ;;  %v9633_v52 = vld [vmem:[%s14903_s0 + $0xcc] ss:$16 sps:$4 sm:$0xff]  }
 0x22b   : > { %6312 = vmatpush2.bf16.msra.mxu1 %v8831_v27  ;;  %6152 = vmatprep.subr.bf16.mxu0 %v8836_v43  ;;  %v3559_v27 = vmul.f32 0.5, %v11744_v5  ;;  %v11847_v41 = vadd.f32 %v2787_v46, %v2627_v7  ;;  %v2631_v24 = vadd.f32 %v2630_v11, %v11560_v13  ;;  %v2791_v47 = vpop.f32.mrf.mxu1  ;;  %v9632_v43 = vld [vmem:[%s14903_s0 + $0xc4] ss:$16 sps:$4 sm:$0xff]   ;;  %v3566_v5 = vmul.f32 0.5, %v11746_v30  ;;  %v8840_v7 = vld [vmem:[%s10046_s27 + $0x180] ss:$16 sps:$4 sm:$0xff]  }
 0x22c   : > { %3253 = vmatmul.mubr.bf16.gmra.mxu0 %v9630_v57  ;;  %v4166_v12 = vadd.f32 1.0, %v9291_v50  ;;  %v2632_v29 = vpop.f32.mrf.mxu0  ;;  %6313 = vmatprep.subr.bf16.mxu1 %v8839_v16  ;;  %v11861_v46 = vpack.c.bf16 %v4351_v31, %v4343_v62  ;;  %v4358_v57 = vmul.f32 %v4158_v35, %v3558_v36  ;;  %9304 = verf.f32 %v3791_v45  ;;  %v8843_v50 = vld [vmem:[%s10046_s27 + $0x380] ss:$16 sps:$4 sm:$0xff]   ;;  %v8848_v35 = vld [vmem:[%s10046_s27 + $0x164] ss:$16 sps:$4 sm:$0xff]  }
 0x22d   : > { %3414 = vmatmul.mubr.bf16.gmra.mxu1 %v9631_v58  ;;  %3262 = vmatprep.mubr.bf16.mxu0 %v9632_v43  ;;  %v9293_v11 = vpop.eup %9292  ;;  %v3567_v58 = vmul.f32 0.5, %v11770_v25  ;;  %v3798_v30 = vmul.f32 0.70710677, %v11845_v38  ;;  %v2793_v61 = vpop.f32.mrf.mxu1  ;;  %v11867_v16 = vadd.f32 %v2791_v47, %v2631_v24  ;;  %v2633_v25 = vadd.f32 %v2632_v29, %v11564_v39  ;;  %v8851_v47 = vld [vmem:[%s10046_s27 + $0x364] ss:$16 sps:$4 sm:$0xff]  }
 0x22e   : > { %3423 = vmatprep.mubr.bf16.mxu1 %v9633_v52  ;;  %15218 = vst [vmem:[#allocation43_spill] sm:$0xff] %v11861_v46  ;;  %6153 = vmatpush2.bf16.msra.mxu0 %v8834_v42  ;;  %v4366_v43 = vmul.f32 %v4166_v12, %v3566_v5  ;;  %v4167_v19 = vadd.f32 1.0, %v9293_v11  ;;  %v3799_v52 = vmul.f32 0.70710677, %v11847_v41  ;;  %v2634_v31 = vpop.f32.mrf.mxu0  ;;  %v4359_v36 = vmul.f32 %v4159_v22, %v3559_v27  ;;  %v8849_v27 = vld [vmem:[%s10046_s27 + $0x360] ss:$16 sps:$4 sm:$0xff]  }
 0x22f   : > { %6314 = vmatpush2.bf16.msra.mxu1 %v8837_v26  ;;  %6154 = vmatprep.subr.bf16.mxu0 %v8842_v4  ;;  %9306 = verf.f32 %v3798_v30  ;;  %v2635_v62 = vadd.f32 %v2634_v31, %v11560_v13  ;;  %v2795_v42 = vpop.f32.mrf.mxu1  ;;  %v9295_v26 = vpop.eup %9294  ;;  %v11876_v12 = vadd.f32 %v2793_v61, %v2633_v25  ;;  %v8846_v30 = vld [vmem:[%s10046_s27 + $0x160] ss:$16 sps:$4 sm:$0xff]   ;;  %v8857_v61 = vld [vmem:[%s10046_s27 + $0x344] ss:$16 sps:$4 sm:$0xff]   ;;  %v9635_v25 = vld [vmem:[%s14903_s0 + $0xc8] ss:$16 sps:$4 sm:$0xff]  }
 0x230   : > { %6315 = vmatprep.subr.bf16.mxu1 %v8845_v15  ;;  %v11872_v45 = vpack.c.bf16 %v4366_v43, %v4358_v57  ;;  %v4367_v5 = vmul.f32 %v4167_v19, %v3567_v58  ;;  %9308 = verf.f32 %v3799_v52  ;;  %v2636_v24 = vpop.f32.mrf.mxu0  ;;  %v9297_v4 = vpop.eup %9296  ;;  %v3806_v15 = vmul.f32 0.70710677, %v11867_v16  ;;  %v9634_v58 = vld [vmem:[%s14903_s0 + $0xc0] ss:$16 sps:$4 sm:$0xff]   ;;  %v8854_v43 = vld [vmem:[%s10046_s27 + $0x144] ss:$16 sps:$4 sm:$0xff]  }
 0x231   : > { %v11878_v29 = vadd.f32 %v2795_v42, %v2635_v62  ;;  %v2797_v11 = vpop.f32.mrf.mxu1  ;;  %v4174_v22 = vadd.f32 1.0, %v9295_v26  ;;  %v2637_v19 = vadd.f32 %v2636_v24, %v11564_v39  ;;  %v9636_v62 = vld [vmem:[%s14903_s0 + $0xe4] ss:$16 sps:$4 sm:$0xff]   ;;  %v3582_v42 = vmul.f32 0.5, %v11793_v6  ;;  %v9637_v24 = vld [vmem:[%s14903_s0 + $0xec] ss:$16 sps:$4 sm:$0xff]  }
 0x232   : > { %15219 = vst [vmem:[#allocation44_spill] sm:$0xff] %v11872_v45  ;;  %6155 = vmatpush2.bf16.msra.mxu0 %v8840_v7  ;;  %v2640_v57 = vpop.f32.mrf.mxu0  ;;  %v11888_v52 = vpack.c.bf16 %v4367_v5, %v4359_v36  ;;  %v9299_v31 = vpop.eup %9298  ;;  %9310 = verf.f32 %v3806_v15  ;;  %v3807_v7 = vmul.f32 0.70710677, %v11876_v12  ;;  %v3583_v15 = vmul.f32 0.5, %v11816_v0  ;;  %v8860_v0 = vld [vmem:[%s10046_s27 + $0x124] ss:$16 sps:$4 sm:$0xff]  }
 0x233   : > { %6316 = vmatpush2.bf16.msra.mxu1 %v8843_v50  ;;  %6156 = vmatprep.subr.bf16.mxu0 %v8848_v35  ;;  %v2801_v50 = vpop.f32.mrf.mxu1  ;;  %v3574_v35 = vmul.f32 0.5, %v11781_v14  ;;  %v4182_v26 = vadd.f32 1.0, %v9299_v31  ;;  %v3814_v36 = vmul.f32 0.70710677, %v11878_v29  ;;  %v2641_v14 = vadd.f32 %v2640_v57, %v11560_v13  ;;  %v8852_v31 = vld [vmem:[%s10046_s27 + $0x140] ss:$16 sps:$4 sm:$0xff]  }
 0x234   : > { %3263 = vmatmul.mubr.bf16.gmra.mxu0 %v9634_v58  ;;  %15220 = vst [vmem:[#allocation45_spill] sm:$0xff] %v11888_v52  ;;  %v2642_v5 = vpop.f32.mrf.mxu0  ;;  %6317 = vmatprep.subr.bf16.mxu1 %v8851_v47  ;;  %v11904_v58 = vadd.f32 %v2797_v11, %v2637_v19  ;;  %v4175_v3 = vadd.f32 1.0, %v9297_v4  ;;  %v3575_v4 = vmul.f32 0.5, %v11783_v37 }
 0x235   : > { %3424 = vmatmul.mubr.bf16.gmra.mxu1 %v9635_v25  ;;  %3272 = vmatprep.mubr.bf16.mxu0 %v9636_v62  ;;  %v2643_v25 = vadd.f32 %v2642_v5, %v11564_v39  ;;  %v2803_v6 = vpop.f32.mrf.mxu1  ;;  %v8855_v62 = vld [vmem:[%s10046_s27 + $0x340] ss:$16 sps:$4 sm:$0xff]   ;;  %v9301_v40 = vpop.eup %9300  ;;  %v4374_v45 = vmul.f32 %v4174_v22, %v3574_v35  ;;  %v4382_v52 = vmul.f32 %v4182_v26, %v3582_v42  ;;  %9312 = verf.f32 %v3814_v36  ;;  %v8863_v26 = vld [vmem:[%s10046_s27 + $0x324] ss:$16 sps:$4 sm:$0xff]  }
 0x236   : > { %3433 = vmatprep.mubr.bf16.mxu1 %v9637_v24  ;;  %6157 = vmatpush2.bf16.msra.mxu0 %v8846_v30  ;;  %v2644_v47 = vpop.f32.mrf.mxu0  ;;  %v9303_v11 = vpop.eup %9302  ;;  %v4183_v19 = vadd.f32 1.0, %v9301_v40  ;;  %9314 = verf.f32 %v3807_v7  ;;  %v3815_v57 = vmul.f32 0.70710677, %v11904_v58  ;;  %v11912_v30 = vadd.f32 %v2801_v50, %v2641_v14  ;;  %v8858_v42 = vld [vmem:[%s10046_s27 + $0x120] ss:$16 sps:$4 sm:$0xff]  }
 0x237   : > { %6318 = vmatpush2.bf16.msra.mxu1 %v8849_v27  ;;  %6158 = vmatprep.subr.bf16.mxu0 %v8854_v43  ;;  %v2805_v27 = vpop.f32.mrf.mxu1  ;;  %v11915_v22 = vpack.c.bf16 %v4382_v52, %v4374_v45  ;;  %v11917_v35 = vadd.f32 %v2803_v6, %v2643_v25  ;;  %v2645_v43 = vadd.f32 %v2644_v47, %v11560_v13  ;;  %v8861_v36 = vld [vmem:[%s10046_s27 + $0x320] ss:$16 sps:$4 sm:$0xff]   ;;  %v8866_v5 = vld [vmem:[%s10046_s27 + $0x104] ss:$16 sps:$4 sm:$0xff]   ;;  %v3590_v52 = vmul.f32 0.5, %v11818_v55 }
 0x238   : > { %6319 = vmatprep.subr.bf16.mxu1 %v8857_v61  ;;  %v2646_v61 = vpop.f32.mrf.mxu0  ;;  %v4383_v40 = vmul.f32 %v4183_v19, %v3583_v15  ;;  %9316 = verf.f32 %v3815_v57  ;;  %v3822_v7 = vmul.f32 0.70710677, %v11912_v30  ;;  %v4375_v45 = vmul.f32 %v4175_v3, %v3575_v4  ;;  %v9638_v15 = vld [vmem:[%s14903_s0 + $0xe0] ss:$16 sps:$4 sm:$0xff]   ;;  %v8869_v6 = vld [vmem:[%s10046_s27 + $0x304] ss:$16 sps:$4 sm:$0xff]  }
 0x239   : > { %15221 = vst [vmem:[#allocation46_spill] sm:$0xff] %v11915_v22  ;;  %v2807_v50 = vpop.f32.mrf.mxu1  ;;  %v9305_v37 = vpop.eup %9304  ;;  %v4190_v24 = vadd.f32 1.0, %v9303_v11  ;;  %v3823_v14 = vmul.f32 0.70710677, %v11917_v35  ;;  %v9639_v47 = vld [vmem:[%s14903_s0 + $0xe8] ss:$16 sps:$4 sm:$0xff]  }
 0x23a   : > { %6159 = vmatpush2.bf16.msra.mxu0 %v8852_v31  ;;  %v2650_v25 = vpop.f32.mrf.mxu0  ;;  %9318 = verf.f32 %v3822_v7  ;;  %v11931_v31 = vadd.f32 %v2805_v27, %v2645_v43  ;;  %v9640_v11 = vld [vmem:[%s14903_s0 + $0x104] ss:$16 sps:$4 sm:$0xff]   ;;  %v3591_v19 = vmul.f32 0.5, %v11828_v32  ;;  %v3598_v57 = vmul.f32 0.5, %v11845_v38  ;;  %v9641_v43 = vld [vmem:[%s14903_s0 + $0x10c] ss:$16 sps:$4 sm:$0xff]  }
 0x23b   : > { %6320 = vmatpush2.bf16.msra.mxu1 %v8855_v62  ;;  %6160 = vmatprep.subr.bf16.mxu0 %v8860_v0  ;;  %v2647_v62 = vadd.f32 %v2646_v61, %v11564_v39  ;;  %v2651_v3 = vadd.f32 %v2650_v25, %v11560_v13  ;;  %v2811_v55 = vpop.f32.mrf.mxu1  ;;  %v3599_v27 = vmul.f32 0.5, %v11847_v41  ;;  %v8864_v61 = vld [vmem:[%s10046_s27 + $0x100] ss:$16 sps:$4 sm:$0xff]   ;;  %v11948_v7 = vpack.c.bf16 %v4383_v40, %v4375_v45 }
 0x23c   : > { %3273 = vmatmul.mubr.bf16.gmra.mxu0 %v9638_v15  ;;  %v9307_v0 = vpop.eup %9306  ;;  %v2652_v4 = vpop.f32.mrf.mxu0  ;;  %6321 = vmatprep.subr.bf16.mxu1 %v8863_v26  ;;  %v4191_v15 = vadd.f32 1.0, %v9305_v37  ;;  %v3830_v32 = vmul.f32 0.70710677, %v11931_v31  ;;  %v8867_v41 = vld [vmem:[%s10046_s27 + $0x300] ss:$16 sps:$4 sm:$0xff]   ;;  %9320 = verf.f32 %v3823_v14  ;;  %v4390_v45 = vmul.f32 %v4190_v24, %v3590_v52 }
 0x23d   : > { %3434 = vmatmul.mubr.bf16.gmra.mxu1 %v9639_v47  ;;  %3282 = vmatprep.mubr.bf16.mxu0 %v9640_v11  ;;  %15222 = vst [vmem:[#allocation47_spill] sm:$0xff] %v11948_v7  ;;  %v9309_v25 = vpop.eup %9308  ;;  %v4198_v47 = vadd.f32 1.0, %v9307_v0  ;;  %v11951_v38 = vadd.f32 %v2807_v50, %v2647_v62  ;;  %v2813_v11 = vpop.f32.mrf.mxu1  ;;  %v11954_v23 = vadd.f32 %v2811_v55, %v2651_v3  ;;  %v8872_v37 = vld [vmem:[%s10046_s27 + $0x4e4] ss:$16 sps:$4 sm:$0xff]  }
 0x23e   : > { %3443 = vmatprep.mubr.bf16.mxu1 %v9641_v43  ;;  %6161 = vmatpush2.bf16.msra.mxu0 %v8858_v42  ;;  %v4199_v22 = vadd.f32 1.0, %v9309_v25  ;;  %v2653_v26 = vadd.f32 %v2652_v4, %v11564_v39  ;;  %v2654_v40 = vpop.f32.mrf.mxu0  ;;  %9322 = verf.f32 %v3830_v32  ;;  %v8875_v55 = vld [vmem:[%s10046_s27 + $0x6e4] ss:$16 sps:$4 sm:$0xff]   ;;  %v4391_v25 = vmul.f32 %v4191_v15, %v3591_v19 }
 0x23f   : > { %6322 = vmatpush2.bf16.msra.mxu1 %v8861_v36  ;;  %6162 = vmatprep.subr.bf16.mxu0 %v8866_v5  ;;  %v4398_v0 = vmul.f32 %v4198_v47, %v3598_v57  ;;  %v3831_v50 = vmul.f32 0.70710677, %v11951_v38  ;;  %v2815_v62 = vpop.f32.mrf.mxu1  ;;  %v9311_v42 = vpop.eup %9310  ;;  %v3838_v43 = vmul.f32 0.70710677, %v11954_v23  ;;  %v2655_v5 = vadd.f32 %v2654_v40, %v11560_v13 }
 0x240   : > { %6323 = vmatprep.subr.bf16.mxu1 %v8869_v6  ;;  %v4399_v36 = vmul.f32 %v4199_v22, %v3599_v27  ;;  %v11960_v14 = vadd.f32 %v2813_v11, %v2653_v26  ;;  %v2656_v3 = vpop.f32.mrf.mxu0  ;;  %v4206_v24 = vadd.f32 1.0, %v9311_v42  ;;  %v9642_v27 = vld [vmem:[%s14903_s0 + $0x100] ss:$16 sps:$4 sm:$0xff]   ;;  %v3606_v15 = vmul.f32 0.5, %v11867_v16  ;;  %v9644_v26 = vld [vmem:[%s14903_s0 + $0x124] ss:$16 sps:$4 sm:$0xff]  }
 0x241   : > { %v11963_v4 = vpack.c.bf16 %v4398_v0, %v4390_v45  ;;  %9324 = verf.f32 %v3831_v50  ;;  %v2817_v52 = vpop.f32.mrf.mxu1  ;;  %v2657_v22 = vadd.f32 %v2656_v3, %v11564_v39  ;;  %v3614_v47 = vmul.f32 0.5, %v11878_v29  ;;  %v9645_v45 = vld [vmem:[%s14903_s0 + $0x12c] ss:$16 sps:$4 sm:$0xff]  }
 0x242   : > { %6163 = vmatpush2.bf16.msra.mxu0 %v8864_v61  ;;  %9326 = verf.f32 %v3838_v43  ;;  %v3839_v6 = vmul.f32 0.70710677, %v11960_v14  ;;  %v2660_v57 = vpop.f32.mrf.mxu0  ;;  %v9313_v19 = vpop.eup %9312  ;;  %v11973_v61 = vadd.f32 %v2815_v62, %v2655_v5  ;;  %v11987_v0 = vpack.c.bf16 %v4399_v36, %v4391_v25 }
 0x243   : > { %15223 = vst [vmem:[#allocation48_spill] sm:$0xff] %v11963_v4  ;;  %6324 = vmatpush2.bf16.msra.mxu1 %v8867_v41  ;;  %6454 = vmatprep.subr.bf16.mxu0 %v8872_v37  ;;  %v2661_v32 = vadd.f32 %v2660_v57, %v11560_v13  ;;  %v2821_v11 = vpop.f32.mrf.mxu1  ;;  %v9643_v41 = vld [vmem:[%s14903_s0 + $0x108] ss:$16 sps:$4 sm:$0xff]   ;;  %v9315_v40 = vpop.eup %9314  ;;  %v4214_v37 = vadd.f32 1.0, %v9313_v19  ;;  %v11982_v16 = vadd.f32 %v2817_v52, %v2657_v22  ;;  %v3615_v50 = vmul.f32 0.5, %v11904_v58 }
 0x244   : > { %3283 = vmatmul.mubr.bf16.gmra.mxu0 %v9642_v27  ;;  %9328 = verf.f32 %v3839_v6  ;;  %v2662_v29 = vpop.f32.mrf.mxu0  ;;  %6615 = vmatprep.subr.bf16.mxu1 %v8875_v55  ;;  %15224 = vst [vmem:[#allocation49_spill] sm:$0xff] %v11987_v0  ;;  %v3846_v62 = vmul.f32 0.70710677, %v11973_v61  ;;  %v4406_v5 = vmul.f32 %v4206_v24, %v3606_v15  ;;  %v4207_v27 = vadd.f32 1.0, %v9315_v40 }
 0x245   : > { %3444 = vmatmul.mubr.bf16.gmra.mxu1 %v9643_v41  ;;  %3292 = vmatprep.mubr.bf16.mxu0 %v9644_v26  ;;  %v11991_v42 = vadd.f32 %v2821_v11, %v2661_v32  ;;  %v2823_v43 = vpop.f32.mrf.mxu1  ;;  %v9317_v3 = vpop.eup %9316  ;;  %v4414_v52 = vmul.f32 %v4214_v37, %v3614_v47  ;;  %v3847_v6 = vmul.f32 0.70710677, %v11982_v16  ;;  %v2663_v22 = vadd.f32 %v2662_v29, %v11564_v39 }
 0x246   : > { %3453 = vmatprep.mubr.bf16.mxu1 %v9645_v45  ;;  %v2664_v57 = vpop.f32.mrf.mxu0  ;;  %v4215_v19 = vadd.f32 1.0, %v9317_v3  ;;  %9330 = verf.f32 %v3846_v62  ;;  %v3607_v47 = vmul.f32 0.5, %v11876_v12  ;;  %v648_v26 = vsub.s32 4, %v15194_v10  ;;  %v9646_v62 = vld [vmem:[%s14903_s0 + $0x120] ss:$16 sps:$4 sm:$0xff]  }
 0x247   : > { %v3854_v36 = vmul.f32 0.70710677, %v11991_v42  ;;  %v2825_v55 = vpop.f32.mrf.mxu1  ;;  %v9319_v58 = vpop.eup %9318  ;;  %v11996_v25 = vpack.c.bf16 %v4414_v52, %v4406_v5  ;;  %9332 = verf.f32 %v3847_v6  ;;  %v11998_v32 = vadd.f32 %v2823_v43, %v2663_v22  ;;  %v9647_v6 = vld [vmem:[%s14903_s0 + $0x128] ss:$16 sps:$4 sm:$0xff]   ;;  %v9648_v22 = vld [vmem:[%s14903_s0 + $0x144] ss:$16 sps:$4 sm:$0xff]  }
 0x248   : > { %v2665_v24 = vadd.f32 %v2664_v57, %v11560_v13  ;;  %v2666_v15 = vpop.f32.mrf.mxu0  ;;  %v4415_v40 = vmul.f32 %v4215_v19, %v3615_v50  ;;  %v3622_v12 = vmul.f32 0.5, %v11912_v30  ;;  %v4222_v3 = vadd.f32 1.0, %v9319_v58  ;;  %v9649_v58 = vld [vmem:[%s14903_s0 + $0x14c] ss:$16 sps:$4 sm:$0xff]  }
 0x249   : > { %15225 = vst [vmem:[#allocation50_spill] sm:$0xff] %v11996_v25  ;;  %v2667_v11 = vadd.f32 %v2666_v15, %v11564_v39  ;;  %v2827_v41 = vpop.f32.mrf.mxu1  ;;  %9334 = verf.f32 %v3854_v36  ;;  %v3855_v37 = vmul.f32 0.70710677, %v11998_v32  ;;  %v9321_v43 = vpop.eup %9320  ;;  %v4407_v19 = vmul.f32 %v4207_v27, %v3607_v47 }
 0x24a   : > { %v12005_v29 = vadd.f32 %v2825_v55, %v2665_v24  ;;  %v2670_v45 = vpop.f32.mrf.mxu0  ;;  %v3630_v30 = vmul.f32 0.5, %v11931_v31  ;;  %v3631_v15 = vmul.f32 0.5, %v11951_v38  ;;  %v4223_v47 = vadd.f32 1.0, %v9321_v43 }
 0x24b   : > { %v12011_v5 = vadd.f32 %v2827_v41, %v2667_v11  ;;  %v2671_v52 = vadd.f32 %v2670_v45, %v11560_v13  ;;  %v2831_v50 = vpop.f32.mrf.mxu1  ;;  %v9323_v57 = vpop.eup %9322  ;;  %9336 = verf.f32 %v3855_v37  ;;  %v3623_v25 = vmul.f32 0.5, %v11917_v35 }
 0x24c   : > { %3293 = vmatmul.mubr.bf16.gmra.mxu0 %v9646_v62  ;;  %v3862_v36 = vmul.f32 0.70710677, %v12005_v29  ;;  %v2672_v55 = vpop.f32.mrf.mxu0  ;;  %v4230_v24 = vadd.f32 1.0, %v9323_v57  ;;  %v12030_v62 = vpack.c.bf16 %v4415_v40, %v4407_v19 }
 0x24d   : > { %3454 = vmatmul.mubr.bf16.gmra.mxu1 %v9647_v6  ;;  %3302 = vmatprep.mubr.bf16.mxu0 %v9648_v22  ;;  %v3863_v11 = vmul.f32 0.70710677, %v12011_v5  ;;  %v12027_v41 = vadd.f32 %v2831_v50, %v2671_v52  ;;  %v2833_v45 = vpop.f32.mrf.mxu1  ;;  %v2673_v31 = vadd.f32 %v2672_v55, %v11564_v39  ;;  %v4422_v22 = vmul.f32 %v4222_v3, %v3622_v12  ;;  %v9650_v3 = vld [vmem:[%s10040_s15] sm:$0xff] }
 0x24e   : > { %3463 = vmatprep.mubr.bf16.mxu1 %v9649_v58  ;;  %v9325_v27 = vpop.eup %9324  ;;  %9338 = verf.f32 %v3862_v36  ;;  %v2674_v37 = vpop.f32.mrf.mxu0  ;;  %15226 = vst [vmem:[#allocation51_spill] sm:$0xff] %v12030_v62  ;;  %v4430_v58 = vmul.f32 %v4230_v24, %v3630_v30  ;;  %v12041_v30 = vrot.slane %v9650_v3, %v648_v26  ;;  %v4423_v24 = vmul.f32 %v4223_v47, %v3623_v25  ;;  %v9652_v25 = vld [vmem:[%s14903_s0 + $0x148] ss:$16 sps:$4 sm:$0xff]   ;;  %v9653_v47 = vld [vmem:[%s14903_s0 + $0x164] ss:$16 sps:$4 sm:$0xff]  }
 0x24f   : > { %v9327_v6 = vpop.eup %9326  ;;  %v4231_v57 = vadd.f32 1.0, %v9325_v27  ;;  %9340 = verf.f32 %v3863_v11  ;;  %v2835_v38 = vpop.f32.mrf.mxu1  ;;  %v3870_v52 = vmul.f32 0.70710677, %v12027_v41  ;;  %v12034_v50 = vadd.f32 %v2833_v45, %v2673_v31  ;;  %v9651_v45 = vld [vmem:[%s14903_s0 + $0x140] ss:$16 sps:$4 sm:$0xff]  }
 0x250   : > { %v2675_v43 = vadd.f32 %v2674_v37, %v11560_v13  ;;  %v2676_v36 = vpop.f32.mrf.mxu0  ;;  %v12037_v4 = vpack.c.bf16 %v4430_v58, %v4422_v22  ;;  %v4238_v11 = vadd.f32 1.0, %v9327_v6  ;;  %v652_v27 = vsub.s32 5, %v15194_v10 }
 0x251   : > { %v9329_v55 = vpop.eup %9328  ;;  %v4431_v40 = vmul.f32 %v4231_v57, %v3631_v15  ;;  %v2677_v19 = vadd.f32 %v2676_v36, %v11564_v39  ;;  %v2837_v12 = vpop.f32.mrf.mxu1  ;;  %9342 = verf.f32 %v3870_v52  ;;  %v3871_v31 = vmul.f32 0.70710677, %v12034_v50 }
 0x252   : > { %15227 = vst [vmem:[#allocation52_spill] sm:$0xff] %v12037_v4  ;;  %v2680_v35 = vpop.f32.mrf.mxu0  ;;  %v12048_v15 = vadd.f32 %v2835_v38, %v2675_v43  ;;  %v3638_v58 = vmul.f32 0.5, %v11954_v23  ;;  %v3639_v57 = vmul.f32 0.5, %v11960_v14  ;;  %v4239_v38 = vadd.f32 1.0, %v9329_v55 }
 0x253   : > { %v12050_v37 = vadd.f32 %v2837_v12, %v2677_v19  ;;  %v2681_v26 = vadd.f32 %v2680_v35, %v11560_v13  ;;  %v2841_v22 = vpop.f32.mrf.mxu1  ;;  %v9331_v6 = vpop.eup %9330  ;;  %v9654_v13 = vld [vmem:[%s14903_s0 + $0x16c] ss:$16 sps:$4 sm:$0xff]   ;;  %v12064_v43 = vpack.c.bf16 %v4431_v40, %v4423_v24  ;;  %v3646_v19 = vmul.f32 0.5, %v11973_v61 }
 0x254   : > { %3303 = vmatmul.mubr.bf16.gmra.mxu0 %v9651_v45  ;;  %v2682_v52 = vpop.f32.mrf.mxu0  ;;  %v9333_v36 = vpop.eup %9332  ;;  %v4246_v12 = vadd.f32 1.0, %v9331_v6  ;;  %9344 = verf.f32 %v3871_v31  ;;  %v3878_v35 = vmul.f32 0.70710677, %v12048_v15  ;;  %v3647_v23 = vmul.f32 0.5, %v11982_v16 }
 0x255   : > { %3464 = vmatmul.mubr.bf16.gmra.mxu1 %v9652_v25  ;;  %3312 = vmatprep.mubr.bf16.mxu0 %v9653_v47  ;;  %15228 = vst [vmem:[#allocation53_spill] sm:$0xff] %v12064_v43  ;;  %v2843_v45 = vpop.f32.mrf.mxu1  ;;  %v4247_v14 = vadd.f32 1.0, %v9333_v36  ;;  %v3879_v55 = vmul.f32 0.70710677, %v12050_v37  ;;  %v12070_v25 = vadd.f32 %v2841_v22, %v2681_v26  ;;  %v2683_v24 = vadd.f32 %v2682_v52, %v11564_v39  ;;  %v9656_v52 = vld [vmem:[%s14903_s0 + $0x168] ss:$16 sps:$4 sm:$0xff]  }
 0x256   : > { %3473 = vmatprep.mubr.bf16.mxu1 %v9654_v13  ;;  %v2684_v47 = vpop.f32.mrf.mxu0  ;;  %v9335_v4 = vpop.eup %9334  ;;  %v4438_v13 = vmul.f32 %v4238_v11, %v3638_v58  ;;  %v4446_v40 = vmul.f32 %v4246_v12, %v3646_v19  ;;  %9346 = verf.f32 %v3878_v35  ;;  %v4439_v6 = vmul.f32 %v4239_v38, %v3639_v57  ;;  %v9655_v11 = vld [vmem:[%s14903_s0 + $0x160] ss:$16 sps:$4 sm:$0xff]  }
 0x257   : > { %v2845_v61 = vpop.f32.mrf.mxu1  ;;  %v4447_v31 = vmul.f32 %v4247_v14, %v3647_v23  ;;  %9348 = verf.f32 %v3879_v55  ;;  %v12075_v16 = vadd.f32 %v2843_v45, %v2683_v24  ;;  %v12077_v26 = vrot.slane %v9650_v3, %v652_v27 }
 0x258   : > { %v2685_v43 = vpop.f32.mrf.mxu0  ;;  %v9337_v10 = vpop.eup %9336  ;;  %v12073_v62 = vpack.c.bf16 %v4446_v40, %v4438_v13  ;;  %v4254_v22 = vadd.f32 1.0, %v9335_v4  ;;  %v3654_v3 = vmul.f32 0.5, %v11991_v42  ;;  %v3663_v35 = vmul.f32 0.5, %v12011_v5 }
 0x259   : > { %v2846_v36 = vpop.f32.mrf.mxu1  ;;  %v12082_v39 = vpack.c.bf16 %v4447_v31, %v4439_v6  ;;  %v4255_v27 = vadd.f32 1.0, %v9337_v10  ;;  %v3662_v43 = vmul.f32 0.5, %v12005_v29 }
 0x25a   : > { %15229 = vst [vmem:[#allocation54_spill] sm:$0xff] %v12073_v62  ;;  %v2882_v47 = vpop.f32.mrf.mxu0  ;;  %v4454_v13 = vmul.f32 %v4254_v22, %v3654_v3 }
 0x25b   : > { %15230 = vst [vmem:[#allocation55_spill] sm:$0xff] %v12082_v39  ;;  %v9339_v58 = vpop.eup %9338  ;;  %v2883_v57 = vadd.f32 %v2882_v47, %v12041_v30  ;;  %v3043_v38 = vpop.f32.mrf.mxu1 }
 0x25c   : > { %3313 = vmatmul.mubr.bf16.gmra.mxu0 %v9655_v11  ;;  %v9341_v4 = vpop.eup %9340  ;;  %v4262_v19 = vadd.f32 1.0, %v9339_v58  ;;  %v2884_v12 = vpop.f32.mrf.mxu0 }
 0x25d   : > { %3474 = vmatmul.mubr.bf16.gmra.mxu1 %v9656_v52  ;;  %3322 = vmatprep.mubr.bf16.mxu0 %v15203_v60  ;;  %v4263_v45 = vadd.f32 1.0, %v9341_v4  ;;  %v12093_v23 = vadd.f32 %v3043_v38, %v2883_v57  ;;  %v2885_v14 = vadd.f32 %v2884_v12, %v12077_v26  ;;  %v3045_v55 = vpop.f32.mrf.mxu1  ;;  %v3655_v60 = vmul.f32 0.5, %v11998_v32 }
 0x25e   : > { %3483 = vmatprep.mubr.bf16.mxu1 %v15204_v17  ;;  %v4462_v40 = vmul.f32 %v4262_v19, %v3662_v43  ;;  %v2886_v42 = vpop.f32.mrf.mxu0  ;;  %v9343_v10 = vpop.eup %9342  ;;  %v3670_v19 = vmul.f32 0.5, %v12027_v41  ;;  %v3671_v12 = vmul.f32 0.5, %v12034_v50 }
 0x25f   : > { %v4463_v24 = vmul.f32 %v4263_v45, %v3663_v35  ;;  %v3696_v29 = vmul.f32 0.70710677, %v12093_v23  ;;  %v12098_v61 = vadd.f32 %v3045_v55, %v2885_v14  ;;  %v3047_v17 = vpop.f32.mrf.mxu1  ;;  %v4455_v6 = vmul.f32 %v4255_v27, %v3655_v60 }
 0x260   : > { %v12100_v5 = vpack.c.bf16 %v4462_v40, %v4454_v13  ;;  %v2887_v31 = vadd.f32 %v2886_v42, %v12041_v30  ;;  %v2888_v36 = vpop.f32.mrf.mxu0  ;;  %v4270_v52 = vadd.f32 1.0, %v9343_v10  ;;  %v3678_v55 = vmul.f32 0.5, %v12048_v15 }
 0x261   : > { %v3697_v47 = vmul.f32 0.70710677, %v12098_v61  ;;  %v2889_v22 = vadd.f32 %v2888_v36, %v12077_v26  ;;  %v3049_v32 = vpop.f32.mrf.mxu1  ;;  %v9345_v11 = vpop.eup %9344  ;;  %9350 = verf.f32 %v3696_v29  ;;  %v12108_v38 = vpack.c.bf16 %v4463_v24, %v4455_v6 }
 0x262   : > { %15231 = vst [vmem:[#allocation56_spill] sm:$0xff] %v12100_v5  ;;  %v12105_v58 = vadd.f32 %v3047_v17, %v2887_v31  ;;  %v2892_v57 = vpop.f32.mrf.mxu0  ;;  %v4271_v35 = vadd.f32 1.0, %v9345_v11  ;;  %v3679_v60 = vmul.f32 0.5, %v12050_v37  ;;  %v4470_v24 = vmul.f32 %v4270_v52, %v3670_v19  ;;  %v8881_v19 = vld [vmem:[%s10046_s27 + $0x6c4] ss:$16 sps:$4 sm:$0xff]  }
 0x263   : > { %15232 = vst [vmem:[#allocation57_spill] sm:$0xff] %v12108_v38  ;;  %9352 = verf.f32 %v3697_v47  ;;  %v12110_v4 = vadd.f32 %v3049_v32, %v2889_v22  ;;  %v2893_v3 = vadd.f32 %v2892_v57, %v12041_v30  ;;  %v3053_v27 = vpop.f32.mrf.mxu1  ;;  %v9347_v43 = vpop.eup %9346  ;;  %v8870_v47 = vld [vmem:[%s10046_s27 + $0x4e0] ss:$16 sps:$4 sm:$0xff]  }
 0x264   : > { %3323 = vmatmul.mubr.bf16.gmra.mxu0 %v15206_v54  ;;  %v3704_v54 = vmul.f32 0.70710677, %v12105_v58  ;;  %v2894_v45 = vpop.f32.mrf.mxu0  ;;  %v9349_v14 = vpop.eup %9348  ;;  %v4278_v13 = vadd.f32 1.0, %v9347_v43  ;;  %v4471_v37 = vmul.f32 %v4271_v35, %v3671_v12 }
 0x265   : > { %3484 = vmatmul.mubr.bf16.gmra.mxu1 %v15208_v33  ;;  %6164 = vmatprep.mubr.bf16.mxu0 %v11058_v8  ;;  %v3705_v33 = vmul.f32 0.70710677, %v12110_v4  ;;  %v3055_v40 = vpop.f32.mrf.mxu1  ;;  %v4279_v42 = vadd.f32 1.0, %v9349_v14  ;;  %v12122_v41 = vadd.f32 %v3053_v27, %v2893_v3  ;;  %v2895_v50 = vadd.f32 %v2894_v45, %v12077_v26  ;;  %v8873_v3 = vld [vmem:[%s10046_s27 + $0x6e0] ss:$16 sps:$4 sm:$0xff]  }
 0x266   : > { %6325 = vmatprep.mubr.bf16.mxu1 %v11706_v59  ;;  %9354 = verf.f32 %v3704_v54  ;;  %v2896_v10 = vpop.f32.mrf.mxu0  ;;  %v4478_v29 = vmul.f32 %v4278_v13, %v3678_v55  ;;  %v8878_v27 = vld [vmem:[%s10046_s27 + $0x4c4] ss:$16 sps:$4 sm:$0xff]  }
 0x267   : > { %9356 = verf.f32 %v3705_v33  ;;  %v2897_v15 = vadd.f32 %v2896_v10, %v12041_v30  ;;  %v3057_v17 = vpop.f32.mrf.mxu1  ;;  %v4479_v6 = vmul.f32 %v4279_v42, %v3679_v60  ;;  %v3712_v31 = vmul.f32 0.70710677, %v12122_v41  ;;  %v8876_v60 = vld [vmem:[%s10046_s27 + $0x4c0] ss:$16 sps:$4 sm:$0xff]  }
 0x268   : > { %v2898_v36 = vpop.f32.mrf.mxu0  ;;  %v12128_v22 = vpack.c.bf16 %v4478_v29, %v4470_v24  ;;  %v12130_v32 = vadd.f32 %v3055_v40, %v2895_v50  ;;  %v8879_v42 = vld [vmem:[%s10046_s27 + $0x6c0] ss:$16 sps:$4 sm:$0xff]   ;;  %v8884_v50 = vld [vmem:[%s10046_s27 + $0x4a4] ss:$16 sps:$4 sm:$0xff]  }
 0x269   : > { %v12132_v11 = vadd.f32 %v3057_v17, %v2897_v15  ;;  %v2899_v57 = vadd.f32 %v2898_v36, %v12077_v26  ;;  %v3059_v52 = vpop.f32.mrf.mxu1  ;;  %9358 = verf.f32 %v3712_v31  ;;  %v12139_v12 = vpack.c.bf16 %v4479_v6, %v4471_v37  ;;  %v8887_v15 = vld [vmem:[%s10046_s27 + $0x6a4] ss:$16 sps:$4 sm:$0xff]  }
 0x26a   : > { %15233 = vst [vmem:[#allocation58_spill] sm:$0xff] %v12128_v22  ;;  %v2902_v43 = vpop.f32.mrf.mxu0  ;;  %v3713_v35 = vmul.f32 0.70710677, %v12130_v32  ;;  %v12158_v37 = vmul.f32 0.70710677, %v11555_v18 }
 0x26b   : > { %15234 = vst [vmem:[#allocation59_spill] sm:$0xff] %v12139_v12  ;;  %v3720_v54 = vmul.f32 0.70710677, %v12132_v11  ;;  %v3063_v45 = vpop.f32.mrf.mxu1  ;;  %v12145_v14 = vadd.f32 %v3059_v52, %v2899_v57  ;;  %v2903_v55 = vadd.f32 %v2902_v43, %v12041_v30  ;;  %v3496_v43 = vmul.f32 0.5, %v12093_v23 }
 0x26c   : > { %6165 = vmatmul.mubr.bf16.vlgmr.msra.gmra.mxu0 %v11030_v51  ;;  %v2904_v13 = vpop.f32.mrf.mxu0  ;;  %9360 = verf.f32 %v3713_v35  ;;  %v3497_v23 = vmul.f32 0.5, %v12098_v61 }
 0x26d   : > { %6326 = vmatmul.mubr.bf16.vlgmr.msra.gmra.mxu1 %v11696_v34  ;;  %6174 = vmatprep.mubr.bf16.mxu0 %v11140_v20  ;;  %v2905_v33 = vadd.f32 %v2904_v13, %v12077_v26  ;;  %v3065_v40 = vpop.f32.mrf.mxu1  ;;  %9362 = verf.f32 %v3720_v54  ;;  %v3721_v10 = vmul.f32 0.70710677, %v12145_v14  ;;  %v12154_v24 = vadd.f32 %v3063_v45, %v2903_v55  ;;  %v8890_v54 = vld [vmem:[%s10046_s27 + $0x484] ss:$16 sps:$4 sm:$0xff]   ;;  %v8971_v20 = vld [vmem:[%s10046_s27 + $0x2ec] ss:$16 sps:$4 sm:$0xff]  }
 0x26e   : > { %6335 = vmatprep.mubr.bf16.mxu1 %v11757_v2  ;;  %6455 = vmatpush1.bf16.msra.mxu0 %v8870_v47  ;;  %v2906_v29 = vpop.f32.mrf.mxu0  ;;  %v9351_v17 = vpop.eup %9350  ;;  %v12271_v34 = vmul.f32 0.5, %v11555_v18  ;;  %v8926_v18 = vld [vmem:[%s10046_s27 + $0x5c4] ss:$16 sps:$4 sm:$0xff]  }
 0x26f   : > { %6616 = vmatpush1.bf16.msra.mxu1 %v8873_v3  ;;  %6456 = vmatprep.subr.bf16.mxu0 %v8878_v27  ;;  %v12160_v6 = vadd.f32 %v3065_v40, %v2905_v33  ;;  %v2907_v31 = vadd.f32 %v2906_v29, %v12041_v30  ;;  %v3067_v36 = vpop.f32.mrf.mxu1  ;;  %9364 = verf.f32 %v3721_v10  ;;  %v3728_v57 = vmul.f32 0.70710677, %v12154_v24  ;;  %v8882_v3 = vld [vmem:[%s10046_s27 + $0x4a0] ss:$16 sps:$4 sm:$0xff]  }
 0x270   : > { %6617 = vmatprep.subr.bf16.mxu1 %v8881_v19  ;;  %v9353_v47 = vpop.eup %9352  ;;  %v2908_v52 = vpop.f32.mrf.mxu0  ;;  %v8885_v27 = vld [vmem:[%s10046_s27 + $0x6a0] ss:$16 sps:$4 sm:$0xff]   ;;  %v4096_v45 = vadd.f32 1.0, %v9351_v17 }
 0x271   : > { %v3729_v19 = vmul.f32 0.70710677, %v12160_v6  ;;  %v3069_v35 = vpop.f32.mrf.mxu1  ;;  %9366 = verf.f32 %v3728_v57  ;;  %v12169_v55 = vadd.f32 %v3067_v36, %v2907_v31  ;;  %v2909_v13 = vadd.f32 %v2908_v52, %v12077_v26 }
 0x272   : > { %6457 = vmatpush1.bf16.msra.mxu0 %v8876_v60  ;;  %v2912_v33 = vpop.f32.mrf.mxu0  ;;  %v8893_v60 = vld [vmem:[%s10046_s27 + $0x684] ss:$16 sps:$4 sm:$0xff]   ;;  %v4097_v10 = vadd.f32 1.0, %v9353_v47  ;;  %v3505_v47 = vmul.f32 0.5, %v12110_v4 }
 0x273   : > { %6618 = vmatpush1.bf16.msra.mxu1 %v8879_v42  ;;  %6458 = vmatprep.subr.bf16.mxu0 %v8884_v50  ;;  %v9355_v40 = vpop.eup %9354  ;;  %v3504_v42 = vmul.f32 0.5, %v12105_v58  ;;  %v2913_v50 = vadd.f32 %v2912_v33, %v12041_v30  ;;  %v3073_v29 = vpop.f32.mrf.mxu1  ;;  %9368 = verf.f32 %v3729_v19  ;;  %v12180_v36 = vadd.f32 %v3069_v35, %v2909_v13  ;;  %v8888_v58 = vld [vmem:[%s10046_s27 + $0x480] ss:$16 sps:$4 sm:$0xff]   ;;  %v8899_v4 = vld [vmem:[%s10046_s27 + $0x664] ss:$16 sps:$4 sm:$0xff]  }
 0x274   : > { %6175 = vmatmul.mubr.bf16.gmra.mxu0 %v11094_v44  ;;  %6619 = vmatprep.subr.bf16.mxu1 %v8887_v15  ;;  %v9357_v17 = vpop.eup %9356  ;;  %v4104_v31 = vadd.f32 1.0, %v9355_v40  ;;  %v3736_v15 = vmul.f32 0.70710677, %v12169_v55  ;;  %v2914_v61 = vpop.f32.mrf.mxu0  ;;  %v8891_v19 = vld [vmem:[%s10046_s27 + $0x680] ss:$16 sps:$4 sm:$0xff]   ;;  %v4296_v35 = vmul.f32 %v4096_v45, %v3496_v43 }
 0x275   : > { %6336 = vmatmul.mubr.bf16.gmra.mxu1 %v11740_v21  ;;  %6184 = vmatprep.mubr.bf16.mxu0 %v11184_v9  ;;  %v4105_v57 = vadd.f32 1.0, %v9357_v17  ;;  %v12185_v52 = vadd.f32 %v3073_v29, %v2913_v50  ;;  %v2915_v33 = vadd.f32 %v2914_v61, %v12077_v26  ;;  %v3075_v40 = vpop.f32.mrf.mxu1  ;;  %v8896_v21 = vld [vmem:[%s10046_s27 + $0x464] ss:$16 sps:$4 sm:$0xff]  }
 0x276   : > { %6345 = vmatprep.mubr.bf16.mxu1 %v11808_v56  ;;  %6459 = vmatpush1.bf16.msra.mxu0 %v8882_v3  ;;  %v4304_v13 = vmul.f32 %v4104_v31, %v3504_v42  ;;  %9370 = verf.f32 %v3736_v15  ;;  %v3737_v3 = vmul.f32 0.70710677, %v12180_v36  ;;  %v2916_v56 = vpop.f32.mrf.mxu0  ;;  %v9359_v17 = vpop.eup %9358  ;;  %v8894_v42 = vld [vmem:[%s10046_s27 + $0x460] ss:$16 sps:$4 sm:$0xff]  }
 0x277   : > { %6620 = vmatpush1.bf16.msra.mxu1 %v8885_v27  ;;  %6460 = vmatprep.subr.bf16.mxu0 %v8890_v54  ;;  %v4305_v50 = vmul.f32 %v4105_v57, %v3505_v47  ;;  %v3744_v29 = vmul.f32 0.70710677, %v12185_v52  ;;  %v12193_v61 = vadd.f32 %v3075_v40, %v2915_v33  ;;  %v3077_v27 = vpop.f32.mrf.mxu1  ;;  %v4297_v54 = vmul.f32 %v4097_v10, %v3497_v23  ;;  %v8897_v31 = vld [vmem:[%s10046_s27 + $0x660] ss:$16 sps:$4 sm:$0xff]   ;;  %v8902_v23 = vld [vmem:[%s10046_s27 + $0x444] ss:$16 sps:$4 sm:$0xff]  }
 0x278   : > { %6621 = vmatprep.subr.bf16.mxu1 %v8893_v60  ;;  %v12195_v2 = vpack.c.bf16 %v4304_v13, %v4296_v35  ;;  %9372 = verf.f32 %v3737_v3  ;;  %v2917_v43 = vadd.f32 %v2916_v56, %v12041_v30  ;;  %v2918_v45 = vpop.f32.mrf.mxu0  ;;  %v4112_v60 = vadd.f32 1.0, %v9359_v17  ;;  %v8905_v40 = vld [vmem:[%s10046_s27 + $0x644] ss:$16 sps:$4 sm:$0xff]   ;;  %v8903_v17 = vld [vmem:[%s10046_s27 + $0x640] ss:$16 sps:$4 sm:$0xff]  }
 0x279   : > { %9374 = verf.f32 %v3744_v29  ;;  %v3745_v15 = vmul.f32 0.70710677, %v12193_v61  ;;  %v2919_v47 = vadd.f32 %v2918_v45, %v12077_v26  ;;  %v3079_v57 = vpop.f32.mrf.mxu1  ;;  %v9361_v10 = vpop.eup %9360  ;;  %v3512_v56 = vmul.f32 0.5, %v12122_v41  ;;  %v8900_v41 = vld [vmem:[%s10046_s27 + $0x440] ss:$16 sps:$4 sm:$0xff]  }
 0x27a   : > { %15235 = vst [vmem:[#allocation60_spill] sm:$0xff] %v12195_v2  ;;  %6461 = vmatpush1.bf16.msra.mxu0 %v8888_v58  ;;  %9376 = verf.f32 %v12158_v37  ;;  %v12205_v58 = vadd.f32 %v3077_v27, %v2917_v43  ;;  %v2922_v33 = vpop.f32.mrf.mxu0  ;;  %v12209_v35 = vpack.c.bf16 %v4305_v50, %v4297_v54  ;;  %v9363_v13 = vpop.eup %9362  ;;  %v3520_v50 = vmul.f32 0.5, %v12132_v11  ;;  %v8908_v11 = vld [vmem:[%s10046_s27 + $0x424] ss:$16 sps:$4 sm:$0xff]  }
 0x27b   : > { %6622 = vmatpush1.bf16.msra.mxu1 %v8891_v19  ;;  %6462 = vmatprep.subr.bf16.mxu0 %v8896_v21  ;;  %v3513_v21 = vmul.f32 0.5, %v12130_v32  ;;  %9378 = verf.f32 %v3745_v15  ;;  %v12212_v19 = vadd.f32 %v3079_v57, %v2919_v47  ;;  %v2923_v37 = vadd.f32 %v2922_v33, %v12041_v30  ;;  %v3083_v3 = vpop.f32.mrf.mxu1 }
 0x27c   : > { %6185 = vmatmul.mubr.bf16.gmra.mxu0 %v11161_v63  ;;  %6623 = vmatprep.subr.bf16.mxu1 %v8899_v4  ;;  %15236 = vst [vmem:[#allocation61_spill] sm:$0xff] %v12209_v35  ;;  %v4113_v4 = vadd.f32 1.0, %v9361_v10  ;;  %v4120_v29 = vadd.f32 1.0, %v9363_v13  ;;  %v3752_v27 = vmul.f32 0.70710677, %v12205_v58  ;;  %v2924_v32 = vpop.f32.mrf.mxu0  ;;  %v9365_v54 = vpop.eup %9364  ;;  %v4312_v43 = vmul.f32 %v4112_v60, %v3512_v56 }
 0x27d   : > { %6346 = vmatmul.mubr.bf16.gmra.mxu1 %v11786_v48  ;;  %6194 = vmatprep.mubr.bf16.mxu0 %v11272_v28  ;;  %v3521_v45 = vmul.f32 0.5, %v12145_v14  ;;  %v3753_v15 = vmul.f32 0.70710677, %v12212_v19  ;;  %v12224_v47 = vadd.f32 %v3083_v3, %v2923_v37  ;;  %v3085_v57 = vpop.f32.mrf.mxu1  ;;  %v4121_v33 = vadd.f32 1.0, %v9365_v54 }
 0x27e   : > { %6355 = vmatprep.mubr.bf16.mxu1 %v11861_v46  ;;  %6463 = vmatpush1.bf16.msra.mxu0 %v8894_v42  ;;  %v4320_v10 = vmul.f32 %v4120_v29, %v3520_v50  ;;  %9380 = verf.f32 %v3752_v27  ;;  %v2925_v13 = vadd.f32 %v2924_v32, %v12077_v26  ;;  %v2926_v42 = vpop.f32.mrf.mxu0  ;;  %v8911_v46 = vld [vmem:[%s10046_s27 + $0x624] ss:$16 sps:$4 sm:$0xff]   ;;  %v9367_v60 = vpop.eup %9366  ;;  %v8906_v27 = vld [vmem:[%s10046_s27 + $0x420] ss:$16 sps:$4 sm:$0xff]   ;;  %v12237_v32 = vmul.f32 0.70710677, %v11551_v53 }
 0x27f   : > { %6624 = vmatpush1.bf16.msra.mxu1 %v8897_v31  ;;  %6464 = vmatprep.subr.bf16.mxu0 %v8902_v23  ;;  %9382 = verf.f32 %v3753_v15  ;;  %v3760_v14 = vmul.f32 0.70710677, %v12224_v47  ;;  %v2927_v56 = vadd.f32 %v2926_v42, %v12041_v30  ;;  %v3087_v37 = vpop.f32.mrf.mxu1  ;;  %v4313_v31 = vmul.f32 %v4113_v4, %v3513_v21  ;;  %v8909_v4 = vld [vmem:[%s10046_s27 + $0x620] ss:$16 sps:$4 sm:$0xff]  }
 0x280   : > { %6625 = vmatprep.subr.bf16.mxu1 %v8905_v40  ;;  %v12231_v23 = vpack.c.bf16 %v4320_v10, %v4312_v43  ;;  %v4321_v3 = vmul.f32 %v4121_v33, %v3521_v45  ;;  %v12233_v50 = vadd.f32 %v3085_v57, %v2925_v13  ;;  %v2928_v29 = vpop.f32.mrf.mxu0  ;;  %v9369_v40 = vpop.eup %9368  ;;  %v8914_v43 = vld [vmem:[%s10046_s27 + $0x404] ss:$16 sps:$4 sm:$0xff]   ;;  %v3528_v45 = vmul.f32 0.5, %v12154_v24 }
 0x281   : > { %9384 = verf.f32 %v3760_v14  ;;  %v12239_v54 = vadd.f32 %v3087_v37, %v2927_v56  ;;  %v2929_v15 = vadd.f32 %v2928_v29, %v12077_v26  ;;  %v3089_v21 = vpop.f32.mrf.mxu1  ;;  %v4128_v57 = vadd.f32 1.0, %v9367_v60  ;;  %v8917_v33 = vld [vmem:[%s10046_s27 + $0x604] ss:$16 sps:$4 sm:$0xff]   ;;  %v15239_v56 = vld [vmem:[#allocation29_spill] sm:$0xff] }
 0x282   : > { %15237 = vst [vmem:[#allocation62_spill] sm:$0xff] %v12231_v23  ;;  %6465 = vmatpush1.bf16.msra.mxu0 %v8900_v41  ;;  %v3761_v41 = vmul.f32 0.70710677, %v12233_v50  ;;  %v2932_v10 = vpop.f32.mrf.mxu0  ;;  %v12248_v13 = vpack.c.bf16 %v4321_v3, %v4313_v31  ;;  %v15240_v3 = vld [vmem:[#allocation45_spill] sm:$0xff]  ;;  %v8920_v29 = vld [vmem:[%s10046_s27 + $0x5e4] ss:$16 sps:$4 sm:$0xff]  }
 0x283   : > { %6626 = vmatpush1.bf16.msra.mxu1 %v8903_v17  ;;  %6466 = vmatprep.subr.bf16.mxu0 %v8908_v11  ;;  %v9371_v42 = vpop.eup %9370  ;;  %v3529_v17 = vmul.f32 0.5, %v12160_v6  ;;  %v3536_v11 = vmul.f32 0.5, %v12169_v55  ;;  %v3768_v14 = vmul.f32 0.70710677, %v12239_v54  ;;  %v12253_v24 = vadd.f32 %v3089_v21, %v2929_v15  ;;  %v3093_v60 = vpop.f32.mrf.mxu1  ;;  %v8912_v55 = vld [vmem:[%s10046_s27 + $0x400] ss:$16 sps:$4 sm:$0xff]  }
 0x284   : > { %6195 = vmatmul.mubr.bf16.gmra.mxu0 %v11233_v49  ;;  %6627 = vmatprep.subr.bf16.mxu1 %v8911_v46  ;;  %15238 = vst [vmem:[#allocation63_spill] sm:$0xff] %v12248_v13  ;;  %v4129_v46 = vadd.f32 1.0, %v9369_v40  ;;  %v4136_v37 = vadd.f32 1.0, %v9371_v42  ;;  %9386 = verf.f32 %v3761_v41  ;;  %v2933_v31 = vadd.f32 %v2932_v10, %v12041_v30  ;;  %v2934_v6 = vpop.f32.mrf.mxu0  ;;  %v8915_v41 = vld [vmem:[%s10046_s27 + $0x600] ss:$16 sps:$4 sm:$0xff]  }
 0x285   : > { %6356 = vmatmul.mubr.bf16.gmra.mxu1 %v11831_v1  ;;  %6204 = vmatprep.mubr.bf16.mxu0 %v15239_v56  ;;  %v9373_v48 = vpop.eup %9372  ;;  %v3537_v15 = vmul.f32 0.5, %v12180_v36  ;;  %9388 = verf.f32 %v3768_v14  ;;  %v3769_v21 = vmul.f32 0.70710677, %v12253_v24  ;;  %v2935_v40 = vadd.f32 %v2934_v6, %v12077_v26  ;;  %v3095_v42 = vpop.f32.mrf.mxu1  ;;  %v8923_v36 = vld [vmem:[%s10046_s27 + $0x7e4] ss:$16 sps:$4 sm:$0xff]  }
 0x286   : > { %6365 = vmatprep.mubr.bf16.mxu1 %v15240_v3  ;;  %6467 = vmatpush1.bf16.msra.mxu0 %v8906_v27  ;;  %v9375_v10 = vpop.eup %9374  ;;  %v4328_v1 = vmul.f32 %v4128_v57, %v3528_v45  ;;  %v4336_v3 = vmul.f32 %v4136_v37, %v3536_v11  ;;  %v4137_v56 = vadd.f32 1.0, %v9373_v48  ;;  %v12265_v27 = vadd.f32 %v3093_v60, %v2933_v31  ;;  %v2936_v49 = vpop.f32.mrf.mxu0  ;;  %v8918_v31 = vld [vmem:[%s10046_s27 + $0x5e0] ss:$16 sps:$4 sm:$0xff]  }
 0x287   : > { %6628 = vmatpush1.bf16.msra.mxu1 %v8909_v4  ;;  %6468 = vmatprep.subr.bf16.mxu0 %v8914_v43  ;;  %v12268_v14 = vpop.eup %9376  ;;  %9390 = verf.f32 %v3769_v21  ;;  %v12273_v4 = vadd.f32 %v3095_v42, %v2935_v40  ;;  %v2937_v43 = vadd.f32 %v2936_v49, %v12041_v30  ;;  %v3097_v45 = vpop.f32.mrf.mxu1  ;;  %v4329_v57 = vmul.f32 %v4129_v46, %v3529_v17  ;;  %v8921_v42 = vld [vmem:[%s10046_s27 + $0x7e0] ss:$16 sps:$4 sm:$0xff]  }
 0x288   : > { %6629 = vmatprep.subr.bf16.mxu1 %v8917_v33  ;;  %v9379_v48 = vpop.eup %9378  ;;  %v12276_v11 = vpack.c.bf16 %v4336_v3, %v4328_v1  ;;  %v4337_v60 = vmul.f32 %v4137_v56, %v3537_v15  ;;  %v3776_v33 = vmul.f32 0.70710677, %v12265_v27  ;;  %v2938_v37 = vpop.f32.mrf.mxu0  ;;  %v3544_v6 = vmul.f32 0.5, %v12185_v52  ;;  %v15242_v46 = vld [vmem:[#allocation19_spill] sm:$0xff]  ;;  %v8929_v3 = vld [vmem:[%s10046_s27 + $0x7c4] ss:$16 sps:$4 sm:$0xff]  }
 0x289   : > { %v4144_v21 = vadd.f32 1.0, %v9375_v10  ;;  %v3777_v40 = vmul.f32 0.70710677, %v12273_v4  ;;  %v3099_v49 = vpop.f32.mrf.mxu1  ;;  %v12284_v1 = vadd.f32 %v3097_v45, %v2937_v43  ;;  %v2939_v17 = vadd.f32 %v2938_v37, %v12077_v26  ;;  %v15244_v45 = vld [vmem:[#allocation44_spill] sm:$0xff] }
 0x28a   : > { %15241 = vst [vmem:[#allocation64_spill] sm:$0xff] %v12276_v11  ;;  %6469 = vmatpush1.bf16.msra.mxu0 %v8912_v55  ;;  %9392 = verf.f32 %v3776_v33  ;;  %v2942_v56 = vpop.f32.mrf.mxu0  ;;  %v12289_v55 = vpack.c.bf16 %v4337_v60, %v4329_v57  ;;  %v3545_v15 = vmul.f32 0.5, %v12193_v61  ;;  %v4145_v10 = vadd.f32 1.0, %v9379_v48  ;;  %v15245_v33 = vld [vmem:[#allocation30_spill] sm:$0xff] }
 0x28b   : > { %6630 = vmatpush1.bf16.msra.mxu1 %v8915_v41  ;;  %6470 = vmatprep.subr.bf16.mxu0 %v8920_v29  ;;  %v9381_v52 = vpop.eup %9380  ;;  %v3552_v29 = vmul.f32 0.5, %v12205_v58  ;;  %v2943_v41 = vadd.f32 %v2942_v56, %v12041_v30  ;;  %v3103_v43 = vpop.f32.mrf.mxu1  ;;  %9394 = verf.f32 %v3777_v40  ;;  %v3784_v57 = vmul.f32 0.70710677, %v12284_v1  ;;  %v8924_v58 = vld [vmem:[%s10046_s27 + $0x5c0] ss:$16 sps:$4 sm:$0xff]  }
 0x28c   : > { %6205 = vmatmul.mubr.bf16.gmra.mxu0 %v15242_v46  ;;  %6631 = vmatprep.subr.bf16.mxu1 %v8923_v36  ;;  %15243 = vst [vmem:[#allocation65_spill] sm:$0xff] %v12289_v55  ;;  %v9383_v37 = vpop.eup %9382  ;;  %v4152_v36 = vadd.f32 1.0, %v9381_v52  ;;  %v12297_v60 = vadd.f32 %v3099_v49, %v2939_v17  ;;  %v2944_v61 = vpop.f32.mrf.mxu0  ;;  %v3553_v48 = vmul.f32 0.5, %v12212_v19  ;;  %v8927_v40 = vld [vmem:[%s10046_s27 + $0x7c0] ss:$16 sps:$4 sm:$0xff]   ;;  %v4344_v17 = vmul.f32 %v4144_v21, %v3544_v6 }
 0x28d   : > { %6366 = vmatmul.mubr.bf16.gmra.mxu1 %v15244_v45  ;;  %6214 = vmatprep.mubr.bf16.mxu0 %v15245_v33  ;;  %v4153_v56 = vadd.f32 1.0, %v9383_v37  ;;  %v12302_v45 = vadd.f32 %v3103_v43, %v2943_v41  ;;  %v2945_v33 = vadd.f32 %v2944_v61, %v12077_v26  ;;  %v3105_v52 = vpop.f32.mrf.mxu1  ;;  %v8932_v46 = vld [vmem:[%s10046_s27 + $0x5a4] ss:$16 sps:$4 sm:$0xff]   ;;  %9396 = verf.f32 %v3784_v57 }
 0x28e   : > { %6375 = vmatprep.mubr.bf16.mxu1 %v11948_v7  ;;  %6471 = vmatpush2.bf16.msra.mxu0 %v8918_v31  ;;  %v9385_v49 = vpop.eup %9384  ;;  %v4352_v28 = vmul.f32 %v4152_v36, %v3552_v29  ;;  %v3785_v31 = vmul.f32 0.70710677, %v12297_v60  ;;  %v2946_v7 = vpop.f32.mrf.mxu0  ;;  %v8935_v19 = vld [vmem:[%s10046_s27 + $0x7a4] ss:$16 sps:$4 sm:$0xff]   ;;  %v4345_v37 = vmul.f32 %v4145_v10, %v3545_v15  ;;  %v3560_v10 = vmul.f32 0.5, %v12224_v47 }
 0x28f   : > { %6632 = vmatpush2.bf16.msra.mxu1 %v8921_v42  ;;  %6472 = vmatprep.subr.bf16.mxu0 %v8926_v18  ;;  %v4353_v41 = vmul.f32 %v4153_v56, %v3553_v48  ;;  %v3792_v43 = vmul.f32 0.70710677, %v12302_v45  ;;  %v3107_v61 = vpop.f32.mrf.mxu1  ;;  %v12311_v18 = vadd.f32 1.0, %v12268_v14  ;;  %v12315_v6 = vadd.f32 %v3105_v52, %v2945_v33  ;;  %v8938_v48 = vld [vmem:[%s10046_s27 + $0x584] ss:$16 sps:$4 sm:$0xff]  }
 0x290   : > { %6633 = vmatprep.subr.bf16.mxu1 %v8929_v3  ;;  %v12313_v42 = vpack.c.bf16 %v4352_v28, %v4344_v17  ;;  %9398 = verf.f32 %v3785_v31  ;;  %v2947_v21 = vadd.f32 %v2946_v7, %v12041_v30  ;;  %v2948_v29 = vpop.f32.mrf.mxu0  ;;  %v8930_v3 = vld [vmem:[%s10046_s27 + $0x5a0] ss:$16 sps:$4 sm:$0xff]   ;;  %v4160_v36 = vadd.f32 1.0, %v9385_v49  ;;  %v15247_v49 = vld [vmem:[#allocation20_spill] sm:$0xff] }
 0x291   : > { %v9387_v15 = vpop.eup %9386  ;;  %v2949_v57 = vadd.f32 %v2948_v29, %v12077_v26  ;;  %v3109_v14 = vpop.f32.mrf.mxu1  ;;  %v8933_v28 = vld [vmem:[%s10046_s27 + $0x7a0] ss:$16 sps:$4 sm:$0xff]   ;;  %v12323_v56 = vpack.c.bf16 %v4353_v41, %v4345_v37  ;;  %9400 = verf.f32 %v3792_v43  ;;  %v8944_v17 = vld [vmem:[%s10046_s27 + $0x784] ss:$16 sps:$4 sm:$0xff]  }
 0x292   : > { %6473 = vmatpush2.bf16.msra.mxu0 %v8924_v58  ;;  %v9389_v33 = vpop.eup %9388  ;;  %v4161_v7 = vadd.f32 1.0, %v9387_v15  ;;  %v3793_v58 = vmul.f32 0.70710677, %v12315_v6  ;;  %v12326_v52 = vadd.f32 %v3107_v61, %v2947_v21  ;;  %v15248_v29 = vld [vmem:[#allocation46_spill] sm:$0xff]  ;;  %v15249_v43 = vld [vmem:[#allocation33_spill] sm:$0xff]  ;;  %v3561_v15 = vmul.f32 0.5, %v12233_v50 }
 0x293   : > { %6634 = vmatpush2.bf16.msra.mxu1 %v8927_v40  ;;  %6474 = vmatprep.subr.bf16.mxu0 %v8932_v46  ;;  %15246 = vst [vmem:[#allocation66_spill] sm:$0xff] %v12323_v56  ;;  %v2952_v47 = vpop.f32.mrf.mxu0  ;;  %v3568_v40 = vmul.f32 0.5, %v12239_v54  ;;  %v4168_v46 = vadd.f32 1.0, %v9389_v33  ;;  %v12331_v31 = vadd.f32 %v3109_v14, %v2949_v57  ;;  %v8936_v61 = vld [vmem:[%s10046_s27 + $0x580] ss:$16 sps:$4 sm:$0xff]   ;;  %v4360_v33 = vmul.f32 %v4160_v36, %v3560_v10 }
 0x294   : > { %6215 = vmatmul.mubr.bf16.gmra.mxu0 %v15247_v49  ;;  %6635 = vmatprep.subr.bf16.mxu1 %v8935_v19  ;;  %v2953_v37 = vadd.f32 %v2952_v47, %v12041_v30  ;;  %v3113_v41 = vpop.f32.mrf.mxu1  ;;  %v9391_v21 = vpop.eup %9390  ;;  %v3569_v19 = vmul.f32 0.5, %v12253_v24  ;;  %9402 = verf.f32 %v3793_v58  ;;  %v3800_v54 = vmul.f32 0.70710677, %v12326_v52  ;;  %v8941_v14 = vld [vmem:[%s10046_s27 + $0x564] ss:$16 sps:$4 sm:$0xff]  }
 0x295   : > { %6376 = vmatmul.mubr.bf16.gmra.mxu1 %v15248_v29  ;;  %6224 = vmatprep.mubr.bf16.mxu0 %v15249_v43  ;;  %v2954_v57 = vpop.f32.mrf.mxu0  ;;  %v4368_v47 = vmul.f32 %v4168_v46, %v3568_v40  ;;  %v4169_v29 = vadd.f32 1.0, %v9391_v21  ;;  %v3801_v43 = vmul.f32 0.70710677, %v12331_v31  ;;  %v8942_v50 = vld [vmem:[%s10046_s27 + $0x780] ss:$16 sps:$4 sm:$0xff]   ;;  %v4361_v63 = vmul.f32 %v4161_v7, %v3561_v15 }
 0x296   : > { %6385 = vmatprep.mubr.bf16.mxu1 %v11987_v0  ;;  %6475 = vmatpush2.bf16.msra.mxu0 %v8930_v3  ;;  %v3115_v49 = vpop.f32.mrf.mxu1  ;;  %9404 = verf.f32 %v3800_v54  ;;  %v12344_v24 = vadd.f32 %v3113_v41, %v2953_v37  ;;  %v2955_v58 = vadd.f32 %v2954_v57, %v12077_v26  ;;  %v8953_v3 = vld [vmem:[%s10046_s27 + $0x764] ss:$16 sps:$4 sm:$0xff]   ;;  %v12358_v37 = vmul.f32 %v12311_v18, %v12271_v34  ;;  %v8951_v21 = vld [vmem:[%s10046_s27 + $0x760] ss:$16 sps:$4 sm:$0xff]  }
 0x297   : > { %6476 = vmatprep.subr.bf16.mxu0 %v8938_v48  ;;  %6636 = vmatpush2.bf16.msra.mxu1 %v8933_v28  ;;  %v2956_v0 = vpop.f32.mrf.mxu0  ;;  %v9393_v59 = vpop.eup %9392  ;;  %v12348_v10 = vpack.c.bf16 %v4368_v47, %v4360_v33  ;;  %v4369_v36 = vmul.f32 %v4169_v29, %v3569_v19  ;;  %9406 = verf.f32 %v3801_v43  ;;  %v12361_v29 = vmul.f32 0.70710677, %v12075_v16  ;;  %v15252_v54 = vld [vmem:[#allocation31_spill] sm:$0xff]  ;;  %v8959_v57 = vld [vmem:[%s10046_s27 + $0x744] ss:$16 sps:$4 sm:$0xff]  }
 0x298   : > { %6637 = vmatprep.subr.bf16.mxu1 %v8944_v17  ;;  %v2957_v40 = vadd.f32 %v2956_v0, %v12041_v30  ;;  %v3117_v28 = vpop.f32.mrf.mxu1  ;;  %9408 = verf.f32 %v12237_v32  ;;  %v3808_v48 = vmul.f32 0.70710677, %v12344_v24  ;;  %v12353_v7 = vadd.f32 %v3115_v49, %v2955_v58  ;;  %v8939_v17 = vld [vmem:[%s10046_s27 + $0x560] ss:$16 sps:$4 sm:$0xff]   ;;  %v9395_v41 = vpop.eup %9394  ;;  %v8947_v49 = vld [vmem:[%s10046_s27 + $0x544] ss:$16 sps:$4 sm:$0xff]  }
 0x299   : > { %15250 = vst [vmem:[#allocation67_spill] sm:$0xff] %v12348_v10  ;;  %v2958_v46 = vpop.f32.mrf.mxu0  ;;  %v3576_v15 = vmul.f32 0.5, %v12265_v27  ;;  %v4176_v34 = vadd.f32 1.0, %v9393_v59  ;;  %v3584_v47 = vmul.f32 0.5, %v12284_v1  ;;  %v15253_v27 = vld [vmem:[#allocation48_spill] sm:$0xff]  ;;  %v15254_v58 = vld [vmem:[#allocation34_spill] sm:$0xff] }
 0x29a   : > { %6477 = vmatpush2.bf16.msra.mxu0 %v8936_v61  ;;  %v12363_v0 = vadd.f32 %v3117_v28, %v2957_v40  ;;  %v2959_v32 = vadd.f32 %v2958_v46, %v12077_v26  ;;  %v3119_v43 = vpop.f32.mrf.mxu1  ;;  %v12368_v61 = vpack.c.bf16 %v4369_v36, %v4361_v63  ;;  %9410 = verf.f32 %v3808_v48  ;;  %v9397_v33 = vpop.eup %9396  ;;  %v15255_v28 = vld [vmem:[#allocation51_spill] sm:$0xff]  ;;  %v8950_v48 = vld [vmem:[%s10046_s27 + $0x524] ss:$16 sps:$4 sm:$0xff]  }
 0x29b   : > { %6478 = vmatprep.subr.bf16.mxu0 %v8941_v14  ;;  %6638 = vmatpush2.bf16.msra.mxu1 %v8942_v50  ;;  %v3809_v18 = vmul.f32 0.70710677, %v12353_v7  ;;  %v3577_v14 = vmul.f32 0.5, %v12273_v4  ;;  %v4177_v36 = vadd.f32 1.0, %v9395_v41  ;;  %v4184_v40 = vadd.f32 1.0, %v9397_v33 }
 0x29c   : > { %15251 = vst [vmem:[#allocation68_spill] sm:$0xff] %v12368_v61  ;;  %v2962_v19 = vpop.f32.mrf.mxu0  ;;  %6225 = vmatmul.mubr.bf16.gmra.mxu0 %v15252_v54  ;;  %6639 = vmatprep.subr.bf16.mxu1 %v8953_v3  ;;  %v3816_v63 = vmul.f32 0.70710677, %v12363_v0  ;;  %v12377_v50 = vadd.f32 %v3119_v43, %v2959_v32  ;;  %v8945_v1 = vld [vmem:[%s10046_s27 + $0x540] ss:$16 sps:$4 sm:$0xff]   ;;  %v3585_v32 = vmul.f32 0.5, %v12297_v60 }
 0x29d   : > { %v3123_v59 = vpop.f32.mrf.mxu1  ;;  %6386 = vmatmul.mubr.bf16.gmra.mxu1 %v15253_v27  ;;  %6234 = vmatprep.mubr.bf16.mxu0 %v15254_v58  ;;  %9412 = verf.f32 %v3809_v18  ;;  %v2963_v3 = vadd.f32 %v2962_v19, %v12041_v30  ;;  %v9399_v46 = vpop.eup %9398  ;;  %v8957_v18 = vld [vmem:[%s10046_s27 + $0x740] ss:$16 sps:$4 sm:$0xff]   ;;  %v4376_v19 = vmul.f32 %v4176_v34, %v3576_v15  ;;  %v4384_v27 = vmul.f32 %v4184_v40, %v3584_v47  ;;  %v8962_v54 = vld [vmem:[%s10046_s27 + $0x724] ss:$16 sps:$4 sm:$0xff]  }
 0x29e   : > { %6395 = vmatprep.mubr.bf16.mxu1 %v15255_v28  ;;  %v2964_v4 = vpop.f32.mrf.mxu0  ;;  %6479 = vmatpush2.bf16.msra.mxu0 %v8939_v17  ;;  %9414 = verf.f32 %v3816_v63  ;;  %v3817_v43 = vmul.f32 0.70710677, %v12377_v50  ;;  %v4185_v28 = vadd.f32 1.0, %v9399_v46  ;;  %v9401_v60 = vpop.eup %9400  ;;  %v4377_v44 = vmul.f32 %v4177_v36, %v3577_v14  ;;  %v8956_v40 = vld [vmem:[%s10046_s27 + $0x504] ss:$16 sps:$4 sm:$0xff]  }
 0x29f   : > { %v2965_v41 = vadd.f32 %v2964_v4, %v12077_v26  ;;  %v3125_v33 = vpop.f32.mrf.mxu1  ;;  %6480 = vmatprep.subr.bf16.mxu0 %v8947_v49  ;;  %6640 = vmatpush2.bf16.msra.mxu1 %v8951_v21  ;;  %v12389_v58 = vadd.f32 %v3123_v59, %v2963_v3  ;;  %v15256_v49 = vld [vmem:[#allocation25_spill] sm:$0xff]  ;;  %v12396_v15 = vpack.c.bf16 %v4384_v27, %v4376_v19  ;;  %v3592_v46 = vmul.f32 0.5, %v12302_v45 }
 0x2a0   : > { %v2966_v17 = vpop.f32.mrf.mxu0  ;;  %6641 = vmatprep.subr.bf16.mxu1 %v8959_v57  ;;  %9416 = verf.f32 %v3817_v43  ;;  %v4385_v34 = vmul.f32 %v4185_v28, %v3585_v32  ;;  %v8948_v57 = vld [vmem:[%s10046_s27 + $0x520] ss:$16 sps:$4 sm:$0xff]   ;;  %v4192_v36 = vadd.f32 1.0, %v9401_v60  ;;  %v15257_v32 = vld [vmem:[#allocation32_spill] sm:$0xff]  ;;  %v3601_v19 = vmul.f32 0.5, %v12331_v31  ;;  %v15259_v60 = vld [vmem:[#allocation50_spill] sm:$0xff] }
 0x2a1   : > { %v12392_v63 = vadd.f32 %v3125_v33, %v2965_v41  ;;  %v2967_v4 = vadd.f32 %v2966_v17, %v12041_v30  ;;  %v3127_v9 = vpop.f32.mrf.mxu1  ;;  %v3824_v47 = vmul.f32 0.70710677, %v12389_v58  ;;  %v9403_v3 = vpop.eup %9402  ;;  %9418 = verf.f32 %v12361_v29  ;;  %v8960_v27 = vld [vmem:[%s10046_s27 + $0x720] ss:$16 sps:$4 sm:$0xff]   ;;  %v8965_v33 = vld [vmem:[%s10046_s27 + $0x704] ss:$16 sps:$4 sm:$0xff]  }
 0x2a2   : > { %v2968_v59 = vpop.f32.mrf.mxu0  ;;  %6481 = vmatpush2.bf16.msra.mxu0 %v8945_v1  ;;  %v12410_v29 = vpack.c.bf16 %v4385_v34, %v4377_v44 }
 0x2a3   : > { %v3825_v43 = vmul.f32 0.70710677, %v12392_v63  ;;  %v12404_v41 = vadd.f32 %v3127_v9, %v2967_v4  ;;  %v3129_v14 = vpop.f32.mrf.mxu1  ;;  %6482 = vmatprep.subr.bf16.mxu0 %v8950_v48  ;;  %6642 = vmatpush2.bf16.msra.mxu1 %v8957_v18  ;;  %9420 = verf.f32 %v3824_v47  ;;  %v2969_v28 = vadd.f32 %v2968_v59, %v12077_v26  ;;  %v9405_v45 = vpop.eup %9404  ;;  %v15260_v4 = vld [vmem:[#allocation35_spill] sm:$0xff] }
 0x2a4   : > { %v2972_v1 = vpop.f32.mrf.mxu0  ;;  %6235 = vmatmul.mubr.bf16.gmra.mxu0 %v15257_v32  ;;  %6643 = vmatprep.subr.bf16.mxu1 %v8962_v54  ;;  %15258 = vst [vmem:[#allocation69_spill] sm:$0xff] %v12410_v29  ;;  %v3600_v9 = vmul.f32 0.5, %v12326_v52  ;;  %v9407_v47 = vpop.eup %9406  ;;  %v4193_v54 = vadd.f32 1.0, %v9403_v3  ;;  %v4200_v44 = vadd.f32 1.0, %v9405_v45  ;;  %v15261_v52 = vld [vmem:[#allocation53_spill] sm:$0xff]  ;;  %v3593_v45 = vmul.f32 0.5, %v12315_v6 }
 0x2a5   : > { %v3832_v48 = vmul.f32 0.70710677, %v12404_v41  ;;  %v2973_v18 = vadd.f32 %v2972_v1, %v12041_v30  ;;  %v3133_v17 = vpop.f32.mrf.mxu1  ;;  %6396 = vmatmul.mubr.bf16.gmra.mxu1 %v15259_v60  ;;  %6244 = vmatprep.mubr.bf16.mxu0 %v15260_v4  ;;  %9422 = verf.f32 %v3825_v43  ;;  %v12418_v34 = vadd.f32 %v3129_v14, %v2969_v28  ;;  %v8954_v59 = vld [vmem:[%s10046_s27 + $0x500] ss:$16 sps:$4 sm:$0xff]   ;;  %v12422_v21 = vpop.eup %9408  ;;  %v8968_v14 = vld [vmem:[%s10046_s27 + $0xec] ss:$16 sps:$4 sm:$0xff]  }
 0x2a6   : > { %6405 = vmatprep.mubr.bf16.mxu1 %v15261_v52  ;;  %v2974_v31 = vpop.f32.mrf.mxu0  ;;  %6483 = vmatpush2.bf16.msra.mxu0 %v8948_v57  ;;  %v4201_v1 = vadd.f32 1.0, %v9407_v47  ;;  %v8963_v43 = vld [vmem:[%s10046_s27 + $0x700] ss:$16 sps:$4 sm:$0xff]   ;;  %v4392_v28 = vmul.f32 %v4192_v36, %v3592_v46  ;;  %v4400_v52 = vmul.f32 %v4200_v44, %v3600_v9 }
 0x2a7   : > { %9424 = verf.f32 %v3832_v48  ;;  %v12424_v60 = vadd.f32 %v3133_v17, %v2973_v18  ;;  %v2975_v3 = vadd.f32 %v2974_v31, %v12077_v26  ;;  %v3135_v4 = vpop.f32.mrf.mxu1  ;;  %6484 = vmatprep.subr.bf16.mxu0 %v8956_v40  ;;  %6644 = vmatpush2.bf16.msra.mxu1 %v8960_v27  ;;  %v3833_v57 = vmul.f32 0.70710677, %v12418_v34  ;;  %v9411_v47 = vpop.eup %9410 }
 0x2a8   : > { %v2976_v32 = vpop.f32.mrf.mxu0  ;;  %6645 = vmatprep.subr.bf16.mxu1 %v8965_v33  ;;  %v4401_v48 = vmul.f32 %v4201_v1, %v3601_v19  ;;  %v3608_v18 = vmul.f32 0.5, %v12344_v24  ;;  %v4393_v27 = vmul.f32 %v4193_v54, %v3593_v45  ;;  %v12436_v51 = vpack.c.bf16 %v4400_v52, %v4392_v28 }
 0x2a9   : > { %v3840_v17 = vmul.f32 0.70710677, %v12424_v60  ;;  %v12434_v31 = vadd.f32 %v3135_v4, %v2975_v3  ;;  %v3137_v40 = vpop.f32.mrf.mxu1  ;;  %9426 = verf.f32 %v3833_v57  ;;  %v2977_v6 = vadd.f32 %v2976_v32, %v12041_v30  ;;  %v15263_v32 = vld [vmem:[#allocation21_spill] sm:$0xff]  ;;  %v15266_v57 = vld [vmem:[#allocation23_spill] sm:$0xff] }
 0x2aa   : > { %15262 = vst [vmem:[#allocation70_spill] sm:$0xff] %v12436_v51  ;;  %v2978_v46 = vpop.f32.mrf.mxu0  ;;  %6485 = vmatpush2.bf16.msra.mxu0 %v8954_v59  ;;  %v9413_v36 = vpop.eup %9412  ;;  %v4208_v33 = vadd.f32 1.0, %v9411_v47  ;;  %v3616_v54 = vmul.f32 0.5, %v12363_v0  ;;  %v12445_v59 = vpack.c.bf16 %v4401_v48, %v4393_v27  ;;  %v3886_v47 = vmul.f32 0.70710677, %v12070_v25 }
 0x2ab   : > { %9428 = verf.f32 %v3840_v17  ;;  %v3841_v9 = vmul.f32 0.70710677, %v12434_v31  ;;  %v2979_v24 = vadd.f32 %v2978_v46, %v12077_v26  ;;  %v3139_v19 = vpop.f32.mrf.mxu1  ;;  %6646 = vmatpush2.bf16.msra.mxu1 %v8963_v43  ;;  %6776 = vmatprep.subr.bf16.mxu0 %v8968_v14  ;;  %v9415_v4 = vpop.eup %9414  ;;  %v4209_v44 = vadd.f32 1.0, %v9413_v36  ;;  %v15265_v14 = vld [vmem:[#allocation52_spill] sm:$0xff] }
 0x2ac   : > { %v12442_v52 = vadd.f32 %v3137_v40, %v2977_v6  ;;  %v2982_v1 = vpop.f32.mrf.mxu0  ;;  %6245 = vmatmul.mubr.bf16.gmra.mxu0 %v15263_v32  ;;  %6937 = vmatprep.subr.bf16.mxu1 %v8971_v20  ;;  %15264 = vst [vmem:[#allocation21_spill] sm:$0xff] %v12445_v59  ;;  %v4216_v3 = vadd.f32 1.0, %v9415_v4  ;;  %v3609_v17 = vmul.f32 0.5, %v12353_v7  ;;  %v3617_v20 = vmul.f32 0.5, %v12377_v50 }
 0x2ad   : > { %9430 = verf.f32 %v3841_v9  ;;  %v12447_v28 = vadd.f32 %v3139_v19, %v2979_v24  ;;  %v2983_v45 = vadd.f32 %v2982_v1, %v12041_v30  ;;  %v3143_v43 = vpop.f32.mrf.mxu1  ;;  %6406 = vmatmul.mubr.bf16.gmra.mxu1 %v15265_v14  ;;  %6254 = vmatprep.mubr.bf16.mxu0 %v15266_v57  ;;  %v9417_v0 = vpop.eup %9416  ;;  %v4408_v27 = vmul.f32 %v4208_v33, %v3608_v18 }
 0x2ae   : > { %v3848_v48 = vmul.f32 0.70710677, %v12442_v52  ;;  %6415 = vmatprep.mubr.bf16.mxu1 %v12082_v39  ;;  %v2984_v40 = vpop.f32.mrf.mxu0  ;;  %v4416_v6 = vmul.f32 %v4216_v3, %v3616_v54  ;;  %v4217_v46 = vadd.f32 1.0, %v9417_v0  ;;  %v9419_v24 = vpop.eup %9418  ;;  %v4409_v19 = vmul.f32 %v4209_v44, %v3609_v17 }
 0x2af   : > { %v3849_v36 = vmul.f32 0.70710677, %v12447_v28  ;;  %v3145_v9 = vpop.f32.mrf.mxu1  ;;  %v12458_v4 = vadd.f32 %v3143_v43, %v2983_v45  ;;  %v2985_v7 = vadd.f32 %v2984_v40, %v12077_v26 }
 0x2b0   : > { %9432 = verf.f32 %v3848_v48  ;;  %v2986_v1 = vpop.f32.mrf.mxu0  ;;  %v9421_v50 = vpop.eup %9420  ;;  %v12461_v14 = vpack.c.bf16 %v4416_v6, %v4408_v27  ;;  %v4417_v57 = vmul.f32 %v4217_v46, %v3617_v20  ;;  %v3624_v6 = vmul.f32 0.5, %v12389_v58 }
 0x2b1   : > { %9434 = verf.f32 %v3849_v36  ;;  %v2987_v18 = vadd.f32 %v2986_v1, %v12041_v30  ;;  %v3147_v33 = vpop.f32.mrf.mxu1  ;;  %v3856_v54 = vmul.f32 0.70710677, %v12458_v4  ;;  %v12465_v3 = vadd.f32 %v3145_v9, %v2985_v7  ;;  %v15269_v36 = vld [vmem:[#allocation22_spill] sm:$0xff] }
 0x2b2   : > { %15267 = vst [vmem:[#allocation71_spill] sm:$0xff] %v12461_v14  ;;  %9436 = verf.f32 %v3886_v47  ;;  %v2988_v44 = vpop.f32.mrf.mxu0  ;;  %v9423_v43 = vpop.eup %9422  ;;  %v4224_v0 = vadd.f32 1.0, %v9421_v50  ;;  %v12471_v20 = vpack.c.bf16 %v4417_v57, %v4409_v19  ;;  %v4287_v9 = vadd.f32 1.0, %v9419_v24  ;;  %v15270_v57 = vld [vmem:[#allocation36_spill] sm:$0xff] }
 0x2b3   : > { %v12468_v17 = vadd.f32 %v3147_v33, %v2987_v18  ;;  %v2989_v48 = vadd.f32 %v2988_v44, %v12077_v26  ;;  %v3149_v40 = vpop.f32.mrf.mxu1  ;;  %9438 = verf.f32 %v3856_v54  ;;  %v3857_v47 = vmul.f32 0.70710677, %v12465_v3 }
 0x2b4   : > { %15268 = vst [vmem:[#allocation72_spill] sm:$0xff] %v12471_v20  ;;  %v9425_v27 = vpop.eup %9424  ;;  %v2992_v46 = vpop.f32.mrf.mxu0  ;;  %6255 = vmatmul.mubr.bf16.gmra.mxu0 %v15269_v36  ;;  %v3625_v7 = vmul.f32 0.5, %v12392_v63  ;;  %v3632_v1 = vmul.f32 0.5, %v12404_v41  ;;  %v4225_v58 = vadd.f32 1.0, %v9423_v43  ;;  %v4424_v44 = vmul.f32 %v4224_v0, %v3624_v6  ;;  %v9657_v36 = vld [vmem:[%s10040_s15] sm:$0xff] }
 0x2b5   : > { %v4232_v50 = vadd.f32 1.0, %v9425_v27  ;;  %v3864_v18 = vmul.f32 0.70710677, %v12468_v17  ;;  %v3153_v33 = vpop.f32.mrf.mxu1  ;;  %6416 = vmatmul.mubr.bf16.gmra.mxu1 %v12073_v62  ;;  %6264 = vmatprep.mubr.bf16.mxu0 %v15270_v57  ;;  %9440 = verf.f32 %v3857_v47  ;;  %v12481_v19 = vadd.f32 %v3149_v40, %v2989_v48 }
 0x2b6   : > { %v2993_v54 = vadd.f32 %v2992_v46, %v12041_v30  ;;  %6425 = vmatprep.mubr.bf16.mxu1 %v12108_v38  ;;  %v2994_v24 = vpop.f32.mrf.mxu0  ;;  %v9427_v63 = vpop.eup %9426  ;;  %v3633_v62 = vmul.f32 0.5, %v12418_v34  ;;  %v3687_v47 = vmul.f32 0.5, %v12075_v16 }
 0x2b7   : > { %v4432_v41 = vmul.f32 %v4232_v50, %v3632_v1  ;;  %9442 = verf.f32 %v3864_v18  ;;  %v2995_v27 = vadd.f32 %v2994_v24, %v12077_v26  ;;  %v3155_v45 = vpop.f32.mrf.mxu1  ;;  %v4233_v57 = vadd.f32 1.0, %v9427_v63 }
 0x2b8   : > { %v9429_v39 = vpop.eup %9428  ;;  %v3865_v43 = vmul.f32 0.70710677, %v12481_v19  ;;  %v12488_v48 = vadd.f32 %v3153_v33, %v2993_v54  ;;  %v2996_v40 = vpop.f32.mrf.mxu0  ;;  %v4425_v50 = vmul.f32 %v4225_v58, %v3625_v7  ;;  %v3640_v33 = vmul.f32 0.5, %v12424_v60 }
 0x2b9   : > { %v12491_v46 = vpack.c.bf16 %v4432_v41, %v4424_v44  ;;  %v12493_v38 = vadd.f32 %v3155_v45, %v2995_v27  ;;  %v2997_v0 = vadd.f32 %v2996_v40, %v12041_v30  ;;  %v3157_v6 = vpop.f32.mrf.mxu1  ;;  %v4433_v18 = vmul.f32 %v4233_v57, %v3633_v62  ;;  %v15272_v40 = vld [vmem:[#allocation24_spill] sm:$0xff] }
 0x2ba   : > { %v9431_v1 = vpop.eup %9430  ;;  %9444 = verf.f32 %v3865_v43  ;;  %v3872_v34 = vmul.f32 0.70710677, %v12488_v48  ;;  %v2998_v24 = vpop.f32.mrf.mxu0  ;;  %v4240_v54 = vadd.f32 1.0, %v9429_v39  ;;  %v4487_v44 = vmul.f32 %v4287_v9, %v3687_v47  ;;  %v15274_v9 = vld [vmem:[#allocation38_spill] sm:$0xff] }
 0x2bb   : > { %15271 = vst [vmem:[#allocation73_spill] sm:$0xff] %v12491_v46  ;;  %v3873_v63 = vmul.f32 0.70710677, %v12493_v38  ;;  %v3159_v16 = vpop.f32.mrf.mxu1  ;;  %v12499_v45 = vadd.f32 %v3157_v6, %v2997_v0  ;;  %v2999_v41 = vadd.f32 %v2998_v24, %v12077_v26  ;;  %v12503_v62 = vpack.c.bf16 %v4433_v18, %v4425_v50 }
 0x2bc   : > { %9446 = verf.f32 %v3872_v34  ;;  %v3002_v27 = vpop.f32.mrf.mxu0  ;;  %6265 = vmatmul.mubr.bf16.gmra.mxu0 %v15272_v40  ;;  %v3641_v57 = vmul.f32 0.5, %v12434_v31  ;;  %v4241_v58 = vadd.f32 1.0, %v9431_v1  ;;  %v3648_v39 = vmul.f32 0.5, %v12442_v52 }
 0x2bd   : > { %15273 = vst [vmem:[#allocation74_spill] sm:$0xff] %v12503_v62  ;;  %v9433_v7 = vpop.eup %9432  ;;  %v3003_v60 = vadd.f32 %v3002_v27, %v12041_v30  ;;  %v3163_v43 = vpop.f32.mrf.mxu1  ;;  %6426 = vmatmul.mubr.bf16.gmra.mxu1 %v12100_v5  ;;  %6274 = vmatprep.mubr.bf16.mxu0 %v15274_v9  ;;  %v3649_v6 = vmul.f32 0.5, %v12447_v28  ;;  %v3880_v50 = vmul.f32 0.70710677, %v12499_v45  ;;  %v12512_v18 = vadd.f32 %v3159_v16, %v2999_v41 }
 0x2be   : > { %v9435_v47 = vpop.eup %9434  ;;  %v4248_v0 = vadd.f32 1.0, %v9433_v7  ;;  %6435 = vmatprep.mubr.bf16.mxu1 %v12139_v12  ;;  %v3004_v31 = vpop.f32.mrf.mxu0  ;;  %9448 = verf.f32 %v3873_v63  ;;  %v4440_v27 = vmul.f32 %v4240_v54, %v3640_v33  ;;  %v4441_v41 = vmul.f32 %v4241_v58, %v3641_v57 }
 0x2bf   : > { %v9437_v1 = vpop.eup %9436  ;;  %v4249_v52 = vadd.f32 1.0, %v9435_v47  ;;  %v12515_v30 = vadd.f32 %v3163_v43, %v3003_v60  ;;  %v3005_v34 = vadd.f32 %v3004_v31, %v12077_v26  ;;  %v3165_v24 = vpop.f32.mrf.mxu1  ;;  %9450 = verf.f32 %v3880_v50 }
 0x2c0   : > { %v4448_v7 = vmul.f32 %v4248_v0, %v3648_v39  ;;  %v3881_v28 = vmul.f32 0.70710677, %v12512_v18  ;;  %v3006_v5 = vpop.f32.mrf.mxu0  ;;  %v9439_v16 = vpop.eup %9438  ;;  %v15275_v63 = vsub.s32 6, %v15256_v49  ;;  %v4284_v26 = vadd.f32 1.0, %v12422_v21 }
 0x2c1   : > { %v4449_v9 = vmul.f32 %v4249_v52, %v3649_v6  ;;  %v12519_v12 = vadd.f32 %v3165_v24, %v3005_v34  ;;  %v3167_v40 = vpop.f32.mrf.mxu1  ;;  %v4286_v43 = vadd.f32 1.0, %v9437_v1  ;;  %v4256_v5 = vadd.f32 1.0, %v9439_v16  ;;  %v15279_v1 = vld [vmem:[#allocation37_spill] sm:$0xff] }
 0x2c2   : > { %v12524_v60 = vrot.slane %v9657_v36, %v15275_v63  ;;  %v12527_v33 = vpack.c.bf16 %v4448_v7, %v4440_v27  ;;  %9452 = verf.f32 %v3881_v28  ;;  %v3007_v54 = vpop.f32.mrf.mxu0  ;;  %v9441_v39 = vpop.eup %9440  ;;  %v12531_v57 = vpack.c.bf16 %v12358_v37, %v12358_v37 }
 0x2c3   : > { %v3168_v47 = vpop.f32.mrf.mxu1  ;;  %v15277_v40 = vsub.s32 7, %v15256_v49  ;;  %v12537_v0 = vpack.c.bf16 %v4449_v9, %v4441_v41  ;;  %v3684_v21 = vmul.f32 0.5, %v11551_v53  ;;  %v3686_v50 = vmul.f32 0.5, %v12070_v25 }
 0x2c4   : > { %15276 = vst [vmem:[#allocation75_spill] sm:$0xff] %v12527_v33  ;;  %v9443_v6 = vpop.eup %9442  ;;  %v3204_v31 = vpop.f32.mrf.mxu0  ;;  %6275 = vmatmul.mubr.bf16.gmra.mxu0 %v15279_v1  ;;  %v12542_v52 = vpack.c.bf16 %v4487_v44, %v4487_v44  ;;  %v3656_v34 = vmul.f32 0.5, %v12458_v4  ;;  %v3664_v37 = vmul.f32 0.5, %v12468_v17  ;;  %v4257_v25 = vadd.f32 1.0, %v9441_v39 }
 0x2c5   : > { %v12535_v58 = vrot.slane %v9657_v36, %v15277_v40  ;;  %15278 = vst [vmem:[#allocation76_spill] sm:$0xff] %v12537_v0  ;;  %v4264_v24 = vadd.f32 1.0, %v9443_v6  ;;  %v3205_v49 = vadd.f32 %v3204_v31, %v12524_v60  ;;  %v3365_v36 = vpop.f32.mrf.mxu1  ;;  %6436 = vmatmul.mubr.bf16.gmra.mxu1 %v12128_v22  ;;  %6284 = vmatprep.mubr.bf16.mxu0 %v12531_v57  ;;  %v3657_v41 = vmul.f32 0.5, %v12465_v3 }
 0x2c6   : > { %15280 = vst [vmem:[#allocation37_spill] sm:$0xff] %v12542_v52  ;;  %v4484_v53 = vmul.f32 %v4284_v26, %v3684_v21  ;;  %v4486_v9 = vmul.f32 %v4286_v43, %v3686_v50  ;;  %6445 = vmatprep.mubr.bf16.mxu1 %v12542_v52  ;;  %v3206_v27 = vpop.f32.mrf.mxu0  ;;  %v4456_v7 = vmul.f32 %v4256_v5, %v3656_v34  ;;  %v3665_v63 = vmul.f32 0.5, %v12481_v19  ;;  %v8992_v52 = vld [vmem:[%s10046_s27 + $0x6c] ss:$16 sps:$4 sm:$0xff]  }
 0x2c7   : > { %v9445_v44 = vpop.eup %9444  ;;  %v4464_v28 = vmul.f32 %v4264_v24, %v3664_v37  ;;  %v12550_v4 = vadd.f32 %v3365_v36, %v3205_v49  ;;  %v3207_v17 = vadd.f32 %v3206_v27, %v12535_v58  ;;  %v3367_v16 = vpop.f32.mrf.mxu1  ;;  %v4457_v5 = vmul.f32 %v4257_v25, %v3657_v41 }
 0x2c8   : > { %v4265_v54 = vadd.f32 1.0, %v9445_v44  ;;  %v3208_v47 = vpop.f32.mrf.mxu0  ;;  %v12559_v6 = vpack.c.bf16 %v4484_v53, %v4484_v53  ;;  %v12562_v34 = vpack.c.bf16 %v4486_v9, %v4486_v9  ;;  %v3672_v9 = vmul.f32 0.5, %v12488_v48 }
 0x2c9   : > { %v9447_v26 = vpop.eup %9446  ;;  %v12555_v43 = vpack.c.bf16 %v4464_v28, %v4456_v7  ;;  %v12557_v39 = vadd.f32 %v3367_v16, %v3207_v17  ;;  %v3369_v40 = vpop.f32.mrf.mxu1  ;;  %v3209_v50 = vadd.f32 %v3208_v47, %v12524_v60  ;;  %v3698_v3 = vmul.f32 0.70710677, %v12550_v4 }
 0x2ca   : > { %15282 = vst [vmem:[#allocation78_spill] sm:$0xff] %v12559_v6  ;;  %v4465_v21 = vmul.f32 %v4265_v54, %v3665_v63  ;;  %v3210_v31 = vpop.f32.mrf.mxu0  ;;  %15283 = vst [vmem:[#allocation79_spill] sm:$0xff] %v12562_v34  ;;  %v4272_v49 = vadd.f32 1.0, %v9447_v26  ;;  %v3680_v7 = vmul.f32 0.5, %v12499_v45  ;;  %v3681_v28 = vmul.f32 0.5, %v12512_v18 }
 0x2cb   : > { %15281 = vst [vmem:[#allocation77_spill] sm:$0xff] %v12555_v43  ;;  %v3699_v19 = vmul.f32 0.70710677, %v12557_v39  ;;  %v3371_v37 = vpop.f32.mrf.mxu1  ;;  %v9449_v24 = vpop.eup %9448  ;;  %v12566_v36 = vadd.f32 %v3369_v40, %v3209_v50  ;;  %v3211_v27 = vadd.f32 %v3210_v31, %v12535_v58 }
 0x2cc   : > { %v3214_v53 = vpop.f32.mrf.mxu0  ;;  %6285 = vmatmul.mubr.bf16.gmra.mxu0 %v12559_v6  ;;  %v12570_v25 = vpack.c.bf16 %v4465_v21, %v4457_v5  ;;  %v9451_v44 = vpop.eup %9450  ;;  %v4273_v26 = vadd.f32 1.0, %v9449_v24  ;;  %v4472_v5 = vmul.f32 %v4272_v49, %v3672_v9  ;;  %v8974_v49 = vld [vmem:[%s10046_s27 + $0xcc] ss:$16 sps:$4 sm:$0xff]  }
 0x2cd   : > { %v3215_v17 = vadd.f32 %v3214_v53, %v12524_v60  ;;  %v3375_v16 = vpop.f32.mrf.mxu1  ;;  %6446 = vmatmul.mubr.bf16.gmra.mxu1 %v12562_v34  ;;  %6486 = vmatprep.mubr.bf16.mxu0 %v12209_v35  ;;  %v4280_v41 = vadd.f32 1.0, %v9451_v44  ;;  %9454 = verf.f32 %v3699_v19  ;;  %v3706_v63 = vmul.f32 0.70710677, %v12566_v36  ;;  %v8966_v53 = vld [vmem:[%s10046_s27 + $0xe8] ss:$16 sps:$4 sm:$0xff]  }
 0x2ce   : > { %15284 = vst [vmem:[#allocation80_spill] sm:$0xff] %v12570_v25  ;;  %v12579_v54 = vadd.f32 %v3371_v37, %v3211_v27  ;;  %v3216_v47 = vpop.f32.mrf.mxu0  ;;  %9456 = verf.f32 %v3698_v3  ;;  %v3673_v19 = vmul.f32 0.5, %v12493_v38 }
 0x2cf   : > { %v9453_v48 = vpop.eup %9452  ;;  %v12581_v45 = vadd.f32 %v3375_v16, %v3215_v17  ;;  %v3217_v18 = vadd.f32 %v3216_v47, %v12535_v58  ;;  %v3377_v40 = vpop.f32.mrf.mxu1  ;;  %v4480_v21 = vmul.f32 %v4280_v41, %v3680_v7  ;;  %9458 = verf.f32 %v3706_v63 }
 0x2d0   : > { %v4281_v50 = vadd.f32 1.0, %v9453_v48  ;;  %v3218_v31 = vpop.f32.mrf.mxu0  ;;  %v3707_v37 = vmul.f32 0.70710677, %v12579_v54  ;;  %v4473_v41 = vmul.f32 %v4273_v26, %v3673_v19 }
 0x2d1   : > { %v3379_v27 = vpop.f32.mrf.mxu1  ;;  %v12587_v44 = vpack.c.bf16 %v4480_v21, %v4472_v5  ;;  %v12589_v24 = vadd.f32 %v3377_v40, %v3217_v18  ;;  %v3219_v17 = vadd.f32 %v3218_v31, %v12524_v60  ;;  %v3714_v9 = vmul.f32 0.70710677, %v12581_v45  ;;  %v8972_v5 = vld [vmem:[%s10046_s27 + $0xc8] ss:$16 sps:$4 sm:$0xff]  }
 0x2d2   : > { %v4481_v3 = vmul.f32 %v4281_v50, %v3681_v28  ;;  %v3220_v16 = vpop.f32.mrf.mxu0  ;;  %9460 = verf.f32 %v3707_v37  ;;  %v8980_v50 = vld [vmem:[%s10046_s27 + $0xac] ss:$16 sps:$4 sm:$0xff]  }
 0x2d3   : > { %15285 = vst [vmem:[#allocation81_spill] sm:$0xff] %v12587_v44  ;;  %v3221_v7 = vadd.f32 %v3220_v16, %v12535_v58  ;;  %v3381_v38 = vpop.f32.mrf.mxu1  ;;  %v3715_v63 = vmul.f32 0.70710677, %v12589_v24  ;;  %v12596_v47 = vadd.f32 %v3379_v27, %v3219_v17 }
 0x2d4   : > { %v3224_v28 = vpop.f32.mrf.mxu0  ;;  %6487 = vmatmul.mubr.bf16.vlgmr.msra.gmra.mxu0 %v12195_v2  ;;  %v12606_v31 = vpack.c.bf16 %v4481_v3, %v4473_v41  ;;  %v8986_v41 = vld [vmem:[%s10046_s27 + $0x8c] ss:$16 sps:$4 sm:$0xff]  }
 0x2d5   : > { %v12599_v48 = vadd.f32 %v3381_v38, %v3221_v7  ;;  %v3225_v18 = vadd.f32 %v3224_v28, %v12524_v60  ;;  %v3385_v40 = vpop.f32.mrf.mxu1  ;;  %6496 = vmatprep.mubr.bf16.mxu0 %v12248_v13  ;;  %6777 = vmatpush1.bf16.msra.mxu0 %v8966_v53  ;;  %9462 = verf.f32 %v3715_v63  ;;  %v3722_v26 = vmul.f32 0.70710677, %v12596_v47  ;;  %v8978_v7 = vld [vmem:[%s10046_s27 + $0xa8] ss:$16 sps:$4 sm:$0xff]  }
 0x2d6   : > { %v3226_v21 = vpop.f32.mrf.mxu0  ;;  %6778 = vmatprep.subr.bf16.mxu0 %v8974_v49  ;;  %15286 = vst [vmem:[#allocation82_spill] sm:$0xff] %v12606_v31  ;;  %9464 = verf.f32 %v3714_v9 }
 0x2d7   : > { %v3723_v19 = vmul.f32 0.70710677, %v12599_v48  ;;  %v12609_v37 = vadd.f32 %v3385_v40, %v3225_v18  ;;  %v3227_v27 = vadd.f32 %v3226_v21, %v12535_v58  ;;  %v3387_v17 = vpop.f32.mrf.mxu1  ;;  %9466 = verf.f32 %v3722_v26 }
 0x2d8   : > { %v3228_v53 = vpop.f32.mrf.mxu0 }
 0x2d9   : > { %9468 = verf.f32 %v3723_v19  ;;  %v3389_v16 = vpop.f32.mrf.mxu1  ;;  %6779 = vmatpush1.bf16.msra.mxu0 %v8972_v5  ;;  %v3730_v49 = vmul.f32 0.70710677, %v12609_v37  ;;  %v12614_v38 = vadd.f32 %v3387_v17, %v3227_v27  ;;  %v3229_v3 = vadd.f32 %v3228_v53, %v12524_v60  ;;  %v8984_v53 = vld [vmem:[%s10046_s27 + $0x88] ss:$16 sps:$4 sm:$0xff]  }
 0x2da   : > { %v3230_v9 = vpop.f32.mrf.mxu0  ;;  %6780 = vmatprep.subr.bf16.mxu0 %v8980_v50  ;;  %v9455_v63 = vpop.eup %9454 }
 0x2db   : > { %v3231_v28 = vadd.f32 %v3230_v9, %v12535_v58  ;;  %v3391_v18 = vpop.f32.mrf.mxu1  ;;  %v9457_v40 = vpop.eup %9456  ;;  %v3731_v26 = vmul.f32 0.70710677, %v12614_v38  ;;  %v12620_v21 = vadd.f32 %v3389_v16, %v3229_v3  ;;  %v4099_v9 = vadd.f32 1.0, %v9455_v63 }
 0x2dc   : > { %v3234_v5 = vpop.f32.mrf.mxu0  ;;  %6497 = vmatmul.mubr.bf16.gmra.mxu0 %v12231_v23  ;;  %v9459_v19 = vpop.eup %9458  ;;  %9470 = verf.f32 %v3730_v49  ;;  %v4098_v63 = vadd.f32 1.0, %v9457_v40  ;;  %v3506_v49 = vmul.f32 0.5, %v12566_v36  ;;  %v8990_v36 = vld [vmem:[%s10046_s27 + $0x68] ss:$16 sps:$4 sm:$0xff]  }
 0x2dd   : > { %v12623_v27 = vadd.f32 %v3391_v18, %v3231_v28  ;;  %v3235_v50 = vadd.f32 %v3234_v5, %v12524_v60  ;;  %v3395_v17 = vpop.f32.mrf.mxu1  ;;  %6506 = vmatprep.mubr.bf16.mxu0 %v12289_v55  ;;  %6781 = vmatpush1.bf16.msra.mxu0 %v8978_v7  ;;  %v4106_v34 = vadd.f32 1.0, %v9459_v19  ;;  %v3738_v16 = vmul.f32 0.70710677, %v12620_v21 }
 0x2de   : > { %v3236_v3 = vpop.f32.mrf.mxu0  ;;  %6782 = vmatprep.subr.bf16.mxu0 %v8986_v41  ;;  %9472 = verf.f32 %v3731_v26  ;;  %v3498_v7 = vmul.f32 0.5, %v12550_v4  ;;  %v3499_v41 = vmul.f32 0.5, %v12557_v39  ;;  %v3507_v26 = vmul.f32 0.5, %v12579_v54 }
 0x2df   : > { %v3739_v23 = vmul.f32 0.70710677, %v12623_v27  ;;  %v12631_v28 = vadd.f32 %v3395_v17, %v3235_v50  ;;  %v3237_v18 = vadd.f32 %v3236_v3, %v12535_v58  ;;  %v3397_v5 = vpop.f32.mrf.mxu1  ;;  %v9461_v22 = vpop.eup %9460  ;;  %9474 = verf.f32 %v3738_v16 }
 0x2e0   : > { %v3238_v19 = vpop.f32.mrf.mxu0  ;;  %v4107_v55 = vadd.f32 1.0, %v9461_v22  ;;  %v4306_v17 = vmul.f32 %v4106_v34, %v3506_v49  ;;  %v4299_v2 = vmul.f32 %v4099_v9, %v3499_v41  ;;  %v3514_v54 = vmul.f32 0.5, %v12581_v45 }
 0x2e1   : > { %9476 = verf.f32 %v3739_v23  ;;  %v3399_v50 = vpop.f32.mrf.mxu1  ;;  %6783 = vmatpush1.bf16.msra.mxu0 %v8984_v53  ;;  %v3746_v3 = vmul.f32 0.70710677, %v12631_v28  ;;  %v12639_v13 = vadd.f32 %v3397_v5, %v3237_v18  ;;  %v3239_v4 = vadd.f32 %v3238_v19, %v12524_v60  ;;  %v8998_v53 = vld [vmem:[%s10046_s27 + $0x4c] ss:$16 sps:$4 sm:$0xff]  }
 0x2e2   : > { %v3240_v40 = vpop.f32.mrf.mxu0  ;;  %6784 = vmatprep.subr.bf16.mxu0 %v8992_v52  ;;  %v9463_v16 = vpop.eup %9462  ;;  %v4307_v39 = vmul.f32 %v4107_v55, %v3507_v26  ;;  %v4298_v49 = vmul.f32 %v4098_v63, %v3498_v7  ;;  %v3515_v18 = vmul.f32 0.5, %v12589_v24  ;;  %v3522_v5 = vmul.f32 0.5, %v12596_v47  ;;  %v8969_v47 = vld [vmem:[%s10046_s27 + $0x2e8] ss:$16 sps:$4 sm:$0xff]   ;;  %v8977_v7 = vld [vmem:[%s10046_s27 + $0x2cc] ss:$16 sps:$4 sm:$0xff]  }
 0x2e3   : > { %v3241_v22 = vadd.f32 %v3240_v40, %v12535_v58  ;;  %v3401_v23 = vpop.f32.mrf.mxu1  ;;  %v9465_v34 = vpop.eup %9464  ;;  %v3747_v19 = vmul.f32 0.70710677, %v12639_v13  ;;  %v12650_v45 = vadd.f32 %v3399_v50, %v3239_v4  ;;  %9478 = verf.f32 %v3746_v3  ;;  %v8996_v4 = vld [vmem:[%s10046_s27 + $0x48] ss:$16 sps:$4 sm:$0xff]  }
 0x2e4   : > { %v3244_v52 = vpop.f32.mrf.mxu0  ;;  %6507 = vmatmul.mubr.bf16.gmra.mxu0 %v12276_v11  ;;  %v9467_v55 = vpop.eup %9466  ;;  %v12656_v24 = vpack.c.bf16 %v4307_v39, %v4299_v2  ;;  %v12660_v40 = vpack.c.bf16 %v4306_v17, %v4298_v49  ;;  %v4115_v11 = vadd.f32 1.0, %v9463_v16 }
 0x2e5   : > { %v12652_v9 = vadd.f32 %v3401_v23, %v3241_v22  ;;  %v3245_v41 = vadd.f32 %v3244_v52, %v12524_v60  ;;  %v3405_v26 = vpop.f32.mrf.mxu1  ;;  %6516 = vmatprep.mubr.bf16.mxu0 %v12323_v56  ;;  %v4122_v35 = vadd.f32 1.0, %v9467_v55  ;;  %6785 = vmatpush1.bf16.msra.mxu0 %v8990_v36  ;;  %v9004_v22 = vld [vmem:[%s10046_s27 + $0x2c] ss:$16 sps:$4 sm:$0xff]   ;;  %v4114_v23 = vadd.f32 1.0, %v9465_v34 }
 0x2e6   : > { %v9469_v63 = vpop.eup %9468  ;;  %v3246_v50 = vpop.f32.mrf.mxu0  ;;  %v3523_v52 = vmul.f32 0.5, %v12599_v48  ;;  %v3754_v56 = vmul.f32 0.70710677, %v12650_v45  ;;  %6647 = vmatprep.mubr.bf16.mxu1 %v12656_v24  ;;  %6786 = vmatprep.subr.bf16.mxu0 %v8998_v53  ;;  %9480 = verf.f32 %v3747_v19  ;;  %v8975_v53 = vld [vmem:[%s10046_s27 + $0x2c8] ss:$16 sps:$4 sm:$0xff]   ;;  %v4315_v19 = vmul.f32 %v4115_v11, %v3515_v18 }
 0x2e7   : > { %v4123_v6 = vadd.f32 1.0, %v9469_v63  ;;  %v3407_v2 = vpop.f32.mrf.mxu1  ;;  %v3755_v17 = vmul.f32 0.70710677, %v12652_v9  ;;  %v12668_v16 = vadd.f32 %v3405_v26, %v3245_v41  ;;  %v3247_v3 = vadd.f32 %v3246_v50, %v12535_v58  ;;  %6648 = vmatmul.mubr.bf16.vlgmr.msra.gmra.mxu1 %v12660_v40  ;;  %v8983_v26 = vld [vmem:[%s10046_s27 + $0x2ac] ss:$16 sps:$4 sm:$0xff]  }
 0x2e8   : > { %v3248_v36 = vpop.f32.mrf.mxu0  ;;  %v4322_v48 = vmul.f32 %v4122_v35, %v3522_v5  ;;  %9482 = verf.f32 %v3754_v56  ;;  %6938 = vmatpush1.bf16.msra.mxu1 %v8969_v47  ;;  %v4314_v35 = vmul.f32 %v4114_v23, %v3514_v54  ;;  %v9002_v50 = vld [vmem:[%s10046_s27 + $0x28] ss:$16 sps:$4 sm:$0xff]   ;;  %v3539_v23 = vmul.f32 0.5, %v12623_v27  ;;  %v8989_v27 = vld [vmem:[%s10046_s27 + $0x28c] ss:$16 sps:$4 sm:$0xff]  }
 0x2e9   : > { %v4323_v39 = vmul.f32 %v4123_v6, %v3523_v52  ;;  %v3249_v34 = vadd.f32 %v3248_v36, %v12524_v60  ;;  %v3409_v49 = vpop.f32.mrf.mxu1  ;;  %9484 = verf.f32 %v3755_v17  ;;  %v3762_v55 = vmul.f32 0.70710677, %v12668_v16  ;;  %6939 = vmatprep.subr.bf16.mxu1 %v8977_v7  ;;  %6787 = vmatpush1.bf16.msra.mxu0 %v8996_v4  ;;  %v9471_v63 = vpop.eup %9470  ;;  %v8981_v7 = vld [vmem:[%s10046_s27 + $0x2a8] ss:$16 sps:$4 sm:$0xff]   ;;  %v9010_v17 = vld [vmem:[%s10046_s27 + $0xc] ss:$16 sps:$4 sm:$0xff]  }
 0x2ea   : > { %v3250_v41 = vpop.f32.mrf.mxu0  ;;  %v12676_v6 = vadd.f32 %v3407_v2, %v3247_v3  ;;  %6788 = vmatprep.subr.bf16.mxu0 %v9004_v22  ;;  %v12687_v54 = vpack.c.bf16 %v4322_v48, %v4314_v35 }
 0x2eb   : > { %v12678_v56 = vadd.f32 %v3409_v49, %v3249_v34  ;;  %v3251_v5 = vadd.f32 %v3250_v41, %v12535_v58  ;;  %v3411_v47 = vpop.f32.mrf.mxu1  ;;  %v9473_v11 = vpop.eup %9472  ;;  %v12683_v52 = vpack.c.bf16 %v4323_v39, %v4315_v19  ;;  %9486 = verf.f32 %v3762_v55 }
 0x2ec   : > { %v3254_v18 = vpop.f32.mrf.mxu0  ;;  %6517 = vmatmul.mubr.bf16.gmra.mxu0 %v12313_v42  ;;  %v9475_v4 = vpop.eup %9474  ;;  %15287 = vst [vmem:[#allocation83_spill] sm:$0xff] %v12687_v54  ;;  %v3763_v2 = vmul.f32 0.70710677, %v12676_v6  ;;  %6940 = vmatpush1.bf16.msra.mxu1 %v8975_v53  ;;  %v4131_v19 = vadd.f32 1.0, %v9473_v11  ;;  %v4130_v55 = vadd.f32 1.0, %v9471_v63 }
 0x2ed   : > { %v3770_v3 = vmul.f32 0.70710677, %v12678_v56  ;;  %v3415_v36 = vpop.f32.mrf.mxu1  ;;  %6526 = vmatprep.mubr.bf16.mxu0 %v12368_v61  ;;  %v4138_v39 = vadd.f32 1.0, %v9475_v4  ;;  %v12693_v34 = vadd.f32 %v3411_v47, %v3251_v5  ;;  %v3255_v49 = vadd.f32 %v3254_v18, %v12524_v60  ;;  %6657 = vmatprep.mubr.bf16.mxu1 %v12683_v52  ;;  %v9008_v4 = vld [vmem:[%s10046_s27 + $0x8] ss:$16 sps:$4 sm:$0xff]  }
 0x2ee   : > { %v9477_v22 = vpop.eup %9476  ;;  %v3256_v48 = vpop.f32.mrf.mxu0  ;;  %6941 = vmatprep.subr.bf16.mxu1 %v8983_v26  ;;  %9488 = verf.f32 %v3763_v2  ;;  %6789 = vmatpush1.bf16.msra.mxu0 %v9002_v50  ;;  %v3538_v5 = vmul.f32 0.5, %v12620_v21  ;;  %v9016_v11 = vld [vmem:[%s10046_s27 + $0x1ec] ss:$16 sps:$4 sm:$0xff]   ;;  %v3531_v18 = vmul.f32 0.5, %v12614_v38  ;;  %v8987_v21 = vld [vmem:[%s10046_s27 + $0x288] ss:$16 sps:$4 sm:$0xff]  }
 0x2ef   : > { %v4139_v41 = vadd.f32 1.0, %v9477_v22  ;;  %v3257_v35 = vadd.f32 %v3256_v48, %v12535_v58  ;;  %v3417_v53 = vpop.f32.mrf.mxu1  ;;  %9490 = verf.f32 %v3770_v3  ;;  %v3771_v47 = vmul.f32 0.70710677, %v12693_v34  ;;  %6658 = vmatmul.mubr.bf16.gmra.mxu1 %v12687_v54  ;;  %6790 = vmatprep.subr.bf16.mxu0 %v9010_v17  ;;  %v8995_v17 = vld [vmem:[%s10046_s27 + $0x26c] ss:$16 sps:$4 sm:$0xff]  }
 0x2f0   : > { %v3258_v26 = vpop.f32.mrf.mxu0  ;;  %v12705_v22 = vadd.f32 %v3415_v36, %v3255_v49  ;;  %6942 = vmatpush1.bf16.msra.mxu1 %v8981_v7  ;;  %v3530_v3 = vmul.f32 0.5, %v12609_v37  ;;  %v4338_v48 = vmul.f32 %v4138_v39, %v3538_v5  ;;  %v9479_v38 = vpop.eup %9478  ;;  %v3555_v5 = vmul.f32 0.5, %v12652_v9  ;;  %v9001_v9 = vld [vmem:[%s10046_s27 + $0x24c] ss:$16 sps:$4 sm:$0xff]  }
 0x2f1   : > { %v4339_v2 = vmul.f32 %v4139_v41, %v3539_v23  ;;  %v12707_v50 = vadd.f32 %v3417_v53, %v3257_v35  ;;  %v3419_v63 = vpop.f32.mrf.mxu1  ;;  %9492 = verf.f32 %v3771_v47  ;;  %v3259_v54 = vadd.f32 %v3258_v26, %v12524_v60  ;;  %6943 = vmatprep.subr.bf16.mxu1 %v8989_v27  ;;  %v9014_v41 = vld [vmem:[%s10046_s27 + $0x1e8] ss:$16 sps:$4 sm:$0xff]   ;;  %v9022_v27 = vld [vmem:[%s10046_s27 + $0x1cc] ss:$16 sps:$4 sm:$0xff]  }
 0x2f2   : > { %v3260_v61 = vpop.f32.mrf.mxu0  ;;  %v4331_v23 = vmul.f32 %v4131_v19, %v3531_v18  ;;  %v3778_v36 = vmul.f32 0.70710677, %v12705_v22  ;;  %6791 = vmatpush1.bf16.msra.mxu0 %v9008_v4  ;;  %v4330_v7 = vmul.f32 %v4130_v55, %v3530_v3  ;;  %v4146_v18 = vadd.f32 1.0, %v9479_v38 }
 0x2f3   : > { %v3421_v49 = vpop.f32.mrf.mxu1  ;;  %v3779_v35 = vmul.f32 0.70710677, %v12707_v50  ;;  %v12716_v37 = vadd.f32 %v3419_v63, %v3259_v54  ;;  %v3261_v39 = vadd.f32 %v3260_v61, %v12535_v58  ;;  %6792 = vmatprep.subr.bf16.mxu0 %v9016_v11  ;;  %v9481_v19 = vpop.eup %9480  ;;  %v8993_v54 = vld [vmem:[%s10046_s27 + $0x268] ss:$16 sps:$4 sm:$0xff]  }
 0x2f4   : > { %v3264_v53 = vpop.f32.mrf.mxu0  ;;  %6527 = vmatmul.mubr.bf16.gmra.mxu0 %v12348_v10  ;;  %v12724_v55 = vpack.c.bf16 %v4339_v2, %v4331_v23  ;;  %6944 = vmatpush1.bf16.msra.mxu1 %v8987_v21  ;;  %v12727_v61 = vpack.c.bf16 %v4338_v48, %v4330_v7  ;;  %9494 = verf.f32 %v3778_v36  ;;  %v9020_v48 = vld [vmem:[%s10046_s27 + $0x1c8] ss:$16 sps:$4 sm:$0xff]   ;;  %v4147_v38 = vadd.f32 1.0, %v9481_v19 }
 0x2f5   : > { %v3265_v4 = vadd.f32 %v3264_v53, %v12524_v60  ;;  %v3425_v47 = vpop.f32.mrf.mxu1  ;;  %6536 = vmatprep.mubr.bf16.mxu0 %v12410_v29  ;;  %v9483_v26 = vpop.eup %9482  ;;  %v3786_v11 = vmul.f32 0.70710677, %v12716_v37  ;;  %6945 = vmatprep.subr.bf16.mxu1 %v8995_v17  ;;  %9496 = verf.f32 %v3779_v35  ;;  %v12731_v29 = vadd.f32 %v3421_v49, %v3261_v39  ;;  %v9028_v49 = vld [vmem:[%s10046_s27 + $0x1ac] ss:$16 sps:$4 sm:$0xff]   ;;  %v9026_v10 = vld [vmem:[%s10046_s27 + $0x1a8] ss:$16 sps:$4 sm:$0xff]  }
 0x2f6   : > { %15288 = vst [vmem:[#allocation84_spill] sm:$0xff] %v12727_v61  ;;  %v3266_v63 = vpop.f32.mrf.mxu0  ;;  %v9485_v3 = vpop.eup %9484  ;;  %v4154_v53 = vadd.f32 1.0, %v9483_v26  ;;  %6667 = vmatprep.mubr.bf16.mxu1 %v12724_v55  ;;  %6793 = vmatpush2.bf16.msra.mxu0 %v9014_v41  ;;  %v3546_v7 = vmul.f32 0.5, %v12631_v28  ;;  %v3554_v35 = vmul.f32 0.5, %v12650_v45  ;;  %v8999_v41 = vld [vmem:[%s10046_s27 + $0x248] ss:$16 sps:$4 sm:$0xff]  }
 0x2f7   : > { %v3267_v2 = vadd.f32 %v3266_v63, %v12535_v58  ;;  %v3427_v21 = vpop.f32.mrf.mxu1  ;;  %v4155_v23 = vadd.f32 1.0, %v9485_v3  ;;  %9498 = verf.f32 %v3786_v11  ;;  %v12736_v36 = vadd.f32 %v3425_v47, %v3265_v4  ;;  %6668 = vmatmul.mubr.bf16.gmra.mxu1 %v12727_v61  ;;  %6794 = vmatprep.subr.bf16.mxu0 %v9022_v27  ;;  %v9007_v27 = vld [vmem:[%s10046_s27 + $0x22c] ss:$16 sps:$4 sm:$0xff]  }
 0x2f8   : > { %v3268_v17 = vpop.f32.mrf.mxu0  ;;  %v3787_v39 = vmul.f32 0.70710677, %v12731_v29  ;;  %6946 = vmatpush1.bf16.msra.mxu1 %v8993_v54  ;;  %v3547_v19 = vmul.f32 0.5, %v12639_v13  ;;  %v3563_v47 = vmul.f32 0.5, %v12676_v6  ;;  %v9487_v3 = vpop.eup %9486  ;;  %v4354_v28 = vmul.f32 %v4154_v53, %v3554_v35  ;;  %v9034_v53 = vld [vmem:[%s10046_s27 + $0x18c] ss:$16 sps:$4 sm:$0xff]  }
 0x2f9   : > { %v3429_v26 = vpop.f32.mrf.mxu1  ;;  %v4355_v4 = vmul.f32 %v4155_v23, %v3555_v5  ;;  %v12746_v11 = vadd.f32 %v3427_v21, %v3267_v2  ;;  %6947 = vmatprep.subr.bf16.mxu1 %v9001_v9  ;;  %v3269_v45 = vadd.f32 %v3268_v17, %v12524_v60  ;;  %v4346_v5 = vmul.f32 %v4146_v18, %v3546_v7 }
 0x2fa   : > { %v3270_v63 = vpop.f32.mrf.mxu0  ;;  %9500 = verf.f32 %v3787_v39  ;;  %6795 = vmatpush2.bf16.msra.mxu0 %v9020_v48  ;;  %v4347_v23 = vmul.f32 %v4147_v38, %v3547_v19  ;;  %v3794_v6 = vmul.f32 0.70710677, %v12736_v36  ;;  %v3570_v17 = vmul.f32 0.5, %v12678_v56  ;;  %v9013_v56 = vld [vmem:[%s10046_s27 + $0x20c] ss:$16 sps:$4 sm:$0xff]  }
 0x2fb   : > { %v3271_v54 = vadd.f32 %v3270_v63, %v12535_v58  ;;  %v3431_v61 = vpop.f32.mrf.mxu1  ;;  %v9489_v13 = vpop.eup %9488  ;;  %v3795_v2 = vmul.f32 0.70710677, %v12746_v11  ;;  %6796 = vmatprep.subr.bf16.mxu0 %v9028_v49  ;;  %v12757_v35 = vadd.f32 %v3429_v26, %v3269_v45  ;;  %v9005_v63 = vld [vmem:[%s10046_s27 + $0x228] ss:$16 sps:$4 sm:$0xff]   ;;  %v4162_v45 = vadd.f32 1.0, %v9487_v3 }
 0x2fc   : > { %v3274_v9 = vpop.f32.mrf.mxu0  ;;  %6537 = vmatmul.mubr.bf16.gmra.mxu0 %v12396_v15  ;;  %v9491_v21 = vpop.eup %9490  ;;  %6948 = vmatpush1.bf16.msra.mxu1 %v8999_v41  ;;  %v4163_v7 = vadd.f32 1.0, %v9489_v13  ;;  %v12763_v49 = vpack.c.bf16 %v4355_v4, %v4347_v23  ;;  %v9032_v13 = vld [vmem:[%s10046_s27 + $0x188] ss:$16 sps:$4 sm:$0xff]   ;;  %v3562_v3 = vmul.f32 0.5, %v12668_v16 }
 0x2fd   : > { %v12759_v48 = vadd.f32 %v3431_v61, %v3271_v54  ;;  %v3275_v18 = vadd.f32 %v3274_v9, %v12524_v60  ;;  %v3435_v38 = vpop.f32.mrf.mxu1  ;;  %6546 = vmatprep.mubr.bf16.mxu0 %v12445_v59  ;;  %v4170_v39 = vadd.f32 1.0, %v9491_v21  ;;  %9502 = verf.f32 %v3795_v2  ;;  %6949 = vmatprep.subr.bf16.mxu1 %v9007_v27  ;;  %v9035_v59 = vld [vmem:[%s10046_s27 + $0x168] ss:$16 sps:$4 sm:$0xff]  }
 0x2fe   : > { %v3276_v19 = vpop.f32.mrf.mxu0  ;;  %v9493_v26 = vpop.eup %9492  ;;  %v12767_v61 = vpack.c.bf16 %v4354_v28, %v4346_v5  ;;  %v3571_v54 = vmul.f32 0.5, %v12693_v34  ;;  %v3802_v9 = vmul.f32 0.70710677, %v12757_v35  ;;  %6797 = vmatpush2.bf16.msra.mxu0 %v9026_v10  ;;  %9504 = verf.f32 %v3794_v6  ;;  %6677 = vmatprep.mubr.bf16.mxu1 %v12763_v49  ;;  %v9037_v28 = vld [vmem:[%s10046_s27 + $0x16c] ss:$16 sps:$4 sm:$0xff]  }
 0x2ff   : > { %v3437_v41 = vpop.f32.mrf.mxu1  ;;  %v4171_v21 = vadd.f32 1.0, %v9493_v26  ;;  %v3803_v4 = vmul.f32 0.70710677, %v12759_v48  ;;  %v12773_v23 = vadd.f32 %v3435_v38, %v3275_v18  ;;  %6798 = vmatprep.subr.bf16.mxu0 %v9034_v53  ;;  %v3277_v34 = vadd.f32 %v3276_v19, %v12535_v58  ;;  %v9011_v53 = vld [vmem:[%s10046_s27 + $0x208] ss:$16 sps:$4 sm:$0xff]  }
 0x300   : > { %15289 = vst [vmem:[#allocation85_spill] sm:$0xff] %v12767_v61  ;;  %v3278_v27 = vpop.f32.mrf.mxu0  ;;  %9506 = verf.f32 %v3802_v9  ;;  %6678 = vmatmul.mubr.bf16.gmra.mxu1 %v12767_v61  ;;  %v4363_v6 = vmul.f32 %v4163_v7, %v3563_v47  ;;  %v4370_v2 = vmul.f32 %v4170_v39, %v3570_v17  ;;  %v3888_v17 = vmul.f32 0.70710677, %v12515_v30 }
 0x301   : > { %v3279_v10 = vadd.f32 %v3278_v27, %v12524_v60  ;;  %v3439_v5 = vpop.f32.mrf.mxu1  ;;  %v4371_v18 = vmul.f32 %v4171_v21, %v3571_v54  ;;  %9508 = verf.f32 %v3803_v4  ;;  %6950 = vmatpush1.bf16.msra.mxu1 %v9005_v63  ;;  %v9495_v26 = vpop.eup %9494  ;;  %v3810_v16 = vmul.f32 0.70710677, %v12773_v23  ;;  %v9019_v27 = vld [vmem:[%s10046_s27 + $0x3ec] ss:$16 sps:$4 sm:$0xff]  }
 0x302   : > { %v3280_v38 = vpop.f32.mrf.mxu0  ;;  %v12783_v9 = vadd.f32 %v3437_v41, %v3277_v34  ;;  %6951 = vmatprep.subr.bf16.mxu1 %v9013_v56  ;;  %6799 = vmatpush2.bf16.msra.mxu0 %v9032_v13  ;;  %v9497_v47 = vpop.eup %9496  ;;  %v4362_v7 = vmul.f32 %v4162_v45, %v3562_v3  ;;  %v9043_v41 = vld [vmem:[%s10046_s27 + $0x14c] ss:$16 sps:$4 sm:$0xff]   ;;  %v3889_v56 = vmul.f32 0.70710677, %v12519_v12  ;;  %v3578_v13 = vmul.f32 0.5, %v12705_v22 }
 0x303   : > { %v12785_v19 = vadd.f32 %v3439_v5, %v3279_v10  ;;  %v3441_v61 = vpop.f32.mrf.mxu1  ;;  %v3281_v39 = vadd.f32 %v3280_v38, %v12535_v58  ;;  %v12792_v54 = vpack.c.bf16 %v4371_v18, %v4363_v6  ;;  %6800 = vmatprep.subr.bf16.mxu0 %v9037_v28  ;;  %9510 = verf.f32 %v3810_v16  ;;  %v9017_v5 = vld [vmem:[%s10046_s27 + $0x3e8] ss:$16 sps:$4 sm:$0xff]   ;;  %v9025_v38 = vld [vmem:[%s10046_s27 + $0x3cc] ss:$16 sps:$4 sm:$0xff]  }
 0x304   : > { %v3284_v63 = vpop.f32.mrf.mxu0  ;;  %6547 = vmatmul.mubr.bf16.gmra.mxu0 %v12436_v51  ;;  %v9499_v21 = vpop.eup %9498  ;;  %v3811_v4 = vmul.f32 0.70710677, %v12783_v9  ;;  %v12799_v45 = vpack.c.bf16 %v4370_v2, %v4362_v7  ;;  %v9041_v16 = vld [vmem:[%s10046_s27 + $0x148] ss:$16 sps:$4 sm:$0xff]   ;;  %v3586_v51 = vmul.f32 0.5, %v12716_v37 }
 0x305   : > { %15290 = vst [vmem:[#allocation86_spill] sm:$0xff] %v12792_v54  ;;  %v3445_v34 = vpop.f32.mrf.mxu1  ;;  %6556 = vmatprep.mubr.bf16.mxu0 %v12471_v20  ;;  %v4186_v3 = vadd.f32 1.0, %v9499_v21  ;;  %v3818_v10 = vmul.f32 0.70710677, %v12785_v19  ;;  %6687 = vmatprep.mubr.bf16.mxu1 %v12792_v54  ;;  %v12804_v22 = vadd.f32 %v3441_v61, %v3281_v39  ;;  %v3285_v6 = vadd.f32 %v3284_v63, %v12524_v60  ;;  %v9046_v61 = vld [vmem:[%s10046_s27 + $0x12c] ss:$16 sps:$4 sm:$0xff]  }
 0x306   : > { %15291 = vst [vmem:[#allocation87_spill] sm:$0xff] %v12799_v45  ;;  %v3286_v28 = vpop.f32.mrf.mxu0  ;;  %6952 = vmatpush1.bf16.msra.mxu1 %v9011_v53  ;;  %9512 = verf.f32 %v3811_v4  ;;  %6801 = vmatpush2.bf16.msra.mxu0 %v9035_v59  ;;  %v4178_v21 = vadd.f32 1.0, %v9495_v26  ;;  %v4179_v20 = vadd.f32 1.0, %v9497_v47  ;;  %v3587_v39 = vmul.f32 0.5, %v12731_v29  ;;  %v9023_v29 = vld [vmem:[%s10046_s27 + $0x3c8] ss:$16 sps:$4 sm:$0xff]  }
 0x307   : > { %v3287_v18 = vadd.f32 %v3286_v28, %v12535_v58  ;;  %v3447_v2 = vpop.f32.mrf.mxu1  ;;  %6953 = vmatprep.subr.bf16.mxu1 %v9019_v27  ;;  %v9501_v7 = vpop.eup %9500  ;;  %9514 = verf.f32 %v3818_v10  ;;  %6802 = vmatprep.subr.bf16.mxu0 %v9043_v41  ;;  %v3819_v4 = vmul.f32 0.70710677, %v12804_v22  ;;  %v12814_v28 = vadd.f32 %v3445_v34, %v3285_v6  ;;  %v9044_v54 = vld [vmem:[%s10046_s27 + $0x128] ss:$16 sps:$4 sm:$0xff]  }
 0x308   : > { %v3288_v53 = vpop.f32.mrf.mxu0  ;;  %v4187_v63 = vadd.f32 1.0, %v9501_v7  ;;  %6688 = vmatmul.mubr.bf16.gmra.mxu1 %v12799_v45  ;;  %v3579_v26 = vmul.f32 0.5, %v12707_v50  ;;  %v4386_v37 = vmul.f32 %v4186_v3, %v3586_v51  ;;  %v9031_v45 = vld [vmem:[%s10046_s27 + $0x3ac] ss:$16 sps:$4 sm:$0xff]   ;;  %v4378_v51 = vmul.f32 %v4178_v21, %v3578_v13 }
 0x309   : > { %v3449_v59 = vpop.f32.mrf.mxu1  ;;  %v12818_v27 = vadd.f32 %v3447_v2, %v3287_v18  ;;  %v3289_v47 = vadd.f32 %v3288_v53, %v12524_v60  ;;  %9516 = verf.f32 %v3819_v4  ;;  %v3826_v34 = vmul.f32 0.70710677, %v12814_v28  ;;  %v9040_v4 = vld [vmem:[%s10046_s27 + $0x38c] ss:$16 sps:$4 sm:$0xff]  }
 0x30a   : > { %v3290_v41 = vpop.f32.mrf.mxu0  ;;  %6954 = vmatpush2.bf16.msra.mxu1 %v9017_v5  ;;  %v9503_v10 = vpop.eup %9502  ;;  %v4387_v7 = vmul.f32 %v4187_v63, %v3587_v39  ;;  %6803 = vmatpush2.bf16.msra.mxu0 %v9041_v16  ;;  %9518 = verf.f32 %v3888_v17  ;;  %v4379_v50 = vmul.f32 %v4179_v20, %v3579_v26  ;;  %v9052_v5 = vld [vmem:[%s10046_s27 + $0x10c] ss:$16 sps:$4 sm:$0xff]   ;;  %v12833_v13 = vpack.c.bf16 %v4386_v37, %v4378_v51 }
 0x30b   : > { %v3451_v6 = vpop.f32.mrf.mxu1  ;;  %6955 = vmatprep.subr.bf16.mxu1 %v9025_v38  ;;  %v3827_v3 = vmul.f32 0.70710677, %v12818_v27  ;;  %6804 = vmatprep.subr.bf16.mxu0 %v9046_v61  ;;  %v9505_v2 = vpop.eup %9504  ;;  %9520 = verf.f32 %v3889_v56  ;;  %v12828_v53 = vadd.f32 %v3449_v59, %v3289_v47  ;;  %v3291_v38 = vadd.f32 %v3290_v41, %v12535_v58  ;;  %v9029_v56 = vld [vmem:[%s10046_s27 + $0x3a8] ss:$16 sps:$4 sm:$0xff]  }
 0x30c   : > { %v3294_v18 = vpop.f32.mrf.mxu0  ;;  %6557 = vmatmul.mubr.bf16.gmra.mxu0 %v12461_v14  ;;  %15292 = vst [vmem:[#allocation88_spill] sm:$0xff] %v12833_v13  ;;  %v4195_v21 = vadd.f32 1.0, %v9503_v10  ;;  %v3603_v61 = vmul.f32 0.5, %v12759_v48  ;;  %v12836_v39 = vpack.c.bf16 %v4387_v7, %v4379_v50  ;;  %9522 = verf.f32 %v3826_v34  ;;  %v9050_v10 = vld [vmem:[%s10046_s27 + $0x108] ss:$16 sps:$4 sm:$0xff]  }
 0x30d   : > { %v3295_v16 = vadd.f32 %v3294_v18, %v12524_v60  ;;  %v3455_v17 = vpop.f32.mrf.mxu1  ;;  %6566 = vmatprep.mubr.bf16.mxu0 %v12503_v62  ;;  %v9507_v20 = vpop.eup %9506  ;;  %v3834_v47 = vmul.f32 0.70710677, %v12828_v53  ;;  %v12841_v41 = vadd.f32 %v3451_v6, %v3291_v38  ;;  %9524 = verf.f32 %v3827_v3  ;;  %v9064_v34 = vld [vmem:[%s10046_s27 + $0x4ec] ss:$16 sps:$4 sm:$0xff]   ;;  %v9125_v62 = vld [vmem:[%s10046_s27 + $0x7a8] ss:$16 sps:$4 sm:$0xff]  }
 0x30e   : > { %v3296_v63 = vpop.f32.mrf.mxu0  ;;  %6956 = vmatpush2.bf16.msra.mxu1 %v9023_v29  ;;  %v9509_v59 = vpop.eup %9508  ;;  %v4202_v26 = vadd.f32 1.0, %v9507_v20  ;;  %6805 = vmatpush2.bf16.msra.mxu0 %v9044_v54  ;;  %v4194_v50 = vadd.f32 1.0, %v9505_v2  ;;  %v3602_v6 = vmul.f32 0.5, %v12757_v35  ;;  %v3594_v3 = vmul.f32 0.5, %v12736_v36 }
 0x30f   : > { %v3457_v37 = vpop.f32.mrf.mxu1  ;;  %6957 = vmatprep.subr.bf16.mxu1 %v9031_v45  ;;  %v4203_v51 = vadd.f32 1.0, %v9509_v59  ;;  %v12844_v48 = vadd.f32 %v3455_v17, %v3295_v16  ;;  %6697 = vmatprep.mubr.bf16.mxu1 %v12836_v39  ;;  %v3297_v29 = vadd.f32 %v3296_v63, %v12535_v58  ;;  %9526 = verf.f32 %v3834_v47  ;;  %v9049_v47 = vld [vmem:[%s10046_s27 + $0x36c] ss:$16 sps:$4 sm:$0xff]  }
 0x310   : > { %v3298_v7 = vpop.f32.mrf.mxu0  ;;  %6806 = vmatprep.subr.bf16.mxu0 %v9052_v5  ;;  %v3835_v45 = vmul.f32 0.70710677, %v12841_v41  ;;  %6698 = vmatmul.mubr.bf16.gmra.mxu1 %v12833_v13  ;;  %v3595_v18 = vmul.f32 0.5, %v12746_v11  ;;  %v9038_v5 = vld [vmem:[%s10046_s27 + $0x388] ss:$16 sps:$4 sm:$0xff]   ;;  %v9511_v2 = vpop.eup %9510  ;;  %v4402_v20 = vmul.f32 %v4202_v26, %v3602_v6  ;;  %v12858_v35 = vmul.f32 0.5, %v12773_v23 }
 0x311   : > { %v3459_v54 = vpop.f32.mrf.mxu1  ;;  %v4403_v38 = vmul.f32 %v4203_v51, %v3603_v61  ;;  %v12854_v16 = vadd.f32 %v3457_v37, %v3297_v29  ;;  %v3299_v63 = vadd.f32 %v3298_v7, %v12524_v60  ;;  %v3842_v61 = vmul.f32 0.70710677, %v12844_v48 }
 0x312   : > { %v3300_v17 = vpop.f32.mrf.mxu0  ;;  %6958 = vmatpush2.bf16.msra.mxu1 %v9029_v56  ;;  %9528 = verf.f32 %v3835_v45  ;;  %6807 = vmatpush2.bf16.msra.mxu0 %v9050_v10  ;;  %v4395_v11 = vmul.f32 %v4195_v21, %v3595_v18  ;;  %v4394_v26 = vmul.f32 %v4194_v50, %v3594_v3  ;;  %v3618_v29 = vmul.f32 0.5, %v12785_v19 }
 0x313   : > { %v3461_v59 = vpop.f32.mrf.mxu1  ;;  %6959 = vmatprep.subr.bf16.mxu1 %v9040_v4  ;;  %v9513_v36 = vpop.eup %9512  ;;  %v3843_v37 = vmul.f32 0.70710677, %v12854_v16  ;;  %v3301_v56 = vadd.f32 %v3300_v17, %v12535_v58  ;;  %7098 = vmatprep.subr.bf16.mxu0 %v9064_v34  ;;  %v12867_v4 = vadd.f32 %v3459_v54, %v3299_v63  ;;  %v9047_v34 = vld [vmem:[%s10046_s27 + $0x368] ss:$16 sps:$4 sm:$0xff]   ;;  %v9055_v63 = vld [vmem:[%s10046_s27 + $0x34c] ss:$16 sps:$4 sm:$0xff]  }
 0x314   : > { %v3304_v51 = vpop.f32.mrf.mxu0  ;;  %6567 = vmatmul.mubr.bf16.gmra.mxu0 %v12491_v46  ;;  %v9515_v23 = vpop.eup %9514  ;;  %v12873_v45 = vpack.c.bf16 %v4403_v38, %v4395_v11  ;;  %v12876_v50 = vpack.c.bf16 %v4402_v20, %v4394_v26  ;;  %v4211_v19 = vadd.f32 1.0, %v9513_v36  ;;  %v3611_v36 = vmul.f32 0.5, %v12783_v9  ;;  %v9119_v46 = vld [vmem:[%s10046_s27 + $0x7c8] ss:$16 sps:$4 sm:$0xff]  }
 0x315   : > { %v3305_v10 = vadd.f32 %v3304_v51, %v12524_v60  ;;  %v3465_v21 = vpop.f32.mrf.mxu1  ;;  %6576 = vmatprep.mubr.bf16.mxu0 %v12537_v0  ;;  %v4218_v7 = vadd.f32 1.0, %v9515_v23  ;;  %9530 = verf.f32 %v3843_v37  ;;  %v12871_v6 = vadd.f32 %v3461_v59, %v3301_v56 }
 0x316   : > { %15293 = vst [vmem:[#allocation89_spill] sm:$0xff] %v12873_v45  ;;  %v3306_v18 = vpop.f32.mrf.mxu0  ;;  %6960 = vmatpush2.bf16.msra.mxu1 %v9038_v5  ;;  %15294 = vst [vmem:[#allocation90_spill] sm:$0xff] %v12876_v50  ;;  %v3850_v54 = vmul.f32 0.70710677, %v12867_v4  ;;  %v9517_v51 = vpop.eup %9516  ;;  %v4210_v23 = vadd.f32 1.0, %v9511_v2  ;;  %9532 = verf.f32 %v3842_v61  ;;  %6707 = vmatprep.mubr.bf16.mxu1 %v12873_v45  ;;  %v3619_v11 = vmul.f32 0.5, %v12804_v22 }
 0x317   : > { %v12879_v3 = vadd.f32 %v3465_v21, %v3305_v10  ;;  %v3467_v17 = vpop.f32.mrf.mxu1  ;;  %6961 = vmatprep.subr.bf16.mxu1 %v9049_v47  ;;  %v3851_v59 = vmul.f32 0.70710677, %v12871_v6  ;;  %v3307_v38 = vadd.f32 %v3306_v18, %v12535_v58  ;;  %v12885_v20 = vpop.eup %9518  ;;  %v4219_v37 = vadd.f32 1.0, %v9517_v51  ;;  %v9053_v21 = vld [vmem:[%s10046_s27 + $0x348] ss:$16 sps:$4 sm:$0xff]  }
 0x318   : > { %v3308_v5 = vpop.f32.mrf.mxu0  ;;  %9534 = verf.f32 %v3850_v54  ;;  %6708 = vmatmul.mubr.bf16.gmra.mxu1 %v12876_v50  ;;  %v9521_v47 = vpop.eup %9520  ;;  %v4418_v61 = vmul.f32 %v4218_v7, %v3618_v29  ;;  %v4411_v18 = vmul.f32 %v4211_v19, %v3611_v36  ;;  %v9058_v50 = vld [vmem:[%s10046_s27 + $0x32c] ss:$16 sps:$4 sm:$0xff]   ;;  %v12898_v29 = vmul.f32 0.5, %v12515_v30 }
 0x319   : > { %v3469_v2 = vpop.f32.mrf.mxu1  ;;  %9536 = verf.f32 %v3851_v59  ;;  %v12890_v56 = vadd.f32 %v3467_v17, %v3307_v38  ;;  %v3309_v26 = vadd.f32 %v3308_v5, %v12524_v60  ;;  %v4419_v9 = vmul.f32 %v4219_v37, %v3619_v11  ;;  %v9523_v0 = vpop.eup %9522 }
 0x31a   : > { %v3310_v10 = vpop.f32.mrf.mxu0  ;;  %6962 = vmatpush2.bf16.msra.mxu1 %v9047_v34  ;;  %v3858_v22 = vmul.f32 0.70710677, %v12879_v3  ;;  %v4410_v7 = vmul.f32 %v4210_v23, %v12858_v35  ;;  %v9525_v19 = vpop.eup %9524  ;;  %v3689_v38 = vmul.f32 0.5, %v12519_v12  ;;  %v9056_v12 = vld [vmem:[%s10046_s27 + $0x328] ss:$16 sps:$4 sm:$0xff]  }
 0x31b   : > { %v3311_v54 = vadd.f32 %v3310_v10, %v12535_v58  ;;  %v3471_v51 = vpop.f32.mrf.mxu1  ;;  %6963 = vmatprep.subr.bf16.mxu1 %v9055_v63  ;;  %v3859_v17 = vmul.f32 0.70710677, %v12890_v56  ;;  %v12902_v59 = vadd.f32 %v3469_v2, %v3309_v26  ;;  %v12910_v30 = vpack.c.bf16 %v4419_v9, %v4411_v18  ;;  %v9061_v9 = vld [vmem:[%s10046_s27 + $0x30c] ss:$16 sps:$4 sm:$0xff]  }
 0x31c   : > { %v3314_v34 = vpop.f32.mrf.mxu0  ;;  %6577 = vmatmul.mubr.bf16.gmra.mxu0 %v12527_v33  ;;  %v9527_v35 = vpop.eup %9526  ;;  %v12912_v23 = vpack.c.bf16 %v4418_v61, %v4410_v7  ;;  %v4289_v2 = vadd.f32 1.0, %v9521_v47  ;;  %v4226_v26 = vadd.f32 1.0, %v9523_v0  ;;  %v4227_v61 = vadd.f32 1.0, %v9525_v19 }
 0x31d   : > { %v12906_v5 = vadd.f32 %v3471_v51, %v3311_v54  ;;  %v3315_v63 = vadd.f32 %v3314_v34, %v12524_v60  ;;  %v3475_v36 = vpop.f32.mrf.mxu1  ;;  %6586 = vmatprep.mubr.bf16.mxu0 %v12570_v25  ;;  %15295 = vst [vmem:[#allocation91_spill] sm:$0xff] %v12910_v30  ;;  %9538 = verf.f32 %v3859_v17  ;;  %v3866_v11 = vmul.f32 0.70710677, %v12902_v59  ;;  %6717 = vmatprep.mubr.bf16.mxu1 %v12910_v30  ;;  %v9067_v25 = vld [vmem:[%s10046_s27 + $0x6ec] ss:$16 sps:$4 sm:$0xff]  }
 0x31e   : > { %15296 = vst [vmem:[#allocation92_spill] sm:$0xff] %v12912_v23  ;;  %v3316_v37 = vpop.f32.mrf.mxu0  ;;  %6964 = vmatpush2.bf16.msra.mxu1 %v9053_v21  ;;  %v4234_v10 = vadd.f32 1.0, %v9527_v35  ;;  %9540 = verf.f32 %v3858_v22  ;;  %v3634_v0 = vmul.f32 0.5, %v12828_v53  ;;  %v3635_v22 = vmul.f32 0.5, %v12841_v41 }
 0x31f   : > { %v3867_v54 = vmul.f32 0.70710677, %v12906_v5  ;;  %v3477_v18 = vpop.f32.mrf.mxu1  ;;  %6965 = vmatprep.subr.bf16.mxu1 %v9058_v50  ;;  %v9529_v51 = vpop.eup %9528  ;;  %9542 = verf.f32 %v3866_v11  ;;  %v12919_v7 = vadd.f32 %v3475_v36, %v3315_v63  ;;  %v3317_v47 = vadd.f32 %v3316_v37, %v12535_v58  ;;  %v9059_v11 = vld [vmem:[%s10046_s27 + $0x308] ss:$16 sps:$4 sm:$0xff]  }
 0x320   : > { %v3318_v21 = vpop.f32.mrf.mxu0  ;;  %v4235_v17 = vadd.f32 1.0, %v9529_v51  ;;  %6718 = vmatmul.mubr.bf16.gmra.mxu1 %v12912_v23  ;;  %v3626_v34 = vmul.f32 0.5, %v12814_v28  ;;  %v3627_v19 = vmul.f32 0.5, %v12818_v27  ;;  %v4288_v41 = vadd.f32 1.0, %v12885_v20 }
 0x321   : > { %9544 = verf.f32 %v3867_v54  ;;  %v3479_v50 = vpop.f32.mrf.mxu1  ;;  %v12927_v35 = vadd.f32 %v3477_v18, %v3317_v47  ;;  %v3319_v63 = vadd.f32 %v3318_v21, %v12524_v60  ;;  %v4434_v37 = vmul.f32 %v4234_v10, %v3634_v0 }
 0x322   : > { %v3320_v36 = vpop.f32.mrf.mxu0  ;;  %6966 = vmatpush2.bf16.msra.mxu1 %v9056_v12  ;;  %v9531_v53 = vpop.eup %9530  ;;  %v4435_v54 = vmul.f32 %v4235_v17, %v3635_v22  ;;  %v4426_v28 = vmul.f32 %v4226_v26, %v3626_v34  ;;  %v4427_v33 = vmul.f32 %v4227_v61, %v3627_v19  ;;  %v3874_v27 = vmul.f32 0.70710677, %v12919_v7 }
 0x323   : > { %v3321_v51 = vadd.f32 %v3320_v36, %v12535_v58  ;;  %v3481_v23 = vpop.f32.mrf.mxu1  ;;  %6967 = vmatprep.subr.bf16.mxu1 %v9061_v9  ;;  %v4489_v47 = vmul.f32 %v4289_v2, %v3689_v38  ;;  %v9533_v12 = vpop.eup %9532  ;;  %v3875_v21 = vmul.f32 0.70710677, %v12927_v35  ;;  %v12937_v30 = vadd.f32 %v3479_v50, %v3319_v63 }
 0x324   : > { %v3324_v18 = vpop.f32.mrf.mxu0  ;;  %6587 = vmatmul.mubr.bf16.gmra.mxu0 %v12555_v43  ;;  %v3643_v9 = vmul.f32 0.5, %v12854_v16  ;;  %v4243_v61 = vadd.f32 1.0, %v9531_v53  ;;  %v3651_v22 = vmul.f32 0.5, %v12871_v6  ;;  %v12945_v17 = vpack.c.bf16 %v4435_v54, %v4427_v33  ;;  %v15331_v43 = vld [vmem:[#allocation34_spill] sm:$0xff] }
 0x325   : > { %v12939_v20 = vadd.f32 %v3481_v23, %v3321_v51  ;;  %v3325_v10 = vadd.f32 %v3324_v18, %v12524_v60  ;;  %v3485_v0 = vpop.f32.mrf.mxu1  ;;  %6596 = vmatprep.mubr.bf16.mxu0 %v12606_v31  ;;  %v9535_v26 = vpop.eup %9534  ;;  %v12947_v50 = vpack.c.bf16 %v4434_v37, %v4426_v28  ;;  %9546 = verf.f32 %v3875_v21 }
 0x326   : > { %15297 = vst [vmem:[#allocation93_spill] sm:$0xff] %v12945_v17  ;;  %v3326_v38 = vpop.f32.mrf.mxu0  ;;  %6968 = vmatpush2.bf16.msra.mxu1 %v9059_v11  ;;  %v9537_v2 = vpop.eup %9536  ;;  %v4250_v23 = vadd.f32 1.0, %v9535_v26  ;;  %v3882_v60 = vmul.f32 0.70710677, %v12937_v30  ;;  %9548 = verf.f32 %v3874_v27  ;;  %6727 = vmatprep.mubr.bf16.mxu1 %v12945_v17  ;;  %v4242_v6 = vadd.f32 1.0, %v9533_v12 }
 0x327   : > { %15298 = vst [vmem:[#allocation94_spill] sm:$0xff] %v12947_v50  ;;  %v3487_v34 = vpop.f32.mrf.mxu1  ;;  %7259 = vmatprep.subr.bf16.mxu1 %v9067_v25  ;;  %v4251_v19 = vadd.f32 1.0, %v9537_v2  ;;  %v3883_v16 = vmul.f32 0.70710677, %v12939_v20  ;;  %v12951_v63 = vadd.f32 %v3485_v0, %v3325_v10  ;;  %v3650_v36 = vmul.f32 0.5, %v12867_v4 }
 0x328   : > { %v3328_v33 = vpop.f32.mrf.mxu0  ;;  %9550 = verf.f32 %v3882_v60  ;;  %v3327_v11 = vadd.f32 %v3326_v38, %v12535_v58  ;;  %6728 = vmatmul.mubr.bf16.gmra.mxu1 %v12947_v50  ;;  %v4443_v37 = vmul.f32 %v4243_v61, %v3643_v9  ;;  %v3642_v27 = vmul.f32 0.5, %v12844_v48  ;;  %v9107_v50 = vld [vmem:[%s10046_s27 + $0x608] ss:$16 sps:$4 sm:$0xff]  }
 0x329   : > { %v3489_v53 = vpop.f32.mrf.mxu1  ;;  %v4451_v25 = vmul.f32 %v4251_v19, %v3651_v22  ;;  %9552 = verf.f32 %v3883_v16  ;;  %v3890_v54 = vmul.f32 0.70710677, %v12951_v63  ;;  %v4450_v18 = vmul.f32 %v4250_v23, %v3650_v36 }
 0x32a   : > { %v3329_v51 = vpop.f32.mrf.mxu0  ;;  %v9539_v28 = vpop.eup %9538  ;;  %v12959_v21 = vadd.f32 %v3487_v34, %v3327_v11  ;;  %v12961_v4 = vpack.c.bf16 %v4489_v47, %v4489_v47  ;;  %v4488_v9 = vmul.f32 %v4288_v41, %v12898_v29  ;;  %v4442_v61 = vmul.f32 %v4242_v6, %v3642_v27 }
 0x32b   : > { %v3490_v12 = vpop.f32.mrf.mxu1  ;;  %v9541_v10 = vpop.eup %9540  ;;  %v12964_v0 = vpack.c.bf16 %v4451_v25, %v4443_v37  ;;  %v4259_v22 = vadd.f32 1.0, %v9539_v28  ;;  %v3659_v47 = vmul.f32 0.5, %v12890_v56  ;;  %v3667_v23 = vmul.f32 0.5, %v12906_v5 }
 0x32c   : > { %15299 = vst [vmem:[#allocation95_spill] sm:$0xff] %v12961_v4  ;;  %v6166_v58 = vpop.f32.mrf.mxu0  ;;  %6597 = vmatmul.mubr.bf16.gmra.mxu0 %v12587_v44  ;;  %v9543_v26 = vpop.eup %9542  ;;  %v3891_v38 = vmul.f32 0.70710677, %v12959_v21  ;;  %9554 = verf.f32 %v3890_v54  ;;  %v12974_v19 = vpack.c.bf16 %v4450_v18, %v4442_v61  ;;  %v4258_v36 = vadd.f32 1.0, %v9541_v10  ;;  %v15327_v44 = vld [vmem:[#allocation33_spill] sm:$0xff] }
 0x32d   : > { %15300 = vst [vmem:[#allocation96_spill] sm:$0xff] %v12964_v0  ;;  %v6327_v48 = vpop.f32.mrf.mxu1  ;;  %6606 = vmatprep.mubr.bf16.mxu0 %v12961_v4  ;;  %6737 = vmatprep.mubr.bf16.mxu1 %v12964_v0  ;;  %v4266_v29 = vadd.f32 1.0, %v9543_v26  ;;  %v4459_v11 = vmul.f32 %v4259_v22, %v3659_v47  ;;  %v3666_v56 = vmul.f32 0.5, %v12902_v59  ;;  %v12980_v37 = vpack.c.bf16 %v4488_v9, %v4488_v9 }
 0x32e   : > { %v9545_v2 = vpop.eup %9544  ;;  %v12971_v60 = vadd.f32 %v6327_v48, %v6166_v58  ;;  %v6168_v34 = vpop.f32.mrf.mxu0  ;;  %15301 = vst [vmem:[#allocation97_spill] sm:$0xff] %v12974_v19  ;;  %9556 = verf.f32 %v3891_v38  ;;  %v3658_v51 = vmul.f32 0.5, %v12879_v3 }
 0x32f   : > { %v4267_v41 = vadd.f32 1.0, %v9545_v2  ;;  %v6329_v16 = vpop.f32.mrf.mxu1  ;;  %15302 = vst [vmem:[#allocation98_spill] sm:$0xff] %v12980_v37  ;;  %v4466_v28 = vmul.f32 %v4266_v29, %v3666_v56  ;;  %v3683_v29 = vmul.f32 0.5, %v12939_v20  ;;  %v9062_v56 = vld [vmem:[%s10046_s27 + $0x4e8] ss:$16 sps:$4 sm:$0xff]   ;;  %v3674_v20 = vmul.f32 0.5, %v12919_v7 }
 0x330   : > { %v12976_v33 = vadd.f32 %v6329_v16, %v6168_v34  ;;  %v6170_v6 = vpop.f32.mrf.mxu0  ;;  %6738 = vmatmul.mubr.bf16.gmra.mxu1 %v12974_v19  ;;  %v4458_v26 = vmul.f32 %v4258_v36, %v3658_v51  ;;  %v3675_v34 = vmul.f32 0.5, %v12927_v35  ;;  %v3682_v36 = vmul.f32 0.5, %v12937_v30  ;;  %v9068_v7 = vld [vmem:[%s10046_s27 + $0x4c8] ss:$16 sps:$4 sm:$0xff]  }
 0x331   : > { %v4467_v5 = vmul.f32 %v4267_v41, %v3667_v23  ;;  %v6331_v53 = vpop.f32.mrf.mxu1  ;;  %v9095_v19 = vld [vmem:[%s10046_s27 + $0x648] ss:$16 sps:$4 sm:$0xff]  }
 0x332   : > { %v12982_v25 = vadd.f32 %v6331_v53, %v6170_v6  ;;  %v6172_v54 = vpop.f32.mrf.mxu0  ;;  %v9547_v12 = vpop.eup %9546  ;;  %v12994_v2 = vpack.c.bf16 %v4466_v28, %v4458_v26  ;;  %v9070_v28 = vld [vmem:[%s10046_s27 + $0x4cc] ss:$16 sps:$4 sm:$0xff]  }
 0x333   : > { %v6333_v27 = vpop.f32.mrf.mxu1  ;;  %v12985_v18 = vpack.c.bf16 %v4467_v5, %v4459_v11  ;;  %v9549_v59 = vpop.eup %9548  ;;  %v4275_v22 = vadd.f32 1.0, %v9547_v12  ;;  %v15305_v26 = vld [vmem:[#allocation41_spill] sm:$0xff] }
 0x334   : > { %v12987_v10 = vadd.f32 %v6333_v27, %v6172_v54  ;;  %v6176_v58 = vpop.f32.mrf.mxu0  ;;  %6607 = vmatmul.mubr.bf16.gmra.mxu0 %v12980_v37  ;;  %15304 = vst [vmem:[#allocation100_spill] sm:$0xff] %v12994_v2  ;;  %v4274_v6 = vadd.f32 1.0, %v9549_v59  ;;  %v15323_v37 = vld [vmem:[#allocation30_spill] sm:$0xff] }
 0x335   : > { %15303 = vst [vmem:[#allocation99_spill] sm:$0xff] %v12985_v18  ;;  %v6337_v61 = vpop.f32.mrf.mxu1  ;;  %6747 = vmatprep.mubr.bf16.mxu1 %v12985_v18  ;;  %6808 = vmatprep.mubr.bf16.mxu0 %v11058_v8  ;;  %v9551_v9 = vpop.eup %9550  ;;  %v4475_v5 = vmul.f32 %v4275_v22, %v3675_v34  ;;  %v3691_v22 = vmul.f32 0.5, %v12959_v21 }
 0x336   : > { %v12992_v3 = vadd.f32 %v6337_v61, %v6176_v58  ;;  %v6178_v38 = vpop.f32.mrf.mxu0  ;;  %v9553_v48 = vpop.eup %9552  ;;  %v4282_v47 = vadd.f32 1.0, %v9551_v9  ;;  %v4474_v9 = vmul.f32 %v4274_v6, %v3674_v20 }
 0x337   : > { %v6339_v23 = vpop.f32.mrf.mxu1  ;;  %v4283_v41 = vadd.f32 1.0, %v9553_v48  ;;  %v15307_v48 = vld [vmem:[#allocation26_spill] sm:$0xff] }
 0x338   : > { %v12998_v16 = vadd.f32 %v6339_v23, %v6178_v38  ;;  %v6180_v8 = vpop.f32.mrf.mxu0  ;;  %6748 = vmatmul.mubr.bf16.gmra.mxu1 %v12994_v2  ;;  %v4482_v27 = vmul.f32 %v4282_v47, %v3682_v36 }
 0x339   : > { %v6341_v11 = vpop.f32.mrf.mxu1  ;;  %v4483_v53 = vmul.f32 %v4283_v41, %v3683_v29  ;;  %v9555_v35 = vpop.eup %9554  ;;  %v9076_v29 = vld [vmem:[%s10046_s27 + $0x4ac] ss:$16 sps:$4 sm:$0xff]  }
 0x33a   : > { %v13003_v54 = vadd.f32 %v6341_v11, %v6180_v8  ;;  %v6182_v51 = vpop.f32.mrf.mxu0  ;;  %v13019_v41 = vpack.c.bf16 %v4482_v27, %v4474_v9  ;;  %v4290_v8 = vadd.f32 1.0, %v9555_v35  ;;  %v9082_v35 = vld [vmem:[%s10046_s27 + $0x48c] ss:$16 sps:$4 sm:$0xff]  }
 0x33b   : > { %v6343_v12 = vpop.f32.mrf.mxu1  ;;  %v9557_v58 = vpop.eup %9556  ;;  %v13010_v61 = vpack.c.bf16 %v4483_v53, %v4475_v5  ;;  %v15311_v9 = vld [vmem:[#allocation27_spill] sm:$0xff] }
 0x33c   : > { %v13007_v59 = vadd.f32 %v6343_v12, %v6182_v51  ;;  %v6186_v30 = vpop.f32.mrf.mxu0  ;;  %6809 = vmatmul.mubr.bf16.vlgmr.msra.gmra.mxu0 %v15305_v26  ;;  %v4291_v23 = vadd.f32 1.0, %v9557_v58  ;;  %15308 = vst [vmem:[#allocation26_spill] sm:$0xff] %v13019_v41  ;;  %v9074_v51 = vld [vmem:[%s10046_s27 + $0x4a8] ss:$16 sps:$4 sm:$0xff]  }
 0x33d   : > { %15306 = vst [vmem:[#allocation41_spill] sm:$0xff] %v13010_v61  ;;  %v6347_v38 = vpop.f32.mrf.mxu1  ;;  %6818 = vmatprep.mubr.bf16.mxu0 %v15307_v48  ;;  %7099 = vmatpush1.bf16.msra.mxu0 %v9062_v56  ;;  %v3690_v56 = vmul.f32 0.5, %v12951_v63 }
 0x33e   : > { %v13015_v47 = vadd.f32 %v6347_v38, %v6186_v30  ;;  %6757 = vmatprep.mubr.bf16.mxu1 %v13010_v61  ;;  %v6188_v34 = vpop.f32.mrf.mxu0  ;;  %7100 = vmatprep.subr.bf16.mxu0 %v9070_v28  ;;  %v4491_v21 = vmul.f32 %v4291_v23, %v3691_v22  ;;  %v15310_v30 = vld [vmem:[#allocation16_spill] sm:$0xff]  ;;  %v9088_v23 = vld [vmem:[%s10046_s27 + $0x46c] ss:$16 sps:$4 sm:$0xff]  }
 0x33f   : > { %v6349_v6 = vpop.f32.mrf.mxu1  ;;  %v4490_v27 = vmul.f32 %v4290_v8, %v3690_v56  ;;  %v9080_v22 = vld [vmem:[%s10046_s27 + $0x488] ss:$16 sps:$4 sm:$0xff]  }
 0x340   : > { %v13021_v36 = vadd.f32 %v6349_v6, %v6188_v34  ;;  %v6190_v11 = vpop.f32.mrf.mxu0  ;;  %6758 = vmatmul.mubr.bf16.gmra.mxu1 %v13019_v41  ;;  %v13025_v53 = vpack.c.bf16 %v4491_v21, %v4491_v21  ;;  %v9086_v21 = vld [vmem:[%s10046_s27 + $0x468] ss:$16 sps:$4 sm:$0xff]  }
 0x341   : > { %v6351_v5 = vpop.f32.mrf.mxu1  ;;  %7101 = vmatpush1.bf16.msra.mxu0 %v9068_v7  ;;  %v13040_v7 = vpack.c.bf16 %v4490_v27, %v4490_v27  ;;  %v9083_v61 = vld [vmem:[%s10046_s27 + $0x688] ss:$16 sps:$4 sm:$0xff]  }
 0x342   : > { %15309 = vst [vmem:[#allocation101_spill] sm:$0xff] %v13025_v53  ;;  %v13028_v28 = vadd.f32 %v6351_v5, %v6190_v11  ;;  %v6192_v20 = vpop.f32.mrf.mxu0  ;;  %7102 = vmatprep.subr.bf16.mxu0 %v9076_v29  ;;  %6767 = vmatprep.mubr.bf16.mxu1 %v13025_v53  ;;  %v15313_v11 = vld [vmem:[#allocation40_spill] sm:$0xff]  ;;  %v15319_v53 = vld [vmem:[#allocation29_spill] sm:$0xff] }
 0x343   : > { %v6353_v12 = vpop.f32.mrf.mxu1  ;;  %15312 = vst [vmem:[#allocation16_spill] sm:$0xff] %v13040_v7 }
 0x344   : > { %v13032_v58 = vadd.f32 %v6353_v12, %v6192_v20  ;;  %v6196_v63 = vpop.f32.mrf.mxu0  ;;  %6819 = vmatmul.mubr.bf16.gmra.mxu0 %v15310_v30  ;;  %v15314_v12 = vld [vmem:[#allocation17_spill] sm:$0xff]  ;;  %v15315_v30 = vld [vmem:[#allocation18_spill] sm:$0xff] }
 0x345   : > { %v6357_v26 = vpop.f32.mrf.mxu1  ;;  %6828 = vmatprep.mubr.bf16.mxu0 %v15311_v9  ;;  %7103 = vmatpush1.bf16.msra.mxu0 %v9074_v51  ;;  %v9094_v51 = vld [vmem:[%s10046_s27 + $0x44c] ss:$16 sps:$4 sm:$0xff]  }
 0x346   : > { %v13037_v38 = vadd.f32 %v6357_v26, %v6196_v63  ;;  %v6198_v48 = vpop.f32.mrf.mxu0  ;;  %7104 = vmatprep.subr.bf16.mxu0 %v9082_v35  ;;  %v9092_v26 = vld [vmem:[%s10046_s27 + $0x448] ss:$16 sps:$4 sm:$0xff]  }
 0x347   : > { %v6359_v34 = vpop.f32.mrf.mxu1 }
 0x348   : > { %v13042_v29 = vadd.f32 %v6359_v34, %v6198_v48  ;;  %v6200_v8 = vpop.f32.mrf.mxu0  ;;  %6768 = vmatmul.mubr.bf16.gmra.mxu1 %v13040_v7  ;;  %v9065_v48 = vld [vmem:[%s10046_s27 + $0x6e8] ss:$16 sps:$4 sm:$0xff]   ;;  %v9073_v34 = vld [vmem:[%s10046_s27 + $0x6cc] ss:$16 sps:$4 sm:$0xff]  }
 0x349   : > { %v6361_v6 = vpop.f32.mrf.mxu1  ;;  %7105 = vmatpush1.bf16.msra.mxu0 %v9080_v22  ;;  %6969 = vmatprep.mubr.bf16.mxu1 %v15313_v11 }
 0x34a   : > { %v13047_v56 = vadd.f32 %v6361_v6, %v6200_v8  ;;  %v6202_v5 = vpop.f32.mrf.mxu0  ;;  %7106 = vmatprep.subr.bf16.mxu0 %v9088_v23  ;;  %v9100_v8 = vld [vmem:[%s10046_s27 + $0x42c] ss:$16 sps:$4 sm:$0xff]  }
 0x34b   : > { %v6363_v20 = vpop.f32.mrf.mxu1 }
 0x34c   : > { %v13050_v35 = vadd.f32 %v6363_v20, %v6202_v5  ;;  %v6206_v27 = vpop.f32.mrf.mxu0  ;;  %6829 = vmatmul.mubr.bf16.gmra.mxu0 %v15314_v12  ;;  %v15316_v5 = vld [vmem:[#allocation39_spill] sm:$0xff]  ;;  %v15317_v12 = vld [vmem:[#allocation13_spill] sm:$0xff] }
 0x34d   : > { %v6367_v63 = vpop.f32.mrf.mxu1  ;;  %6838 = vmatprep.mubr.bf16.mxu0 %v15315_v30  ;;  %7107 = vmatpush1.bf16.msra.mxu0 %v9086_v21  ;;  %v9098_v21 = vld [vmem:[%s10046_s27 + $0x428] ss:$16 sps:$4 sm:$0xff]   ;;  %v9106_v30 = vld [vmem:[%s10046_s27 + $0x40c] ss:$16 sps:$4 sm:$0xff]  }
 0x34e   : > { %v13055_v9 = vadd.f32 %v6367_v63, %v6206_v27  ;;  %v6208_v22 = vpop.f32.mrf.mxu0  ;;  %7108 = vmatprep.subr.bf16.mxu0 %v9094_v51  ;;  %v9071_v51 = vld [vmem:[%s10046_s27 + $0x6c8] ss:$16 sps:$4 sm:$0xff]  }
 0x34f   : > { %v6369_v23 = vpop.f32.mrf.mxu1 }
 0x350   : > { %v13060_v6 = vadd.f32 %v6369_v23, %v6208_v22  ;;  %v6210_v11 = vpop.f32.mrf.mxu0  ;;  %6970 = vmatmul.mubr.bf16.vlgmr.msra.gmra.mxu1 %v15316_v5  ;;  %v9079_v22 = vld [vmem:[%s10046_s27 + $0x6ac] ss:$16 sps:$4 sm:$0xff]   ;;  %v15318_v5 = vld [vmem:[#allocation28_spill] sm:$0xff] }
 0x351   : > { %v6371_v20 = vpop.f32.mrf.mxu1  ;;  %7109 = vmatpush1.bf16.msra.mxu0 %v9092_v26  ;;  %6979 = vmatprep.mubr.bf16.mxu1 %v15317_v12 }
 0x352   : > { %7260 = vmatpush1.bf16.msra.mxu1 %v9065_v48  ;;  %v13065_v27 = vadd.f32 %v6371_v20, %v6210_v11  ;;  %v6212_v63 = vpop.f32.mrf.mxu0  ;;  %7110 = vmatprep.subr.bf16.mxu0 %v9100_v8  ;;  %v9104_v48 = vld [vmem:[%s10046_s27 + $0x408] ss:$16 sps:$4 sm:$0xff]  }
 0x353   : > { %v6373_v7 = vpop.f32.mrf.mxu1  ;;  %7261 = vmatprep.subr.bf16.mxu1 %v9073_v34  ;;  %v9077_v34 = vld [vmem:[%s10046_s27 + $0x6a8] ss:$16 sps:$4 sm:$0xff]  }
 0x354   : > { %v13070_v23 = vadd.f32 %v6373_v7, %v6212_v63  ;;  %v6216_v26 = vpop.f32.mrf.mxu0  ;;  %6839 = vmatmul.mubr.bf16.gmra.mxu0 %v15318_v5  ;;  %v9085_v7 = vld [vmem:[%s10046_s27 + $0x68c] ss:$16 sps:$4 sm:$0xff]  }
 0x355   : > { %v6377_v12 = vpop.f32.mrf.mxu1  ;;  %6848 = vmatprep.mubr.bf16.mxu0 %v15319_v53  ;;  %7111 = vmatpush1.bf16.msra.mxu0 %v9098_v21  ;;  %v9112_v63 = vld [vmem:[%s10046_s27 + $0x5ec] ss:$16 sps:$4 sm:$0xff]   ;;  %v15320_v53 = vld [vmem:[#allocation12_spill] sm:$0xff] }
 0x356   : > { %v13075_v11 = vadd.f32 %v6377_v12, %v6216_v26  ;;  %v6218_v20 = vpop.f32.mrf.mxu0  ;;  %7262 = vmatpush1.bf16.msra.mxu1 %v9071_v51  ;;  %7112 = vmatprep.subr.bf16.mxu0 %v9106_v30  ;;  %v9110_v26 = vld [vmem:[%s10046_s27 + $0x5e8] ss:$16 sps:$4 sm:$0xff]   ;;  %v15321_v12 = vld [vmem:[#allocation15_spill] sm:$0xff] }
 0x357   : > { %v6379_v8 = vpop.f32.mrf.mxu1  ;;  %7263 = vmatprep.subr.bf16.mxu1 %v9079_v22  ;;  %v9118_v22 = vld [vmem:[%s10046_s27 + $0x5cc] ss:$16 sps:$4 sm:$0xff]  }
 0x358   : > { %v13080_v5 = vadd.f32 %v6379_v8, %v6218_v20  ;;  %v6220_v41 = vpop.f32.mrf.mxu0  ;;  %6980 = vmatmul.mubr.bf16.gmra.mxu1 %v15320_v53  ;;  %v9091_v20 = vld [vmem:[%s10046_s27 + $0x66c] ss:$16 sps:$4 sm:$0xff]  }
 0x359   : > { %v6381_v21 = vpop.f32.mrf.mxu1  ;;  %7113 = vmatpush1.bf16.msra.mxu0 %v9104_v48  ;;  %6989 = vmatprep.mubr.bf16.mxu1 %v15321_v12  ;;  %v15322_v53 = vld [vmem:[#allocation19_spill] sm:$0xff] }
 0x35a   : > { %v13085_v51 = vadd.f32 %v6381_v21, %v6220_v41  ;;  %v6222_v30 = vpop.f32.mrf.mxu0  ;;  %7264 = vmatpush1.bf16.msra.mxu1 %v9077_v34  ;;  %7114 = vmatprep.subr.bf16.mxu0 %v9112_v63  ;;  %v9116_v41 = vld [vmem:[%s10046_s27 + $0x5c8] ss:$16 sps:$4 sm:$0xff]  }
 0x35b   : > { %v6383_v2 = vpop.f32.mrf.mxu1  ;;  %7265 = vmatprep.subr.bf16.mxu1 %v9085_v7  ;;  %v9089_v7 = vld [vmem:[%s10046_s27 + $0x668] ss:$16 sps:$4 sm:$0xff]  }
 0x35c   : > { %v13090_v8 = vadd.f32 %v6383_v2, %v6222_v30  ;;  %v6226_v48 = vpop.f32.mrf.mxu0  ;;  %6849 = vmatmul.mubr.bf16.gmra.mxu0 %v15322_v53  ;;  %v9097_v2 = vld [vmem:[%s10046_s27 + $0x64c] ss:$16 sps:$4 sm:$0xff]  }
 0x35d   : > { %v6387_v12 = vpop.f32.mrf.mxu1  ;;  %6858 = vmatprep.mubr.bf16.mxu0 %v15323_v37  ;;  %7115 = vmatpush2.bf16.msra.mxu0 %v9110_v26  ;;  %v9124_v30 = vld [vmem:[%s10046_s27 + $0x5ac] ss:$16 sps:$4 sm:$0xff]   ;;  %v15324_v37 = vld [vmem:[#allocation14_spill] sm:$0xff] }
 0x35e   : > { %v13095_v34 = vadd.f32 %v6387_v12, %v6226_v48  ;;  %v6228_v21 = vpop.f32.mrf.mxu0  ;;  %7266 = vmatpush1.bf16.msra.mxu1 %v9083_v61  ;;  %7116 = vmatprep.subr.bf16.mxu0 %v9118_v22  ;;  %v9122_v48 = vld [vmem:[%s10046_s27 + $0x5a8] ss:$16 sps:$4 sm:$0xff]   ;;  %v15325_v12 = vld [vmem:[#allocation43_spill] sm:$0xff] }
 0x35f   : > { %v6389_v63 = vpop.f32.mrf.mxu1  ;;  %7267 = vmatprep.subr.bf16.mxu1 %v9091_v20  ;;  %v9130_v20 = vld [vmem:[%s10046_s27 + $0x58c] ss:$16 sps:$4 sm:$0xff]  }
 0x360   : > { %v13100_v53 = vadd.f32 %v6389_v63, %v6228_v21  ;;  %v6230_v18 = vpop.f32.mrf.mxu0  ;;  %6990 = vmatmul.mubr.bf16.gmra.mxu1 %v15324_v37  ;;  %v9103_v21 = vld [vmem:[%s10046_s27 + $0x62c] ss:$16 sps:$4 sm:$0xff]   ;;  %v15326_v37 = vld [vmem:[#allocation20_spill] sm:$0xff] }
 0x361   : > { %v6391_v26 = vpop.f32.mrf.mxu1  ;;  %7117 = vmatpush2.bf16.msra.mxu0 %v9116_v41  ;;  %6999 = vmatprep.mubr.bf16.mxu1 %v15325_v12 }
 0x362   : > { %v13105_v61 = vadd.f32 %v6391_v26, %v6230_v18  ;;  %v6232_v22 = vpop.f32.mrf.mxu0  ;;  %7268 = vmatpush1.bf16.msra.mxu1 %v9089_v7  ;;  %7118 = vmatprep.subr.bf16.mxu0 %v9124_v30  ;;  %v9128_v18 = vld [vmem:[%s10046_s27 + $0x588] ss:$16 sps:$4 sm:$0xff]  }
 0x363   : > { %v6393_v4 = vpop.f32.mrf.mxu1  ;;  %7269 = vmatprep.subr.bf16.mxu1 %v9097_v2  ;;  %v9101_v2 = vld [vmem:[%s10046_s27 + $0x628] ss:$16 sps:$4 sm:$0xff]  }
 0x364   : > { %v13110_v63 = vadd.f32 %v6393_v4, %v6232_v22  ;;  %v6236_v41 = vpop.f32.mrf.mxu0  ;;  %6859 = vmatmul.mubr.bf16.gmra.mxu0 %v15326_v37  ;;  %v9109_v4 = vld [vmem:[%s10046_s27 + $0x60c] ss:$16 sps:$4 sm:$0xff]  }
 0x365   : > { %v6397_v12 = vpop.f32.mrf.mxu1  ;;  %6868 = vmatprep.mubr.bf16.mxu0 %v15327_v44  ;;  %7119 = vmatpush2.bf16.msra.mxu0 %v9122_v48  ;;  %v9133_v22 = vld [vmem:[%s10046_s27 + $0x56c] ss:$16 sps:$4 sm:$0xff]   ;;  %v15328_v44 = vld [vmem:[#allocation42_spill] sm:$0xff] }
 0x366   : > { %v13115_v7 = vadd.f32 %v6397_v12, %v6236_v41  ;;  %v6238_v26 = vpop.f32.mrf.mxu0  ;;  %7270 = vmatpush1.bf16.msra.mxu1 %v9095_v19  ;;  %7120 = vmatprep.subr.bf16.mxu0 %v9130_v20  ;;  %v9131_v41 = vld [vmem:[%s10046_s27 + $0x568] ss:$16 sps:$4 sm:$0xff]   ;;  %v15329_v12 = vld [vmem:[#allocation45_spill] sm:$0xff] }
 0x367   : > { %v6399_v30 = vpop.f32.mrf.mxu1  ;;  %7271 = vmatprep.subr.bf16.mxu1 %v9103_v21  ;;  %v9139_v21 = vld [vmem:[%s10046_s27 + $0x54c] ss:$16 sps:$4 sm:$0xff]  }
 0x368   : > { %v13120_v37 = vadd.f32 %v6399_v30, %v6238_v26  ;;  %v6240_v0 = vpop.f32.mrf.mxu0  ;;  %7000 = vmatmul.mubr.bf16.gmra.mxu1 %v15328_v44  ;;  %v9115_v26 = vld [vmem:[%s10046_s27 + $0x7ec] ss:$16 sps:$4 sm:$0xff]  }
 0x369   : > { %v6401_v48 = vpop.f32.mrf.mxu1  ;;  %7121 = vmatpush2.bf16.msra.mxu0 %v9128_v18  ;;  %7009 = vmatprep.mubr.bf16.mxu1 %v15329_v12  ;;  %v15330_v44 = vld [vmem:[#allocation31_spill] sm:$0xff] }
 0x36a   : > { %v13125_v19 = vadd.f32 %v6401_v48, %v6240_v0  ;;  %v6242_v20 = vpop.f32.mrf.mxu0  ;;  %7272 = vmatpush1.bf16.msra.mxu1 %v9101_v2  ;;  %7122 = vmatprep.subr.bf16.mxu0 %v9133_v22  ;;  %v9137_v0 = vld [vmem:[%s10046_s27 + $0x548] ss:$16 sps:$4 sm:$0xff]  }
 0x36b   : > { %v6403_v31 = vpop.f32.mrf.mxu1  ;;  %7273 = vmatprep.subr.bf16.mxu1 %v9109_v4  ;;  %v9113_v4 = vld [vmem:[%s10046_s27 + $0x7e8] ss:$16 sps:$4 sm:$0xff]  }
 0x36c   : > { %v13130_v30 = vadd.f32 %v6403_v31, %v6242_v20  ;;  %v6246_v18 = vpop.f32.mrf.mxu0  ;;  %6869 = vmatmul.mubr.bf16.gmra.mxu0 %v15330_v44  ;;  %v9121_v31 = vld [vmem:[%s10046_s27 + $0x7cc] ss:$16 sps:$4 sm:$0xff]  }
 0x36d   : > { %v6407_v12 = vpop.f32.mrf.mxu1  ;;  %6878 = vmatprep.mubr.bf16.mxu0 %v15331_v43  ;;  %7123 = vmatpush2.bf16.msra.mxu0 %v9131_v41  ;;  %v9142_v20 = vld [vmem:[%s10046_s27 + $0x52c] ss:$16 sps:$4 sm:$0xff]   ;;  %v15332_v43 = vld [vmem:[#allocation44_spill] sm:$0xff] }
 0x36e   : > { %v13135_v2 = vadd.f32 %v6407_v12, %v6246_v18  ;;  %v6248_v48 = vpop.f32.mrf.mxu0  ;;  %7274 = vmatpush1.bf16.msra.mxu1 %v9107_v50  ;;  %7124 = vmatprep.subr.bf16.mxu0 %v9139_v21  ;;  %v9140_v18 = vld [vmem:[%s10046_s27 + $0x528] ss:$16 sps:$4 sm:$0xff]   ;;  %v15333_v12 = vld [vmem:[#allocation47_spill] sm:$0xff] }
 0x36f   : > { %v6409_v22 = vpop.f32.mrf.mxu1  ;;  %7275 = vmatprep.subr.bf16.mxu1 %v9115_v26  ;;  %v9148_v26 = vld [vmem:[%s10046_s27 + $0x50c] ss:$16 sps:$4 sm:$0xff]  }
 0x370   : > { %v13140_v44 = vadd.f32 %v6409_v22, %v6248_v48  ;;  %v6250_v17 = vpop.f32.mrf.mxu0  ;;  %7010 = vmatmul.mubr.bf16.gmra.mxu1 %v15332_v43  ;;  %v9127_v48 = vld [vmem:[%s10046_s27 + $0x7ac] ss:$16 sps:$4 sm:$0xff]  }
 0x371   : > { %v6411_v41 = vpop.f32.mrf.mxu1  ;;  %7125 = vmatpush2.bf16.msra.mxu0 %v9137_v0  ;;  %7019 = vmatprep.mubr.bf16.mxu1 %v15333_v12  ;;  %v15334_v0 = vld [vmem:[#allocation32_spill] sm:$0xff]  ;;  %v15335_v12 = vld [vmem:[#allocation35_spill] sm:$0xff] }
 0x372   : > { %v13145_v50 = vadd.f32 %v6411_v41, %v6250_v17  ;;  %v6252_v21 = vpop.f32.mrf.mxu0  ;;  %7276 = vmatpush2.bf16.msra.mxu1 %v9113_v4  ;;  %7126 = vmatprep.subr.bf16.mxu0 %v9142_v20  ;;  %v9146_v17 = vld [vmem:[%s10046_s27 + $0x508] ss:$16 sps:$4 sm:$0xff]  }
 0x373   : > { %v6413_v45 = vpop.f32.mrf.mxu1  ;;  %7277 = vmatprep.subr.bf16.mxu1 %v9121_v31 }
 0x374   : > { %v13150_v22 = vadd.f32 %v6413_v45, %v6252_v21  ;;  %v6256_v43 = vpop.f32.mrf.mxu0  ;;  %6879 = vmatmul.mubr.bf16.gmra.mxu0 %v15334_v0  ;;  %v9136_v45 = vld [vmem:[%s10046_s27 + $0x78c] ss:$16 sps:$4 sm:$0xff]   ;;  %v15336_v0 = vld [vmem:[#allocation46_spill] sm:$0xff] }
 0x375   : > { %v6417_v13 = vpop.f32.mrf.mxu1  ;;  %6888 = vmatprep.mubr.bf16.mxu0 %v15335_v12  ;;  %7127 = vmatpush2.bf16.msra.mxu0 %v9140_v18  ;;  %v15337_v18 = vld [vmem:[#allocation49_spill] sm:$0xff] }
 0x376   : > { %v13155_v41 = vadd.f32 %v6417_v13, %v6256_v43  ;;  %v6258_v4 = vpop.f32.mrf.mxu0  ;;  %7278 = vmatpush2.bf16.msra.mxu1 %v9119_v46  ;;  %7128 = vmatprep.subr.bf16.mxu0 %v9148_v26  ;;  %v9134_v46 = vld [vmem:[%s10046_s27 + $0x788] ss:$16 sps:$4 sm:$0xff]  }
 0x377   : > { %v6419_v31 = vpop.f32.mrf.mxu1  ;;  %7279 = vmatprep.subr.bf16.mxu1 %v9127_v48  ;;  %v9145_v48 = vld [vmem:[%s10046_s27 + $0x76c] ss:$16 sps:$4 sm:$0xff]  }
 0x378   : > { %v13159_v20 = vadd.f32 %v6419_v31, %v6258_v4  ;;  %v6260_v21 = vpop.f32.mrf.mxu0  ;;  %7020 = vmatmul.mubr.bf16.gmra.mxu1 %v15336_v0  ;;  %v15340_v0 = vld [vmem:[#allocation23_spill] sm:$0xff] }
 0x379   : > { %v6421_v14 = vpop.f32.mrf.mxu1  ;;  %7129 = vmatpush2.bf16.msra.mxu0 %v9146_v17  ;;  %7029 = vmatprep.mubr.bf16.mxu1 %v15337_v18  ;;  %v9151_v18 = vld [vmem:[%s10046_s27 + $0x74c] ss:$16 sps:$4 sm:$0xff]  }
 0x37a   : > { %v13163_v13 = vadd.f32 %v6421_v14, %v6260_v21  ;;  %v6262_v43 = vpop.f32.mrf.mxu0  ;;  %7280 = vmatpush2.bf16.msra.mxu1 %v9125_v62  ;;  %v9143_v62 = vld [vmem:[%s10046_s27 + $0x768] ss:$16 sps:$4 sm:$0xff]  }
 0x37b   : > { %v6423_v26 = vpop.f32.mrf.mxu1  ;;  %7281 = vmatprep.subr.bf16.mxu1 %v9136_v45 }
 0x37c   : > { %15338 = vst [vmem:[#allocation27_spill] sm:$0xff] %v13163_v13  ;;  %v13167_v12 = vadd.f32 %v6423_v26, %v6262_v43  ;;  %v6266_v4 = vpop.f32.mrf.mxu0  ;;  %6889 = vmatmul.mubr.bf16.gmra.mxu0 %v15263_v32  ;;  %v15343_v26 = vld [vmem:[#allocation48_spill] sm:$0xff]  ;;  %v15344_v32 = vld [vmem:[#allocation51_spill] sm:$0xff] }
 0x37d   : > { %v6427_v31 = vpop.f32.mrf.mxu1  ;;  %6898 = vmatprep.mubr.bf16.mxu0 %v15340_v0 }
 0x37e   : > { %15339 = vst [vmem:[#allocation40_spill] sm:$0xff] %v13167_v12  ;;  %v13171_v17 = vadd.f32 %v6427_v31, %v6266_v4  ;;  %v6268_v14 = vpop.f32.mrf.mxu0  ;;  %7282 = vmatpush2.bf16.msra.mxu1 %v9134_v46  ;;  %v9149_v46 = vld [vmem:[%s10046_s27 + $0x748] ss:$16 sps:$4 sm:$0xff]  }
 0x37f   : > { %v6429_v21 = vpop.f32.mrf.mxu1  ;;  %7283 = vmatprep.subr.bf16.mxu1 %v9145_v48 }
 0x380   : > { %15341 = vst [vmem:[#allocation17_spill] sm:$0xff] %v13171_v17  ;;  %v13175_v45 = vadd.f32 %v6429_v21, %v6268_v14  ;;  %v6270_v43 = vpop.f32.mrf.mxu0  ;;  %7030 = vmatmul.mubr.bf16.gmra.mxu1 %v15343_v26  ;;  %v9154_v17 = vld [vmem:[%s10046_s27 + $0x72c] ss:$16 sps:$4 sm:$0xff]   ;;  %v15347_v21 = vld [vmem:[#allocation22_spill] sm:$0xff]  ;;  %v15348_v26 = vld [vmem:[#allocation36_spill] sm:$0xff] }
 0x381   : > { %v6431_v12 = vpop.f32.mrf.mxu1  ;;  %7039 = vmatprep.mubr.bf16.mxu1 %v15344_v32 }
 0x382   : > { %15342 = vst [vmem:[#allocation18_spill] sm:$0xff] %v13175_v45  ;;  %v13179_v0 = vadd.f32 %v6431_v12, %v6270_v43  ;;  %v6272_v4 = vpop.f32.mrf.mxu0  ;;  %7284 = vmatpush2.bf16.msra.mxu1 %v9143_v62  ;;  %v9152_v43 = vld [vmem:[%s10046_s27 + $0x728] ss:$16 sps:$4 sm:$0xff]  }
 0x383   : > { %v6433_v31 = vpop.f32.mrf.mxu1  ;;  %7285 = vmatprep.subr.bf16.mxu1 %v9151_v18 }
 0x384   : > { %15345 = vst [vmem:[#allocation39_spill] sm:$0xff] %v13179_v0  ;;  %v13183_v48 = vadd.f32 %v6433_v31, %v6272_v4  ;;  %v6276_v14 = vpop.f32.mrf.mxu0  ;;  %6899 = vmatmul.mubr.bf16.gmra.mxu0 %v15347_v21  ;;  %v9157_v0 = vld [vmem:[%s10046_s27 + $0x70c] ss:$16 sps:$4 sm:$0xff]   ;;  %v15351_v4 = vld [vmem:[#allocation50_spill] sm:$0xff] }
 0x385   : > { %v6437_v45 = vpop.f32.mrf.mxu1  ;;  %6908 = vmatprep.mubr.bf16.mxu0 %v15348_v26 }
 0x386   : > { %15346 = vst [vmem:[#allocation13_spill] sm:$0xff] %v13183_v48  ;;  %v13187_v32 = vadd.f32 %v6437_v45, %v6276_v14  ;;  %v6278_v12 = vpop.f32.mrf.mxu0  ;;  %7286 = vmatpush2.bf16.msra.mxu1 %v9149_v46  ;;  %v15352_v48 = vld [vmem:[#allocation53_spill] sm:$0xff]  ;;  %v9155_v45 = vld [vmem:[%s10046_s27 + $0x708] ss:$16 sps:$4 sm:$0xff]  }
 0x387   : > { %v6439_v62 = vpop.f32.mrf.mxu1  ;;  %7287 = vmatprep.subr.bf16.mxu1 %v9154_v17  ;;  %v15355_v17 = vld [vmem:[#allocation24_spill] sm:$0xff] }
 0x388   : > { %15349 = vst [vmem:[#allocation28_spill] sm:$0xff] %v13187_v32  ;;  %v13191_v13 = vadd.f32 %v6439_v62, %v6278_v12  ;;  %v6280_v18 = vpop.f32.mrf.mxu0  ;;  %7040 = vmatmul.mubr.bf16.gmra.mxu1 %v15351_v4  ;;  %v15356_v62 = vld [vmem:[#allocation38_spill] sm:$0xff] }
 0x389   : > { %v6441_v31 = vpop.f32.mrf.mxu1  ;;  %7049 = vmatprep.mubr.bf16.mxu1 %v15352_v48 }
 0x38a   : > { %15350 = vst [vmem:[#allocation29_spill] sm:$0xff] %v13191_v13  ;;  %v13195_v21 = vadd.f32 %v6441_v31, %v6280_v18  ;;  %v6282_v26 = vpop.f32.mrf.mxu0  ;;  %7288 = vmatpush2.bf16.msra.mxu1 %v9152_v43  ;;  %v15357_v43 = vld [vmem:[#allocation52_spill] sm:$0xff] }
 0x38b   : > { %v6443_v14 = vpop.f32.mrf.mxu1  ;;  %7289 = vmatprep.subr.bf16.mxu1 %v9157_v0  ;;  %v15358_v0 = vld [vmem:[#allocation55_spill] sm:$0xff] }
 0x38c   : > { %15353 = vst [vmem:[#allocation12_spill] sm:$0xff] %v13195_v21  ;;  %v13198_v46 = vadd.f32 %v6443_v14, %v6282_v26  ;;  %v6286_v32 = vpop.f32.mrf.mxu0  ;;  %6909 = vmatmul.mubr.bf16.gmra.mxu0 %v15355_v17 }
 0x38d   : > { %v6447_v12 = vpop.f32.mrf.mxu1  ;;  %6918 = vmatprep.mubr.bf16.mxu0 %v15356_v62  ;;  %v15359_v62 = vld [vmem:[#allocation54_spill] sm:$0xff] }
 0x38e   : > { %15354 = vst [vmem:[#allocation15_spill] sm:$0xff] %v13198_v46  ;;  %v13202_v13 = vadd.f32 %v6447_v12, %v6286_v32  ;;  %v6288_v4 = vpop.f32.mrf.mxu0  ;;  %7290 = vmatpush2.bf16.msra.mxu1 %v9155_v45 }
 0x38f   : > { %v6449_v48 = vpop.f32.mrf.mxu1 }
 0x390   : > { %v13204_v18 = vadd.f32 %v6449_v48, %v6288_v4  ;;  %v6290_v31 = vpop.f32.mrf.mxu0  ;;  %7050 = vmatmul.mubr.bf16.gmra.mxu1 %v15357_v43 }
 0x391   : > { %v6451_v21 = vpop.f32.mrf.mxu1  ;;  %7059 = vmatprep.mubr.bf16.mxu1 %v15358_v0  ;;  %v15361_v0 = vld [vmem:[#allocation78_spill] sm:$0xff] }
 0x392   : > { %v6291_v26 = vpop.f32.mrf.mxu0  ;;  %v15360_v21 = vld [vmem:[#allocation57_spill] sm:$0xff] }
 0x393   : > { %v6452_v14 = vpop.f32.mrf.mxu1  ;;  %v15363_v26 = vld [vmem:[#allocation56_spill] sm:$0xff] }
 0x394   : > { %v6488_v46 = vpop.f32.mrf.mxu0  ;;  %6919 = vmatmul.mubr.bf16.gmra.mxu0 %v15279_v1  ;;  %v15364_v14 = vld [vmem:[#allocation59_spill] sm:$0xff] }
 0x395   : > { %v6489_v17 = vadd.f32 %v6488_v46, %v12971_v60  ;;  %6928 = vmatprep.mubr.bf16.mxu0 %v12531_v57  ;;  %v15362_v60 = vld [vmem:[#allocation61_spill] sm:$0xff] }
 0x396   : > { %v6490_v32 = vpop.f32.mrf.mxu0 }
 0x397   : > { %v6491_v45 = vadd.f32 %v6490_v32, %v12976_v33 }
 0x398   : > { %v6492_v12 = vpop.f32.mrf.mxu0  ;;  %7060 = vmatmul.mubr.bf16.gmra.mxu1 %v15359_v62  ;;  %v15365_v62 = vld [vmem:[#allocation60_spill] sm:$0xff] }
 0x399   : > { %v6493_v4 = vadd.f32 %v6492_v12, %v12982_v25  ;;  %7069 = vmatprep.mubr.bf16.mxu1 %v15360_v21  ;;  %v15366_v21 = vld [vmem:[#allocation63_spill] sm:$0xff] }
 0x39a   : > { %v6494_v48 = vpop.f32.mrf.mxu0 }
 0x39b   : > { %v6495_v31 = vadd.f32 %v6494_v48, %v12987_v10 }
 0x39c   : > { %v6498_v43 = vpop.f32.mrf.mxu0  ;;  %6929 = vmatmul.mubr.bf16.gmra.mxu0 %v15361_v0 }
 0x39d   : > { %v6499_v1 = vadd.f32 %v6498_v43, %v12992_v3  ;;  %7130 = vmatprep.mubr.bf16.mxu0 %v15362_v60 }
 0x39e   : > { %v6500_v57 = vpop.f32.mrf.mxu0 }
 0x39f   : > { %v6501_v33 = vadd.f32 %v6500_v57, %v12998_v16 }
 0x3a0   : > { %v6502_v46 = vpop.f32.mrf.mxu0  ;;  %7070 = vmatmul.mubr.bf16.gmra.mxu1 %v15363_v26 }
 0x3a1   : > { %v6503_v25 = vadd.f32 %v6502_v46, %v13003_v54  ;;  %7079 = vmatprep.mubr.bf16.mxu1 %v15364_v14  ;;  %v15368_v54 = vld [vmem:[#allocation58_spill] sm:$0xff]  ;;  %v15369_v46 = vld [vmem:[#allocation37_spill] sm:$0xff] }
 0x3a2   : > { %v6504_v32 = vpop.f32.mrf.mxu0 }
 0x3a3   : > { %v6505_v10 = vadd.f32 %v6504_v32, %v13007_v59 }
 0x3a4   : > { %v6508_v12 = vpop.f32.mrf.mxu0  ;;  %7131 = vmatmul.mubr.bf16.vlgmr.msra.gmra.mxu0 %v15365_v62  ;;  %v15371_v62 = vld [vmem:[#allocation62_spill] sm:$0xff] }
 0x3a5   : > { %v6509_v3 = vadd.f32 %v6508_v12, %v13015_v47  ;;  %7140 = vmatprep.mubr.bf16.mxu0 %v15366_v21  ;;  %v15373_v21 = vld [vmem:[#allocation65_spill] sm:$0xff] }
 0x3a6   : > { %v6510_v48 = vpop.f32.mrf.mxu0 }
 0x3a7   : > { %v6511_v16 = vadd.f32 %v6510_v48, %v13021_v36  ;;  %v6649_v43 = vpop.f32.mrf.mxu1 }
 0x3a8   : > { %v6512_v0 = vpop.f32.mrf.mxu0  ;;  %v13228_v60 = vadd.f32 %v6649_v43, %v6489_v17  ;;  %7080 = vmatmul.mubr.bf16.gmra.mxu1 %v15368_v54 }
 0x3a9   : > { %v6513_v57 = vadd.f32 %v6512_v0, %v13028_v28  ;;  %7089 = vmatprep.mubr.bf16.mxu1 %v15369_v46  ;;  %v6651_v59 = vpop.f32.mrf.mxu1 }
 0x3aa   : > { %15367 = vst [vmem:[#allocation19_spill] sm:$0xff] %v13228_v60  ;;  %v6514_v26 = vpop.f32.mrf.mxu0  ;;  %v13233_v14 = vadd.f32 %v6651_v59, %v6491_v45 }
 0x3ab   : > { %v6515_v47 = vadd.f32 %v6514_v26, %v13032_v58  ;;  %v6653_v32 = vpop.f32.mrf.mxu1  ;;  %v15376_v58 = vld [vmem:[#allocation79_spill] sm:$0xff] }
 0x3ac   : > { %15370 = vst [vmem:[#allocation30_spill] sm:$0xff] %v13233_v14  ;;  %v6518_v12 = vpop.f32.mrf.mxu0  ;;  %7141 = vmatmul.mubr.bf16.gmra.mxu0 %v15371_v62  ;;  %v13237_v36 = vadd.f32 %v6653_v32, %v6493_v4  ;;  %v15378_v62 = vld [vmem:[#allocation64_spill] sm:$0xff] }
 0x3ad   : > { %v6519_v17 = vadd.f32 %v6518_v12, %v13037_v38  ;;  %7150 = vmatprep.mubr.bf16.mxu0 %v15373_v21  ;;  %v6655_v48 = vpop.f32.mrf.mxu1  ;;  %v15380_v21 = vld [vmem:[#allocation66_spill] sm:$0xff] }
 0x3ae   : > { %15372 = vst [vmem:[#allocation14_spill] sm:$0xff] %v13237_v36  ;;  %v6520_v28 = vpop.f32.mrf.mxu0  ;;  %v13241_v43 = vadd.f32 %v6655_v48, %v6495_v31 }
 0x3af   : > { %v6521_v0 = vadd.f32 %v6520_v28, %v13042_v29  ;;  %v6659_v45 = vpop.f32.mrf.mxu1 }
 0x3b0   : > { %15374 = vst [vmem:[#allocation43_spill] sm:$0xff] %v13241_v43  ;;  %v6522_v54 = vpop.f32.mrf.mxu0  ;;  %v13244_v46 = vadd.f32 %v6659_v45, %v6499_v1  ;;  %7090 = vmatmul.mubr.bf16.gmra.mxu1 %v15376_v58 }
 0x3b1   : > { %v6523_v59 = vadd.f32 %v6522_v54, %v13047_v56  ;;  %7291 = vmatprep.mubr.bf16.mxu1 %v12656_v24  ;;  %v6661_v4 = vpop.f32.mrf.mxu1 }
 0x3b2   : > { %15375 = vst [vmem:[#allocation20_spill] sm:$0xff] %v13244_v46  ;;  %v6524_v38 = vpop.f32.mrf.mxu0  ;;  %v13249_v26 = vadd.f32 %v6661_v4, %v6501_v33 }
 0x3b3   : > { %v6525_v32 = vadd.f32 %v6524_v38, %v13050_v35  ;;  %v6663_v31 = vpop.f32.mrf.mxu1 }
 0x3b4   : > { %15377 = vst [vmem:[#allocation33_spill] sm:$0xff] %v13249_v26  ;;  %v6528_v12 = vpop.f32.mrf.mxu0  ;;  %7151 = vmatmul.mubr.bf16.gmra.mxu0 %v15378_v62  ;;  %v13253_v29 = vadd.f32 %v6663_v31, %v6503_v25  ;;  %v15385_v31 = vld [vmem:[#allocation68_spill] sm:$0xff] }
 0x3b5   : > { %v6529_v1 = vadd.f32 %v6528_v12, %v13055_v9  ;;  %7160 = vmatprep.mubr.bf16.mxu0 %v15380_v21  ;;  %v6665_v48 = vpop.f32.mrf.mxu1  ;;  %v15387_v21 = vld [vmem:[#allocation83_spill] sm:$0xff] }
 0x3b6   : > { %15379 = vst [vmem:[#allocation42_spill] sm:$0xff] %v13253_v29  ;;  %v6530_v56 = vpop.f32.mrf.mxu0  ;;  %v13257_v28 = vadd.f32 %v6665_v48, %v6505_v10 }
 0x3b7   : > { %v6531_v24 = vadd.f32 %v6530_v56, %v13060_v6  ;;  %v6669_v33 = vpop.f32.mrf.mxu1 }
 0x3b8   : > { %15381 = vst [vmem:[#allocation45_spill] sm:$0xff] %v13257_v28  ;;  %v6532_v45 = vpop.f32.mrf.mxu0  ;;  %v13260_v54 = vadd.f32 %v6669_v33, %v6509_v3  ;;  %7292 = vmatmul.mubr.bf16.vlgmr.msra.gmra.mxu1 %v12660_v40  ;;  %v15390_v33 = vld [vmem:[#allocation67_spill] sm:$0xff] }
 0x3b9   : > { %v6533_v35 = vadd.f32 %v6532_v45, %v13065_v27  ;;  %7301 = vmatprep.mubr.bf16.mxu1 %v12683_v52  ;;  %v6671_v25 = vpop.f32.mrf.mxu1 }
 0x3ba   : > { %15382 = vst [vmem:[#allocation31_spill] sm:$0xff] %v13260_v54  ;;  %v6534_v9 = vpop.f32.mrf.mxu0  ;;  %v13265_v58 = vadd.f32 %v6671_v25, %v6511_v16  ;;  %v15391_v25 = vld [vmem:[#allocation69_spill] sm:$0xff] }
 0x3bb   : > { %v6535_v4 = vadd.f32 %v6534_v9, %v13070_v23  ;;  %v6673_v10 = vpop.f32.mrf.mxu1 }
 0x3bc   : > { %15383 = vst [vmem:[#allocation34_spill] sm:$0xff] %v13265_v58  ;;  %v6538_v38 = vpop.f32.mrf.mxu0  ;;  %7161 = vmatmul.mubr.bf16.gmra.mxu0 %v12313_v42  ;;  %v13269_v6 = vadd.f32 %v6673_v10, %v6513_v57 }
 0x3bd   : > { %v6539_v3 = vadd.f32 %v6538_v38, %v13075_v11  ;;  %7170 = vmatprep.mubr.bf16.mxu0 %v15385_v31  ;;  %v6675_v40 = vpop.f32.mrf.mxu1 }
 0x3be   : > { %15384 = vst [vmem:[#allocation44_spill] sm:$0xff] %v13269_v6  ;;  %v6540_v27 = vpop.f32.mrf.mxu0  ;;  %v13273_v12 = vadd.f32 %v6675_v40, %v6515_v47 }
 0x3bf   : > { %v6541_v52 = vadd.f32 %v6540_v27, %v13080_v5 }
 0x3c0   : > { %15386 = vst [vmem:[#allocation47_spill] sm:$0xff] %v13273_v12  ;;  %v6542_v16 = vpop.f32.mrf.mxu0  ;;  %v6679_v62 = vpop.f32.mrf.mxu1  ;;  %7302 = vmatmul.mubr.bf16.gmra.mxu1 %v15387_v21  ;;  %v15397_v21 = vld [vmem:[#allocation21_spill] sm:$0xff] }
 0x3c1   : > { %v6543_v23 = vadd.f32 %v6542_v16, %v13085_v51  ;;  %v13278_v48 = vadd.f32 %v6679_v62, %v6519_v17  ;;  %7311 = vmatprep.mubr.bf16.mxu1 %v12724_v55 }
 0x3c2   : > { %v6544_v42 = vpop.f32.mrf.mxu0  ;;  %v6681_v11 = vpop.f32.mrf.mxu1 }
 0x3c3   : > { %15388 = vst [vmem:[#allocation32_spill] sm:$0xff] %v13278_v48  ;;  %v6545_v57 = vadd.f32 %v6544_v42, %v13090_v8  ;;  %v13282_v56 = vadd.f32 %v6681_v11, %v6521_v0  ;;  %v15394_v0 = vld [vmem:[#allocation84_spill] sm:$0xff] }
 0x3c4   : > { %v6548_v47 = vpop.f32.mrf.mxu0  ;;  %7171 = vmatmul.mubr.bf16.gmra.mxu0 %v15390_v33  ;;  %v6683_v5 = vpop.f32.mrf.mxu1 }
 0x3c5   : > { %15389 = vst [vmem:[#allocation35_spill] sm:$0xff] %v13282_v56  ;;  %v6549_v45 = vadd.f32 %v6548_v47, %v13095_v34  ;;  %7180 = vmatprep.mubr.bf16.mxu0 %v15391_v25  ;;  %v13287_v9 = vadd.f32 %v6683_v5, %v6523_v59  ;;  %v15402_v5 = vld [vmem:[#allocation86_spill] sm:$0xff] }
 0x3c6   : > { %v6550_v51 = vpop.f32.mrf.mxu0  ;;  %v6685_v17 = vpop.f32.mrf.mxu1 }
 0x3c7   : > { %15392 = vst [vmem:[#allocation46_spill] sm:$0xff] %v13287_v9  ;;  %v6551_v55 = vadd.f32 %v6550_v51, %v13100_v53  ;;  %v13290_v10 = vadd.f32 %v6685_v17, %v6525_v32 }
 0x3c8   : > { %v6552_v38 = vpop.f32.mrf.mxu0  ;;  %v6689_v8 = vpop.f32.mrf.mxu1  ;;  %7312 = vmatmul.mubr.bf16.gmra.mxu1 %v15394_v0 }
 0x3c9   : > { %15393 = vst [vmem:[#allocation49_spill] sm:$0xff] %v13290_v10  ;;  %v6553_v31 = vadd.f32 %v6552_v38, %v13105_v61  ;;  %v13294_v40 = vadd.f32 %v6689_v8, %v6529_v1  ;;  %7321 = vmatprep.mubr.bf16.mxu1 %v12763_v49  ;;  %v15405_v8 = vld [vmem:[#allocation72_spill] sm:$0xff] }
 0x3ca   : > { %v6554_v34 = vpop.f32.mrf.mxu0  ;;  %v6691_v27 = vpop.f32.mrf.mxu1 }
 0x3cb   : > { %15395 = vst [vmem:[#allocation23_spill] sm:$0xff] %v13294_v40  ;;  %v6555_v59 = vadd.f32 %v6554_v34, %v13110_v63  ;;  %v13298_v16 = vadd.f32 %v6691_v27, %v6531_v24  ;;  %v15400_v24 = vld [vmem:[#allocation85_spill] sm:$0xff] }
 0x3cc   : > { %v6558_v62 = vpop.f32.mrf.mxu0  ;;  %7181 = vmatmul.mubr.bf16.gmra.mxu0 %v12396_v15  ;;  %v6693_v53 = vpop.f32.mrf.mxu1 }
 0x3cd   : > { %15396 = vst [vmem:[#allocation48_spill] sm:$0xff] %v13298_v16  ;;  %v6559_v32 = vadd.f32 %v6558_v62, %v13115_v7  ;;  %7190 = vmatprep.mubr.bf16.mxu0 %v15397_v21  ;;  %v13303_v42 = vadd.f32 %v6693_v53, %v6533_v35 }
 0x3ce   : > { %v6560_v61 = vpop.f32.mrf.mxu0  ;;  %v6695_v1 = vpop.f32.mrf.mxu1 }
 0x3cf   : > { %15398 = vst [vmem:[#allocation51_spill] sm:$0xff] %v13303_v42  ;;  %v6561_v49 = vadd.f32 %v6560_v61, %v13120_v37  ;;  %v13306_v11 = vadd.f32 %v6695_v1, %v6535_v4  ;;  %v15404_v37 = vld [vmem:[#allocation70_spill] sm:$0xff] }
 0x3d0   : > { %v6562_v47 = vpop.f32.mrf.mxu0  ;;  %v6699_v63 = vpop.f32.mrf.mxu1  ;;  %7322 = vmatmul.mubr.bf16.gmra.mxu1 %v15400_v24  ;;  %v15412_v24 = vld [vmem:[#allocation74_spill] sm:$0xff] }
 0x3d1   : > { %15399 = vst [vmem:[#allocation22_spill] sm:$0xff] %v13306_v11  ;;  %v6563_v33 = vadd.f32 %v6562_v47, %v13125_v19  ;;  %v13310_v15 = vadd.f32 %v6699_v63, %v6539_v3  ;;  %7331 = vmatprep.mubr.bf16.mxu1 %v15402_v5 }
 0x3d2   : > { %v6564_v7 = vpop.f32.mrf.mxu0  ;;  %v6701_v25 = vpop.f32.mrf.mxu1 }
 0x3d3   : > { %15401 = vst [vmem:[#allocation36_spill] sm:$0xff] %v13310_v15  ;;  %v6565_v35 = vadd.f32 %v6564_v7, %v13130_v30  ;;  %v13314_v51 = vadd.f32 %v6701_v25, %v6541_v52  ;;  %v15408_v52 = vld [vmem:[#allocation87_spill] sm:$0xff] }
 0x3d4   : > { %v6568_v17 = vpop.f32.mrf.mxu0  ;;  %7191 = vmatmul.mubr.bf16.gmra.mxu0 %v15404_v37  ;;  %v6703_v4 = vpop.f32.mrf.mxu1 }
 0x3d5   : > { %15403 = vst [vmem:[#allocation50_spill] sm:$0xff] %v13314_v51  ;;  %v6569_v38 = vadd.f32 %v6568_v17, %v13135_v2  ;;  %7200 = vmatprep.mubr.bf16.mxu0 %v15405_v8  ;;  %v13319_v0 = vadd.f32 %v6703_v4, %v6543_v23  ;;  %v15416_v17 = vld [vmem:[#allocation27_spill] sm:$0xff]  ;;  %v15418_v8 = vld [vmem:[#allocation89_spill] sm:$0xff] }
 0x3d6   : > { %v6570_v19 = vpop.f32.mrf.mxu0  ;;  %v6705_v3 = vpop.f32.mrf.mxu1 }
 0x3d7   : > { %15406 = vst [vmem:[#allocation53_spill] sm:$0xff] %v13319_v0  ;;  %v6571_v34 = vadd.f32 %v6570_v19, %v13140_v44  ;;  %v13322_v27 = vadd.f32 %v6705_v3, %v6545_v57  ;;  %v15411_v44 = vld [vmem:[#allocation71_spill] sm:$0xff] }
 0x3d8   : > { %v6572_v62 = vpop.f32.mrf.mxu0  ;;  %v6709_v30 = vpop.f32.mrf.mxu1  ;;  %7332 = vmatmul.mubr.bf16.gmra.mxu1 %v15408_v52  ;;  %v15422_v52 = vld [vmem:[#allocation17_spill] sm:$0xff] }
 0x3d9   : > { %15407 = vst [vmem:[#allocation24_spill] sm:$0xff] %v13322_v27  ;;  %v6573_v53 = vadd.f32 %v6572_v62, %v13145_v50  ;;  %v13326_v21 = vadd.f32 %v6709_v30, %v6549_v45  ;;  %7341 = vmatprep.mubr.bf16.mxu1 %v12836_v39 }
 0x3da   : > { %v6574_v2 = vpop.f32.mrf.mxu0  ;;  %v6711_v61 = vpop.f32.mrf.mxu1 }
 0x3db   : > { %15409 = vst [vmem:[#allocation38_spill] sm:$0xff] %v13326_v21  ;;  %v6575_v23 = vadd.f32 %v6574_v2, %v13150_v22  ;;  %v13330_v1 = vadd.f32 %v6711_v61, %v6551_v55  ;;  %v15415_v55 = vld [vmem:[#allocation88_spill] sm:$0xff] }
 0x3dc   : > { %v6578_v47 = vpop.f32.mrf.mxu0  ;;  %7201 = vmatmul.mubr.bf16.gmra.mxu0 %v15411_v44  ;;  %v6713_v57 = vpop.f32.mrf.mxu1  ;;  %v15423_v61 = vld [vmem:[#allocation76_spill] sm:$0xff] }
 0x3dd   : > { %15410 = vst [vmem:[#allocation52_spill] sm:$0xff] %v13330_v1  ;;  %v6579_v63 = vadd.f32 %v6578_v47, %v13155_v41  ;;  %7210 = vmatprep.mubr.bf16.mxu0 %v15412_v24  ;;  %v13335_v5 = vadd.f32 %v6713_v57, %v6553_v31  ;;  %v15419_v31 = vld [vmem:[#allocation40_spill] sm:$0xff]  ;;  %v15425_v57 = vld [vmem:[#allocation18_spill] sm:$0xff] }
 0x3de   : > { %v6580_v50 = vpop.f32.mrf.mxu0  ;;  %v6715_v45 = vpop.f32.mrf.mxu1 }
 0x3df   : > { %15413 = vst [vmem:[#allocation55_spill] sm:$0xff] %v13335_v5  ;;  %v6581_v39 = vadd.f32 %v6580_v50, %v13159_v20  ;;  %v13338_v7 = vadd.f32 %v6715_v45, %v6555_v59  ;;  %v15421_v20 = vld [vmem:[#allocation73_spill] sm:$0xff] }
 0x3e0   : > { %v6582_v25 = vpop.f32.mrf.mxu0  ;;  %v6719_v22 = vpop.f32.mrf.mxu1  ;;  %7342 = vmatmul.mubr.bf16.gmra.mxu1 %v15415_v55 }
 0x3e1   : > { %15414 = vst [vmem:[#allocation54_spill] sm:$0xff] %v13338_v7  ;;  %v6583_v37 = vadd.f32 %v6582_v25, %v15416_v17  ;;  %v13342_v4 = vadd.f32 %v6719_v22, %v6559_v32  ;;  %7351 = vmatprep.mubr.bf16.mxu1 %v15418_v8  ;;  %v15428_v22 = vld [vmem:[#allocation39_spill] sm:$0xff] }
 0x3e2   : > { %v6584_v41 = vpop.f32.mrf.mxu0  ;;  %v6721_v19 = vpop.f32.mrf.mxu1  ;;  %v15430_v8 = vld [vmem:[#allocation91_spill] sm:$0xff] }
 0x3e3   : > { %15417 = vst [vmem:[#allocation57_spill] sm:$0xff] %v13342_v4  ;;  %v6585_v3 = vadd.f32 %v6584_v41, %v15419_v31  ;;  %v13346_v62 = vadd.f32 %v6721_v19, %v6561_v49  ;;  %v15427_v49 = vld [vmem:[#allocation90_spill] sm:$0xff] }
 0x3e4   : > { %v6588_v30 = vpop.f32.mrf.mxu0  ;;  %7211 = vmatmul.mubr.bf16.gmra.mxu0 %v15421_v20  ;;  %v6723_v59 = vpop.f32.mrf.mxu1 }
 0x3e5   : > { %15420 = vst [vmem:[#allocation78_spill] sm:$0xff] %v13346_v62  ;;  %v6589_v2 = vadd.f32 %v6588_v30, %v15422_v52  ;;  %7220 = vmatprep.mubr.bf16.mxu0 %v15423_v61  ;;  %v13351_v47 = vadd.f32 %v6723_v59, %v6563_v33  ;;  %v15431_v33 = vld [vmem:[#allocation13_spill] sm:$0xff]  ;;  %v15433_v59 = vld [vmem:[#allocation75_spill] sm:$0xff]  ;;  %v15434_v52 = vld [vmem:[#allocation28_spill] sm:$0xff] }
 0x3e6   : > { %v6590_v32 = vpop.f32.mrf.mxu0  ;;  %v6725_v44 = vpop.f32.mrf.mxu1 }
 0x3e7   : > { %15424 = vst [vmem:[#allocation61_spill] sm:$0xff] %v13351_v47  ;;  %v6591_v24 = vadd.f32 %v6590_v32, %v15425_v57  ;;  %v13354_v50 = vadd.f32 %v6725_v44, %v6565_v35  ;;  %v15435_v32 = vld [vmem:[#allocation80_spill] sm:$0xff] }
 0x3e8   : > { %v6592_v45 = vpop.f32.mrf.mxu0  ;;  %v6729_v25 = vpop.f32.mrf.mxu1  ;;  %7352 = vmatmul.mubr.bf16.gmra.mxu1 %v15427_v49 }
 0x3e9   : > { %15426 = vst [vmem:[#allocation56_spill] sm:$0xff] %v13354_v50  ;;  %v6593_v55 = vadd.f32 %v6592_v45, %v15428_v22  ;;  %v13358_v17 = vadd.f32 %v6729_v25, %v6569_v38  ;;  %7361 = vmatprep.mubr.bf16.mxu1 %v15430_v8  ;;  %v15437_v45 = vld [vmem:[#allocation29_spill] sm:$0xff] }
 0x3ea   : > { %v6594_v41 = vpop.f32.mrf.mxu0  ;;  %v6731_v19 = vpop.f32.mrf.mxu1 }
 0x3eb   : > { %15429 = vst [vmem:[#allocation59_spill] sm:$0xff] %v13358_v17  ;;  %v6595_v31 = vadd.f32 %v6594_v41, %v15431_v33  ;;  %v13362_v30 = vadd.f32 %v6731_v19, %v6571_v34  ;;  %v15439_v34 = vld [vmem:[#allocation92_spill] sm:$0xff] }
 0x3ec   : > { %v6598_v20 = vpop.f32.mrf.mxu0  ;;  %7221 = vmatmul.mubr.bf16.gmra.mxu0 %v15433_v59  ;;  %v6733_v35 = vpop.f32.mrf.mxu1  ;;  %v15440_v41 = vld [vmem:[#allocation12_spill] sm:$0xff]  ;;  %v15442_v59 = vld [vmem:[#allocation93_spill] sm:$0xff] }
 0x3ed   : > { %15432 = vst [vmem:[#allocation60_spill] sm:$0xff] %v13362_v30  ;;  %v6599_v61 = vadd.f32 %v6598_v20, %v15434_v52  ;;  %7230 = vmatprep.mubr.bf16.mxu0 %v15435_v32  ;;  %v13367_v44 = vadd.f32 %v6733_v35, %v6573_v53  ;;  %v15443_v53 = vld [vmem:[#allocation15_spill] sm:$0xff] }
 0x3ee   : > { %v6600_v38 = vpop.f32.mrf.mxu0  ;;  %v6735_v57 = vpop.f32.mrf.mxu1 }
 0x3ef   : > { %15436 = vst [vmem:[#allocation63_spill] sm:$0xff] %v13367_v44  ;;  %v6601_v25 = vadd.f32 %v6600_v38, %v15437_v45  ;;  %v13370_v49 = vadd.f32 %v6735_v57, %v6575_v23  ;;  %v15445_v38 = vld [vmem:[#allocation77_spill] sm:$0xff]  ;;  %v15446_v45 = vld [vmem:[#allocation82_spill] sm:$0xff] }
 0x3f0   : > { %v6602_v22 = vpop.f32.mrf.mxu0  ;;  %v6739_v8 = vpop.f32.mrf.mxu1  ;;  %7362 = vmatmul.mubr.bf16.gmra.mxu1 %v15439_v34 }
 0x3f1   : > { %15438 = vst [vmem:[#allocation58_spill] sm:$0xff] %v13370_v49  ;;  %v6603_v19 = vadd.f32 %v6602_v22, %v15440_v41  ;;  %v13374_v33 = vadd.f32 %v6739_v8, %v6579_v63  ;;  %7371 = vmatprep.mubr.bf16.mxu1 %v15442_v59 }
 0x3f2   : > { %v6604_v20 = vpop.f32.mrf.mxu0  ;;  %v6741_v52 = vpop.f32.mrf.mxu1 }
 0x3f3   : > { %15441 = vst [vmem:[#allocation37_spill] sm:$0xff] %v13374_v33  ;;  %v6605_v35 = vadd.f32 %v6604_v20, %v15443_v53  ;;  %v13378_v32 = vadd.f32 %v6741_v52, %v6581_v39  ;;  %v15449_v39 = vld [vmem:[#allocation94_spill] sm:$0xff]  ;;  %v15451_v53 = vld [vmem:[#allocation96_spill] sm:$0xff] }
 0x3f4   : > { %v6608_v44 = vpop.f32.mrf.mxu0  ;;  %7231 = vmatmul.mubr.bf16.gmra.mxu0 %v15445_v38  ;;  %v6743_v23 = vpop.f32.mrf.mxu1 }
 0x3f5   : > { %15444 = vst [vmem:[#allocation62_spill] sm:$0xff] %v13378_v32  ;;  %v6609_v57 = vadd.f32 %v6608_v44, %v13202_v13  ;;  %7240 = vmatprep.mubr.bf16.mxu0 %v15446_v45  ;;  %v13383_v34 = vadd.f32 %v6743_v23, %v6583_v37  ;;  %v15453_v23 = vld [vmem:[#allocation81_spill] sm:$0xff] }
 0x3f6   : > { %v6610_v63 = vpop.f32.mrf.mxu0  ;;  %v6745_v22 = vpop.f32.mrf.mxu1 }
 0x3f7   : > { %15447 = vst [vmem:[#allocation65_spill] sm:$0xff] %v13383_v34  ;;  %v6611_v8 = vadd.f32 %v6610_v63, %v13204_v18  ;;  %v13386_v41 = vadd.f32 %v6745_v22, %v6585_v3  ;;  %v15454_v34 = vld [vmem:[#allocation95_spill] sm:$0xff] }
 0x3f8   : > { %v6612_v59 = vpop.f32.mrf.mxu0  ;;  %v6749_v20 = vpop.f32.mrf.mxu1  ;;  %7372 = vmatmul.mubr.bf16.gmra.mxu1 %v15449_v39 }
 0x3f9   : > { %15448 = vst [vmem:[#allocation79_spill] sm:$0xff] %v13386_v41  ;;  %v13389_v52 = vadd.f32 %v6749_v20, %v6589_v2  ;;  %7381 = vmatprep.mubr.bf16.mxu1 %v15451_v53  ;;  %v15457_v20 = vld [vmem:[#allocation97_spill] sm:$0xff]  ;;  %v15470_v41 = vld [vmem:[#allocation16_spill] sm:$0xff] }
 0x3fa   : > { %v6613_v38 = vpop.f32.mrf.mxu0  ;;  %v6751_v13 = vpop.f32.mrf.mxu1 }
 0x3fb   : > { %15450 = vst [vmem:[#allocation64_spill] sm:$0xff] %v13389_v52  ;;  %v13392_v44 = vadd.f32 %v6751_v13, %v6591_v24  ;;  %v15459_v24 = vld [vmem:[#allocation99_spill] sm:$0xff] }
 0x3fc   : > { %v6810_v37 = vpop.f32.mrf.mxu0  ;;  %7241 = vmatmul.mubr.bf16.gmra.mxu0 %v15453_v23  ;;  %v6753_v45 = vpop.f32.mrf.mxu1 }
 0x3fd   : > { %15452 = vst [vmem:[#allocation66_spill] sm:$0xff] %v13392_v44  ;;  %7250 = vmatprep.mubr.bf16.mxu0 %v15454_v34  ;;  %v13396_v18 = vadd.f32 %v6753_v45, %v6593_v55  ;;  %v15461_v34 = vld [vmem:[#allocation98_spill] sm:$0xff] }
 0x3fe   : > { %v6812_v3 = vpop.f32.mrf.mxu0  ;;  %v6755_v63 = vpop.f32.mrf.mxu1 }
 0x3ff   : > { %15455 = vst [vmem:[#allocation68_spill] sm:$0xff] %v13396_v18  ;;  %v13398_v22 = vadd.f32 %v6755_v63, %v6595_v31 }
 0x400   : > { %v6814_v2 = vpop.f32.mrf.mxu0  ;;  %v6759_v59 = vpop.f32.mrf.mxu1  ;;  %7382 = vmatmul.mubr.bf16.gmra.mxu1 %v15457_v20 }
 0x401   : > { %15456 = vst [vmem:[#allocation83_spill] sm:$0xff] %v13398_v22  ;;  %v13401_v39 = vadd.f32 %v6759_v59, %v6599_v61  ;;  %7391 = vmatprep.mubr.bf16.mxu1 %v15459_v24  ;;  %v15464_v61 = vld [vmem:[#allocation100_spill] sm:$0xff]  ;;  %v15466_v24 = vld [vmem:[#allocation41_spill] sm:$0xff] }
 0x402   : > { %v6816_v53 = vpop.f32.mrf.mxu0  ;;  %v6761_v38 = vpop.f32.mrf.mxu1 }
 0x403   : > { %15458 = vst [vmem:[#allocation67_spill] sm:$0xff] %v13401_v39  ;;  %v13404_v13 = vadd.f32 %v6761_v38, %v6601_v25 }
 0x404   : > { %v6820_v23 = vpop.f32.mrf.mxu0  ;;  %7251 = vmatmul.mubr.bf16.gmra.mxu0 %v15461_v34  ;;  %v6763_v55 = vpop.f32.mrf.mxu1 }
 0x405   : > { %15460 = vst [vmem:[#allocation69_spill] sm:$0xff] %v13404_v13  ;;  %v13407_v45 = vadd.f32 %v6763_v55, %v6603_v19 }
 0x406   : > { %v6822_v31 = vpop.f32.mrf.mxu0  ;;  %v6765_v63 = vpop.f32.mrf.mxu1 }
 0x407   : > { %15462 = vst [vmem:[#allocation84_spill] sm:$0xff] %v13407_v45  ;;  %v13409_v22 = vadd.f32 %v6765_v63, %v6605_v35  ;;  %v15468_v35 = vld [vmem:[#allocation26_spill] sm:$0xff] }
 0x408   : > { %v6824_v18 = vpop.f32.mrf.mxu0  ;;  %v6769_v20 = vpop.f32.mrf.mxu1  ;;  %7392 = vmatmul.mubr.bf16.gmra.mxu1 %v15464_v61 }
 0x409   : > { %15463 = vst [vmem:[#allocation21_spill] sm:$0xff] %v13409_v22  ;;  %v13412_v59 = vadd.f32 %v6769_v20, %v6609_v57  ;;  %7401 = vmatprep.mubr.bf16.mxu1 %v15466_v24  ;;  %v15469_v22 = vld [vmem:[#allocation101_spill] sm:$0xff] }
 0x40a   : > { %v6826_v25 = vpop.f32.mrf.mxu0  ;;  %v6771_v38 = vpop.f32.mrf.mxu1 }
 0x40b   : > { %15465 = vst [vmem:[#allocation85_spill] sm:$0xff] %v13412_v59  ;;  %v13415_v13 = vadd.f32 %v6771_v38, %v6611_v8 }
 0x40c   : > { %v6830_v34 = vpop.f32.mrf.mxu0  ;;  %v6773_v39 = vpop.f32.mrf.mxu1 }
 0x40d   : > { %15467 = vst [vmem:[#allocation86_spill] sm:$0xff] %v13415_v13 }
 0x40e   : > { %v6832_v19 = vpop.f32.mrf.mxu0  ;;  %v6774_v55 = vpop.f32.mrf.mxu1 }
 0x410   : > { %v6834_v45 = vpop.f32.mrf.mxu0  ;;  %v6971_v44 = vpop.f32.mrf.mxu1  ;;  %7402 = vmatmul.mubr.bf16.gmra.mxu1 %v15468_v35 }
 0x411   : > { %v13418_v63 = vadd.f32 %v6971_v44, %v6810_v37  ;;  %7411 = vmatprep.mubr.bf16.mxu1 %v15469_v22 }
 0x412   : > { %v6836_v57 = vpop.f32.mrf.mxu0  ;;  %v6973_v20 = vpop.f32.mrf.mxu1 }
 0x413   : > { %v13421_v61 = vadd.f32 %v6973_v20, %v6812_v3 }
 0x414   : > { %v6840_v24 = vpop.f32.mrf.mxu0  ;;  %v6975_v59 = vpop.f32.mrf.mxu1 }
 0x415   : > { %v13423_v8 = vadd.f32 %v6975_v59, %v6814_v2 }
 0x416   : > { %v6842_v38 = vpop.f32.mrf.mxu0  ;;  %v6977_v39 = vpop.f32.mrf.mxu1 }
 0x417   : > { %v13425_v13 = vadd.f32 %v6977_v39, %v6816_v53 }
 0x418   : > { %v6844_v55 = vpop.f32.mrf.mxu0  ;;  %v6981_v52 = vpop.f32.mrf.mxu1  ;;  %7412 = vmatmul.mubr.bf16.gmra.mxu1 %v15470_v41 }
 0x419   : > { %v13428_v44 = vadd.f32 %v6981_v52, %v6820_v23 }
 0x41a   : > { %v6846_v37 = vpop.f32.mrf.mxu0  ;;  %v6983_v22 = vpop.f32.mrf.mxu1 }
 0x41b   : > { %v13430_v35 = vadd.f32 %v6983_v22, %v6822_v31 }
 0x41c   : > { %v6850_v3 = vpop.f32.mrf.mxu0  ;;  %v6985_v20 = vpop.f32.mrf.mxu1 }
 0x41d   : > { %v13432_v32 = vadd.f32 %v6985_v20, %v6824_v18 }
 0x41e   : > { %v6852_v2 = vpop.f32.mrf.mxu0  ;;  %v6987_v59 = vpop.f32.mrf.mxu1 }
 0x41f   : > { %v13434_v33 = vadd.f32 %v6987_v59, %v6826_v25 }
 0x420   : > { %v6854_v53 = vpop.f32.mrf.mxu0  ;;  %v6991_v39 = vpop.f32.mrf.mxu1 }
 0x421   : > { %v13436_v49 = vadd.f32 %v6991_v39, %v6830_v34 }
 0x422   : > { %v6856_v30 = vpop.f32.mrf.mxu0  ;;  %v6993_v41 = vpop.f32.mrf.mxu1 }
 0x423   : > { %v13438_v52 = vadd.f32 %v6993_v41, %v6832_v19 }
 0x424   : > { %v6860_v23 = vpop.f32.mrf.mxu0  ;;  %v6995_v17 = vpop.f32.mrf.mxu1 }
 0x425   : > { %v13440_v31 = vadd.f32 %v6995_v17, %v6834_v45 }
 0x426   : > { %v6862_v22 = vpop.f32.mrf.mxu0  ;;  %v6997_v50 = vpop.f32.mrf.mxu1 }
 0x427   : > { %v13442_v18 = vadd.f32 %v6997_v50, %v6836_v57 }
 0x428   : > { %v6864_v20 = vpop.f32.mrf.mxu0  ;;  %v7001_v47 = vpop.f32.mrf.mxu1 }
 0x429   : > { %v13444_v25 = vadd.f32 %v7001_v47, %v6840_v24 }
 0x42a   : > { %v6866_v59 = vpop.f32.mrf.mxu0  ;;  %v7003_v62 = vpop.f32.mrf.mxu1 }
 0x42b   : > { %v13446_v34 = vadd.f32 %v7003_v62, %v6842_v38 }
 0x42c   : > { %v6870_v39 = vpop.f32.mrf.mxu0  ;;  %v7005_v4 = vpop.f32.mrf.mxu1 }
 0x42d   : > { %v13448_v19 = vadd.f32 %v7005_v4, %v6844_v55 }
 0x42e   : > { %v6872_v41 = vpop.f32.mrf.mxu0  ;;  %v7007_v7 = vpop.f32.mrf.mxu1 }
 0x42f   : > { %v13450_v17 = vadd.f32 %v7007_v7, %v6846_v37 }
 0x430   : > { %v6874_v45 = vpop.f32.mrf.mxu0  ;;  %v7011_v5 = vpop.f32.mrf.mxu1 }
 0x431   : > { %v13452_v50 = vadd.f32 %v7011_v5, %v6850_v3 }
 0x432   : > { %v6876_v57 = vpop.f32.mrf.mxu0  ;;  %v7013_v1 = vpop.f32.mrf.mxu1 }
 0x433   : > { %v13454_v47 = vadd.f32 %v7013_v1, %v6852_v2 }
 0x434   : > { %v6880_v24 = vpop.f32.mrf.mxu0  ;;  %v7015_v21 = vpop.f32.mrf.mxu1 }
 0x435   : > { %v13456_v62 = vadd.f32 %v7015_v21, %v6854_v53 }
 0x436   : > { %v6882_v38 = vpop.f32.mrf.mxu0  ;;  %v7017_v27 = vpop.f32.mrf.mxu1 }
 0x437   : > { %v13458_v4 = vadd.f32 %v7017_v27, %v6856_v30 }
 0x438   : > { %v6884_v55 = vpop.f32.mrf.mxu0  ;;  %v7021_v0 = vpop.f32.mrf.mxu1 }
 0x439   : > { %v13460_v7 = vadd.f32 %v7021_v0, %v6860_v23 }
 0x43a   : > { %v6886_v37 = vpop.f32.mrf.mxu0  ;;  %v7023_v51 = vpop.f32.mrf.mxu1 }
 0x43b   : > { %v13462_v5 = vadd.f32 %v7023_v51, %v6862_v22 }
 0x43c   : > { %v6890_v3 = vpop.f32.mrf.mxu0  ;;  %v7025_v15 = vpop.f32.mrf.mxu1 }
 0x43d   : > { %v13464_v1 = vadd.f32 %v7025_v15, %v6864_v20 }
 0x43e   : > { %v6892_v2 = vpop.f32.mrf.mxu0  ;;  %v7027_v11 = vpop.f32.mrf.mxu1 }
 0x43f   : > { %v13466_v21 = vadd.f32 %v7027_v11, %v6866_v59 }
 0x440   : > { %v6894_v53 = vpop.f32.mrf.mxu0  ;;  %v7031_v42 = vpop.f32.mrf.mxu1 }
 0x441   : > { %v13468_v27 = vadd.f32 %v7031_v42, %v6870_v39 }
 0x442   : > { %v6896_v30 = vpop.f32.mrf.mxu0  ;;  %v7033_v16 = vpop.f32.mrf.mxu1 }
 0x443   : > { %v13470_v0 = vadd.f32 %v7033_v16, %v6872_v41 }
 0x444   : > { %v6900_v23 = vpop.f32.mrf.mxu0  ;;  %v7035_v40 = vpop.f32.mrf.mxu1 }
 0x445   : > { %v13472_v51 = vadd.f32 %v7035_v40, %v6874_v45 }
 0x446   : > { %v6902_v22 = vpop.f32.mrf.mxu0  ;;  %v7037_v10 = vpop.f32.mrf.mxu1 }
 0x447   : > { %v13474_v15 = vadd.f32 %v7037_v10, %v6876_v57 }
 0x448   : > { %v6904_v20 = vpop.f32.mrf.mxu0  ;;  %v7041_v9 = vpop.f32.mrf.mxu1 }
 0x449   : > { %v13476_v11 = vadd.f32 %v7041_v9, %v6880_v24 }
 0x44a   : > { %v6906_v59 = vpop.f32.mrf.mxu0  ;;  %v7043_v56 = vpop.f32.mrf.mxu1 }
 0x44b   : > { %v13478_v42 = vadd.f32 %v7043_v56, %v6882_v38 }
 0x44c   : > { %v6910_v39 = vpop.f32.mrf.mxu0  ;;  %v7045_v48 = vpop.f32.mrf.mxu1 }
 0x44d   : > { %v13480_v16 = vadd.f32 %v7045_v48, %v6884_v55 }
 0x44e   : > { %v6912_v41 = vpop.f32.mrf.mxu0  ;;  %v7047_v12 = vpop.f32.mrf.mxu1 }
 0x44f   : > { %v13482_v40 = vadd.f32 %v7047_v12, %v6886_v37 }
 0x450   : > { %v6914_v45 = vpop.f32.mrf.mxu0  ;;  %v7051_v6 = vpop.f32.mrf.mxu1 }
 0x451   : > { %v13484_v10 = vadd.f32 %v7051_v6, %v6890_v3 }
 0x452   : > { %v6916_v57 = vpop.f32.mrf.mxu0  ;;  %v7053_v58 = vpop.f32.mrf.mxu1 }
 0x453   : > { %v13486_v9 = vadd.f32 %v7053_v58, %v6892_v2 }
 0x454   : > { %v6920_v24 = vpop.f32.mrf.mxu0  ;;  %v7055_v54 = vpop.f32.mrf.mxu1 }
 0x455   : > { %v13488_v56 = vadd.f32 %v7055_v54, %v6894_v53 }
 0x456   : > { %v6922_v38 = vpop.f32.mrf.mxu0  ;;  %v7057_v28 = vpop.f32.mrf.mxu1 }
 0x457   : > { %v13490_v48 = vadd.f32 %v7057_v28, %v6896_v30 }
 0x458   : > { %v6924_v55 = vpop.f32.mrf.mxu0  ;;  %v7061_v29 = vpop.f32.mrf.mxu1 }
 0x459   : > { %v13492_v12 = vadd.f32 %v7061_v29, %v6900_v23 }
 0x45a   : > { %v6926_v37 = vpop.f32.mrf.mxu0  ;;  %v7063_v26 = vpop.f32.mrf.mxu1 }
 0x45b   : > { %v13494_v6 = vadd.f32 %v7063_v26, %v6902_v22 }
 0x45c   : > { %v6930_v3 = vpop.f32.mrf.mxu0  ;;  %v7065_v46 = vpop.f32.mrf.mxu1 }
 0x45d   : > { %v13496_v58 = vadd.f32 %v7065_v46, %v6904_v20 }
 0x45e   : > { %v6932_v2 = vpop.f32.mrf.mxu0  ;;  %v7067_v43 = vpop.f32.mrf.mxu1 }
 0x45f   : > { %15471 = vst [vmem:[#allocation70_spill] sm:$0xff] %v13496_v58  ;;  %v13498_v54 = vadd.f32 %v7067_v43, %v6906_v59 }
 0x460   : > { %v6934_v53 = vpop.f32.mrf.mxu0  ;;  %v7071_v36 = vpop.f32.mrf.mxu1 }
 0x461   : > { %v13500_v28 = vadd.f32 %v7071_v36, %v6910_v39 }
 0x462   : > { %v6935_v30 = vpop.f32.mrf.mxu0  ;;  %v7073_v14 = vpop.f32.mrf.mxu1 }
 0x463   : > { %v13502_v29 = vadd.f32 %v7073_v14, %v6912_v41 }
 0x464   : > { %v7132_v23 = vpop.f32.mrf.mxu0  ;;  %v7075_v60 = vpop.f32.mrf.mxu1 }
 0x465   : > { %15472 = vst [vmem:[#allocation72_spill] sm:$0xff] %v13502_v29  ;;  %v7133_v26 = vadd.f32 %v7132_v23, %v13418_v63  ;;  %v13505_v22 = vadd.f32 %v7075_v60, %v6914_v45 }
 0x466   : > { %v7134_v46 = vpop.f32.mrf.mxu0  ;;  %v7077_v20 = vpop.f32.mrf.mxu1 }
 0x467   : > { %v7135_v58 = vadd.f32 %v7134_v46, %v13421_v61  ;;  %v13508_v43 = vadd.f32 %v7077_v20, %v6916_v57 }
 0x468   : > { %v7136_v59 = vpop.f32.mrf.mxu0  ;;  %v7081_v53 = vpop.f32.mrf.mxu1 }
 0x469   : > { %v7137_v36 = vadd.f32 %v7136_v59, %v13423_v8  ;;  %v13511_v39 = vadd.f32 %v7081_v53, %v6920_v24 }
 0x46a   : > { %v7138_v14 = vpop.f32.mrf.mxu0  ;;  %v7083_v41 = vpop.f32.mrf.mxu1 }
 0x46b   : > { %v7139_v30 = vadd.f32 %v7138_v14, %v13425_v13  ;;  %v13514_v29 = vadd.f32 %v7083_v41, %v6922_v38 }
 0x46c   : > { %v7142_v60 = vpop.f32.mrf.mxu0  ;;  %v7085_v63 = vpop.f32.mrf.mxu1 }
 0x46d   : > { %v7143_v45 = vadd.f32 %v7142_v60, %v13428_v44  ;;  %v13517_v23 = vadd.f32 %v7085_v63, %v6924_v55 }
 0x46e   : > { %v7144_v61 = vpop.f32.mrf.mxu0  ;;  %v7087_v57 = vpop.f32.mrf.mxu1 }
 0x46f   : > { %v7145_v46 = vadd.f32 %v7144_v61, %v13430_v35  ;;  %v13520_v20 = vadd.f32 %v7087_v57, %v6926_v37 }
 0x470   : > { %v7146_v8 = vpop.f32.mrf.mxu0  ;;  %v7091_v24 = vpop.f32.mrf.mxu1 }
 0x471   : > { %v7147_v59 = vadd.f32 %v7146_v8, %v13432_v32  ;;  %v13523_v53 = vadd.f32 %v7091_v24, %v6930_v3 }
 0x472   : > { %v7148_v13 = vpop.f32.mrf.mxu0  ;;  %v7093_v38 = vpop.f32.mrf.mxu1 }
 0x473   : > { %v7149_v14 = vadd.f32 %v7148_v13, %v13434_v33  ;;  %v13526_v41 = vadd.f32 %v7093_v38, %v6932_v2 }
 0x474   : > { %v7152_v44 = vpop.f32.mrf.mxu0  ;;  %v7095_v55 = vpop.f32.mrf.mxu1 }
 0x475   : > { %v7153_v60 = vadd.f32 %v7152_v44, %v13436_v49 }
 0x476   : > { %v7154_v63 = vpop.f32.mrf.mxu0  ;;  %v7096_v35 = vpop.f32.mrf.mxu1 }
 0x477   : > { %v7155_v37 = vadd.f32 %v7154_v63, %v13438_v52 }
 0x478   : > { %v7156_v61 = vpop.f32.mrf.mxu0  ;;  %v7293_v57 = vpop.f32.mrf.mxu1 }
 0x479   : > { %v7157_v32 = vadd.f32 %v7156_v61, %v13440_v31  ;;  %v13531_v3 = vadd.f32 %v7293_v57, %v7133_v26 }
 0x47a   : > { %v7158_v8 = vpop.f32.mrf.mxu0  ;;  %v7295_v24 = vpop.f32.mrf.mxu1 }
 0x47b   : > { %v7159_v33 = vadd.f32 %v7158_v8, %v13442_v18  ;;  %v13534_v2 = vadd.f32 %v7295_v24, %v7135_v58 }
 0x47c   : > { %v7162_v13 = vpop.f32.mrf.mxu0  ;;  %v7297_v38 = vpop.f32.mrf.mxu1 }
 0x47d   : > { %v7163_v49 = vadd.f32 %v7162_v13, %v13444_v25  ;;  %v13537_v44 = vadd.f32 %v7297_v38, %v7137_v36 }
 0x47e   : > { %v7164_v55 = vpop.f32.mrf.mxu0  ;;  %v7299_v52 = vpop.f32.mrf.mxu1 }
 0x47f   : > { %v7165_v63 = vadd.f32 %v7164_v55, %v13446_v34  ;;  %v13540_v35 = vadd.f32 %v7299_v52, %v7139_v30 }
 0x480   : > { %v7166_v31 = vpop.f32.mrf.mxu0  ;;  %v7303_v26 = vpop.f32.mrf.mxu1 }
 0x481   : > { %v7167_v61 = vadd.f32 %v7166_v31, %v13448_v19  ;;  %v13543_v57 = vadd.f32 %v7303_v26, %v7143_v45 }
 0x482   : > { %v7168_v18 = vpop.f32.mrf.mxu0  ;;  %v7305_v58 = vpop.f32.mrf.mxu1 }
 0x483   : > { %v7169_v8 = vadd.f32 %v7168_v18, %v13450_v17  ;;  %v13546_v24 = vadd.f32 %v7305_v58, %v7145_v46 }
 0x484   : > { %v7172_v25 = vpop.f32.mrf.mxu0  ;;  %v7307_v36 = vpop.f32.mrf.mxu1 }
 0x485   : > { %v7173_v13 = vadd.f32 %v7172_v25, %v13452_v50  ;;  %v13549_v38 = vadd.f32 %v7307_v36, %v7147_v59 }
 0x486   : > { %v7174_v34 = vpop.f32.mrf.mxu0  ;;  %v7309_v30 = vpop.f32.mrf.mxu1 }
 0x487   : > { %v7175_v55 = vadd.f32 %v7174_v34, %v13454_v47  ;;  %v13552_v52 = vadd.f32 %v7309_v30, %v7149_v14 }
 0x488   : > { %v7176_v19 = vpop.f32.mrf.mxu0  ;;  %v7313_v45 = vpop.f32.mrf.mxu1 }
 0x489   : > { %v7177_v31 = vadd.f32 %v7176_v19, %v13456_v62  ;;  %v13555_v26 = vadd.f32 %v7313_v45, %v7153_v60 }
 0x48a   : > { %v7178_v17 = vpop.f32.mrf.mxu0  ;;  %v7315_v46 = vpop.f32.mrf.mxu1 }
 0x48b   : > { %v7179_v18 = vadd.f32 %v7178_v17, %v13458_v4  ;;  %v13558_v58 = vadd.f32 %v7315_v46, %v7155_v37 }
 0x48c   : > { %v7182_v50 = vpop.f32.mrf.mxu0  ;;  %v7317_v59 = vpop.f32.mrf.mxu1 }
 0x48d   : > { %v7183_v25 = vadd.f32 %v7182_v50, %v13460_v7  ;;  %v13561_v36 = vadd.f32 %v7317_v59, %v7157_v32 }
 0x48e   : > { %v7184_v47 = vpop.f32.mrf.mxu0  ;;  %v7319_v14 = vpop.f32.mrf.mxu1 }
 0x48f   : > { %v7185_v34 = vadd.f32 %v7184_v47, %v13462_v5  ;;  %v13564_v30 = vadd.f32 %v7319_v14, %v7159_v33 }
 0x490   : > { %v7186_v62 = vpop.f32.mrf.mxu0  ;;  %v7323_v60 = vpop.f32.mrf.mxu1 }
 0x491   : > { %v7187_v19 = vadd.f32 %v7186_v62, %v13464_v1  ;;  %v13567_v45 = vadd.f32 %v7323_v60, %v7163_v49 }
 0x492   : > { %v7188_v4 = vpop.f32.mrf.mxu0  ;;  %v7325_v37 = vpop.f32.mrf.mxu1 }
 0x493   : > { %v7189_v17 = vadd.f32 %v7188_v4, %v13466_v21  ;;  %v13570_v46 = vadd.f32 %v7325_v37, %v7165_v63 }
 0x494   : > { %v7192_v7 = vpop.f32.mrf.mxu0  ;;  %v7327_v32 = vpop.f32.mrf.mxu1 }
 0x495   : > { %v7193_v50 = vadd.f32 %v7192_v7, %v13468_v27  ;;  %v13573_v59 = vadd.f32 %v7327_v32, %v7167_v61 }
 0x496   : > { %v7194_v5 = vpop.f32.mrf.mxu0  ;;  %v7329_v33 = vpop.f32.mrf.mxu1 }
 0x497   : > { %v7195_v47 = vadd.f32 %v7194_v5, %v13470_v0  ;;  %v13576_v14 = vadd.f32 %v7329_v33, %v7169_v8 }
 0x498   : > { %v7196_v1 = vpop.f32.mrf.mxu0  ;;  %v7333_v49 = vpop.f32.mrf.mxu1 }
 0x499   : > { %v7197_v62 = vadd.f32 %v7196_v1, %v13472_v51  ;;  %v13579_v60 = vadd.f32 %v7333_v49, %v7173_v13 }
 0x49a   : > { %v7198_v21 = vpop.f32.mrf.mxu0  ;;  %v7335_v63 = vpop.f32.mrf.mxu1 }
 0x49b   : > { %15473 = vst [vmem:[#allocation87_spill] sm:$0xff] %v13579_v60  ;;  %v7199_v4 = vadd.f32 %v7198_v21, %v13474_v15  ;;  %v13582_v37 = vadd.f32 %v7335_v63, %v7175_v55 }
 0x49c   : > { %v7202_v27 = vpop.f32.mrf.mxu0  ;;  %v7337_v61 = vpop.f32.mrf.mxu1 }
 0x49d   : > { %v7203_v7 = vadd.f32 %v7202_v27, %v13476_v11  ;;  %v13585_v32 = vadd.f32 %v7337_v61, %v7177_v31 }
 0x49e   : > { %v7204_v0 = vpop.f32.mrf.mxu0  ;;  %v7339_v8 = vpop.f32.mrf.mxu1 }
 0x49f   : > { %v13587_v5 = vadd.f32 %v7339_v8, %v7179_v18 }
 0x4a0   : > { %v7206_v33 = vpop.f32.mrf.mxu0  ;;  %v7343_v51 = vpop.f32.mrf.mxu1 }
 0x4a1   : > { %15474 = vst [vmem:[#allocation71_spill] sm:$0xff] %v13587_v5  ;;  %v13589_v13 = vadd.f32 %v7343_v51, %v7183_v25 }
 0x4a2   : > { %v7208_v1 = vpop.f32.mrf.mxu0  ;;  %v7345_v49 = vpop.f32.mrf.mxu1 }
 0x4a3   : > { %15475 = vst [vmem:[#allocation74_spill] sm:$0xff] %v13589_v13  ;;  %v13591_v60 = vadd.f32 %v7345_v49, %v7185_v34 }
 0x4a4   : > { %v7212_v15 = vpop.f32.mrf.mxu0  ;;  %v7347_v55 = vpop.f32.mrf.mxu1 }
 0x4a5   : > { %15476 = vst [vmem:[#allocation88_spill] sm:$0xff] %v13591_v60  ;;  %v13593_v21 = vadd.f32 %v7347_v55, %v7187_v19 }
 0x4a6   : > { %v7214_v63 = vpop.f32.mrf.mxu0  ;;  %v7349_v11 = vpop.f32.mrf.mxu1 }
 0x4a7   : > { %15477 = vst [vmem:[#allocation27_spill] sm:$0xff] %v13593_v21  ;;  %v13595_v31 = vadd.f32 %v7349_v11, %v7189_v17  ;;  %v7205_v17 = vadd.f32 %v7204_v0, %v13478_v42  ;;  %v7215_v0 = vadd.f32 %v7214_v63, %v13486_v9 }
 0x4a8   : > { %v7216_v27 = vpop.f32.mrf.mxu0  ;;  %v7353_v61 = vpop.f32.mrf.mxu1 }
 0x4a9   : > { %v13597_v18 = vadd.f32 %v7353_v61, %v7193_v50 }
 0x4aa   : > { %v7218_v8 = vpop.f32.mrf.mxu0  ;;  %v7355_v5 = vpop.f32.mrf.mxu1 }
 0x4ab   : > { %15478 = vst [vmem:[#allocation89_spill] sm:$0xff] %v13597_v18  ;;  %v13599_v25 = vadd.f32 %v7355_v5, %v7195_v47  ;;  %v7207_v18 = vadd.f32 %v7206_v33, %v13480_v16 }
 0x4ac   : > { %v7222_v51 = vpop.f32.mrf.mxu0  ;;  %v7357_v13 = vpop.f32.mrf.mxu1 }
 0x4ad   : > { %15479 = vst [vmem:[#allocation40_spill] sm:$0xff] %v13599_v25  ;;  %v13601_v34 = vadd.f32 %v7357_v13, %v7197_v62  ;;  %v7209_v62 = vadd.f32 %v7208_v1, %v13482_v40 }
 0x4ae   : > { %v7224_v49 = vpop.f32.mrf.mxu0  ;;  %v7359_v60 = vpop.f32.mrf.mxu1 }
 0x4af   : > { %15480 = vst [vmem:[#allocation73_spill] sm:$0xff] %v13601_v34  ;;  %v13603_v19 = vadd.f32 %v7359_v60, %v7199_v4 }
 0x4b0   : > { %v7226_v55 = vpop.f32.mrf.mxu0  ;;  %v7363_v21 = vpop.f32.mrf.mxu1 }
 0x4b1   : > { %15481 = vst [vmem:[#allocation17_spill] sm:$0xff] %v13603_v19  ;;  %v13606_v11 = vadd.f32 %v7363_v21, %v7203_v7  ;;  %v7213_v19 = vadd.f32 %v7212_v15, %v13484_v10 }
 0x4b2   : > { %v7228_v50 = vpop.f32.mrf.mxu0  ;;  %v7365_v61 = vpop.f32.mrf.mxu1 }
 0x4b3   : > { %v13609_v47 = vadd.f32 %v7365_v61, %v7205_v17  ;;  %v7217_v17 = vadd.f32 %v7216_v27, %v13488_v56 }
 0x4b4   : > { %v7232_v5 = vpop.f32.mrf.mxu0  ;;  %v7367_v25 = vpop.f32.mrf.mxu1 }
 0x4b5   : > { %v13612_v13 = vadd.f32 %v7367_v25, %v7207_v18  ;;  %v7219_v18 = vadd.f32 %v7218_v8, %v13490_v48 }
 0x4b6   : > { %v7234_v60 = vpop.f32.mrf.mxu0  ;;  %v7369_v4 = vpop.f32.mrf.mxu1 }
 0x4b7   : > { %v13615_v34 = vadd.f32 %v7369_v4, %v7209_v62  ;;  %v7223_v62 = vadd.f32 %v7222_v51, %v13492_v12 }
 0x4b8   : > { %v7236_v42 = vpop.f32.mrf.mxu0  ;;  %v7373_v7 = vpop.f32.mrf.mxu1 }
 0x4b9   : > { %v13618_v21 = vadd.f32 %v7373_v7, %v7213_v19  ;;  %v7225_v19 = vadd.f32 %v7224_v49, %v13494_v6 }
 0x4ba   : > { %v7238_v16 = vpop.f32.mrf.mxu0  ;;  %v7375_v33 = vpop.f32.mrf.mxu1 }
 0x4bb   : > { %v13621_v61 = vadd.f32 %v7375_v33, %v7215_v0  ;;  %v15484_v0 = vld [vmem:[#allocation70_spill] sm:$0xff] }
 0x4bc   : > { %v7242_v40 = vpop.f32.mrf.mxu0  ;;  %v7377_v1 = vpop.f32.mrf.mxu1  ;;  %v7227_v33 = vadd.f32 %v7226_v55, %v15484_v0 }
 0x4bd   : > { %15482 = vst [vmem:[#allocation76_spill] sm:$0xff] %v13621_v61  ;;  %v13624_v25 = vadd.f32 %v7377_v1, %v7217_v17  ;;  %v7229_v17 = vadd.f32 %v7228_v50, %v13498_v54  ;;  %v7239_v50 = vadd.f32 %v7238_v16, %v13508_v43 }
 0x4be   : > { %v7244_v10 = vpop.f32.mrf.mxu0  ;;  %v7379_v15 = vpop.f32.mrf.mxu1 }
 0x4bf   : > { %v13627_v4 = vadd.f32 %v7379_v15, %v7219_v18  ;;  %v7233_v18 = vadd.f32 %v7232_v5, %v13500_v28  ;;  %v7243_v5 = vadd.f32 %v7242_v40, %v13511_v39 }
 0x4c0   : > { %v7246_v9 = vpop.f32.mrf.mxu0  ;;  %v7383_v63 = vpop.f32.mrf.mxu1 }
 0x4c1   : > { %v13630_v7 = vadd.f32 %v7383_v63, %v7223_v62  ;;  %v15485_v62 = vld [vmem:[#allocation72_spill] sm:$0xff] }
 0x4c2   : > { %v7248_v56 = vpop.f32.mrf.mxu0  ;;  %v7385_v27 = vpop.f32.mrf.mxu1  ;;  %v7235_v63 = vadd.f32 %v7234_v60, %v15485_v62  ;;  %v7245_v60 = vadd.f32 %v7244_v10, %v13514_v29 }
 0x4c3   : > { %15483 = vst [vmem:[#allocation18_spill] sm:$0xff] %v13630_v7  ;;  %v13633_v61 = vadd.f32 %v7385_v27, %v7225_v19  ;;  %v7237_v27 = vadd.f32 %v7236_v42, %v13505_v22  ;;  %v7247_v22 = vadd.f32 %v7246_v9, %v13517_v23  ;;  %v7249_v43 = vadd.f32 %v7248_v56, %v13520_v20 }
 0x4c4   : > { %v7252_v48 = vpop.f32.mrf.mxu0  ;;  %v7387_v8 = vpop.f32.mrf.mxu1 }
 0x4c5   : > { %v13636_v1 = vadd.f32 %v7387_v8, %v7227_v33  ;;  %v7253_v39 = vadd.f32 %v7252_v48, %v13523_v53 }
 0x4c6   : > { %v7254_v12 = vpop.f32.mrf.mxu0  ;;  %v7389_v51 = vpop.f32.mrf.mxu1 }
 0x4c7   : > { %v13639_v15 = vadd.f32 %v7389_v51, %v7229_v17  ;;  %v7255_v29 = vadd.f32 %v7254_v12, %v13526_v41 }
 0x4c8   : > { %v7256_v6 = vpop.f32.mrf.mxu0  ;;  %v7393_v49 = vpop.f32.mrf.mxu1 }
 0x4c9   : > { %v13642_v7 = vadd.f32 %v7393_v49, %v7233_v18 }
 0x4ca   : > { %v7257_v55 = vpop.f32.mrf.mxu0  ;;  %v7395_v19 = vpop.f32.mrf.mxu1 }
 0x4cb   : > { %v13645_v0 = vadd.f32 %v7395_v19, %v7235_v63 }
 0x4cc   : > { %v7397_v54 = vpop.f32.mrf.mxu1 }
 0x4cd   : > { %v13648_v33 = vadd.f32 %v7397_v54, %v7237_v27 }
 0x4ce   : > { %v7399_v28 = vpop.f32.mrf.mxu1 }
 0x4cf   : > { %v13651_v8 = vadd.f32 %v7399_v28, %v7239_v50 }
 0x4d0   : > { %v7403_v17 = vpop.f32.mrf.mxu1 }
 0x4d1   : > { %v13654_v51 = vadd.f32 %v7403_v17, %v7243_v5 }
 0x4d2   : > { %v7405_v18 = vpop.f32.mrf.mxu1 }
 0x4d3   : > { %v13657_v42 = vadd.f32 %v7405_v18, %v7245_v60 }
 0x4d4   : > { %v7407_v6 = vpop.f32.mrf.mxu1 }
 0x4d5   : > { %v13660_v16 = vadd.f32 %v7407_v6, %v7247_v22 }
 0x4d6   : > { %v7409_v49 = vpop.f32.mrf.mxu1 }
 0x4d7   : > { %v13663_v40 = vadd.f32 %v7409_v49, %v7249_v43 }
 0x4d8   : > { %v7413_v62 = vpop.f32.mrf.mxu1 }
 0x4d9   : > { %v13666_v10 = vadd.f32 %v7413_v62, %v7253_v39 }
 0x4da   : > { %v7415_v63 = vpop.f32.mrf.mxu1  ;;  %7423 = sbr.rel (%p15486_p10) target bundleno = 1304 (0x518), region = 60 }
 0x4db   : > { %v13668_v55 = vadd.f32 %v7415_v63, %v7255_v29 }
 0x4dc   : > { %v7417_v23 = vpop.f32.mrf.mxu1 }
 0x4de   : > { %v7418_v9 = vpop.f32.mrf.mxu1 }
 0x4df   : > { %v7424_v20 = vld [vmem:[#allocation7] sm:$0xf]  ;;  %v15487_v56 = vld [vmem:[#allocation25_spill] sm:$0xff]  ;;  %v15493_v17 = vld [vmem:[#allocation30_spill] sm:$0xff] }
 0x4e0   : > { %v15488_v19 = vsub.s32 0, %v15487_v56  ;;  %v15489_v53 = vsub.s32 1, %v15487_v56  ;;  %v15490_v41 = vsub.s32 2, %v15487_v56  ;;  %v15491_v54 = vsub.s32 3, %v15487_v56  ;;  %v15492_v28 = vld [vmem:[#allocation19_spill] sm:$0xff]  ;;  %v15494_v6 = vld [vmem:[#allocation14_spill] sm:$0xff] }
 0x4e1   : > { %v15495_v49 = vld [vmem:[#allocation43_spill] sm:$0xff]  ;;  %v15496_v63 = vld [vmem:[#allocation20_spill] sm:$0xff]  ;;  %v15497_v9 = vld [vmem:[#allocation33_spill] sm:$0xff] }
 0x4e2   : > { %v13674_v27 = vrot.slane %v7424_v20, %v15488_v19  ;;  %v13678_v48 = vrot.slane %v7424_v20, %v15489_v53  ;;  %v13682_v12 = vrot.slane %v7424_v20, %v15490_v41  ;;  %v13686_v50 = vrot.slane %v7424_v20, %v15491_v54  ;;  %v15498_v53 = vld [vmem:[#allocation42_spill] sm:$0xff]  ;;  %v15499_v54 = vld [vmem:[#allocation45_spill] sm:$0xff] }
 0x4e4   : > { %v7446_v5 = vadd.f32 %v13674_v27, %v15492_v28  ;;  %v7447_v60 = vadd.f32 %v13678_v48, %v15493_v17  ;;  %v7448_v18 = vadd.f32 %v13682_v12, %v13531_v3  ;;  %v7449_v22 = vadd.f32 %v13686_v50, %v13534_v2 }
 0x4e5   : > { %v7450_v43 = vadd.f32 %v13674_v27, %v15494_v6  ;;  %v7451_v39 = vadd.f32 %v13678_v48, %v15495_v49  ;;  %v7452_v62 = vadd.f32 %v13682_v12, %v13537_v44  ;;  %v7453_v29 = vadd.f32 %v13686_v50, %v13540_v35 }
 0x4e6   : > { %7546 = vst [vmem:[%s14908_s5] sm:$0xff] %v7446_v5  ;;  %7547 = vst [vmem:[%s14908_s5 + $0x8] sm:$0xff] %v7447_v60  ;;  %v7454_v23 = vadd.f32 %v13674_v27, %v15496_v63  ;;  %v7455_v20 = vadd.f32 %v13678_v48, %v15497_v9  ;;  %v7456_v56 = vadd.f32 %v13682_v12, %v13543_v57  ;;  %v15500_v60 = vld [vmem:[#allocation31_spill] sm:$0xff] }
 0x4e7   : > { %7548 = vst [vmem:[%s14908_s5 + $0x10] sm:$0xff] %v7448_v18  ;;  %7549 = vst [vmem:[%s14908_s5 + $0x18] sm:$0xff] %v7449_v22  ;;  %v7457_v19 = vadd.f32 %v13686_v50, %v13546_v24  ;;  %v7458_v41 = vadd.f32 %v13674_v27, %v15498_v53  ;;  %v7459_v28 = vadd.f32 %v13678_v48, %v15499_v54  ;;  %v15501_v22 = vld [vmem:[#allocation34_spill] sm:$0xff] }
 0x4e8   : > { %7550 = vst [vmem:[%s14908_s5 + $0x20] sm:$0xff] %v7450_v43  ;;  %7551 = vst [vmem:[%s14908_s5 + $0x28] sm:$0xff] %v7451_v39  ;;  %v7460_v5 = vadd.f32 %v13682_v12, %v13549_v38  ;;  %v7461_v17 = vadd.f32 %v13686_v50, %v13552_v52  ;;  %v7462_v18 = vadd.f32 %v13674_v27, %v15500_v60  ;;  %v15502_v39 = vld [vmem:[#allocation44_spill] sm:$0xff] }
 0x4e9   : > { %7552 = vst [vmem:[%s14908_s5 + $0x30] sm:$0xff] %v7452_v62  ;;  %7553 = vst [vmem:[%s14908_s5 + $0x38] sm:$0xff] %v7453_v29  ;;  %v7463_v6 = vadd.f32 %v13678_v48, %v15501_v22  ;;  %v7464_v43 = vadd.f32 %v13682_v12, %v13555_v26  ;;  %v7465_v49 = vadd.f32 %v13686_v50, %v13558_v58  ;;  %v15503_v29 = vld [vmem:[#allocation47_spill] sm:$0xff] }
 0x4ea   : > { %7554 = vst [vmem:[%s14908_s5 + $0x40] sm:$0xff] %v7454_v23  ;;  %7555 = vst [vmem:[%s14908_s5 + $0x48] sm:$0xff] %v7455_v20  ;;  %v7466_v62 = vadd.f32 %v13674_v27, %v15502_v39  ;;  %v7467_v63 = vadd.f32 %v13678_v48, %v15503_v29  ;;  %v7468_v23 = vadd.f32 %v13682_v12, %v13561_v36  ;;  %v15504_v20 = vld [vmem:[#allocation32_spill] sm:$0xff] }
 0x4eb   : > { %7556 = vst [vmem:[%s14908_s5 + $0x50] sm:$0xff] %v7456_v56  ;;  %7557 = vst [vmem:[%s14908_s5 + $0x58] sm:$0xff] %v7457_v19  ;;  %v7469_v9 = vadd.f32 %v13686_v50, %v13564_v30  ;;  %v7470_v56 = vadd.f32 %v13674_v27, %v15504_v20  ;;  %v15505_v19 = vld [vmem:[#allocation35_spill] sm:$0xff]  ;;  %v7473_v54 = vadd.f32 %v13686_v50, %v13570_v46  ;;  %v15512_v20 = vld [vmem:[#allocation22_spill] sm:$0xff] }
 0x4ec   : > { %7558 = vst [vmem:[%s14908_s5 + $0x60] sm:$0xff] %v7458_v41  ;;  %7559 = vst [vmem:[%s14908_s5 + $0x68] sm:$0xff] %v7459_v28  ;;  %v7471_v53 = vadd.f32 %v13678_v48, %v15505_v19  ;;  %v7472_v41 = vadd.f32 %v13682_v12, %v13567_v45  ;;  %v15506_v28 = vld [vmem:[#allocation46_spill] sm:$0xff]  ;;  %v7477_v22 = vadd.f32 %v13686_v50, %v13576_v14 }
 0x4ed   : > { %7560 = vst [vmem:[%s14908_s5 + $0x70] sm:$0xff] %v7460_v5  ;;  %7561 = vst [vmem:[%s14908_s5 + $0x78] sm:$0xff] %v7461_v17  ;;  %v7474_v5 = vadd.f32 %v13674_v27, %v15506_v28  ;;  %v15507_v17 = vld [vmem:[#allocation49_spill] sm:$0xff]  ;;  %v7484_v19 = vadd.f32 %v13682_v12, %v13585_v32 }
 0x4ee   : > { %7562 = vst [vmem:[%s14908_s5 + $0x80] sm:$0xff] %v7462_v18  ;;  %7563 = vst [vmem:[%s14908_s5 + $0x88] sm:$0xff] %v7463_v6  ;;  %v7475_v60 = vadd.f32 %v13678_v48, %v15507_v17  ;;  %v7476_v18 = vadd.f32 %v13682_v12, %v13573_v59  ;;  %v15508_v6 = vld [vmem:[#allocation23_spill] sm:$0xff] }
 0x4ef   : > { %7564 = vst [vmem:[%s14908_s5 + $0x90] sm:$0xff] %v7464_v43  ;;  %7565 = vst [vmem:[%s14908_s5 + $0x98] sm:$0xff] %v7465_v49  ;;  %v7478_v43 = vadd.f32 %v13674_v27, %v15508_v6  ;;  %v15509_v49 = vld [vmem:[#allocation48_spill] sm:$0xff] }
 0x4f0   : > { %7566 = vst [vmem:[%s14908_s5 + $0xa0] sm:$0xff] %v7466_v62  ;;  %7567 = vst [vmem:[%s14908_s5 + $0xa8] sm:$0xff] %v7467_v63  ;;  %v7479_v39 = vadd.f32 %v13678_v48, %v15509_v49  ;;  %v15510_v62 = vld [vmem:[#allocation87_spill] sm:$0xff]  ;;  %v7481_v63 = vadd.f32 %v13686_v50, %v13582_v37 }
 0x4f1   : > { %7568 = vst [vmem:[%s14908_s5 + $0xb0] sm:$0xff] %v7468_v23  ;;  %7569 = vst [vmem:[%s14908_s5 + $0xb8] sm:$0xff] %v7469_v9  ;;  %v7480_v29 = vadd.f32 %v13682_v12, %v15510_v62  ;;  %v15511_v23 = vld [vmem:[#allocation51_spill] sm:$0xff] }
 0x4f2   : > { %7570 = vst [vmem:[%s14908_s5 + $0xc0] sm:$0xff] %v7470_v56  ;;  %7571 = vst [vmem:[%s14908_s5 + $0xc8] sm:$0xff] %v7471_v53  ;;  %v7482_v9 = vadd.f32 %v13674_v27, %v15511_v23  ;;  %v7483_v56 = vadd.f32 %v13678_v48, %v15512_v20  ;;  %v15513_v53 = vld [vmem:[#allocation71_spill] sm:$0xff]  ;;  %v7493_v23 = vadd.f32 %v13686_v50, %v13595_v31 }
 0x4f3   : > { %7572 = vst [vmem:[%s14908_s5 + $0xd0] sm:$0xff] %v7472_v41  ;;  %7573 = vst [vmem:[%s14908_s5 + $0xd8] sm:$0xff] %v7473_v54  ;;  %v7485_v41 = vadd.f32 %v13686_v50, %v15513_v53  ;;  %v15514_v54 = vld [vmem:[#allocation36_spill] sm:$0xff]  ;;  %v15523_v53 = vld [vmem:[#allocation89_spill] sm:$0xff] }
 0x4f4   : > { %7574 = vst [vmem:[%s14908_s5 + $0xe0] sm:$0xff] %v7474_v5  ;;  %7575 = vst [vmem:[%s14908_s5 + $0xe8] sm:$0xff] %v7475_v60  ;;  %v7486_v28 = vadd.f32 %v13674_v27, %v15514_v54  ;;  %v15515_v5 = vld [vmem:[#allocation50_spill] sm:$0xff]  ;;  %v15524_v54 = vld [vmem:[#allocation40_spill] sm:$0xff] }
 0x4f5   : > { %7576 = vst [vmem:[%s14908_s5 + $0xf0] sm:$0xff] %v7476_v18  ;;  %7577 = vst [vmem:[%s14908_s5 + $0xf8] sm:$0xff] %v7477_v22  ;;  %v7487_v17 = vadd.f32 %v13678_v48, %v15515_v5  ;;  %v15516_v60 = vld [vmem:[#allocation74_spill] sm:$0xff]  ;;  %v15517_v22 = vld [vmem:[#allocation88_spill] sm:$0xff] }
 0x4f6   : > { %7578 = vst [vmem:[%s14908_s5 + $0x100] sm:$0xff] %v7478_v43  ;;  %7579 = vst [vmem:[%s14908_s5 + $0x108] sm:$0xff] %v7479_v39  ;;  %v7488_v18 = vadd.f32 %v13682_v12, %v15516_v60  ;;  %v7489_v6 = vadd.f32 %v13686_v50, %v15517_v22  ;;  %v15518_v43 = vld [vmem:[#allocation53_spill] sm:$0xff]  ;;  %v15519_v39 = vld [vmem:[#allocation24_spill] sm:$0xff] }
 0x4f7   : > { %7580 = vst [vmem:[%s14908_s5 + $0x110] sm:$0xff] %v7480_v29  ;;  %7581 = vst [vmem:[%s14908_s5 + $0x118] sm:$0xff] %v7481_v63  ;;  %v7490_v49 = vadd.f32 %v13674_v27, %v15518_v43  ;;  %v7491_v62 = vadd.f32 %v13678_v48, %v15519_v39  ;;  %v15520_v29 = vld [vmem:[#allocation27_spill] sm:$0xff]  ;;  %v15526_v60 = vld [vmem:[#allocation54_spill] sm:$0xff] }
 0x4f8   : > { %7582 = vst [vmem:[%s14908_s5 + $0x120] sm:$0xff] %v7482_v9  ;;  %7583 = vst [vmem:[%s14908_s5 + $0x128] sm:$0xff] %v7483_v56  ;;  %v7492_v63 = vadd.f32 %v13682_v12, %v15520_v29  ;;  %v15521_v9 = vld [vmem:[#allocation38_spill] sm:$0xff]  ;;  %v15522_v56 = vld [vmem:[#allocation52_spill] sm:$0xff] }
 0x4f9   : > { %7584 = vst [vmem:[%s14908_s5 + $0x130] sm:$0xff] %v7484_v19  ;;  %7585 = vst [vmem:[%s14908_s5 + $0x138] sm:$0xff] %v7485_v41  ;;  %v7494_v20 = vadd.f32 %v13674_v27, %v15521_v9  ;;  %v7495_v19 = vadd.f32 %v13678_v48, %v15522_v56  ;;  %v7496_v41 = vadd.f32 %v13682_v12, %v15523_v53  ;;  %v15525_v5 = vld [vmem:[#allocation55_spill] sm:$0xff]  ;;  %v15527_v22 = vld [vmem:[#allocation73_spill] sm:$0xff] }
 0x4fa   : > { %7586 = vst [vmem:[%s14908_s5 + $0x140] sm:$0xff] %v7486_v28  ;;  %7587 = vst [vmem:[%s14908_s5 + $0x148] sm:$0xff] %v7487_v17  ;;  %v7497_v28 = vadd.f32 %v13686_v50, %v15524_v54  ;;  %v7498_v17 = vadd.f32 %v13674_v27, %v15525_v5  ;;  %v15528_v43 = vld [vmem:[#allocation17_spill] sm:$0xff]  ;;  %v15530_v29 = vld [vmem:[#allocation78_spill] sm:$0xff]  ;;  %v7505_v9 = vadd.f32 %v13686_v50, %v13609_v47 }
 0x4fb   : > { %7588 = vst [vmem:[%s14908_s5 + $0x150] sm:$0xff] %v7488_v18  ;;  %7589 = vst [vmem:[%s14908_s5 + $0x158] sm:$0xff] %v7489_v6  ;;  %v7499_v18 = vadd.f32 %v13678_v48, %v15526_v60  ;;  %v7500_v6 = vadd.f32 %v13682_v12, %v15527_v22  ;;  %v15529_v39 = vld [vmem:[#allocation57_spill] sm:$0xff]  ;;  %v7509_v54 = vadd.f32 %v13686_v50, %v13615_v34  ;;  %v15535_v22 = vld [vmem:[#allocation76_spill] sm:$0xff] }
 0x4fc   : > { %7590 = vst [vmem:[%s14908_s5 + $0x160] sm:$0xff] %v7490_v49  ;;  %7591 = vst [vmem:[%s14908_s5 + $0x168] sm:$0xff] %v7491_v62  ;;  %v7501_v49 = vadd.f32 %v13686_v50, %v15528_v43  ;;  %v7502_v62 = vadd.f32 %v13674_v27, %v15529_v39  ;;  %v15536_v43 = vld [vmem:[#allocation63_spill] sm:$0xff]  ;;  %v15537_v39 = vld [vmem:[#allocation58_spill] sm:$0xff] }
 0x4fd   : > { %7592 = vst [vmem:[%s14908_s5 + $0x170] sm:$0xff] %v7492_v63  ;;  %7593 = vst [vmem:[%s14908_s5 + $0x178] sm:$0xff] %v7493_v23  ;;  %v7503_v63 = vadd.f32 %v13678_v48, %v15530_v29  ;;  %v7504_v23 = vadd.f32 %v13682_v12, %v13606_v11  ;;  %v7516_v29 = vadd.f32 %v13682_v12, %v13624_v25 }
 0x4fe   : > { %7594 = vst [vmem:[%s14908_s5 + $0x180] sm:$0xff] %v7494_v20  ;;  %7595 = vst [vmem:[%s14908_s5 + $0x188] sm:$0xff] %v7495_v19  ;;  %v15531_v20 = vld [vmem:[#allocation61_spill] sm:$0xff]  ;;  %v15532_v19 = vld [vmem:[#allocation56_spill] sm:$0xff] }
 0x4ff   : > { %7596 = vst [vmem:[%s14908_s5 + $0x190] sm:$0xff] %v7496_v41  ;;  %7597 = vst [vmem:[%s14908_s5 + $0x198] sm:$0xff] %v7497_v28  ;;  %v7506_v56 = vadd.f32 %v13674_v27, %v15531_v20  ;;  %v7507_v53 = vadd.f32 %v13678_v48, %v15532_v19  ;;  %v7508_v41 = vadd.f32 %v13682_v12, %v13612_v13  ;;  %v15533_v28 = vld [vmem:[#allocation59_spill] sm:$0xff]  ;;  %v15539_v20 = vld [vmem:[#allocation62_spill] sm:$0xff] }
 0x500   : > { %7598 = vst [vmem:[%s14908_s5 + $0x1a0] sm:$0xff] %v7498_v17  ;;  %7599 = vst [vmem:[%s14908_s5 + $0x1a8] sm:$0xff] %v7499_v18  ;;  %v7510_v5 = vadd.f32 %v13674_v27, %v15533_v28  ;;  %v15534_v17 = vld [vmem:[#allocation60_spill] sm:$0xff]  ;;  %v7512_v18 = vadd.f32 %v13682_v12, %v13618_v21  ;;  %v15540_v19 = vld [vmem:[#allocation18_spill] sm:$0xff] }
 0x501   : > { %7600 = vst [vmem:[%s14908_s5 + $0x1b0] sm:$0xff] %v7500_v6  ;;  %7601 = vst [vmem:[%s14908_s5 + $0x1b8] sm:$0xff] %v7501_v49  ;;  %v7511_v60 = vadd.f32 %v13678_v48, %v15534_v17  ;;  %v7513_v6 = vadd.f32 %v13686_v50, %v15535_v22  ;;  %v7514_v49 = vadd.f32 %v13674_v27, %v15536_v43  ;;  %v15543_v22 = vld [vmem:[#allocation64_spill] sm:$0xff]  ;;  %v15544_v43 = vld [vmem:[#allocation66_spill] sm:$0xff] }
 0x502   : > { %7602 = vst [vmem:[%s14908_s5 + $0x1c0] sm:$0xff] %v7502_v62  ;;  %7603 = vst [vmem:[%s14908_s5 + $0x1c8] sm:$0xff] %v7503_v63  ;;  %v7515_v62 = vadd.f32 %v13678_v48, %v15537_v39  ;;  %v7517_v63 = vadd.f32 %v13686_v50, %v13627_v4  ;;  %v7528_v39 = vadd.f32 %v13682_v12, %v13642_v7 }
 0x503   : > { %7604 = vst [vmem:[%s14908_s5 + $0x1d0] sm:$0xff] %v7504_v23  ;;  %7605 = vst [vmem:[%s14908_s5 + $0x1d8] sm:$0xff] %v7505_v9  ;;  %v15538_v23 = vld [vmem:[#allocation37_spill] sm:$0xff] }
 0x504   : > { %7606 = vst [vmem:[%s14908_s5 + $0x1e0] sm:$0xff] %v7506_v56  ;;  %7607 = vst [vmem:[%s14908_s5 + $0x1e8] sm:$0xff] %v7507_v53  ;;  %v7518_v9 = vadd.f32 %v13674_v27, %v15538_v23  ;;  %v7519_v56 = vadd.f32 %v13678_v48, %v15539_v20  ;;  %v7520_v53 = vadd.f32 %v13682_v12, %v15540_v19  ;;  %v15546_v23 = vld [vmem:[#allocation83_spill] sm:$0xff] }
 0x505   : > { %7608 = vst [vmem:[%s14908_s5 + $0x1f0] sm:$0xff] %v7508_v41  ;;  %7609 = vst [vmem:[%s14908_s5 + $0x1f8] sm:$0xff] %v7509_v54  ;;  %v7521_v41 = vadd.f32 %v13686_v50, %v13633_v61  ;;  %v15541_v54 = vld [vmem:[#allocation65_spill] sm:$0xff]  ;;  %v7532_v20 = vadd.f32 %v13682_v12, %v13648_v33  ;;  %v15547_v19 = vld [vmem:[#allocation67_spill] sm:$0xff] }
 0x506   : > { %7610 = vst [vmem:[%s14908_s5 + $0x200] sm:$0xff] %v7510_v5  ;;  %7611 = vst [vmem:[%s14908_s5 + $0x208] sm:$0xff] %v7511_v60  ;;  %v7522_v28 = vadd.f32 %v13674_v27, %v15541_v54  ;;  %v15542_v5 = vld [vmem:[#allocation79_spill] sm:$0xff]  ;;  %v7524_v60 = vadd.f32 %v13682_v12, %v13636_v1 }
 0x507   : > { %7612 = vst [vmem:[%s14908_s5 + $0x210] sm:$0xff] %v7512_v18  ;;  %7613 = vst [vmem:[%s14908_s5 + $0x218] sm:$0xff] %v7513_v6  ;;  %v7523_v17 = vadd.f32 %v13678_v48, %v15542_v5  ;;  %v7525_v18 = vadd.f32 %v13686_v50, %v13639_v15  ;;  %v7526_v6 = vadd.f32 %v13674_v27, %v15543_v22 }
 0x508   : > { %7614 = vst [vmem:[%s14908_s5 + $0x220] sm:$0xff] %v7514_v49  ;;  %7615 = vst [vmem:[%s14908_s5 + $0x228] sm:$0xff] %v7515_v62  ;;  %v7527_v49 = vadd.f32 %v13678_v48, %v15544_v43  ;;  %v7529_v62 = vadd.f32 %v13686_v50, %v13645_v0  ;;  %v7537_v5 = vadd.f32 %v13686_v50, %v13657_v42 }
 0x509   : > { %7616 = vst [vmem:[%s14908_s5 + $0x230] sm:$0xff] %v7516_v29  ;;  %7617 = vst [vmem:[%s14908_s5 + $0x238] sm:$0xff] %v7517_v63  ;;  %v15545_v29 = vld [vmem:[#allocation68_spill] sm:$0xff]  ;;  %v7541_v43 = vadd.f32 %v13686_v50, %v13663_v40 }
 0x50a   : > { %7618 = vst [vmem:[%s14908_s5 + $0x240] sm:$0xff] %v7518_v9  ;;  %7619 = vst [vmem:[%s14908_s5 + $0x248] sm:$0xff] %v7519_v56  ;;  %v7530_v63 = vadd.f32 %v13674_v27, %v15545_v29  ;;  %v7531_v9 = vadd.f32 %v13678_v48, %v15546_v23  ;;  %v7533_v56 = vadd.f32 %v13686_v50, %v13651_v8 }
 0x50b   : > { %7620 = vst [vmem:[%s14908_s5 + $0x250] sm:$0xff] %v7520_v53  ;;  %7621 = vst [vmem:[%s14908_s5 + $0x258] sm:$0xff] %v7521_v41  ;;  %v7534_v53 = vadd.f32 %v13674_v27, %v15547_v19  ;;  %v15548_v41 = vld [vmem:[#allocation69_spill] sm:$0xff]  ;;  %v7545_v23 = vadd.f32 %v13686_v50, %v13668_v55 }
 0x50c   : > { %7622 = vst [vmem:[%s14908_s5 + $0x260] sm:$0xff] %v7522_v28  ;;  %7623 = vst [vmem:[%s14908_s5 + $0x268] sm:$0xff] %v7523_v17  ;;  %v7535_v54 = vadd.f32 %v13678_v48, %v15548_v41  ;;  %v7536_v28 = vadd.f32 %v13682_v12, %v13654_v51  ;;  %v15549_v17 = vld [vmem:[#allocation84_spill] sm:$0xff] }
 0x50d   : > { %7624 = vst [vmem:[%s14908_s5 + $0x270] sm:$0xff] %v7524_v60  ;;  %7625 = vst [vmem:[%s14908_s5 + $0x278] sm:$0xff] %v7525_v18  ;;  %v7538_v60 = vadd.f32 %v13674_v27, %v15549_v17  ;;  %v15550_v18 = vld [vmem:[#allocation21_spill] sm:$0xff] }
 0x50e   : > { %7626 = vst [vmem:[%s14908_s5 + $0x280] sm:$0xff] %v7526_v6  ;;  %7627 = vst [vmem:[%s14908_s5 + $0x288] sm:$0xff] %v7527_v49  ;;  %v7539_v22 = vadd.f32 %v13678_v48, %v15550_v18  ;;  %v7540_v6 = vadd.f32 %v13682_v12, %v13660_v16  ;;  %v15551_v49 = vld [vmem:[#allocation85_spill] sm:$0xff] }
 0x50f   : > { %7628 = vst [vmem:[%s14908_s5 + $0x290] sm:$0xff] %v7528_v39  ;;  %7629 = vst [vmem:[%s14908_s5 + $0x298] sm:$0xff] %v7529_v62  ;;  %v7542_v39 = vadd.f32 %v13674_v27, %v15551_v49  ;;  %v15552_v62 = vld [vmem:[#allocation86_spill] sm:$0xff] }
 0x510   : > { %7630 = vst [vmem:[%s14908_s5 + $0x2a0] sm:$0xff] %v7530_v63  ;;  %7631 = vst [vmem:[%s14908_s5 + $0x2a8] sm:$0xff] %v7531_v9  ;;  %v7543_v29 = vadd.f32 %v13678_v48, %v15552_v62  ;;  %v7544_v63 = vadd.f32 %v13682_v12, %v13666_v10 }
 0x511   : > { %7632 = vst [vmem:[%s14908_s5 + $0x2b0] sm:$0xff] %v7532_v20  ;;  %7633 = vst [vmem:[%s14908_s5 + $0x2b8] sm:$0xff] %v7533_v56 }
 0x512   : > { %7634 = vst [vmem:[%s14908_s5 + $0x2c0] sm:$0xff] %v7534_v53  ;;  %7635 = vst [vmem:[%s14908_s5 + $0x2c8] sm:$0xff] %v7535_v54 }
 0x513   : > { %7636 = vst [vmem:[%s14908_s5 + $0x2d0] sm:$0xff] %v7536_v28  ;;  %7637 = vst [vmem:[%s14908_s5 + $0x2d8] sm:$0xff] %v7537_v5 }
 0x514   : > { %7638 = vst [vmem:[%s14908_s5 + $0x2e0] sm:$0xff] %v7538_v60  ;;  %7639 = vst [vmem:[%s14908_s5 + $0x2e8] sm:$0xff] %v7539_v22 }
 0x515   : > { %7640 = vst [vmem:[%s14908_s5 + $0x2f0] sm:$0xff] %v7540_v6  ;;  %7641 = vst [vmem:[%s14908_s5 + $0x2f8] sm:$0xff] %v7541_v43 }
 0x516   : > { %7642 = vst [vmem:[%s14908_s5 + $0x300] sm:$0xf] %v7542_v39  ;;  %7643 = vst [vmem:[%s14908_s5 + $0x308] sm:$0xf] %v7543_v29 }
 0x517   : > { %7644 = vst [vmem:[%s14908_s5 + $0x310] sm:$0xf] %v7544_v63  ;;  %7645 = vst [vmem:[%s14908_s5 + $0x318] sm:$0xf] %v7545_v23 }
 0x518 PF: > { %p15553_p0 = scmp.eq.s32.totalorder %s9934_s17, 0 }
 0x51a   : > { %7649 = sbr.rel (%p15553_p0) target bundleno = 1379 (0x563), region = 64 }
 0x51f   : > { %v7650_v27 = vld [vmem:[%s14908_s5] sm:$0xff]  ;;  %v7651_v48 = vld [vmem:[%s14908_s5 + $0x8] sm:$0xff]  ;;  %v7652_v12 = vld [vmem:[%s14908_s5 + $0x10] sm:$0xff] }
 0x520   : > { %v15554_v50 = vld [vmem:[#allocation19_spill] sm:$0xff]  ;;  %v15555_v20 = vld [vmem:[#allocation30_spill] sm:$0xff]  ;;  %v7752_v19 = vadd.f32 %v7652_v12, %v13531_v3  ;;  %v7653_v53 = vld [vmem:[%s14908_s5 + $0x18] sm:$0xff] }
 0x521   : > { %v7750_v9 = vadd.f32 %v7650_v27, %v15554_v50  ;;  %v7751_v56 = vadd.f32 %v7651_v48, %v15555_v20  ;;  %v7654_v41 = vld [vmem:[%s14908_s5 + $0x20] sm:$0xff]  ;;  %v7655_v54 = vld [vmem:[%s14908_s5 + $0x28] sm:$0xff]  ;;  %v7753_v28 = vadd.f32 %v7653_v53, %v13534_v2  ;;  %v7656_v3 = vld [vmem:[%s14908_s5 + $0x30] sm:$0xff] }
 0x522   : > { %v15556_v5 = vld [vmem:[#allocation14_spill] sm:$0xff]  ;;  %v15557_v60 = vld [vmem:[#allocation43_spill] sm:$0xff]  ;;  %v7657_v22 = vld [vmem:[%s14908_s5 + $0x38] sm:$0xff]  ;;  %7852 = vst [vmem:[%s14908_s5 + $0x10] sm:$0xff] %v7752_v19  ;;  %v7756_v2 = vadd.f32 %v7656_v3, %v13537_v44 }
 0x523   : > { %v7754_v17 = vadd.f32 %v7654_v41, %v15556_v5  ;;  %v7755_v18 = vadd.f32 %v7655_v54, %v15557_v60  ;;  %v7658_v6 = vld [vmem:[%s14908_s5 + $0x40] sm:$0xff]  ;;  %7850 = vst [vmem:[%s14908_s5] sm:$0xff] %v7750_v9  ;;  %7851 = vst [vmem:[%s14908_s5 + $0x8] sm:$0xff] %v7751_v56  ;;  %v7757_v43 = vadd.f32 %v7657_v22, %v13540_v35  ;;  %v15558_v49 = vld [vmem:[#allocation20_spill] sm:$0xff] }
 0x524   : > { %v7758_v39 = vadd.f32 %v7658_v6, %v15558_v49  ;;  %v7659_v62 = vld [vmem:[%s14908_s5 + $0x48] sm:$0xff]  ;;  %v7660_v29 = vld [vmem:[%s14908_s5 + $0x50] sm:$0xff]  ;;  %v7661_v63 = vld [vmem:[%s14908_s5 + $0x58] sm:$0xff]  ;;  %7853 = vst [vmem:[%s14908_s5 + $0x18] sm:$0xff] %v7753_v28 }
 0x525   : > { %7854 = vst [vmem:[%s14908_s5 + $0x20] sm:$0xff] %v7754_v17  ;;  %7855 = vst [vmem:[%s14908_s5 + $0x28] sm:$0xff] %v7755_v18  ;;  %v15559_v44 = vld [vmem:[#allocation33_spill] sm:$0xff]  ;;  %v7760_v23 = vadd.f32 %v7660_v29, %v13543_v57  ;;  %v7761_v27 = vadd.f32 %v7661_v63, %v13546_v24  ;;  %v7663_v12 = vld [vmem:[%s14908_s5 + $0x68] sm:$0xff] }
 0x526   : > { %v7759_v35 = vadd.f32 %v7659_v62, %v15559_v44  ;;  %v7662_v48 = vld [vmem:[%s14908_s5 + $0x60] sm:$0xff]  ;;  %v7664_v50 = vld [vmem:[%s14908_s5 + $0x70] sm:$0xff]  ;;  %7856 = vst [vmem:[%s14908_s5 + $0x30] sm:$0xff] %v7756_v2  ;;  %7857 = vst [vmem:[%s14908_s5 + $0x38] sm:$0xff] %v7757_v43 }
 0x527   : > { %7858 = vst [vmem:[%s14908_s5 + $0x40] sm:$0xff] %v7758_v39  ;;  %v15560_v57 = vld [vmem:[#allocation42_spill] sm:$0xff]  ;;  %v15561_v9 = vld [vmem:[#allocation45_spill] sm:$0xff]  ;;  %v7764_v56 = vadd.f32 %v7664_v50, %v13549_v38  ;;  %7860 = vst [vmem:[%s14908_s5 + $0x50] sm:$0xff] %v7760_v23 }
 0x528   : > { %v7762_v24 = vadd.f32 %v7662_v48, %v15560_v57  ;;  %v7763_v20 = vadd.f32 %v7663_v12, %v15561_v9  ;;  %v7665_v19 = vld [vmem:[%s14908_s5 + $0x78] sm:$0xff]  ;;  %v7666_v53 = vld [vmem:[%s14908_s5 + $0x80] sm:$0xff]  ;;  %v7667_v41 = vld [vmem:[%s14908_s5 + $0x88] sm:$0xff]  ;;  %7859 = vst [vmem:[%s14908_s5 + $0x48] sm:$0xff] %v7759_v35 }
 0x529   : > { %7861 = vst [vmem:[%s14908_s5 + $0x58] sm:$0xff] %v7761_v27  ;;  %v7765_v38 = vadd.f32 %v7665_v19, %v13552_v52  ;;  %v15562_v54 = vld [vmem:[#allocation31_spill] sm:$0xff]  ;;  %v15563_v5 = vld [vmem:[#allocation34_spill] sm:$0xff]  ;;  %v7669_v18 = vld [vmem:[%s14908_s5 + $0x98] sm:$0xff] }
 0x52a   : > { %v7766_v28 = vadd.f32 %v7666_v53, %v15562_v54  ;;  %v7767_v17 = vadd.f32 %v7667_v41, %v15563_v5  ;;  %v7668_v60 = vld [vmem:[%s14908_s5 + $0x90] sm:$0xff]  ;;  %v7670_v3 = vld [vmem:[%s14908_s5 + $0xa0] sm:$0xff]  ;;  %7862 = vst [vmem:[%s14908_s5 + $0x60] sm:$0xff] %v7762_v24  ;;  %7863 = vst [vmem:[%s14908_s5 + $0x68] sm:$0xff] %v7763_v20  ;;  %v7769_v22 = vadd.f32 %v7669_v18, %v13558_v58 }
 0x52b   : > { %7864 = vst [vmem:[%s14908_s5 + $0x70] sm:$0xff] %v7764_v56  ;;  %v7768_v52 = vadd.f32 %v7668_v60, %v13555_v26  ;;  %v15564_v6 = vld [vmem:[#allocation44_spill] sm:$0xff]  ;;  %v7671_v43 = vld [vmem:[%s14908_s5 + $0xa8] sm:$0xff]  ;;  %7865 = vst [vmem:[%s14908_s5 + $0x78] sm:$0xff] %v7765_v38 }
 0x52c   : > { %v7770_v2 = vadd.f32 %v7670_v3, %v15564_v6  ;;  %v7672_v49 = vld [vmem:[%s14908_s5 + $0xb0] sm:$0xff]  ;;  %v7673_v39 = vld [vmem:[%s14908_s5 + $0xb8] sm:$0xff]  ;;  %7866 = vst [vmem:[%s14908_s5 + $0x80] sm:$0xff] %v7766_v28  ;;  %7867 = vst [vmem:[%s14908_s5 + $0x88] sm:$0xff] %v7767_v17 }
 0x52d   : > { %v15565_v26 = vld [vmem:[#allocation47_spill] sm:$0xff]  ;;  %v7772_v62 = vadd.f32 %v7672_v49, %v13561_v36  ;;  %v7773_v29 = vadd.f32 %v7673_v39, %v13564_v30  ;;  %v7674_v63 = vld [vmem:[%s14908_s5 + $0xc0] sm:$0xff]  ;;  %7868 = vst [vmem:[%s14908_s5 + $0x90] sm:$0xff] %v7768_v52  ;;  %7869 = vst [vmem:[%s14908_s5 + $0x98] sm:$0xff] %v7769_v22 }
 0x52e   : > { %v7771_v58 = vadd.f32 %v7671_v43, %v15565_v26  ;;  %v7675_v44 = vld [vmem:[%s14908_s5 + $0xc8] sm:$0xff]  ;;  %v7676_v35 = vld [vmem:[%s14908_s5 + $0xd0] sm:$0xff]  ;;  %7870 = vst [vmem:[%s14908_s5 + $0xa0] sm:$0xff] %v7770_v2  ;;  %v7677_v12 = vld [vmem:[%s14908_s5 + $0xd8] sm:$0xff] }
 0x52f   : > { %v15566_v36 = vld [vmem:[#allocation32_spill] sm:$0xff]  ;;  %v15567_v23 = vld [vmem:[#allocation35_spill] sm:$0xff]  ;;  %v7776_v48 = vadd.f32 %v7676_v35, %v13567_v45  ;;  %v7678_v50 = vld [vmem:[%s14908_s5 + $0xe0] sm:$0xff]  ;;  %7872 = vst [vmem:[%s14908_s5 + $0xb0] sm:$0xff] %v7772_v62  ;;  %v7777_v45 = vadd.f32 %v7677_v12, %v13570_v46 }
 0x530   : > { %v7774_v30 = vadd.f32 %v7674_v63, %v15566_v36  ;;  %v7775_v27 = vadd.f32 %v7675_v44, %v15567_v23  ;;  %v7679_v57 = vld [vmem:[%s14908_s5 + $0xe8] sm:$0xff]  ;;  %7871 = vst [vmem:[%s14908_s5 + $0xa8] sm:$0xff] %v7771_v58  ;;  %7873 = vst [vmem:[%s14908_s5 + $0xb8] sm:$0xff] %v7773_v29  ;;  %v15569_v20 = vld [vmem:[#allocation49_spill] sm:$0xff] }
 0x531   : > { %v15568_v24 = vld [vmem:[#allocation46_spill] sm:$0xff]  ;;  %v7779_v56 = vadd.f32 %v7679_v57, %v15569_v20  ;;  %v7680_v19 = vld [vmem:[%s14908_s5 + $0xf0] sm:$0xff]  ;;  %v7681_v53 = vld [vmem:[%s14908_s5 + $0xf8] sm:$0xff]  ;;  %7876 = vst [vmem:[%s14908_s5 + $0xd0] sm:$0xff] %v7776_v48 }
 0x532   : > { %v7778_v9 = vadd.f32 %v7678_v50, %v15568_v24  ;;  %v7682_v41 = vld [vmem:[%s14908_s5 + $0x100] sm:$0xff]  ;;  %7874 = vst [vmem:[%s14908_s5 + $0xc0] sm:$0xff] %v7774_v30  ;;  %7875 = vst [vmem:[%s14908_s5 + $0xc8] sm:$0xff] %v7775_v27  ;;  %v7780_v46 = vadd.f32 %v7680_v19, %v13573_v59  ;;  %v7781_v38 = vadd.f32 %v7681_v53, %v13576_v14  ;;  %v15570_v54 = vld [vmem:[#allocation23_spill] sm:$0xff] }
 0x533   : > { %v7782_v28 = vadd.f32 %v7682_v41, %v15570_v54  ;;  %v7683_v5 = vld [vmem:[%s14908_s5 + $0x108] sm:$0xff]  ;;  %v7684_v17 = vld [vmem:[%s14908_s5 + $0x110] sm:$0xff]  ;;  %v7685_v60 = vld [vmem:[%s14908_s5 + $0x118] sm:$0xff]  ;;  %7877 = vst [vmem:[%s14908_s5 + $0xd8] sm:$0xff] %v7777_v45 }
 0x534   : > { %7878 = vst [vmem:[%s14908_s5 + $0xe0] sm:$0xff] %v7778_v9  ;;  %7879 = vst [vmem:[%s14908_s5 + $0xe8] sm:$0xff] %v7779_v56  ;;  %v15571_v59 = vld [vmem:[#allocation48_spill] sm:$0xff]  ;;  %v15572_v18 = vld [vmem:[#allocation87_spill] sm:$0xff]  ;;  %v7785_v52 = vadd.f32 %v7685_v60, %v13582_v37 }
 0x535   : > { %v7783_v14 = vadd.f32 %v7683_v5, %v15571_v59  ;;  %v7784_v3 = vadd.f32 %v7684_v17, %v15572_v18  ;;  %v7686_v22 = vld [vmem:[%s14908_s5 + $0x120] sm:$0xff]  ;;  %v7687_v6 = vld [vmem:[%s14908_s5 + $0x128] sm:$0xff]  ;;  %v7688_v2 = vld [vmem:[%s14908_s5 + $0x130] sm:$0xff]  ;;  %7880 = vst [vmem:[%s14908_s5 + $0xf0] sm:$0xff] %v7780_v46 }
 0x536   : > { %7881 = vst [vmem:[%s14908_s5 + $0xf8] sm:$0xff] %v7781_v38  ;;  %7882 = vst [vmem:[%s14908_s5 + $0x100] sm:$0xff] %v7782_v28  ;;  %v15573_v37 = vld [vmem:[#allocation51_spill] sm:$0xff]  ;;  %v15574_v49 = vld [vmem:[#allocation22_spill] sm:$0xff]  ;;  %v7788_v26 = vadd.f32 %v7688_v2, %v13585_v32 }
 0x537   : > { %v7786_v43 = vadd.f32 %v7686_v22, %v15573_v37  ;;  %v7787_v39 = vadd.f32 %v7687_v6, %v15574_v49  ;;  %v7689_v58 = vld [vmem:[%s14908_s5 + $0x138] sm:$0xff]  ;;  %v7690_v62 = vld [vmem:[%s14908_s5 + $0x140] sm:$0xff]  ;;  %v7691_v29 = vld [vmem:[%s14908_s5 + $0x148] sm:$0xff]  ;;  %7883 = vst [vmem:[%s14908_s5 + $0x108] sm:$0xff] %v7783_v14 }
 0x538   : > { %7884 = vst [vmem:[%s14908_s5 + $0x110] sm:$0xff] %v7784_v3  ;;  %7885 = vst [vmem:[%s14908_s5 + $0x118] sm:$0xff] %v7785_v52  ;;  %v15575_v32 = vld [vmem:[#allocation71_spill] sm:$0xff]  ;;  %v15576_v44 = vld [vmem:[#allocation36_spill] sm:$0xff] }
 0x539   : > { %v7789_v63 = vadd.f32 %v7689_v58, %v15575_v32  ;;  %v7790_v35 = vadd.f32 %v7690_v62, %v15576_v44  ;;  %v15577_v36 = vld [vmem:[#allocation50_spill] sm:$0xff]  ;;  %v7692_v23 = vld [vmem:[%s14908_s5 + $0x150] sm:$0xff]  ;;  %v7693_v27 = vld [vmem:[%s14908_s5 + $0x158] sm:$0xff]  ;;  %7886 = vst [vmem:[%s14908_s5 + $0x120] sm:$0xff] %v7786_v43 }
 0x53a   : > { %v7791_v30 = vadd.f32 %v7691_v29, %v15577_v36  ;;  %v7694_v48 = vld [vmem:[%s14908_s5 + $0x160] sm:$0xff]  ;;  %7887 = vst [vmem:[%s14908_s5 + $0x128] sm:$0xff] %v7787_v39  ;;  %7888 = vst [vmem:[%s14908_s5 + $0x130] sm:$0xff] %v7788_v26  ;;  %v15579_v57 = vld [vmem:[#allocation88_spill] sm:$0xff] }
 0x53b   : > { %v15578_v12 = vld [vmem:[#allocation74_spill] sm:$0xff]  ;;  %v7793_v45 = vadd.f32 %v7693_v27, %v15579_v57  ;;  %v15580_v24 = vld [vmem:[#allocation53_spill] sm:$0xff]  ;;  %v7696_v56 = vld [vmem:[%s14908_s5 + $0x170] sm:$0xff]  ;;  %7889 = vst [vmem:[%s14908_s5 + $0x138] sm:$0xff] %v7789_v63 }
 0x53c   : > { %v7792_v50 = vadd.f32 %v7692_v23, %v15578_v12  ;;  %v7794_v9 = vadd.f32 %v7694_v48, %v15580_v24  ;;  %v7695_v20 = vld [vmem:[%s14908_s5 + $0x168] sm:$0xff]  ;;  %v7697_v19 = vld [vmem:[%s14908_s5 + $0x178] sm:$0xff]  ;;  %7890 = vst [vmem:[%s14908_s5 + $0x140] sm:$0xff] %v7790_v35  ;;  %7891 = vst [vmem:[%s14908_s5 + $0x148] sm:$0xff] %v7791_v30 }
 0x53d   : > { %v15581_v53 = vld [vmem:[#allocation24_spill] sm:$0xff]  ;;  %v15582_v46 = vld [vmem:[#allocation27_spill] sm:$0xff]  ;;  %v7797_v54 = vadd.f32 %v7697_v19, %v13595_v31  ;;  %v7698_v28 = vld [vmem:[%s14908_s5 + $0x180] sm:$0xff]  ;;  %7893 = vst [vmem:[%s14908_s5 + $0x158] sm:$0xff] %v7793_v45 }
 0x53e   : > { %v7795_v41 = vadd.f32 %v7695_v20, %v15581_v53  ;;  %v7796_v38 = vadd.f32 %v7696_v56, %v15582_v46  ;;  %v7699_v5 = vld [vmem:[%s14908_s5 + $0x188] sm:$0xff]  ;;  %v7700_v17 = vld [vmem:[%s14908_s5 + $0x190] sm:$0xff]  ;;  %7892 = vst [vmem:[%s14908_s5 + $0x150] sm:$0xff] %v7792_v50  ;;  %7894 = vst [vmem:[%s14908_s5 + $0x160] sm:$0xff] %v7794_v9 }
 0x53f   : > { %v15583_v31 = vld [vmem:[#allocation38_spill] sm:$0xff]  ;;  %v15584_v59 = vld [vmem:[#allocation52_spill] sm:$0xff]  ;;  %v15585_v18 = vld [vmem:[#allocation89_spill] sm:$0xff]  ;;  %7897 = vst [vmem:[%s14908_s5 + $0x178] sm:$0xff] %v7797_v54 }
 0x540   : > { %v7798_v60 = vadd.f32 %v7698_v28, %v15583_v31  ;;  %v7799_v14 = vadd.f32 %v7699_v5, %v15584_v59  ;;  %v7800_v3 = vadd.f32 %v7700_v17, %v15585_v18  ;;  %v7701_v52 = vld [vmem:[%s14908_s5 + $0x198] sm:$0xff]  ;;  %v7702_v22 = vld [vmem:[%s14908_s5 + $0x1a0] sm:$0xff]  ;;  %v7703_v6 = vld [vmem:[%s14908_s5 + $0x1a8] sm:$0xff]  ;;  %7895 = vst [vmem:[%s14908_s5 + $0x168] sm:$0xff] %v7795_v41 }
 0x541   : > { %7896 = vst [vmem:[%s14908_s5 + $0x170] sm:$0xff] %v7796_v38  ;;  %v15586_v2 = vld [vmem:[#allocation40_spill] sm:$0xff]  ;;  %v15587_v43 = vld [vmem:[#allocation55_spill] sm:$0xff]  ;;  %v15588_v39 = vld [vmem:[#allocation54_spill] sm:$0xff] }
 0x542   : > { %v7801_v37 = vadd.f32 %v7701_v52, %v15586_v2  ;;  %v7802_v49 = vadd.f32 %v7702_v22, %v15587_v43  ;;  %v7803_v26 = vadd.f32 %v7703_v6, %v15588_v39  ;;  %v7704_v58 = vld [vmem:[%s14908_s5 + $0x1b0] sm:$0xff]  ;;  %v7705_v62 = vld [vmem:[%s14908_s5 + $0x1b8] sm:$0xff]  ;;  %v7706_v29 = vld [vmem:[%s14908_s5 + $0x1c0] sm:$0xff]  ;;  %7898 = vst [vmem:[%s14908_s5 + $0x180] sm:$0xff] %v7798_v60 }
 0x543   : > { %7899 = vst [vmem:[%s14908_s5 + $0x188] sm:$0xff] %v7799_v14  ;;  %7900 = vst [vmem:[%s14908_s5 + $0x190] sm:$0xff] %v7800_v3  ;;  %v15589_v32 = vld [vmem:[#allocation73_spill] sm:$0xff]  ;;  %v7707_v23 = vld [vmem:[%s14908_s5 + $0x1c8] sm:$0xff] }
 0x544   : > { %v7804_v63 = vadd.f32 %v7704_v58, %v15589_v32  ;;  %v15590_v44 = vld [vmem:[#allocation17_spill] sm:$0xff]  ;;  %v7708_v27 = vld [vmem:[%s14908_s5 + $0x1d0] sm:$0xff]  ;;  %7901 = vst [vmem:[%s14908_s5 + $0x198] sm:$0xff] %v7801_v37  ;;  %7902 = vst [vmem:[%s14908_s5 + $0x1a0] sm:$0xff] %v7802_v49 }
 0x545   : > { %v7805_v35 = vadd.f32 %v7705_v62, %v15590_v44  ;;  %v15591_v36 = vld [vmem:[#allocation57_spill] sm:$0xff]  ;;  %7903 = vst [vmem:[%s14908_s5 + $0x1a8] sm:$0xff] %v7803_v26  ;;  %v15592_v12 = vld [vmem:[#allocation78_spill] sm:$0xff]  ;;  %v7808_v57 = vadd.f32 %v7708_v27, %v13606_v11  ;;  %v7712_v20 = vld [vmem:[%s14908_s5 + $0x1f0] sm:$0xff] }
 0x546   : > { %v7806_v30 = vadd.f32 %v7706_v29, %v15591_v36  ;;  %v7709_v48 = vld [vmem:[%s14908_s5 + $0x1d8] sm:$0xff]  ;;  %v7807_v50 = vadd.f32 %v7707_v23, %v15592_v12  ;;  %v7710_v24 = vld [vmem:[%s14908_s5 + $0x1e0] sm:$0xff]  ;;  %v7711_v9 = vld [vmem:[%s14908_s5 + $0x1e8] sm:$0xff]  ;;  %7904 = vst [vmem:[%s14908_s5 + $0x1b0] sm:$0xff] %v7804_v63  ;;  %v7812_v53 = vadd.f32 %v7712_v20, %v13612_v13 }
 0x547   : > { %v7809_v45 = vadd.f32 %v7709_v48, %v13609_v47  ;;  %7905 = vst [vmem:[%s14908_s5 + $0x1b8] sm:$0xff] %v7805_v35  ;;  %v15593_v11 = vld [vmem:[#allocation61_spill] sm:$0xff]  ;;  %v15594_v56 = vld [vmem:[#allocation56_spill] sm:$0xff]  ;;  %v7715_v38 = vld [vmem:[%s14908_s5 + $0x208] sm:$0xff] }
 0x548   : > { %7906 = vst [vmem:[%s14908_s5 + $0x1c0] sm:$0xff] %v7806_v30  ;;  %v7810_v47 = vadd.f32 %v7710_v24, %v15593_v11  ;;  %v7811_v19 = vadd.f32 %v7711_v9, %v15594_v56  ;;  %v7713_v41 = vld [vmem:[%s14908_s5 + $0x1f8] sm:$0xff]  ;;  %v7714_v46 = vld [vmem:[%s14908_s5 + $0x200] sm:$0xff]  ;;  %7907 = vst [vmem:[%s14908_s5 + $0x1c8] sm:$0xff] %v7807_v50 }
 0x549   : > { %7908 = vst [vmem:[%s14908_s5 + $0x1d0] sm:$0xff] %v7808_v57  ;;  %7909 = vst [vmem:[%s14908_s5 + $0x1d8] sm:$0xff] %v7809_v45  ;;  %v7813_v13 = vadd.f32 %v7713_v41, %v13615_v34  ;;  %v15595_v54 = vld [vmem:[#allocation59_spill] sm:$0xff]  ;;  %v15596_v5 = vld [vmem:[#allocation60_spill] sm:$0xff] }
 0x54a   : > { %v7814_v28 = vadd.f32 %v7714_v46, %v15595_v54  ;;  %v7815_v17 = vadd.f32 %v7715_v38, %v15596_v5  ;;  %v7716_v31 = vld [vmem:[%s14908_s5 + $0x210] sm:$0xff]  ;;  %v7717_v60 = vld [vmem:[%s14908_s5 + $0x218] sm:$0xff]  ;;  %v7718_v59 = vld [vmem:[%s14908_s5 + $0x220] sm:$0xff]  ;;  %7910 = vst [vmem:[%s14908_s5 + $0x1e0] sm:$0xff] %v7810_v47 }
 0x54b   : > { %7911 = vst [vmem:[%s14908_s5 + $0x1e8] sm:$0xff] %v7811_v19  ;;  %7912 = vst [vmem:[%s14908_s5 + $0x1f0] sm:$0xff] %v7812_v53  ;;  %v7816_v34 = vadd.f32 %v7716_v31, %v13618_v21  ;;  %v15597_v14 = vld [vmem:[#allocation76_spill] sm:$0xff]  ;;  %v15598_v3 = vld [vmem:[#allocation63_spill] sm:$0xff] }
 0x54c   : > { %v7817_v18 = vadd.f32 %v7717_v60, %v15597_v14  ;;  %v7818_v52 = vadd.f32 %v7718_v59, %v15598_v3  ;;  %v7719_v22 = vld [vmem:[%s14908_s5 + $0x228] sm:$0xff]  ;;  %v7720_v6 = vld [vmem:[%s14908_s5 + $0x230] sm:$0xff]  ;;  %v7721_v2 = vld [vmem:[%s14908_s5 + $0x238] sm:$0xff]  ;;  %7913 = vst [vmem:[%s14908_s5 + $0x1f8] sm:$0xff] %v7813_v13 }
 0x54d   : > { %7914 = vst [vmem:[%s14908_s5 + $0x200] sm:$0xff] %v7814_v28  ;;  %7915 = vst [vmem:[%s14908_s5 + $0x208] sm:$0xff] %v7815_v17  ;;  %v15599_v21 = vld [vmem:[#allocation58_spill] sm:$0xff]  ;;  %v7820_v43 = vadd.f32 %v7720_v6, %v13624_v25  ;;  %v7821_v49 = vadd.f32 %v7721_v2, %v13627_v4  ;;  %v7724_v58 = vld [vmem:[%s14908_s5 + $0x250] sm:$0xff] }
 0x54e   : > { %v7819_v37 = vadd.f32 %v7719_v22, %v15599_v21  ;;  %v7722_v39 = vld [vmem:[%s14908_s5 + $0x240] sm:$0xff]  ;;  %v7723_v26 = vld [vmem:[%s14908_s5 + $0x248] sm:$0xff]  ;;  %7916 = vst [vmem:[%s14908_s5 + $0x210] sm:$0xff] %v7816_v34  ;;  %7917 = vst [vmem:[%s14908_s5 + $0x218] sm:$0xff] %v7817_v18 }
 0x54f   : > { %7918 = vst [vmem:[%s14908_s5 + $0x220] sm:$0xff] %v7818_v52  ;;  %v15600_v25 = vld [vmem:[#allocation37_spill] sm:$0xff]  ;;  %v15601_v62 = vld [vmem:[#allocation62_spill] sm:$0xff]  ;;  %7920 = vst [vmem:[%s14908_s5 + $0x230] sm:$0xff] %v7820_v43 }
 0x550   : > { %v7822_v4 = vadd.f32 %v7722_v39, %v15600_v25  ;;  %v7823_v29 = vadd.f32 %v7723_v26, %v15601_v62  ;;  %v15602_v32 = vld [vmem:[#allocation18_spill] sm:$0xff]  ;;  %v7725_v44 = vld [vmem:[%s14908_s5 + $0x258] sm:$0xff]  ;;  %7919 = vst [vmem:[%s14908_s5 + $0x228] sm:$0xff] %v7819_v37  ;;  %7921 = vst [vmem:[%s14908_s5 + $0x238] sm:$0xff] %v7821_v49 }
 0x551   : > { %v7824_v63 = vadd.f32 %v7724_v58, %v15602_v32  ;;  %v7726_v35 = vld [vmem:[%s14908_s5 + $0x260] sm:$0xff]  ;;  %v7727_v36 = vld [vmem:[%s14908_s5 + $0x268] sm:$0xff]  ;;  %v7825_v30 = vadd.f32 %v7725_v44, %v13633_v61  ;;  %v7728_v50 = vld [vmem:[%s14908_s5 + $0x270] sm:$0xff] }
 0x552   : > { %v15603_v23 = vld [vmem:[#allocation65_spill] sm:$0xff]  ;;  %v15604_v48 = vld [vmem:[#allocation79_spill] sm:$0xff]  ;;  %7922 = vst [vmem:[%s14908_s5 + $0x240] sm:$0xff] %v7822_v4  ;;  %7923 = vst [vmem:[%s14908_s5 + $0x248] sm:$0xff] %v7823_v29  ;;  %v7828_v61 = vadd.f32 %v7728_v50, %v13636_v1 }
 0x553   : > { %v7826_v27 = vadd.f32 %v7726_v35, %v15603_v23  ;;  %v7827_v12 = vadd.f32 %v7727_v36, %v15604_v48  ;;  %v7729_v57 = vld [vmem:[%s14908_s5 + $0x278] sm:$0xff]  ;;  %v7730_v45 = vld [vmem:[%s14908_s5 + $0x280] sm:$0xff]  ;;  %7924 = vst [vmem:[%s14908_s5 + $0x250] sm:$0xff] %v7824_v63  ;;  %v7731_v11 = vld [vmem:[%s14908_s5 + $0x288] sm:$0xff] }
 0x554   : > { %v7829_v24 = vadd.f32 %v7729_v57, %v13639_v15  ;;  %v15605_v9 = vld [vmem:[#allocation64_spill] sm:$0xff]  ;;  %7925 = vst [vmem:[%s14908_s5 + $0x258] sm:$0xff] %v7825_v30  ;;  %v15606_v1 = vld [vmem:[#allocation66_spill] sm:$0xff]  ;;  %7928 = vst [vmem:[%s14908_s5 + $0x270] sm:$0xff] %v7828_v61 }
 0x555   : > { %v7830_v20 = vadd.f32 %v7730_v45, %v15605_v9  ;;  %v7732_v47 = vld [vmem:[%s14908_s5 + $0x290] sm:$0xff]  ;;  %v7733_v56 = vld [vmem:[%s14908_s5 + $0x298] sm:$0xff]  ;;  %7926 = vst [vmem:[%s14908_s5 + $0x260] sm:$0xff] %v7826_v27  ;;  %7927 = vst [vmem:[%s14908_s5 + $0x268] sm:$0xff] %v7827_v12  ;;  %v7831_v15 = vadd.f32 %v7731_v11, %v15606_v1 }
 0x556   : > { %v7832_v19 = vadd.f32 %v7732_v47, %v13642_v7  ;;  %v7833_v53 = vadd.f32 %v7733_v56, %v13645_v0  ;;  %v7734_v41 = vld [vmem:[%s14908_s5 + $0x2a0] sm:$0xff]  ;;  %v7735_v46 = vld [vmem:[%s14908_s5 + $0x2a8] sm:$0xff]  ;;  %v7736_v38 = vld [vmem:[%s14908_s5 + $0x2b0] sm:$0xff]  ;;  %7929 = vst [vmem:[%s14908_s5 + $0x278] sm:$0xff] %v7829_v24 }
 0x557   : > { %7930 = vst [vmem:[%s14908_s5 + $0x280] sm:$0xff] %v7830_v20  ;;  %v15607_v7 = vld [vmem:[#allocation68_spill] sm:$0xff]  ;;  %v15608_v13 = vld [vmem:[#allocation83_spill] sm:$0xff]  ;;  %v7836_v28 = vadd.f32 %v7736_v38, %v13648_v33  ;;  %v7738_v17 = vld [vmem:[%s14908_s5 + $0x2c0] sm:$0xff] }
 0x558   : > { %v7834_v0 = vadd.f32 %v7734_v41, %v15607_v7  ;;  %v7835_v54 = vadd.f32 %v7735_v46, %v15608_v13  ;;  %v7737_v5 = vld [vmem:[%s14908_s5 + $0x2b8] sm:$0xff]  ;;  %v7739_v31 = vld [vmem:[%s14908_s5 + $0x2c8] sm:$0xff]  ;;  %7931 = vst [vmem:[%s14908_s5 + $0x288] sm:$0xff] %v7831_v15  ;;  %7932 = vst [vmem:[%s14908_s5 + $0x290] sm:$0xff] %v7832_v19 }
 0x559   : > { %7933 = vst [vmem:[%s14908_s5 + $0x298] sm:$0xff] %v7833_v53  ;;  %v7837_v33 = vadd.f32 %v7737_v5, %v13651_v8  ;;  %v15609_v60 = vld [vmem:[#allocation67_spill] sm:$0xff]  ;;  %v15610_v34 = vld [vmem:[#allocation69_spill] sm:$0xff]  ;;  %7936 = vst [vmem:[%s14908_s5 + $0x2b0] sm:$0xff] %v7836_v28 }
 0x55a   : > { %v7838_v59 = vadd.f32 %v7738_v17, %v15609_v60  ;;  %v7839_v14 = vadd.f32 %v7739_v31, %v15610_v34  ;;  %v7740_v18 = vld [vmem:[%s14908_s5 + $0x2d0] sm:$0xff]  ;;  %v7741_v3 = vld [vmem:[%s14908_s5 + $0x2d8] sm:$0xff]  ;;  %v7742_v52 = vld [vmem:[%s14908_s5 + $0x2e0] sm:$0xff]  ;;  %7934 = vst [vmem:[%s14908_s5 + $0x2a0] sm:$0xff] %v7834_v0 }
 0x55b   : > { %7935 = vst [vmem:[%s14908_s5 + $0x2a8] sm:$0xff] %v7835_v54  ;;  %v7840_v8 = vadd.f32 %v7740_v18, %v13654_v51  ;;  %v7841_v22 = vadd.f32 %v7741_v3, %v13657_v42  ;;  %v15611_v6 = vld [vmem:[#allocation84_spill] sm:$0xff]  ;;  %v7743_v21 = vld [vmem:[%s14908_s5 + $0x2e8] sm:$0xff]  ;;  %7937 = vst [vmem:[%s14908_s5 + $0x2b8] sm:$0xff] %v7837_v33 }
 0x55c   : > { %v7842_v2 = vadd.f32 %v7742_v52, %v15611_v6  ;;  %v7744_v37 = vld [vmem:[%s14908_s5 + $0x2f0] sm:$0xff]  ;;  %v7745_v43 = vld [vmem:[%s14908_s5 + $0x2f8] sm:$0xff]  ;;  %7938 = vst [vmem:[%s14908_s5 + $0x2c0] sm:$0xff] %v7838_v59  ;;  %7939 = vst [vmem:[%s14908_s5 + $0x2c8] sm:$0xff] %v7839_v14 }
 0x55d   : > { %v15612_v51 = vld [vmem:[#allocation21_spill] sm:$0xff]  ;;  %v7844_v49 = vadd.f32 %v7744_v37, %v13660_v16  ;;  %v7845_v39 = vadd.f32 %v7745_v43, %v13663_v40  ;;  %v7747_v58 = vld [vmem:[%s14908_s5 + $0x308] sm:$0xf]  ;;  %v7748_v25 = vld [vmem:[%s14908_s5 + $0x310] sm:$0xf]  ;;  %7940 = vst [vmem:[%s14908_s5 + $0x2d0] sm:$0xff] %v7840_v8 }
 0x55e   : > { %v7843_v42 = vadd.f32 %v7743_v21, %v15612_v51  ;;  %v7746_v26 = vld [vmem:[%s14908_s5 + $0x300] sm:$0xf]  ;;  %7941 = vst [vmem:[%s14908_s5 + $0x2d8] sm:$0xff] %v7841_v22  ;;  %7942 = vst [vmem:[%s14908_s5 + $0x2e0] sm:$0xff] %v7842_v2  ;;  %v15614_v4 = vld [vmem:[#allocation86_spill] sm:$0xff]  ;;  %v7848_v29 = vadd.f32 %v7748_v25, %v13666_v10 }
 0x55f   : > { %v15613_v16 = vld [vmem:[#allocation85_spill] sm:$0xff]  ;;  %v7847_v62 = vadd.f32 %v7747_v58, %v15614_v4  ;;  %v7749_v32 = vld [vmem:[%s14908_s5 + $0x318] sm:$0xf]  ;;  %7944 = vst [vmem:[%s14908_s5 + $0x2f0] sm:$0xff] %v7844_v49  ;;  %7945 = vst [vmem:[%s14908_s5 + $0x2f8] sm:$0xff] %v7845_v39 }
 0x560   : > { %v7846_v40 = vadd.f32 %v7746_v26, %v15613_v16  ;;  %7943 = vst [vmem:[%s14908_s5 + $0x2e8] sm:$0xff] %v7843_v42  ;;  %v7849_v63 = vadd.f32 %v7749_v32, %v13668_v55  ;;  %7948 = vst [vmem:[%s14908_s5 + $0x310] sm:$0xf] %v7848_v29 }
 0x561   : > { %7947 = vst [vmem:[%s14908_s5 + $0x308] sm:$0xf] %v7847_v62 }
 0x562   : > { %7946 = vst [vmem:[%s14908_s5 + $0x300] sm:$0xf] %v7846_v40  ;;  %7949 = vst [vmem:[%s14908_s5 + $0x318] sm:$0xf] %v7849_v63 }
 0x563 PF: > { %p19_p1 = scmp.ge.s32.totalorder %s9872_s22, 4   ;;  %s15615_s18 = smov %s9802_s19 }
 0x564   : > { %s15616_s19 = smov %s9806_s20  ;;  %s15617_s20 = smov %s9882_s25 }
 0x565   : > { %s15618_s21 = smov %s9872_s22  ;;  %21 = sbr.rel (!%p19_p1) target bundleno = 6 (0x6), region = 112 }
 0x56a   :  { %7961 = vsyncpa [#allocation3], 1 }
 0x56b   :  { %7963 = vsyncpa [#allocation3 + $0x1], 1 }
 0x56c   :  { %7964 = vsyncpa [#allocation5], 1 }
 0x56d   :  { %7966 = vsyncpa [#allocation5 + $0x1], 1 }
 0x56e   :  { %7967 = vsyncpa [#allocation8], 1 }

</bundles_post_ra>
